<compile_context>
chip_gen: v6e
topology: v6e:2x2x1
jax: 0.10.0
libtpu: 0.0.40
codegen_flags: <defaults>
</compile_context>

<pallas_src>
import numpy as np

import jax
import jax.numpy as jnp
from jax.experimental import pallas as pl
from jax.experimental.pallas import tpu as pltpu

# ------------------------- configuration (small) -------------------------
B = 2
CNN_IN, CNN_OUT, CNN_K = 4, 16, 3
PC_NCAPS, PC_IN, PC_OUT, PC_K, PC_STRIDE = 8, CNN_OUT, 4, 3, 2
H = W = 16
H1 = W1 = H - CNN_K + 1                       # 14
H2 = W2 = (H1 - PC_K) // PC_STRIDE + 1        # 6
NUM_ROUTES = PC_OUT * H2 * W2                 # 144
DC_NCAPS, DC_IN, DC_OUT = 10, PC_NCAPS, 16
NUM_ITER = 3

N_TAPS = PC_K * PC_K                          # 9
M1 = B * H1 * W1                              # 392 conv1 output positions (lanes)
M2 = B * H2 * W2                              # 72  PrimaryCaps output positions (lanes)
K1 = CNN_K * CNN_K * CNN_IN                   # 36  conv1 patch size
PCC = PC_NCAPS * PC_OUT                       # 32  fused PrimaryCaps output channels

VMEM_SPEC = pl.BlockSpec(memory_space=pltpu.MemorySpace.VMEM)
HIGHEST = jax.lax.Precision.HIGHEST           # used only by the pure-JAX reference


# ------------------------- Pallas kernels -------------------------
def _conv_primarycaps_kernel(p1_ref, w1_ref, b1_ref, sel_ref, w2_ref, b2_ref, o_ref):
    """ConvLayer + the 8 fused PrimaryCaps convs in one kernel; nothing leaves VMEM in between.

    p1_ref : (K1, M1)            bf16  transposed conv1 im2col patches of the input
    w1_ref : (CNN_OUT, K1)       bf16  conv1 weight (rows = out channels)
    b1_ref : (CNN_OUT, 1)        f32   conv1 bias (broadcast over lanes)
    sel_ref: (N_TAPS, M1, M2)    bf16  constant 0/1 tap-selection matrices (= stride-2 im2col)
    w2_ref : (N_TAPS, PCC, PC_IN) bf16 per-tap PrimaryCaps weights, rows ordered (caps, ch)
    b2_ref : (PCC, 1)            f32   PrimaryCaps bias
    o_ref  : (PCC, M2)           f32   un-squashed PrimaryCaps output, [(caps,ch), (b,hw)]
    """
    # ConvLayer: transposed GEMM so the 392-wide spatial axis is lane-dense; + bias + ReLU.
    h = jnp.dot(w1_ref[...], p1_ref[...], preferred_element_type=jnp.float32)   # (16, 392)
    h = jnp.maximum(h + b1_ref[...], 0.0).astype(jnp.bfloat16)                  # stays in VMEM

    # PrimaryCaps: for each tap, gather the strided conv window with a constant 0/1 matmul
    # (the in-kernel im2col), then apply that tap's (32, 16) weight; accumulate in f32.
    acc = jnp.zeros((PCC, M2), jnp.float32)
    for t in range(N_TAPS):                                    # static, unrolled
        g = jnp.dot(h, sel_ref[t], preferred_element_type=jnp.float32)          # (16, 72)
        acc = acc + jnp.dot(w2_ref[t], g.astype(jnp.bfloat16),
                            preferred_element_type=jnp.float32)                 # (32, 72)
    o_ref[...] = acc + b2_ref[...]
    # NOTE(scale-up): at production sizes, tile M1/M2 with a grid and
    # dimension_semantics=("parallel", ...) so both v7x TensorCores are used, and re-derive the
    # block budget against v7x's 64 MiB VMEM.  At this size a grid only adds overhead.


def _digitcaps_kernel(u_ref, w_ref, v_ref):
    """PrimaryCaps squash + DigitCaps dynamic routing, all lane-dense on the route axis R.

    u_ref: (B, I, R)     un-squashed primary capsule outputs (I = dc in_channels = 8)
    w_ref: (I, J, O, R)  DigitCaps weights, W[0, r, j, o, i] transposed to (i, j, o, r)
    v_ref: (B, J, O, 1)  routed digit capsule outputs (== torch v_j.squeeze(1))
    """
    Bb, I, R = u_ref.shape
    _, J, O, _ = w_ref.shape

    u = u_ref[...]                                             # (B, I, R) f32
    # --- PrimaryCaps squash over the capsule dim I (sublane reduce) ---
    # TODO(synk): no epsilon under sqrt(sqn) (faithful to the torch module); zero-norm -> NaN.
    sqn = jnp.sum(u * u, axis=1, keepdims=True)                # (B, 1, R)
    # sqn / ((1+sqn)*sqrt(sqn)) == sqrt(sqn) * 1/(1+sqn)   (EUP sqrt + EUP approx reciprocal)
    scale = jnp.sqrt(sqn) * pl.reciprocal(1.0 + sqn, approx=True)
    us = u * scale                                             # (B, I, R)

    # --- u_hat[b, j, o, r] = sum_i us[b, i, r] * W[i, j, o, r]  (lane-dense VPU MACs) ---
    u_hat = us[:, 0, None, None, :] * w_ref[0][None]
    for i in range(1, I):
        u_hat = u_hat + us[:, i, None, None, :] * w_ref[i][None]   # (B, J, O, R)

    def squash_elem(s):
        # torch squashes over a size-1 trailing dim:  s^2*s/((1+s^2)*sqrt(s^2)) == s*|s|/(1+s^2)
        return s * jnp.abs(s) * pl.reciprocal(1.0 + s * s, approx=True)

    inv_r = 1.0 / R
    # --- routing iteration 0: b_ij == 0  =>  c_ij == 1/R exactly, skip the softmax ---
    s = jnp.sum(u_hat, axis=-1, keepdims=True) * inv_r         # (B, J, O, 1)
    v = squash_elem(s)
    if NUM_ITER > 1:
        a = jnp.sum(u_hat * v, axis=2, keepdims=True)          # (B, J, 1, R) (sublane reduce on O)
        b_ij = jnp.mean(a, axis=0)                             # (J, 1, R)

    # --- routing iterations 1 .. NUM_ITER-1 ---
    for it in range(1, NUM_ITER):
        b_max = jnp.max(b_ij, axis=-1, keepdims=True)          # (J, 1, 1)
        e = jnp.exp(b_ij - b_max)                              # (J, 1, R)
        c = e * pl.reciprocal(jnp.sum(e, axis=-1, keepdims=True), approx=True)   # softmax over R
        s = jnp.sum(c[None] * u_hat, axis=-1, keepdims=True)   # (B, J, O, 1)
        v = squash_elem(s)
        if it < NUM_ITER - 1:
            a = jnp.sum(u_hat * v, axis=2, keepdims=True)      # (B, J, 1, R)
            b_ij = b_ij + jnp.mean(a, axis=0)

    # Output kept (B, J, O, 1): a lane-dense (B, J*O) store would need an in-kernel relayout
    # of a 1.3 KB result -- the masked-store cost here is negligible, lowering risk is not.
    v_ref[...] = v


# ------------------------- one-time parameter prep (hoisted out of the forward) -------------------------
def _build_tap_selection():
    """sel[t, p, m] = 1 iff conv1 output position p feeds PrimaryCaps tap t at output position m."""
    sel = np.zeros((N_TAPS, M1, M2), np.float32)
    for dh in range(PC_K):
        for dw in range(PC_K):
            t = dh * PC_K + dw
            for b in range(B):
                for y in range(H2):
                    for x in range(W2):
                        p = b * H1 * W1 + (PC_STRIDE * y + dh) * W1 + (PC_STRIDE * x + dw)
                        m = b * H2 * W2 + y * W2 + x
                        sel[t, p, m] = 1.0
    return jnp.asarray(sel, jnp.bfloat16)


def prepare_params(params):
    """One-time re-layout of the parameters into kernel-friendly operands (so a training loop
    would not pay these transposes/casts every step)."""
    w1t = jnp.transpose(params["w_conv"], (0, 2, 3, 1)).reshape(CNN_OUT, K1)          # (co, kh*kw*ci)
    w2t = jnp.transpose(params["w_pc"], (3, 4, 0, 1, 2)).reshape(N_TAPS, PCC, PC_IN)  # (t, caps*ch, c)
    return {
        "w1t": w1t.astype(jnp.bfloat16),                                              # (16, 36)
        "b1": params["b_conv"].reshape(CNN_OUT, 1).astype(jnp.float32),               # (16, 1)
        "sel": _build_tap_selection(),                                                # (9, 392, 72)
        "w2t": w2t.astype(jnp.bfloat16),                                              # (9, 32, 16)
        "b2": params["b_pc"].reshape(PCC, 1).astype(jnp.float32),                     # (32, 1)
        # W[0, r, j, o, i] -> (i, j, o, r): routes R=144 on lanes for the DigitCaps kernel.
        "w_dc": jnp.transpose(params["w_dc"][0], (3, 1, 2, 0)).astype(jnp.float32),   # (8,10,16,144)
    }


# ------------------------- wrappers (thin XLA glue + pallas_call) -------------------------
def _input_patches_t(x_nchw):
    """x: (B, Cin, H, W) -> transposed conv1 im2col patches (K1, M1) bf16.
    Row order (kh, kw, ci); column order (b, y, x)."""
    cols = []
    for kh in range(CNN_K):
        for kw in range(CNN_K):
            cols.append(x_nchw[:, :, kh:kh + H1, kw:kw + W1])   # (B, Cin, H1, W1)
    p = jnp.stack(cols, axis=0)                                 # (9, B, Cin, H1, W1)
    p = jnp.transpose(p, (0, 2, 1, 3, 4))                       # (9, Cin, B, H1, W1)
    return p.reshape(K1, M1).astype(jnp.bfloat16)


def conv_primarycaps_pallas(p1t, prep):
    return pl.pallas_call(
        _conv_primarycaps_kernel,
        out_shape=jax.ShapeDtypeStruct((PCC, M2), jnp.float32),
        in_specs=[VMEM_SPEC] * 6,
        out_specs=VMEM_SPEC,
    )(p1t, prep["w1t"], prep["b1"], prep["sel"], prep["w2t"], prep["b2"])


def digitcaps_pallas(u_bir, w_ijor):
    Bb, I, R = u_bir.shape
    _, J, O, _ = w_ijor.shape
    return pl.pallas_call(
        _digitcaps_kernel,
        out_shape=jax.ShapeDtypeStruct((Bb, J, O, 1), jnp.float32),
        in_specs=[VMEM_SPEC, VMEM_SPEC],
        out_specs=VMEM_SPEC,
        # No vmem_limit override: footprint is a couple of MiB (safe on v7x's 64 MiB/TC).
    )(u_bir, w_ijor)


def capsnet_forward(prep, data, cl=None):
    # ConvLayer + PrimaryCaps in ONE fused kernel; conv1 im2col on the 8 KB input is XLA glue.
    p1t = _input_patches_t(data)
    u_raw = conv_primarycaps_pallas(p1t, prep)                  # (32, 72)  [(caps,ch), (b,hw)]

    # torch: stack(dim=1).view(B, num_routes, -1): per batch, flatten (caps, ch, hw) and regroup
    # by 8.  This interleaves the GEMM's row/col indices, so it stays one tiny (~9 KB) XLA copy.
    t = u_raw.reshape(PC_NCAPS, PC_OUT, B, H2 * W2)             # (caps, ch, b, hw)
    u_bri = jnp.transpose(t, (2, 0, 1, 3)).reshape(B, NUM_ROUTES, DC_IN)   # (B, 144, 8) torch order
    u_bir = jnp.swapaxes(u_bri, 1, 2)                           # (B, 8, 144): routes on lanes

    # DigitCaps: primary squash + u_hat + 3 routing iterations inside one Pallas kernel.
    return digitcaps_pallas(u_bir, prep["w_dc"])                # (B, 10, 16, 1)


# ------------------------- pure-JAX reference -------------------------
def capsnet_reference(params, data):
    """Faithful port of the torch forward; convs use the same bf16 x bf16 -> f32 math."""
    dn = ("NCHW", "OIHW", "NCHW")
    h = jax.lax.conv_general_dilated(
        data.astype(jnp.bfloat16), params["w_conv"].astype(jnp.bfloat16), (1, 1), "VALID",
        dimension_numbers=dn, preferred_element_type=jnp.float32)
    h = jax.nn.relu(h + params["b_conv"][None, :, None, None])
    hb = h.astype(jnp.bfloat16)
    us = []
    for cap in range(PC_NCAPS):
        o = jax.lax.conv_general_dilated(
            hb, params["w_pc"][cap].astype(jnp.bfloat16), (PC_STRIDE, PC_STRIDE), "VALID",
            dimension_numbers=dn, preferred_element_type=jnp.float32)
        us.append(o + params["b_pc"][cap][None, :, None, None])
    u = jnp.stack(us, axis=1).reshape(B, NUM_ROUTES, -1)
    sqn = jnp.sum(u * u, axis=-1, keepdims=True)
    xsq = sqn * u / ((1.0 + sqn) * jnp.sqrt(sqn))
    Wd = params["w_dc"][0]                                                  # (R, J, O, I)
    u_hat = jnp.einsum("rjoi,bri->brjo", Wd, xsq, precision=HIGHEST)
    b_ij = jnp.zeros((NUM_ROUTES, DC_NCAPS), jnp.float32)
    v = None
    for it in range(NUM_ITER):
        c = jax.nn.softmax(b_ij, axis=0)
        s = jnp.einsum("rj,brjo->bjo", c, u_hat, precision=HIGHEST)
        sq = s * s
        v = sq * s / ((1.0 + sq) * jnp.sqrt(sq))
        if it < NUM_ITER - 1:
            a = jnp.einsum("brjo,bjo->brj", u_hat, v, precision=HIGHEST)
            b_ij = b_ij + jnp.mean(a, axis=0)
    return v[..., None]                                                     # (B, J, O, 1)


# ------------------------- main -------------------------
if __name__ == "__main__":
    key = jax.random.PRNGKey(0)
    k1, k2, k3, k4, k5, k6 = jax.random.split(key, 6)
    params = {
        "w_conv": 0.1 * jax.random.normal(k1, (CNN_OUT, CNN_IN, CNN_K, CNN_K), jnp.float32),
        "b_conv": 0.1 * jax.random.normal(k2, (CNN_OUT,), jnp.float32),
        "w_pc":   0.1 * jax.random.normal(k3, (PC_NCAPS, PC_OUT, PC_IN, PC_K, PC_K), jnp.float32),
        "b_pc":   0.1 * jax.random.normal(k4, (PC_NCAPS, PC_OUT), jnp.float32),
        "w_dc":   jax.random.normal(k5, (1, NUM_ROUTES, DC_NCAPS, DC_OUT, DC_IN), jnp.float32),
    }
    data = jax.random.normal(k6, (B, CNN_IN, H, W), jnp.float32)

    prep = prepare_params(params)        # one-time weight re-layout, hoisted out of the forward

    fwd = jax.jit(lambda d: capsnet_forward(prep, d))
    out = jax.block_until_ready(fwd(data))
    assert out.shape == (B, DC_NCAPS, DC_OUT, 1), out.shape

    ref = capsnet_reference(params, data)
    if not bool(jnp.allclose(out, ref, atol=5e-3, rtol=5e-3)):
        raise RuntimeError(
            f"mismatch vs reference: max abs err = {float(jnp.max(jnp.abs(out - ref)))}")

    print("KERNEL_OK")
</pallas_src>

<mosaic_0001>
module attributes {stable_mosaic.version = 11 : i64} {
  func.func @_conv_primarycaps_kernel(%arg0: memref<36x392xbf16, #tpu.memory_space<vmem>>, %arg1: memref<16x36xbf16, #tpu.memory_space<vmem>>, %arg2: memref<16x1xf32, #tpu.memory_space<vmem>>, %arg3: memref<9x392x72xbf16, #tpu.memory_space<vmem>>, %arg4: memref<9x32x16xbf16, #tpu.memory_space<vmem>>, %arg5: memref<32x1xf32, #tpu.memory_space<vmem>>, %arg6: memref<32x72xf32, #tpu.memory_space<vmem>>) attributes {dimension_semantics = [], scalar_prefetch = 0 : i64, scratch_operands = 0 : i64, tpu.core_type = #tpu.core_type<tc>} {
    %c0 = arith.constant 0 : index
    %c0_0 = arith.constant 0 : index
    %0 = vector.load %arg1[%c0, %c0_0] : memref<16x36xbf16, #tpu.memory_space<vmem>>, vector<16x36xbf16>
    %c0_1 = arith.constant 0 : index
    %c0_2 = arith.constant 0 : index
    %1 = vector.load %arg0[%c0_1, %c0_2] : memref<36x392xbf16, #tpu.memory_space<vmem>>, vector<36x392xbf16>
    %cst = arith.constant dense<0.000000e+00> : vector<16x392xf32>
    %2 = tpu.matmul %0, %1, %cst {dimension_numbers = #tpu.dot_dimension_numbers<[1], [0], [0], [1], [0, 0, 1, 1], [], []>} : vector<16x36xbf16>, vector<36x392xbf16>, vector<16x392xf32> -> vector<16x392xf32>
    %c0_3 = arith.constant 0 : index
    %c0_4 = arith.constant 0 : index
    %3 = vector.load %arg2[%c0_3, %c0_4] : memref<16x1xf32, #tpu.memory_space<vmem>>, vector<16x1xf32>
    %4 = vector.broadcast %3 : vector<16x1xf32> to vector<16x392xf32>
    %5 = arith.addf %2, %4 : vector<16x392xf32>
    %cst_5 = arith.constant 0.000000e+00 : f32
    %6 = vector.broadcast %cst_5 : f32 to vector<16x392xf32>
    %7 = arith.maximumf %5, %6 : vector<16x392xf32>
    %8 = arith.truncf %7 : vector<16x392xf32> to vector<16x392xbf16>
    %cst_6 = arith.constant 0.000000e+00 : f32
    %9 = vector.broadcast %cst_6 : f32 to vector<32x72xf32>
    %c0_7 = arith.constant 0 : index
    %c0_8 = arith.constant 0 : index
    %c0_9 = arith.constant 0 : index
    %10 = vector.load %arg3[%c0_7, %c0_8, %c0_9] : memref<9x392x72xbf16, #tpu.memory_space<vmem>>, vector<1x392x72xbf16>
    %11 = vector.shape_cast %10 : vector<1x392x72xbf16> to vector<392x72xbf16>
    %cst_10 = arith.constant dense<0.000000e+00> : vector<16x72xf32>
    %12 = tpu.matmul %8, %11, %cst_10 {dimension_numbers = #tpu.dot_dimension_numbers<[1], [0], [0], [1], [0, 0, 1, 1], [], []>} : vector<16x392xbf16>, vector<392x72xbf16>, vector<16x72xf32> -> vector<16x72xf32>
    %c0_11 = arith.constant 0 : index
    %c0_12 = arith.constant 0 : index
    %c0_13 = arith.constant 0 : index
    %13 = vector.load %arg4[%c0_11, %c0_12, %c0_13] : memref<9x32x16xbf16, #tpu.memory_space<vmem>>, vector<1x32x16xbf16>
    %14 = vector.shape_cast %13 : vector<1x32x16xbf16> to vector<32x16xbf16>
    %15 = arith.truncf %12 : vector<16x72xf32> to vector<16x72xbf16>
    %cst_14 = arith.constant dense<0.000000e+00> : vector<32x72xf32>
    %16 = tpu.matmul %14, %15, %cst_14 {dimension_numbers = #tpu.dot_dimension_numbers<[1], [0], [0], [1], [0, 0, 1, 1], [], []>} : vector<32x16xbf16>, vector<16x72xbf16>, vector<32x72xf32> -> vector<32x72xf32>
    %17 = arith.addf %9, %16 : vector<32x72xf32>
    %c1 = arith.constant 1 : index
    %c0_15 = arith.constant 0 : index
    %c0_16 = arith.constant 0 : index
    %18 = vector.load %arg3[%c1, %c0_15, %c0_16] : memref<9x392x72xbf16, #tpu.memory_space<vmem>>, vector<1x392x72xbf16>
    %19 = vector.shape_cast %18 : vector<1x392x72xbf16> to vector<392x72xbf16>
    %cst_17 = arith.constant dense<0.000000e+00> : vector<16x72xf32>
    %20 = tpu.matmul %8, %19, %cst_17 {dimension_numbers = #tpu.dot_dimension_numbers<[1], [0], [0], [1], [0, 0, 1, 1], [], []>} : vector<16x392xbf16>, vector<392x72xbf16>, vector<16x72xf32> -> vector<16x72xf32>
    %c1_18 = arith.constant 1 : index
    %c0_19 = arith.constant 0 : index
    %c0_20 = arith.constant 0 : index
    %21 = vector.load %arg4[%c1_18, %c0_19, %c0_20] : memref<9x32x16xbf16, #tpu.memory_space<vmem>>, vector<1x32x16xbf16>
    %22 = vector.shape_cast %21 : vector<1x32x16xbf16> to vector<32x16xbf16>
    %23 = arith.truncf %20 : vector<16x72xf32> to vector<16x72xbf16>
    %cst_21 = arith.constant dense<0.000000e+00> : vector<32x72xf32>
    %24 = tpu.matmul %22, %23, %cst_21 {dimension_numbers = #tpu.dot_dimension_numbers<[1], [0], [0], [1], [0, 0, 1, 1], [], []>} : vector<32x16xbf16>, vector<16x72xbf16>, vector<32x72xf32> -> vector<32x72xf32>
    %25 = arith.addf %17, %24 : vector<32x72xf32>
    %c2 = arith.constant 2 : index
    %c0_22 = arith.constant 0 : index
    %c0_23 = arith.constant 0 : index
    %26 = vector.load %arg3[%c2, %c0_22, %c0_23] : memref<9x392x72xbf16, #tpu.memory_space<vmem>>, vector<1x392x72xbf16>
    %27 = vector.shape_cast %26 : vector<1x392x72xbf16> to vector<392x72xbf16>
    %cst_24 = arith.constant dense<0.000000e+00> : vector<16x72xf32>
    %28 = tpu.matmul %8, %27, %cst_24 {dimension_numbers = #tpu.dot_dimension_numbers<[1], [0], [0], [1], [0, 0, 1, 1], [], []>} : vector<16x392xbf16>, vector<392x72xbf16>, vector<16x72xf32> -> vector<16x72xf32>
    %c2_25 = arith.constant 2 : index
    %c0_26 = arith.constant 0 : index
    %c0_27 = arith.constant 0 : index
    %29 = vector.load %arg4[%c2_25, %c0_26, %c0_27] : memref<9x32x16xbf16, #tpu.memory_space<vmem>>, vector<1x32x16xbf16>
    %30 = vector.shape_cast %29 : vector<1x32x16xbf16> to vector<32x16xbf16>
    %31 = arith.truncf %28 : vector<16x72xf32> to vector<16x72xbf16>
    %cst_28 = arith.constant dense<0.000000e+00> : vector<32x72xf32>
    %32 = tpu.matmul %30, %31, %cst_28 {dimension_numbers = #tpu.dot_dimension_numbers<[1], [0], [0], [1], [0, 0, 1, 1], [], []>} : vector<32x16xbf16>, vector<16x72xbf16>, vector<32x72xf32> -> vector<32x72xf32>
    %33 = arith.addf %25, %32 : vector<32x72xf32>
    %c3 = arith.constant 3 : index
    %c0_29 = arith.constant 0 : index
    %c0_30 = arith.constant 0 : index
    %34 = vector.load %arg3[%c3, %c0_29, %c0_30] : memref<9x392x72xbf16, #tpu.memory_space<vmem>>, vector<1x392x72xbf16>
    %35 = vector.shape_cast %34 : vector<1x392x72xbf16> to vector<392x72xbf16>
    %cst_31 = arith.constant dense<0.000000e+00> : vector<16x72xf32>
    %36 = tpu.matmul %8, %35, %cst_31 {dimension_numbers = #tpu.dot_dimension_numbers<[1], [0], [0], [1], [0, 0, 1, 1], [], []>} : vector<16x392xbf16>, vector<392x72xbf16>, vector<16x72xf32> -> vector<16x72xf32>
    %c3_32 = arith.constant 3 : index
    %c0_33 = arith.constant 0 : index
    %c0_34 = arith.constant 0 : index
    %37 = vector.load %arg4[%c3_32, %c0_33, %c0_34] : memref<9x32x16xbf16, #tpu.memory_space<vmem>>, vector<1x32x16xbf16>
    %38 = vector.shape_cast %37 : vector<1x32x16xbf16> to vector<32x16xbf16>
    %39 = arith.truncf %36 : vector<16x72xf32> to vector<16x72xbf16>
    %cst_35 = arith.constant dense<0.000000e+00> : vector<32x72xf32>
    %40 = tpu.matmul %38, %39, %cst_35 {dimension_numbers = #tpu.dot_dimension_numbers<[1], [0], [0], [1], [0, 0, 1, 1], [], []>} : vector<32x16xbf16>, vector<16x72xbf16>, vector<32x72xf32> -> vector<32x72xf32>
    %41 = arith.addf %33, %40 : vector<32x72xf32>
    %c4 = arith.constant 4 : index
    %c0_36 = arith.constant 0 : index
    %c0_37 = arith.constant 0 : index
    %42 = vector.load %arg3[%c4, %c0_36, %c0_37] : memref<9x392x72xbf16, #tpu.memory_space<vmem>>, vector<1x392x72xbf16>
    %43 = vector.shape_cast %42 : vector<1x392x72xbf16> to vector<392x72xbf16>
    %cst_38 = arith.constant dense<0.000000e+00> : vector<16x72xf32>
    %44 = tpu.matmul %8, %43, %cst_38 {dimension_numbers = #tpu.dot_dimension_numbers<[1], [0], [0], [1], [0, 0, 1, 1], [], []>} : vector<16x392xbf16>, vector<392x72xbf16>, vector<16x72xf32> -> vector<16x72xf32>
    %c4_39 = arith.constant 4 : index
    %c0_40 = arith.constant 0 : index
    %c0_41 = arith.constant 0 : index
    %45 = vector.load %arg4[%c4_39, %c0_40, %c0_41] : memref<9x32x16xbf16, #tpu.memory_space<vmem>>, vector<1x32x16xbf16>
    %46 = vector.shape_cast %45 : vector<1x32x16xbf16> to vector<32x16xbf16>
    %47 = arith.truncf %44 : vector<16x72xf32> to vector<16x72xbf16>
    %cst_42 = arith.constant dense<0.000000e+00> : vector<32x72xf32>
    %48 = tpu.matmul %46, %47, %cst_42 {dimension_numbers = #tpu.dot_dimension_numbers<[1], [0], [0], [1], [0, 0, 1, 1], [], []>} : vector<32x16xbf16>, vector<16x72xbf16>, vector<32x72xf32> -> vector<32x72xf32>
    %49 = arith.addf %41, %48 : vector<32x72xf32>
    %c5 = arith.constant 5 : index
    %c0_43 = arith.constant 0 : index
    %c0_44 = arith.constant 0 : index
    %50 = vector.load %arg3[%c5, %c0_43, %c0_44] : memref<9x392x72xbf16, #tpu.memory_space<vmem>>, vector<1x392x72xbf16>
    %51 = vector.shape_cast %50 : vector<1x392x72xbf16> to vector<392x72xbf16>
    %cst_45 = arith.constant dense<0.000000e+00> : vector<16x72xf32>
    %52 = tpu.matmul %8, %51, %cst_45 {dimension_numbers = #tpu.dot_dimension_numbers<[1], [0], [0], [1], [0, 0, 1, 1], [], []>} : vector<16x392xbf16>, vector<392x72xbf16>, vector<16x72xf32> -> vector<16x72xf32>
    %c5_46 = arith.constant 5 : index
    %c0_47 = arith.constant 0 : index
    %c0_48 = arith.constant 0 : index
    %53 = vector.load %arg4[%c5_46, %c0_47, %c0_48] : memref<9x32x16xbf16, #tpu.memory_space<vmem>>, vector<1x32x16xbf16>
    %54 = vector.shape_cast %53 : vector<1x32x16xbf16> to vector<32x16xbf16>
    %55 = arith.truncf %52 : vector<16x72xf32> to vector<16x72xbf16>
    %cst_49 = arith.constant dense<0.000000e+00> : vector<32x72xf32>
    %56 = tpu.matmul %54, %55, %cst_49 {dimension_numbers = #tpu.dot_dimension_numbers<[1], [0], [0], [1], [0, 0, 1, 1], [], []>} : vector<32x16xbf16>, vector<16x72xbf16>, vector<32x72xf32> -> vector<32x72xf32>
    %57 = arith.addf %49, %56 : vector<32x72xf32>
    %c6 = arith.constant 6 : index
    %c0_50 = arith.constant 0 : index
    %c0_51 = arith.constant 0 : index
    %58 = vector.load %arg3[%c6, %c0_50, %c0_51] : memref<9x392x72xbf16, #tpu.memory_space<vmem>>, vector<1x392x72xbf16>
    %59 = vector.shape_cast %58 : vector<1x392x72xbf16> to vector<392x72xbf16>
    %cst_52 = arith.constant dense<0.000000e+00> : vector<16x72xf32>
    %60 = tpu.matmul %8, %59, %cst_52 {dimension_numbers = #tpu.dot_dimension_numbers<[1], [0], [0], [1], [0, 0, 1, 1], [], []>} : vector<16x392xbf16>, vector<392x72xbf16>, vector<16x72xf32> -> vector<16x72xf32>
    %c6_53 = arith.constant 6 : index
    %c0_54 = arith.constant 0 : index
    %c0_55 = arith.constant 0 : index
    %61 = vector.load %arg4[%c6_53, %c0_54, %c0_55] : memref<9x32x16xbf16, #tpu.memory_space<vmem>>, vector<1x32x16xbf16>
    %62 = vector.shape_cast %61 : vector<1x32x16xbf16> to vector<32x16xbf16>
    %63 = arith.truncf %60 : vector<16x72xf32> to vector<16x72xbf16>
    %cst_56 = arith.constant dense<0.000000e+00> : vector<32x72xf32>
    %64 = tpu.matmul %62, %63, %cst_56 {dimension_numbers = #tpu.dot_dimension_numbers<[1], [0], [0], [1], [0, 0, 1, 1], [], []>} : vector<32x16xbf16>, vector<16x72xbf16>, vector<32x72xf32> -> vector<32x72xf32>
    %65 = arith.addf %57, %64 : vector<32x72xf32>
    %c7 = arith.constant 7 : index
    %c0_57 = arith.constant 0 : index
    %c0_58 = arith.constant 0 : index
    %66 = vector.load %arg3[%c7, %c0_57, %c0_58] : memref<9x392x72xbf16, #tpu.memory_space<vmem>>, vector<1x392x72xbf16>
    %67 = vector.shape_cast %66 : vector<1x392x72xbf16> to vector<392x72xbf16>
    %cst_59 = arith.constant dense<0.000000e+00> : vector<16x72xf32>
    %68 = tpu.matmul %8, %67, %cst_59 {dimension_numbers = #tpu.dot_dimension_numbers<[1], [0], [0], [1], [0, 0, 1, 1], [], []>} : vector<16x392xbf16>, vector<392x72xbf16>, vector<16x72xf32> -> vector<16x72xf32>
    %c7_60 = arith.constant 7 : index
    %c0_61 = arith.constant 0 : index
    %c0_62 = arith.constant 0 : index
    %69 = vector.load %arg4[%c7_60, %c0_61, %c0_62] : memref<9x32x16xbf16, #tpu.memory_space<vmem>>, vector<1x32x16xbf16>
    %70 = vector.shape_cast %69 : vector<1x32x16xbf16> to vector<32x16xbf16>
    %71 = arith.truncf %68 : vector<16x72xf32> to vector<16x72xbf16>
    %cst_63 = arith.constant dense<0.000000e+00> : vector<32x72xf32>
    %72 = tpu.matmul %70, %71, %cst_63 {dimension_numbers = #tpu.dot_dimension_numbers<[1], [0], [0], [1], [0, 0, 1, 1], [], []>} : vector<32x16xbf16>, vector<16x72xbf16>, vector<32x72xf32> -> vector<32x72xf32>
    %73 = arith.addf %65, %72 : vector<32x72xf32>
    %c8 = arith.constant 8 : index
    %c0_64 = arith.constant 0 : index
    %c0_65 = arith.constant 0 : index
    %74 = vector.load %arg3[%c8, %c0_64, %c0_65] : memref<9x392x72xbf16, #tpu.memory_space<vmem>>, vector<1x392x72xbf16>
    %75 = vector.shape_cast %74 : vector<1x392x72xbf16> to vector<392x72xbf16>
    %cst_66 = arith.constant dense<0.000000e+00> : vector<16x72xf32>
    %76 = tpu.matmul %8, %75, %cst_66 {dimension_numbers = #tpu.dot_dimension_numbers<[1], [0], [0], [1], [0, 0, 1, 1], [], []>} : vector<16x392xbf16>, vector<392x72xbf16>, vector<16x72xf32> -> vector<16x72xf32>
    %c8_67 = arith.constant 8 : index
    %c0_68 = arith.constant 0 : index
    %c0_69 = arith.constant 0 : index
    %77 = vector.load %arg4[%c8_67, %c0_68, %c0_69] : memref<9x32x16xbf16, #tpu.memory_space<vmem>>, vector<1x32x16xbf16>
    %78 = vector.shape_cast %77 : vector<1x32x16xbf16> to vector<32x16xbf16>
    %79 = arith.truncf %76 : vector<16x72xf32> to vector<16x72xbf16>
    %cst_70 = arith.constant dense<0.000000e+00> : vector<32x72xf32>
    %80 = tpu.matmul %78, %79, %cst_70 {dimension_numbers = #tpu.dot_dimension_numbers<[1], [0], [0], [1], [0, 0, 1, 1], [], []>} : vector<32x16xbf16>, vector<16x72xbf16>, vector<32x72xf32> -> vector<32x72xf32>
    %81 = arith.addf %73, %80 : vector<32x72xf32>
    %c0_71 = arith.constant 0 : index
    %c0_72 = arith.constant 0 : index
    %82 = vector.load %arg5[%c0_71, %c0_72] : memref<32x1xf32, #tpu.memory_space<vmem>>, vector<32x1xf32>
    %83 = vector.broadcast %82 : vector<32x1xf32> to vector<32x72xf32>
    %84 = arith.addf %81, %83 : vector<32x72xf32>
    %c0_73 = arith.constant 0 : index
    %c0_74 = arith.constant 0 : index
    %85 = vector.load %arg6[%c0_73, %c0_74] : memref<32x72xf32, #tpu.memory_space<vmem>>, vector<32x72xf32>
    tpu.vector_store %arg6[%c0_73, %c0_74], %84 {strides = array<i32>} : memref<32x72xf32, #tpu.memory_space<vmem>>, vector<32x72xf32>,
    return
  }
}

module attributes {stable_mosaic.version = 11 : i64} {
  func.func @_digitcaps_kernel(%arg0: memref<2x8x144xf32, #tpu.memory_space<vmem>>, %arg1: memref<8x10x16x144xf32, #tpu.memory_space<vmem>>, %arg2: memref<2x10x16x1xf32, #tpu.memory_space<vmem>>) attributes {dimension_semantics = [], scalar_prefetch = 0 : i64, scratch_operands = 0 : i64, tpu.core_type = #tpu.core_type<tc>} {
    %c0 = arith.constant 0 : index
    %c0_0 = arith.constant 0 : index
    %c0_1 = arith.constant 0 : index
    %0 = vector.load %arg0[%c0, %c0_0, %c0_1] : memref<2x8x144xf32, #tpu.memory_space<vmem>>, vector<2x8x144xf32>
    %1 = arith.mulf %0, %0 : vector<2x8x144xf32>
    %cst = arith.constant dense<0.000000e+00> : vector<2x144xf32>
    %2 = vector.multi_reduction <add>, %1, %cst [1] : vector<2x8x144xf32> to vector<2x144xf32>
    %3 = vector.shape_cast %2 : vector<2x144xf32> to vector<2x1x144xf32>
    %4 = math.sqrt %3 : vector<2x1x144xf32>
    %cst_2 = arith.constant 1.000000e+00 : f32
    %5 = vector.broadcast %cst_2 : f32 to vector<2x1x144xf32>
    %6 = arith.addf %5, %3 : vector<2x1x144xf32>
    %7 = tpu.reciprocal %6 {approx = true} : vector<2x1x144xf32> -> vector<2x1x144xf32>
    %8 = arith.mulf %4, %7 : vector<2x1x144xf32>
    %9 = vector.broadcast %8 : vector<2x1x144xf32> to vector<2x8x144xf32>
    %10 = arith.mulf %0, %9 : vector<2x8x144xf32>
    %11 = vector.extract_strided_slice %10 {offsets = [0, 0, 0], sizes = [2, 1, 144], strides = [1, 1, 1]} : vector<2x8x144xf32> to vector<2x1x144xf32>
    %12 = vector.shape_cast %11 : vector<2x1x144xf32> to vector<2x144xf32>
    %13 = vector.shape_cast %12 : vector<2x144xf32> to vector<2x1x1x144xf32>
    %c0_3 = arith.constant 0 : index
    %c0_4 = arith.constant 0 : index
    %c0_5 = arith.constant 0 : index
    %c0_6 = arith.constant 0 : index
    %14 = vector.load %arg1[%c0_3, %c0_4, %c0_5, %c0_6] : memref<8x10x16x144xf32, #tpu.memory_space<vmem>>, vector<1x10x16x144xf32>
    %15 = vector.shape_cast %14 : vector<1x10x16x144xf32> to vector<10x16x144xf32>
    %16 = vector.shape_cast %15 : vector<10x16x144xf32> to vector<1x10x16x144xf32>
    %17 = vector.broadcast %13 : vector<2x1x1x144xf32> to vector<2x10x16x144xf32>
    %18 = vector.broadcast %16 : vector<1x10x16x144xf32> to vector<2x10x16x144xf32>
    %19 = arith.mulf %17, %18 : vector<2x10x16x144xf32>
    %20 = vector.extract_strided_slice %10 {offsets = [0, 1, 0], sizes = [2, 1, 144], strides = [1, 1, 1]} : vector<2x8x144xf32> to vector<2x1x144xf32>
    %21 = vector.shape_cast %20 : vector<2x1x144xf32> to vector<2x144xf32>
    %22 = vector.shape_cast %21 : vector<2x144xf32> to vector<2x1x1x144xf32>
    %c1 = arith.constant 1 : index
    %c0_7 = arith.constant 0 : index
    %c0_8 = arith.constant 0 : index
    %c0_9 = arith.constant 0 : index
    %23 = vector.load %arg1[%c1, %c0_7, %c0_8, %c0_9] : memref<8x10x16x144xf32, #tpu.memory_space<vmem>>, vector<1x10x16x144xf32>
    %24 = vector.shape_cast %23 : vector<1x10x16x144xf32> to vector<10x16x144xf32>
    %25 = vector.shape_cast %24 : vector<10x16x144xf32> to vector<1x10x16x144xf32>
    %26 = vector.broadcast %22 : vector<2x1x1x144xf32> to vector<2x10x16x144xf32>
    %27 = vector.broadcast %25 : vector<1x10x16x144xf32> to vector<2x10x16x144xf32>
    %28 = arith.mulf %26, %27 : vector<2x10x16x144xf32>
    %29 = arith.addf %19, %28 : vector<2x10x16x144xf32>
    %30 = vector.extract_strided_slice %10 {offsets = [0, 2, 0], sizes = [2, 1, 144], strides = [1, 1, 1]} : vector<2x8x144xf32> to vector<2x1x144xf32>
    %31 = vector.shape_cast %30 : vector<2x1x144xf32> to vector<2x144xf32>
    %32 = vector.shape_cast %31 : vector<2x144xf32> to vector<2x1x1x144xf32>
    %c2 = arith.constant 2 : index
    %c0_10 = arith.constant 0 : index
    %c0_11 = arith.constant 0 : index
    %c0_12 = arith.constant 0 : index
    %33 = vector.load %arg1[%c2, %c0_10, %c0_11, %c0_12] : memref<8x10x16x144xf32, #tpu.memory_space<vmem>>, vector<1x10x16x144xf32>
    %34 = vector.shape_cast %33 : vector<1x10x16x144xf32> to vector<10x16x144xf32>
    %35 = vector.shape_cast %34 : vector<10x16x144xf32> to vector<1x10x16x144xf32>
    %36 = vector.broadcast %32 : vector<2x1x1x144xf32> to vector<2x10x16x144xf32>
    %37 = vector.broadcast %35 : vector<1x10x16x144xf32> to vector<2x10x16x144xf32>
    %38 = arith.mulf %36, %37 : vector<2x10x16x144xf32>
    %39 = arith.addf %29, %38 : vector<2x10x16x144xf32>
    %40 = vector.extract_strided_slice %10 {offsets = [0, 3, 0], sizes = [2, 1, 144], strides = [1, 1, 1]} : vector<2x8x144xf32> to vector<2x1x144xf32>
    %41 = vector.shape_cast %40 : vector<2x1x144xf32> to vector<2x144xf32>
    %42 = vector.shape_cast %41 : vector<2x144xf32> to vector<2x1x1x144xf32>
    %c3 = arith.constant 3 : index
    %c0_13 = arith.constant 0 : index
    %c0_14 = arith.constant 0 : index
    %c0_15 = arith.constant 0 : index
    %43 = vector.load %arg1[%c3, %c0_13, %c0_14, %c0_15] : memref<8x10x16x144xf32, #tpu.memory_space<vmem>>, vector<1x10x16x144xf32>
    %44 = vector.shape_cast %43 : vector<1x10x16x144xf32> to vector<10x16x144xf32>
    %45 = vector.shape_cast %44 : vector<10x16x144xf32> to vector<1x10x16x144xf32>
    %46 = vector.broadcast %42 : vector<2x1x1x144xf32> to vector<2x10x16x144xf32>
    %47 = vector.broadcast %45 : vector<1x10x16x144xf32> to vector<2x10x16x144xf32>
    %48 = arith.mulf %46, %47 : vector<2x10x16x144xf32>
    %49 = arith.addf %39, %48 : vector<2x10x16x144xf32>
    %50 = vector.extract_strided_slice %10 {offsets = [0, 4, 0], sizes = [2, 1, 144], strides = [1, 1, 1]} : vector<2x8x144xf32> to vector<2x1x144xf32>
    %51 = vector.shape_cast %50 : vector<2x1x144xf32> to vector<2x144xf32>
    %52 = vector.shape_cast %51 : vector<2x144xf32> to vector<2x1x1x144xf32>
    %c4 = arith.constant 4 : index
    %c0_16 = arith.constant 0 : index
    %c0_17 = arith.constant 0 : index
    %c0_18 = arith.constant 0 : index
    %53 = vector.load %arg1[%c4, %c0_16, %c0_17, %c0_18] : memref<8x10x16x144xf32, #tpu.memory_space<vmem>>, vector<1x10x16x144xf32>
    %54 = vector.shape_cast %53 : vector<1x10x16x144xf32> to vector<10x16x144xf32>
    %55 = vector.shape_cast %54 : vector<10x16x144xf32> to vector<1x10x16x144xf32>
    %56 = vector.broadcast %52 : vector<2x1x1x144xf32> to vector<2x10x16x144xf32>
    %57 = vector.broadcast %55 : vector<1x10x16x144xf32> to vector<2x10x16x144xf32>
    %58 = arith.mulf %56, %57 : vector<2x10x16x144xf32>
    %59 = arith.addf %49, %58 : vector<2x10x16x144xf32>
    %60 = vector.extract_strided_slice %10 {offsets = [0, 5, 0], sizes = [2, 1, 144], strides = [1, 1, 1]} : vector<2x8x144xf32> to vector<2x1x144xf32>
    %61 = vector.shape_cast %60 : vector<2x1x144xf32> to vector<2x144xf32>
    %62 = vector.shape_cast %61 : vector<2x144xf32> to vector<2x1x1x144xf32>
    %c5 = arith.constant 5 : index
    %c0_19 = arith.constant 0 : index
    %c0_20 = arith.constant 0 : index
    %c0_21 = arith.constant 0 : index
    %63 = vector.load %arg1[%c5, %c0_19, %c0_20, %c0_21] : memref<8x10x16x144xf32, #tpu.memory_space<vmem>>, vector<1x10x16x144xf32>
    %64 = vector.shape_cast %63 : vector<1x10x16x144xf32> to vector<10x16x144xf32>
    %65 = vector.shape_cast %64 : vector<10x16x144xf32> to vector<1x10x16x144xf32>
    %66 = vector.broadcast %62 : vector<2x1x1x144xf32> to vector<2x10x16x144xf32>
    %67 = vector.broadcast %65 : vector<1x10x16x144xf32> to vector<2x10x16x144xf32>
    %68 = arith.mulf %66, %67 : vector<2x10x16x144xf32>
    %69 = arith.addf %59, %68 : vector<2x10x16x144xf32>
    %70 = vector.extract_strided_slice %10 {offsets = [0, 6, 0], sizes = [2, 1, 144], strides = [1, 1, 1]} : vector<2x8x144xf32> to vector<2x1x144xf32>
    %71 = vector.shape_cast %70 : vector<2x1x144xf32> to vector<2x144xf32>
    %72 = vector.shape_cast %71 : vector<2x144xf32> to vector<2x1x1x144xf32>
    %c6 = arith.constant 6 : index
    %c0_22 = arith.constant 0 : index
    %c0_23 = arith.constant 0 : index
    %c0_24 = arith.constant 0 : index
    %73 = vector.load %arg1[%c6, %c0_22, %c0_23, %c0_24] : memref<8x10x16x144xf32, #tpu.memory_space<vmem>>, vector<1x10x16x144xf32>
    %74 = vector.shape_cast %73 : vector<1x10x16x144xf32> to vector<10x16x144xf32>
    %75 = vector.shape_cast %74 : vector<10x16x144xf32> to vector<1x10x16x144xf32>
    %76 = vector.broadcast %72 : vector<2x1x1x144xf32> to vector<2x10x16x144xf32>
    %77 = vector.broadcast %75 : vector<1x10x16x144xf32> to vector<2x10x16x144xf32>
    %78 = arith.mulf %76, %77 : vector<2x10x16x144xf32>
    %79 = arith.addf %69, %78 : vector<2x10x16x144xf32>
    %80 = vector.extract_strided_slice %10 {offsets = [0, 7, 0], sizes = [2, 1, 144], strides = [1, 1, 1]} : vector<2x8x144xf32> to vector<2x1x144xf32>
    %81 = vector.shape_cast %80 : vector<2x1x144xf32> to vector<2x144xf32>
    %82 = vector.shape_cast %81 : vector<2x144xf32> to vector<2x1x1x144xf32>
    %c7 = arith.constant 7 : index
    %c0_25 = arith.constant 0 : index
    %c0_26 = arith.constant 0 : index
    %c0_27 = arith.constant 0 : index
    %83 = vector.load %arg1[%c7, %c0_25, %c0_26, %c0_27] : memref<8x10x16x144xf32, #tpu.memory_space<vmem>>, vector<1x10x16x144xf32>
    %84 = vector.shape_cast %83 : vector<1x10x16x144xf32> to vector<10x16x144xf32>
    %85 = vector.shape_cast %84 : vector<10x16x144xf32> to vector<1x10x16x144xf32>
    %86 = vector.broadcast %82 : vector<2x1x1x144xf32> to vector<2x10x16x144xf32>
    %87 = vector.broadcast %85 : vector<1x10x16x144xf32> to vector<2x10x16x144xf32>
    %88 = arith.mulf %86, %87 : vector<2x10x16x144xf32>
    %89 = arith.addf %79, %88 : vector<2x10x16x144xf32>
    %cst_28 = arith.constant dense<0.000000e+00> : vector<2x10x16xf32>
    %90 = vector.multi_reduction <add>, %89, %cst_28 [3] : vector<2x10x16x144xf32> to vector<2x10x16xf32>
    %91 = vector.shape_cast %90 : vector<2x10x16xf32> to vector<2x10x16x1xf32>
    %cst_29 = arith.constant 0.0069444445 : f32
    %92 = vector.broadcast %cst_29 : f32 to vector<2x10x16x1xf32>
    %93 = arith.mulf %91, %92 : vector<2x10x16x1xf32>
    %94 = math.absf %93 : vector<2x10x16x1xf32>
    %95 = arith.mulf %93, %94 : vector<2x10x16x1xf32>
    %96 = arith.mulf %93, %93 : vector<2x10x16x1xf32>
    %cst_30 = arith.constant 1.000000e+00 : f32
    %97 = vector.broadcast %cst_30 : f32 to vector<2x10x16x1xf32>
    %98 = arith.addf %97, %96 : vector<2x10x16x1xf32>
    %99 = tpu.reciprocal %98 {approx = true} : vector<2x10x16x1xf32> -> vector<2x10x16x1xf32>
    %100 = arith.mulf %95, %99 : vector<2x10x16x1xf32>
    %101 = vector.broadcast %100 : vector<2x10x16x1xf32> to vector<2x10x16x144xf32>
    %102 = arith.mulf %89, %101 : vector<2x10x16x144xf32>
    %cst_31 = arith.constant dense<0.000000e+00> : vector<2x10x144xf32>
    %103 = vector.multi_reduction <add>, %102, %cst_31 [2] : vector<2x10x16x144xf32> to vector<2x10x144xf32>
    %104 = vector.shape_cast %103 : vector<2x10x144xf32> to vector<2x10x1x144xf32>
    %cst_32 = arith.constant dense<0.000000e+00> : vector<10x1x144xf32>
    %105 = vector.multi_reduction <add>, %104, %cst_32 [0] : vector<2x10x1x144xf32> to vector<10x1x144xf32>
    %cst_33 = arith.constant 2.000000e+00 : f32
    %106 = vector.broadcast %cst_33 : f32 to vector<10x1x144xf32>
    %107 = arith.divf %105, %106 : vector<10x1x144xf32>
    %cst_34 = arith.constant dense<0xFF800000> : vector<10x1xf32>
    %108 = vector.multi_reduction <maximumf>, %107, %cst_34 [2] : vector<10x1x144xf32> to vector<10x1xf32>
    %109 = vector.shape_cast %108 : vector<10x1xf32> to vector<10x1x1xf32>
    %110 = vector.broadcast %109 : vector<10x1x1xf32> to vector<10x1x144xf32>
    %111 = arith.subf %107, %110 : vector<10x1x144xf32>
    %112 = math.exp %111 : vector<10x1x144xf32>
    %cst_35 = arith.constant dense<0.000000e+00> : vector<10x1xf32>
    %113 = vector.multi_reduction <add>, %112, %cst_35 [2] : vector<10x1x144xf32> to vector<10x1xf32>
    %114 = vector.shape_cast %113 : vector<10x1xf32> to vector<10x1x1xf32>
    %115 = tpu.reciprocal %114 {approx = true} : vector<10x1x1xf32> -> vector<10x1x1xf32>
    %116 = vector.broadcast %115 : vector<10x1x1xf32> to vector<10x1x144xf32>
    %117 = arith.mulf %112, %116 : vector<10x1x144xf32>
    %118 = vector.shape_cast %117 : vector<10x1x144xf32> to vector<1x10x1x144xf32>
    %119 = vector.broadcast %118 : vector<1x10x1x144xf32> to vector<2x10x16x144xf32>
    %120 = arith.mulf %119, %89 : vector<2x10x16x144xf32>
    %cst_36 = arith.constant dense<0.000000e+00> : vector<2x10x16xf32>
    %121 = vector.multi_reduction <add>, %120, %cst_36 [3] : vector<2x10x16x144xf32> to vector<2x10x16xf32>
    %122 = vector.shape_cast %121 : vector<2x10x16xf32> to vector<2x10x16x1xf32>
    %123 = math.absf %122 : vector<2x10x16x1xf32>
    %124 = arith.mulf %122, %123 : vector<2x10x16x1xf32>
    %125 = arith.mulf %122, %122 : vector<2x10x16x1xf32>
    %cst_37 = arith.constant 1.000000e+00 : f32
    %126 = vector.broadcast %cst_37 : f32 to vector<2x10x16x1xf32>
    %127 = arith.addf %126, %125 : vector<2x10x16x1xf32>
    %128 = tpu.reciprocal %127 {approx = true} : vector<2x10x16x1xf32> -> vector<2x10x16x1xf32>
    %129 = arith.mulf %124, %128 : vector<2x10x16x1xf32>
    %130 = vector.broadcast %129 : vector<2x10x16x1xf32> to vector<2x10x16x144xf32>
    %131 = arith.mulf %89, %130 : vector<2x10x16x144xf32>
    %cst_38 = arith.constant dense<0.000000e+00> : vector<2x10x144xf32>
    %132 = vector.multi_reduction <add>, %131, %cst_38 [2] : vector<2x10x16x144xf32> to vector<2x10x144xf32>
    %133 = vector.shape_cast %132 : vector<2x10x144xf32> to vector<2x10x1x144xf32>
    %cst_39 = arith.constant dense<0.000000e+00> : vector<10x1x144xf32>
    %134 = vector.multi_reduction <add>, %133, %cst_39 [0] : vector<2x10x1x144xf32> to vector<10x1x144xf32>
    %cst_40 = arith.constant 2.000000e+00 : f32
    %135 = vector.broadcast %cst_40 : f32 to vector<10x1x144xf32>
    %136 = arith.divf %134, %135 : vector<10x1x144xf32>
    %137 = arith.addf %107, %136 : vector<10x1x144xf32>
    %cst_41 = arith.constant dense<0xFF800000> : vector<10x1xf32>
    %138 = vector.multi_reduction <maximumf>, %137, %cst_41 [2] : vector<10x1x144xf32> to vector<10x1xf32>
    %139 = vector.shape_cast %138 : vector<10x1xf32> to vector<10x1x1xf32>
    %140 = vector.broadcast %139 : vector<10x1x1xf32> to vector<10x1x144xf32>
    %141 = arith.subf %137, %140 : vector<10x1x144xf32>
    %142 = math.exp %141 : vector<10x1x144xf32>
    %cst_42 = arith.constant dense<0.000000e+00> : vector<10x1xf32>
    %143 = vector.multi_reduction <add>, %142, %cst_42 [2] : vector<10x1x144xf32> to vector<10x1xf32>
    %144 = vector.shape_cast %143 : vector<10x1xf32> to vector<10x1x1xf32>
    %145 = tpu.reciprocal %144 {approx = true} : vector<10x1x1xf32> -> vector<10x1x1xf32>
    %146 = vector.broadcast %145 : vector<10x1x1xf32> to vector<10x1x144xf32>
    %147 = arith.mulf %142, %146 : vector<10x1x144xf32>
    %148 = vector.shape_cast %147 : vector<10x1x144xf32> to vector<1x10x1x144xf32>
    %149 = vector.broadcast %148 : vector<1x10x1x144xf32> to vector<2x10x16x144xf32>
    %150 = arith.mulf %149, %89 : vector<2x10x16x144xf32>
    %cst_43 = arith.constant dense<0.000000e+00> : vector<2x10x16xf32>
    %151 = vector.multi_reduction <add>, %150, %cst_43 [3] : vector<2x10x16x144xf32> to vector<2x10x16xf32>
    %152 = vector.shape_cast %151 : vector<2x10x16xf32> to vector<2x10x16x1xf32>
    %153 = math.absf %152 : vector<2x10x16x1xf32>
    %154 = arith.mulf %152, %153 : vector<2x10x16x1xf32>
    %155 = arith.mulf %152, %152 : vector<2x10x16x1xf32>
    %cst_44 = arith.constant 1.000000e+00 : f32
    %156 = vector.broadcast %cst_44 : f32 to vector<2x10x16x1xf32>
    %157 = arith.addf %156, %155 : vector<2x10x16x1xf32>
    %158 = tpu.reciprocal %157 {approx = true} : vector<2x10x16x1xf32> -> vector<2x10x16x1xf32>
    %159 = arith.mulf %154, %158 : vector<2x10x16x1xf32>
    %c0_45 = arith.constant 0 : index
    %c0_46 = arith.constant 0 : index
    %c0_47 = arith.constant 0 : index
    %c0_48 = arith.constant 0 : index
    %160 = vector.load %arg2[%c0_45, %c0_46, %c0_47, %c0_48] : memref<2x10x16x1xf32, #tpu.memory_space<vmem>>, vector<2x10x16x1xf32>
    tpu.vector_store %arg2[%c0_45, %c0_46, %c0_47, %c0_48], %159 {strides = array<i32>} : memref<2x10x16x1xf32, #tpu.memory_space<vmem>>, vector<2x10x16x1xf32>,
    return
  }
}

</mosaic_0001>

<bundles_post_ra>
// kernel: _lambda_.2
= control target key start
LH: loop header
LB: loop body
LE: loop exit
PB: predicated region body
PF: predicated region fallthrough
CT: control target
= control target key end

     0   :  { %vm107_vm0 = vcmask 1041408   ;;  %v4717_v2 = vmov 0   ;;  %vm103_vm1 = vcmask 293888   ;;  %vm418_vm2 = vcmask 1043456   ;;  %s5786_s0 = inlined_call_operand.vmem [shape: bf16[36,392], index: 0, kind: input, shape index: {}]   ;;  %s5787_s2 = inlined_call_operand.vmem [shape: f32[16,1], index: 2, kind: input, shape index: {}]   ;;  %s5788_s1 = inlined_call_operand.vmem [shape: bf16[16,36], index: 1, kind: input, shape index: {}]   ;;  %s5789_s3 = inlined_call_operand.vmem [shape: bf16[9,392,72], index: 3, kind: input, shape index: {}]   ;;  %s5790_s5 = inlined_call_operand.vmem [shape: f32[32,1], index: 5, kind: input, shape index: {}]   ;;  %s5791_s4 = inlined_call_operand.vmem [shape: bf16[9,32,16], index: 4, kind: input, shape index: {}]   ;;  %s5792_s6 = inlined_call_operand.vmem [shape: f32[32,72], index: 6, kind: output, shape index: {}]  }
   0x1   :  { %v34_v0 = vld [vmem:[%s5786_s0 + $0x40] sm:$0x33]  ;;  %v35_v1 = vld [vmem:[%s5786_s0 + $0x48] sm:$0x33]  ;;  %152 = vmatprep.mubr.bf16.mxu0 %v4717_v2  ;;  %195 = vmatprep.mubr.bf16.mxu1 %v4717_v2  ;;  %v4475_v19 = vld [vmem:[%s5789_s3 + $0x78] sm:$0xff]   ;;  %vm414_vm3 = vcmask 64512  }
   0x2   :  { %v3474_v3 = vcombine.high %v34_v0, %v34_v0  ;;  %v3476_v4 = vcombine.high %v35_v1, %v35_v1  ;;  %v3473_v5 = vcombine.low %v34_v0, %v34_v0  ;;  %v3475_v6 = vcombine.low %v35_v1, %v35_v1  ;;  %v4461_v7 = vld [vmem:[%s5786_s0 + $0x24] ss:$16 sps:$4 sm:$0xff]   ;;  %4455 = vset.pattern.permute.xlu0 %v4717_v2  ;;  %v4463_v8 = vld [vmem:[%s5786_s0 + $0x2c] ss:$16 sps:$4 sm:$0xff]   ;;  %v4465_v11 = vld [vmem:[%s5786_s0 + $0x20] ss:$16 sps:$4 sm:$0xff]  }
   0x3   :  { %4456 = vset.pattern.permute.xlu1 %v4717_v2  ;;  %v4466_v12 = vld [vmem:[%s5786_s0 + $0x28] ss:$16 sps:$4 sm:$0xff]   ;;  %v4467_v13 = vld [vmem:[%s5786_s0 + $0x4] ss:$16 sps:$4 sm:$0xff]   ;;  %v4469_v14 = vld [vmem:[%s5786_s0 + $0xc] ss:$16 sps:$4 sm:$0xff]  }
   0x4   :  { %3477 = vmatprep.subr.msk.bf16.mxu0 %vm107_vm0, %v3474_v3  ;;  %3479 = vmatprep.subr.msk.bf16.mxu1 %vm107_vm0, %v3476_v4  ;;  %v109_v9 = vsel %vm107_vm0, %v3473_v5, 0  ;;  %v115_v10 = vsel %vm107_vm0, %v3475_v6, 0  ;;  %v4471_v15 = vld [vmem:[%s5786_s0] ss:$16 sps:$4 sm:$0xff]   ;;  %v4472_v17 = vld [vmem:[%s5786_s0 + $0x8] ss:$16 sps:$4 sm:$0xff]  }
   0x5   :  { %131 = vmatpush1.bf16.msra.mxu0 %v109_v9  ;;  %174 = vmatpush1.bf16.msra.mxu1 %v115_v10  ;;  %v36_v16 = vld [vmem:[%s5787_s2] sm:$0xff]  ;;  %v37_v20 = vld [vmem:[%s5787_s2 + $0x8] sm:$0xff]  ;;  %v4474_v21 = vld [vmem:[%s5789_s3 + $0xb8] sm:$0xff]   ;;  %vm807_vm4 = vcmask 130048   ;;  %vm3455_vm5 = vcmask 588800  }
   0x6   :  { %132 = vmatprep.subr.bf16.mxu0 %v4461_v7  ;;  %175 = vmatprep.subr.bf16.mxu1 %v4463_v8  ;;  %v4473_v18 = vld [vmem:[%s5788_s1] sm:$0xff]   ;;  %v4476_v22 = vld [vmem:[%s5789_s3 + $0x38] sm:$0xff]   ;;  %v4478_v23 = vld [vmem:[%s5789_s3 + $0x70] sm:$0xff]  }
   0x7   :  { %40 = vperm.xlu0 %4455, %v36_v16   ;;  %v3429_v24 = vld [vmem:[%s5790_s5 + $0x10] sm:$0xff]  ;;  %v4481_v27 = vld [vmem:[%s5789_s3 + $0x68] sm:$0xff]   ;;  %v4484_v30 = vld [vmem:[%s5789_s3 + $0x60] sm:$0xff]  }
   0x8   :  { %v4477_v25 = vld [vmem:[%s5789_s3 + $0xb0] sm:$0xff]   ;;  %v4480_v28 = vld [vmem:[%s5789_s3 + $0xa8] sm:$0xff]   ;;  %v4483_v31 = vld [vmem:[%s5789_s3 + $0xa0] sm:$0xff]  }
   0x9   :  { %133 = vmatpush1.bf16.msra.mxu0 %v4465_v11  ;;  %176 = vmatpush1.bf16.msra.mxu1 %v4466_v12  ;;  %v4479_v26 = vld [vmem:[%s5789_s3 + $0x30] sm:$0xff]   ;;  %v4482_v29 = vld [vmem:[%s5789_s3 + $0x28] sm:$0xff]   ;;  %v4485_v32 = vld [vmem:[%s5789_s3 + $0x20] sm:$0xff]  }
   0xa   :  { %134 = vmatprep.subr.bf16.mxu0 %v4467_v13  ;;  %177 = vmatprep.subr.bf16.mxu1 %v4469_v14  ;;  %v4487_v33 = vld [vmem:[%s5789_s3 + $0x58] sm:$0xff]   ;;  %v4489_v36 = vld [vmem:[%s5789_s3 + $0x90] sm:$0xff]   ;;  %v4492_v39 = vld [vmem:[%s5789_s3 + $0x88] sm:$0xff]  }
   0xb   :  { %45 = vperm.xlu0 %4455, %v37_v20   ;;  %v4486_v34 = vld [vmem:[%s5789_s3 + $0x98] sm:$0xff]   ;;  %v4490_v37 = vld [vmem:[%s5789_s3 + $0x50] sm:$0xff]   ;;  %v4493_v40 = vld [vmem:[%s5789_s3 + $0x48] sm:$0xff]  }
   0xc   :  { %v4488_v35 = vld [vmem:[%s5789_s3 + $0x18] sm:$0xff]   ;;  %v4491_v38 = vld [vmem:[%s5789_s3 + $0x10] sm:$0xff]   ;;  %v4494_v41 = vld [vmem:[%s5789_s3 + $0x8] sm:$0xff]  }
   0xd   :  { %135 = vmatpush1.bf16.msra.mxu0 %v4471_v15  ;;  %178 = vmatpush1.bf16.msra.mxu1 %v4472_v17  ;;  %v4495_v42 = vld [vmem:[%s5789_s3 + $0x80] sm:$0xff]   ;;  %v4502_v17 = vld [vmem:[%s5789_s3 + $0x134] sm:$0xff]   ;;  %v4505_v20 = vld [vmem:[%s5789_s3 + $0x12c] sm:$0xff]  }
   0xe   :  { %463 = vmatprep.subr.bf16.mxu1 %v4717_v2  ;;  %4175 = vmatprep.subr.bf16.mxu0 %v4475_v19  ;;  %v4496_v43 = vld [vmem:[%s5789_s3 + $0x40] sm:$0xff]   ;;  %v4504_v19 = vld [vmem:[%s5789_s3 + $0x174] sm:$0xff]  }
   0xf   :  { %3443 = vperm.xlu0 %4455, %v3429_v24   ;;  %v4498_v44 = vld [vmem:[%s5789_s3 + $0xc0] ss:$0 sps:$4 sm:$0xff]   ;;  %v4509_v24 = vld [vmem:[%s5789_s3 + $0xe4] sm:$0xff]  }
  0x10   :  { %3478 = vmatmul.mubr.msk.bf16.vlgmr.msra.gmra.mxu0 %vm103_vm1, %v4473_v18  ;;  %3480 = vmatmul.mubr.msk.bf16.vlgmr.msra.gmra.mxu1 %vm103_vm1, %v4473_v18  ;;  %v4497_v45 = vld [vmem:[%s5789_s3] sm:$0xff]   ;;  %v420_v46 = vsel %vm418_vm2, %v4498_v44, 0  ;;  %v4503_v18 = vld [vmem:[%s5789_s3 + $0xf4] sm:$0xff]  }
  0x11   :  { %464 = vmatpush1.bf16.msra.mxu1 %v4474_v21  ;;  %4176 = vmatpush3.bf16.msra.mxu0 %v4476_v22  ;;  %v4499_v47 = vld [vmem:[%s5789_s3 + $0x13c] sm:$0xff]   ;;  %v4506_v21 = vld [vmem:[%s5789_s3 + $0xec] sm:$0xff]  }
  0x12   :  { %465 = vmatprep.subr.bf16.mxu1 %v4717_v2  ;;  %4177 = vmatprep.subr.bf16.mxu0 %v4478_v23  ;;  %v4500_v13 = vld [vmem:[%s5789_s3 + $0xfc] sm:$0xff]   ;;  %v4507_v22 = vld [vmem:[%s5789_s3 + $0x16c] sm:$0xff]   ;;  %v4508_v23 = vld [vmem:[%s5789_s3 + $0x124] sm:$0xff]  }
  0x13   :  { %v4501_v14 = vld [vmem:[%s5789_s3 + $0x17c] sm:$0xff]   ;;  %v4528_v44 = vld [vmem:[%s5789_s3 + $0x1f0] sm:$0xff]  }
  0x15   :  { %466 = vmatpush1.bf16.msra.mxu1 %v4477_v25  ;;  %4178 = vmatpush3.bf16.msra.mxu0 %v4479_v26  ;;  %v4510_v25 = vld [vmem:[%s5789_s3 + $0x164] sm:$0xff]   ;;  %v4511_v26 = vld [vmem:[%s5789_s3 + $0x11c] sm:$0xff]  }
  0x16   :  { %467 = vmatprep.subr.bf16.mxu1 %v4717_v2  ;;  %4179 = vmatprep.subr.bf16.mxu0 %v4481_v27  ;;  %v4512_v27 = vld [vmem:[%s5789_s3 + $0xdc] sm:$0xff]  }
  0x19   :  { %468 = vmatpush1.bf16.msra.mxu1 %v4480_v28  ;;  %4180 = vmatpush3.bf16.msra.mxu0 %v4482_v29  ;;  %v4513_v28 = vld [vmem:[%s5789_s3 + $0x15c] sm:$0xff]   ;;  %v4514_v29 = vld [vmem:[%s5789_s3 + $0x114] sm:$0xff]  }
  0x1a   :  { %469 = vmatprep.subr.bf16.mxu1 %v4717_v2  ;;  %4181 = vmatprep.subr.bf16.mxu0 %v4484_v30  ;;  %v4515_v30 = vld [vmem:[%s5789_s3 + $0xd4] sm:$0xff]  }
  0x1d   :  { %470 = vmatpush1.bf16.msra.mxu1 %v4483_v31  ;;  %4182 = vmatpush3.bf16.msra.mxu0 %v4485_v32  ;;  %v4516_v31 = vld [vmem:[%s5789_s3 + $0x154] sm:$0xff]   ;;  %v4517_v32 = vld [vmem:[%s5789_s3 + $0x10c] sm:$0xff]  }
  0x1e   :  { %471 = vmatprep.subr.bf16.mxu1 %v4717_v2  ;;  %4183 = vmatprep.subr.bf16.mxu0 %v4487_v33  ;;  %v4518_v33 = vld [vmem:[%s5789_s3 + $0xcc] sm:$0xff]  }
  0x21   :  { %472 = vmatpush1.bf16.msra.mxu1 %v4486_v34  ;;  %4184 = vmatpush3.bf16.msra.mxu0 %v4488_v35  ;;  %v4519_v34 = vld [vmem:[%s5789_s3 + $0x14c] sm:$0xff]   ;;  %v4520_v35 = vld [vmem:[%s5789_s3 + $0x104] sm:$0xff]  }
  0x22   :  { %473 = vmatprep.subr.bf16.mxu1 %v4717_v2  ;;  %4185 = vmatprep.subr.bf16.mxu0 %v4490_v37  ;;  %v4522_v37 = vld [vmem:[%s5789_s3 + $0x144] sm:$0xff]  }
  0x25   :  { %474 = vmatpush1.bf16.msra.mxu1 %v4489_v36  ;;  %4186 = vmatpush3.bf16.msra.mxu0 %v4491_v38  ;;  %v4521_v36 = vld [vmem:[%s5789_s3 + $0xc4] sm:$0xff]  }
  0x26   :  { %475 = vmatprep.subr.bf16.mxu1 %v4717_v2  ;;  %4187 = vmatprep.subr.bf16.mxu0 %v4493_v40  ;;  %v4523_v38 = vld [vmem:[%s5789_s3 + $0x184] ss:$0 sps:$4 sm:$0xff]  }
  0x27   :  { %v4524_v40 = vld [vmem:[%s5789_s3 + $0x200] sm:$0xff]  }
  0x29   :  { %476 = vmatpush1.bf16.msra.mxu1 %v4492_v39  ;;  %4188 = vmatpush3.bf16.msra.mxu0 %v4494_v41  ;;  %v707_v39 = vsel %vm418_vm2, %v4523_v38, 0  ;;  %v4525_v41 = vld [vmem:[%s5789_s3 + $0x1c0] sm:$0xff]  }
  0x2a   :  { %477 = vmatprep.subr.bf16.mxu1 %v4717_v2  ;;  %4189 = vmatprep.subr.bf16.mxu0 %v4496_v43  ;;  %v4527_v43 = vld [vmem:[%s5789_s3 + $0x1b8] sm:$0xff]  }
  0x2b   :  { %v4554_v38 = vld [vmem:[%s5789_s3 + $0x2fc] sm:$0xff]  }
  0x2d   :  { %478 = vmatpush1.bf16.msra.mxu1 %v4495_v42  ;;  %4190 = vmatpush3.bf16.msra.mxu0 %v4497_v45  ;;  %v4526_v42 = vld [vmem:[%s5789_s3 + $0x1f8] sm:$0xff]   ;;  %v4529_v45 = vld [vmem:[%s5789_s3 + $0x1b0] sm:$0xff]  }
  0x2e   :  { %493 = vmatprep.subr.bf16.mxu1 %v4717_v2  ;;  %4197 = vmatprep.subr.bf16.mxu0 %v4499_v47  ;;  %v4531_v47 = vld [vmem:[%s5789_s3 + $0x1a8] sm:$0xff]  }
  0x31   :  { %494 = vmatpush2.bf16.msra.mxu1 %v420_v46  ;;  %v4530_v46 = vld [vmem:[%s5789_s3 + $0x1e8] sm:$0xff]  }
  0x32   :  { %750 = vmatprep.subr.bf16.mxu1 %v4717_v2 }
  0x82   :  { %v41_v48 = vpop.permute.xlu0 %40 }
  0x86   :  { %v46_v53 = vpop.permute.xlu0 %45 }
  0xd0   :  { %v154_v49 = vpop.f32.mrf.mxu0  ;;  %v197_v50 = vpop.f32.mrf.mxu1 }
  0xd1   :  { %v155_v60 = vadd.f32 %v154_v49, %v41_v48  ;;  %v198_v61 = vadd.f32 %v197_v50, %v41_v48  ;;  %v4533_v49 = vld [vmem:[%s5789_s3 + $0x1a0] sm:$0xff]   ;;  %v4534_v50 = vld [vmem:[%s5789_s3 + $0x1d8] sm:$0xff]  }
  0xd2   :  { %v156_v51 = vpop.f32.mrf.mxu0  ;;  %v199_v52 = vpop.f32.mrf.mxu1 }
  0xd3   :  { %v157_v56 = vadd.f32 %v156_v51, %v41_v48  ;;  %v200_v57 = vadd.f32 %v199_v52, %v41_v48  ;;  %v206_v9 = vmax.f32 %v155_v60, 0.0  ;;  %v208_v10 = vmax.f32 %v198_v61, 0.0  ;;  %v4532_v48 = vld [vmem:[%s5789_s3 + $0x1e0] sm:$0xff]   ;;  %v4535_v51 = vld [vmem:[%s5789_s3 + $0x198] sm:$0xff]   ;;  %v4536_v52 = vld [vmem:[%s5789_s3 + $0x1d0] sm:$0xff]  }
  0xd4   :  { %v158_v54 = vpop.f32.mrf.mxu0  ;;  %v201_v55 = vpop.f32.mrf.mxu1 }
  0xd5   :  { %v159_v58 = vadd.f32 %v158_v54, %v46_v53  ;;  %v202_v59 = vadd.f32 %v201_v55, %v46_v53  ;;  %v207_v5 = vmax.f32 %v157_v56, 0.0  ;;  %v209_v6 = vmax.f32 %v200_v57, 0.0  ;;  %v4538_v54 = vld [vmem:[%s5789_s3 + $0x1c8] sm:$0xff]   ;;  %v4540_v56 = vld [vmem:[%s5791_s4 + $0x10] sm:$0xff]  }
  0xd6   :  { %v160_v62 = vpop.f32.mrf.mxu0  ;;  %v203_v63 = vpop.f32.mrf.mxu1  ;;  %v4539_v55 = vld [vmem:[%s5789_s3 + $0x188] sm:$0xff]  }
  0xd7   :  { %v161_v0 = vadd.f32 %v160_v62, %v46_v53  ;;  %v204_v1 = vadd.f32 %v203_v63, %v46_v53  ;;  %v210_v3 = vmax.f32 %v159_v58, 0.0  ;;  %v212_v4 = vmax.f32 %v202_v59, 0.0  ;;  %v4537_v53 = vld [vmem:[%s5789_s3 + $0x190] sm:$0xff]  }
  0xd9   :  { %v211_v7 = vmax.f32 %v161_v0, 0.0  ;;  %v213_v8 = vmax.f32 %v204_v1, 0.0  ;;  %v4902_v15 = vpack.c.bf16 %v210_v3, %v206_v9  ;;  %v4904_v16 = vpack.c.bf16 %v212_v4, %v208_v10 }
  0xdb   :  { %v4892_v11 = vpack.c.bf16 %v211_v7, %v207_v5  ;;  %v4894_v12 = vpack.c.bf16 %v213_v8, %v209_v6 }
  0xdd   :  { %454 = vmatprep.mubr.bf16.mxu0 %v4892_v11  ;;  %3506 = vmatprep.mubr.msk.bf16.mxu1 %vm414_vm3, %v4894_v12 }
  0xde   :  { %455 = vmatmul.mubr.bf16.vlgmr.msra.gmra.mxu0 %v4902_v15  ;;  %496 = vmatmul.mubr.bf16.vlgmr.msra.gmra.mxu1 %v4904_v16 }
  0xdf   :  { %4198 = vmatpush3.bf16.msra.mxu0 %v4500_v13  ;;  %751 = vmatpush1.bf16.msra.mxu1 %v4501_v14 }
  0xe0   :  { %741 = vmatprep.mubr.bf16.mxu0 %v4892_v11  ;;  %3581 = vmatprep.mubr.msk.bf16.mxu1 %vm414_vm3, %v4894_v12 }
  0xe1   :  { %4199 = vmatprep.subr.bf16.mxu0 %v4502_v17  ;;  %752 = vmatprep.subr.bf16.mxu1 %v4717_v2 }
  0xe3   :  { %4200 = vmatpush3.bf16.msra.mxu0 %v4503_v18  ;;  %753 = vmatpush1.bf16.msra.mxu1 %v4504_v19 }
  0xe4   :  { %4201 = vmatprep.subr.bf16.mxu0 %v4505_v20  ;;  %754 = vmatprep.subr.bf16.mxu1 %v4717_v2 }
  0xe7   :  { %4202 = vmatpush3.bf16.msra.mxu0 %v4506_v21  ;;  %755 = vmatpush1.bf16.msra.mxu1 %v4507_v22 }
  0xe8   :  { %4203 = vmatprep.subr.bf16.mxu0 %v4508_v23  ;;  %756 = vmatprep.subr.bf16.mxu1 %v4717_v2 }
  0xeb   :  { %4204 = vmatpush3.bf16.msra.mxu0 %v4509_v24  ;;  %757 = vmatpush1.bf16.msra.mxu1 %v4510_v25  ;;  %v4541_v24 = vld [vmem:[%s5791_s4 + $0x18] sm:$0xff]   ;;  %v4542_v25 = vld [vmem:[%s5791_s4] sm:$0xff]  }
  0xec   :  { %4205 = vmatprep.subr.bf16.mxu0 %v4511_v26  ;;  %758 = vmatprep.subr.bf16.mxu1 %v4717_v2  ;;  %v4543_v26 = vld [vmem:[%s5791_s4 + $0x8] sm:$0xff]  }
  0xef   :  { %4206 = vmatpush3.bf16.msra.mxu0 %v4512_v27  ;;  %759 = vmatpush1.bf16.msra.mxu1 %v4513_v28  ;;  %v4544_v27 = vld [vmem:[%s5789_s3 + $0x240] sm:$0xff]   ;;  %v4545_v28 = vld [vmem:[%s5789_s3 + $0x238] sm:$0xff]  }
  0xf0   :  { %4207 = vmatprep.subr.bf16.mxu0 %v4514_v29  ;;  %760 = vmatprep.subr.bf16.mxu1 %v4717_v2  ;;  %v4546_v29 = vld [vmem:[%s5789_s3 + $0x230] sm:$0xff]  }
  0xf3   :  { %4208 = vmatpush3.bf16.msra.mxu0 %v4515_v30  ;;  %761 = vmatpush1.bf16.msra.mxu1 %v4516_v31  ;;  %v4547_v30 = vld [vmem:[%s5789_s3 + $0x228] sm:$0xff]   ;;  %v4548_v31 = vld [vmem:[%s5789_s3 + $0x220] sm:$0xff]  }
  0xf4   :  { %4209 = vmatprep.subr.bf16.mxu0 %v4517_v32  ;;  %762 = vmatprep.subr.bf16.mxu1 %v4717_v2  ;;  %v4549_v32 = vld [vmem:[%s5789_s3 + $0x218] sm:$0xff]  }
  0xf7   :  { %4210 = vmatpush3.bf16.msra.mxu0 %v4518_v33  ;;  %763 = vmatpush1.bf16.msra.mxu1 %v4519_v34  ;;  %v4550_v33 = vld [vmem:[%s5789_s3 + $0x210] sm:$0xff]   ;;  %v4551_v34 = vld [vmem:[%s5789_s3 + $0x208] sm:$0xff]  }
  0xf8   :  { %4211 = vmatprep.subr.bf16.mxu0 %v4520_v35  ;;  %764 = vmatprep.subr.bf16.mxu1 %v4717_v2  ;;  %v4552_v35 = vld [vmem:[%s5789_s3 + $0x248] ss:$0 sps:$4 sm:$0xff]  }
  0xfb   :  { %4212 = vmatpush3.bf16.msra.mxu0 %v4521_v36  ;;  %765 = vmatpush1.bf16.msra.mxu1 %v4522_v37  ;;  %v1126_v36 = vsel %vm418_vm2, %v4552_v35, 0  ;;  %v4553_v37 = vld [vmem:[%s5789_s3 + $0x304] sm:$0xff]   ;;  %v4584_v35 = vld [vmem:[%s5789_s3 + $0x2b4] sm:$0xff]  }
  0xfc   :  { %780 = vmatprep.subr.bf16.mxu1 %v4717_v2 }
  0xfe   :  { %742 = vmatmul.mubr.bf16.vlgmr.msra.gmra.mxu0 %v4902_v15 }
  0xff   :  { %781 = vmatpush2.bf16.msra.mxu1 %v707_v39  ;;  %4402 = vmatprep.mubr.msk.bf16.mxu0 %vm807_vm4, %v4540_v56  ;;  %v4555_v39 = vld [vmem:[%s5789_s3 + $0x2f4] sm:$0xff]   ;;  %v4571_v56 = vld [vmem:[%s5789_s3 + $0x328] sm:$0xff]  }
 0x100   :  { %4225 = vmatprep.subr.bf16.mxu1 %v4524_v40  ;;  %v4556_v40 = vld [vmem:[%s5789_s3 + $0x2ec] sm:$0xff]  }
 0x102   :  { %783 = vmatmul.mubr.bf16.vlgmr.msra.gmra.mxu1 %v4904_v16 }
 0x103   :  { %4226 = vmatpush3.bf16.msra.mxu1 %v4525_v41  ;;  %1160 = vmatprep.mubr.bf16.mxu1 %v4892_v11  ;;  %v4557_v41 = vld [vmem:[%s5789_s3 + $0x2e4] sm:$0xff]  }
 0x104   :  { %4227 = vmatprep.subr.bf16.mxu1 %v4526_v42  ;;  %v4558_v42 = vld [vmem:[%s5789_s3 + $0x2dc] sm:$0xff]  }
 0x107   :  { %4228 = vmatpush3.bf16.msra.mxu1 %v4527_v43  ;;  %v4559_v43 = vld [vmem:[%s5789_s3 + $0x2d4] sm:$0xff]  }
 0x108   :  { %4229 = vmatprep.subr.bf16.mxu1 %v4528_v44  ;;  %v4560_v44 = vld [vmem:[%s5789_s3 + $0x2cc] sm:$0xff]  }
 0x10b   :  { %4230 = vmatpush3.bf16.msra.mxu1 %v4529_v45  ;;  %v4561_v45 = vld [vmem:[%s5789_s3 + $0x30c] ss:$0 sps:$4 sm:$0xff]  }
 0x10c   :  { %4231 = vmatprep.subr.bf16.mxu1 %v4530_v46  ;;  %v1483_v46 = vsel %vm418_vm2, %v4561_v45, 0  ;;  %v4594_v45 = vld [vmem:[%s5789_s3 + $0x28c] sm:$0xff]  }
 0x10f   :  { %4232 = vmatpush3.bf16.msra.mxu1 %v4531_v47  ;;  %v4562_v47 = vld [vmem:[%s5789_s3 + $0x388] sm:$0xff]  }
 0x110   :  { %4233 = vmatprep.subr.bf16.mxu1 %v4532_v48  ;;  %v4563_v48 = vld [vmem:[%s5789_s3 + $0x348] sm:$0xff]  }
 0x113   :  { %4234 = vmatpush3.bf16.msra.mxu1 %v4533_v49  ;;  %v4564_v49 = vld [vmem:[%s5789_s3 + $0x380] sm:$0xff]  }
 0x114   :  { %4235 = vmatprep.subr.bf16.mxu1 %v4534_v50  ;;  %v4565_v50 = vld [vmem:[%s5789_s3 + $0x340] sm:$0xff]  }
 0x117   :  { %4236 = vmatpush3.bf16.msra.mxu1 %v4535_v51  ;;  %v4566_v51 = vld [vmem:[%s5789_s3 + $0x378] sm:$0xff]  }
 0x118   :  { %4237 = vmatprep.subr.bf16.mxu1 %v4536_v52  ;;  %v4567_v52 = vld [vmem:[%s5789_s3 + $0x338] sm:$0xff]  }
 0x11b   :  { %4238 = vmatpush3.bf16.msra.mxu1 %v4537_v53  ;;  %v4568_v53 = vld [vmem:[%s5789_s3 + $0x370] sm:$0xff]  }
 0x11c   :  { %4239 = vmatprep.subr.bf16.mxu1 %v4538_v54  ;;  %v4569_v54 = vld [vmem:[%s5789_s3 + $0x330] sm:$0xff]  }
 0x11f   :  { %4240 = vmatpush3.bf16.msra.mxu1 %v4539_v55  ;;  %v4570_v55 = vld [vmem:[%s5789_s3 + $0x368] sm:$0xff]  }
 0x122   :  { %1161 = vmatmul.mubr.bf16.vlgmr.msra.gmra.mxu1 %v4902_v15 }
 0x19e   :  { %v497_v57 = vpop.f32.mrf.mxu1  ;;  %v4191_v61 = vpop.f32.mrf.mxu0 }
 0x1a0   :  { %v499_v58 = vpop.f32.mrf.mxu1  ;;  %v4192_v62 = vpop.f32.mrf.mxu0 }
 0x1a1   :  { %v4193_v10 = vadd.f32 %v4192_v62, %v4191_v61  ;;  %v4573_v58 = vld [vmem:[%s5789_s3 + $0x320] sm:$0xff]   ;;  %v4576_v61 = vld [vmem:[%s5789_s3 + $0x350] sm:$0xff]  }
 0x1a2   :  { %v500_v59 = vpop.f32.mrf.mxu1  ;;  %v4194_v63 = vpop.f32.mrf.mxu0  ;;  %v4577_v62 = vld [vmem:[%s5789_s3 + $0x310] sm:$0xff]  }
 0x1a3   :  { %v498_v21 = vadd.f32 %v4193_v10, %v497_v57  ;;  %v4572_v57 = vld [vmem:[%s5789_s3 + $0x360] sm:$0xff]  }
 0x1a4   :  { %v502_v60 = vpop.f32.mrf.mxu1  ;;  %v4195_v0 = vpop.f32.mrf.mxu0 }
 0x1a5   :  { %v4196_v6 = vadd.f32 %v4195_v0, %v4194_v63  ;;  %v4575_v60 = vld [vmem:[%s5789_s3 + $0x318] sm:$0xff]   ;;  %v4578_v63 = vld [vmem:[%s5791_s4 + $0x20] sm:$0xff]  }
 0x1a6   :  { %4414 = vmatprep.mubr.msk.bf16.mxu1 %vm807_vm4, %v4578_v63 }
 0x1a7   :  { %v501_v17 = vadd.f32 %v4196_v6, %v500_v59  ;;  %v4574_v59 = vld [vmem:[%s5789_s3 + $0x358] sm:$0xff]  }
 0x1a9   :  { %v508_v23 = vpack.c.bf16 %v501_v17, %v498_v21 }
 0x1be   :  { %v4213_v1 = vpop.f32.mrf.mxu0 }
 0x1c0   :  { %v4214_v3 = vpop.f32.mrf.mxu0 }
 0x1c1   :  { %v4215_v7 = vadd.f32 %v4214_v3, %v4213_v1 }
 0x1c2   :  { %v4216_v4 = vpop.f32.mrf.mxu0  ;;  %v784_v5 = vpop.f32.mrf.mxu1 }
 0x1c3   :  { %v785_v18 = vadd.f32 %v4215_v7, %v784_v5 }
 0x1c4   :  { %v4217_v8 = vpop.f32.mrf.mxu0  ;;  %v786_v9 = vpop.f32.mrf.mxu1 }
 0x1c5   :  { %v4218_v13 = vadd.f32 %v4217_v8, %v4216_v4 }
 0x1c6   :  { %v787_v14 = vpop.f32.mrf.mxu1 }
 0x1c7   :  { %v788_v19 = vadd.f32 %v4218_v13, %v787_v14 }
 0x1c8   :  { %v789_v20 = vpop.f32.mrf.mxu1 }
 0x1c9   :  { %v796_v22 = vpack.c.bf16 %v788_v19, %v785_v18 }
 0x1cb   :  { %4400 = vmatprep.subr.bf16.mxu0 %v796_v22 }
 0x1cc   :  { %4401 = vmatpush3.bf16.msra.mxu0 %v796_v22 }
 0x1cd   :  { %4406 = vmatprep.subr.bf16.mxu0 %v508_v23 }
 0x1cf   :  { %4403 = vmatmul.mubr.msk.bf16.vlgmr.msra.gmra.mxu0 %vm807_vm4, %v4541_v24 }
 0x1d0   :  { %4407 = vmatpush3.bf16.msra.mxu0 %v508_v23  ;;  %4408 = vmatprep.mubr.msk.bf16.mxu0 %vm807_vm4, %v4542_v25 }
 0x1d1   :  { %1169 = vmatprep.subr.bf16.mxu0 %v4717_v2 }
 0x1d7   :  { %4409 = vmatmul.mubr.msk.bf16.vlgmr.msra.gmra.mxu0 %vm807_vm4, %v4543_v26 }
 0x1d8   :  { %1170 = vmatpush1.bf16.msra.mxu0 %v4544_v27  ;;  %3668 = vmatprep.mubr.msk.bf16.mxu0 %vm414_vm3, %v4894_v12 }
 0x1d9   :  { %1171 = vmatprep.subr.bf16.mxu0 %v4717_v2 }
 0x1dc   :  { %1172 = vmatpush1.bf16.msra.mxu0 %v4545_v28 }
 0x1dd   :  { %1173 = vmatprep.subr.bf16.mxu0 %v4717_v2 }
 0x1e0   :  { %1174 = vmatpush1.bf16.msra.mxu0 %v4546_v29 }
 0x1e1   :  { %1175 = vmatprep.subr.bf16.mxu0 %v4717_v2 }
 0x1e2   :  { %v4241_v17 = vpop.f32.mrf.mxu1 }
 0x1e4   :  { %1176 = vmatpush1.bf16.msra.mxu0 %v4547_v30  ;;  %v4242_v18 = vpop.f32.mrf.mxu1  ;;  %v4580_v30 = vld [vmem:[%s5789_s3 + $0x2c4] sm:$0xff]  }
 0x1e5   :  { %1177 = vmatprep.subr.bf16.mxu0 %v4717_v2  ;;  %v4243_v23 = vadd.f32 %v4242_v18, %v4241_v17  ;;  %v4604_v17 = vld [vmem:[%s5789_s3 + $0x398] sm:$0xff]   ;;  %v4605_v18 = vld [vmem:[%s5789_s3 + $0x390] sm:$0xff]  }
 0x1e6   :  { %v4244_v19 = vpop.f32.mrf.mxu1 }
 0x1e8   :  { %1178 = vmatpush1.bf16.msra.mxu0 %v4548_v31  ;;  %v4245_v20 = vpop.f32.mrf.mxu1  ;;  %v4579_v31 = vld [vmem:[%s5791_s4 + $0x28] sm:$0xff]  }
 0x1e9   :  { %1179 = vmatprep.subr.bf16.mxu0 %v4717_v2  ;;  %v4246_v24 = vadd.f32 %v4245_v20, %v4244_v19  ;;  %v4606_v19 = vld [vmem:[%s5789_s3 + $0x3d0] ss:$0 sps:$4 sm:$0xff]  }
 0x1ea   :  { %v1840_v20 = vsel %vm418_vm2, %v4606_v19, 0  ;;  %v4642_v19 = vld [vmem:[%s5789_s3 + $0x4f0] sm:$0xff]  }
 0x1ec   :  { %1180 = vmatpush1.bf16.msra.mxu0 %v4549_v32  ;;  %v4581_v32 = vld [vmem:[%s5789_s3 + $0x284] sm:$0xff]  }
 0x1ed   :  { %1181 = vmatprep.subr.bf16.mxu0 %v4717_v2 }
 0x1f0   :  { %1182 = vmatpush1.bf16.msra.mxu0 %v4550_v33  ;;  %v4582_v33 = vld [vmem:[%s5789_s3 + $0x2bc] sm:$0xff]  }
 0x1f1   :  { %1183 = vmatprep.subr.bf16.mxu0 %v4717_v2 }
 0x1f4   :  { %1184 = vmatpush1.bf16.msra.mxu0 %v4551_v34  ;;  %v4583_v34 = vld [vmem:[%s5789_s3 + $0x27c] sm:$0xff]  }
 0x1f5   :  { %1199 = vmatprep.subr.bf16.mxu0 %v4717_v2 }
 0x1f8   :  { %1200 = vmatpush2.bf16.msra.mxu0 %v1126_v36  ;;  %v4585_v36 = vld [vmem:[%s5789_s3 + $0x274] sm:$0xff]  }
 0x1f9   :  { %1526 = vmatprep.subr.bf16.mxu0 %v4717_v2 }
 0x1fb   :  { %1202 = vmatmul.mubr.bf16.vlgmr.msra.gmra.mxu0 %v4904_v16 }
 0x1fc   :  { %1527 = vmatpush1.bf16.msra.mxu0 %v4553_v37  ;;  %3751 = vmatprep.mubr.msk.bf16.mxu0 %vm414_vm3, %v4894_v12  ;;  %v4586_v37 = vld [vmem:[%s5789_s3 + $0x2ac] sm:$0xff]  }
 0x1fd   :  { %1528 = vmatprep.subr.bf16.mxu0 %v4717_v2 }
 0x200   :  { %1529 = vmatpush1.bf16.msra.mxu0 %v4554_v38  ;;  %v4587_v38 = vld [vmem:[%s5789_s3 + $0x26c] sm:$0xff]  }
 0x201   :  { %1530 = vmatprep.subr.bf16.mxu0 %v4717_v2 }
 0x204   :  { %1531 = vmatpush1.bf16.msra.mxu0 %v4555_v39  ;;  %v4588_v39 = vld [vmem:[%s5789_s3 + $0x2a4] sm:$0xff]  }
 0x205   :  { %1532 = vmatprep.subr.bf16.mxu0 %v4717_v2 }
 0x208   :  { %1533 = vmatpush1.bf16.msra.mxu0 %v4556_v40  ;;  %v4589_v40 = vld [vmem:[%s5789_s3 + $0x264] sm:$0xff]  }
 0x209   :  { %1534 = vmatprep.subr.bf16.mxu0 %v4717_v2 }
 0x20c   :  { %1535 = vmatpush1.bf16.msra.mxu0 %v4557_v41  ;;  %v4590_v41 = vld [vmem:[%s5789_s3 + $0x29c] sm:$0xff]  }
 0x20d   :  { %1536 = vmatprep.subr.bf16.mxu0 %v4717_v2 }
 0x210   :  { %1537 = vmatpush1.bf16.msra.mxu0 %v4558_v42  ;;  %v4591_v42 = vld [vmem:[%s5789_s3 + $0x25c] sm:$0xff]  }
 0x211   :  { %1538 = vmatprep.subr.bf16.mxu0 %v4717_v2 }
 0x214   :  { %1539 = vmatpush1.bf16.msra.mxu0 %v4559_v43  ;;  %v4592_v43 = vld [vmem:[%s5789_s3 + $0x294] sm:$0xff]  }
 0x215   :  { %1540 = vmatprep.subr.bf16.mxu0 %v4717_v2 }
 0x218   :  { %1541 = vmatpush1.bf16.msra.mxu0 %v4560_v44  ;;  %v4593_v44 = vld [vmem:[%s5789_s3 + $0x254] sm:$0xff]  }
 0x219   :  { %1556 = vmatprep.subr.bf16.mxu0 %v4717_v2 }
 0x21c   :  { %1557 = vmatpush2.bf16.msra.mxu0 %v1483_v46 }
 0x21d   :  { %4275 = vmatprep.subr.bf16.mxu0 %v4562_v47 }
 0x21f   :  { %1559 = vmatmul.mubr.bf16.vlgmr.msra.gmra.mxu0 %v4904_v16 }
 0x220   :  { %4276 = vmatpush3.bf16.msra.mxu0 %v4563_v48  ;;  %1874 = vmatprep.mubr.bf16.mxu0 %v4892_v11  ;;  %v4595_v48 = vld [vmem:[%s5789_s3 + $0x24c] sm:$0xff]  }
 0x221   :  { %4277 = vmatprep.subr.bf16.mxu0 %v4564_v49 }
 0x224   :  { %4278 = vmatpush3.bf16.msra.mxu0 %v4565_v50 }
 0x225   :  { %4279 = vmatprep.subr.bf16.mxu0 %v4566_v51  ;;  %v4596_v51 = vld [vmem:[%s5791_s4 + $0x30] sm:$0xff]  }
 0x228   :  { %4280 = vmatpush3.bf16.msra.mxu0 %v4567_v52 }
 0x229   :  { %4281 = vmatprep.subr.bf16.mxu0 %v4568_v53 }
 0x22c   :  { %4282 = vmatpush3.bf16.msra.mxu0 %v4569_v54 }
 0x22d   :  { %4283 = vmatprep.subr.bf16.mxu0 %v4570_v55 }
 0x230   :  { %4284 = vmatpush3.bf16.msra.mxu0 %v4571_v56 }
 0x231   :  { %4285 = vmatprep.subr.bf16.mxu0 %v4572_v57 }
 0x234   :  { %4286 = vmatpush3.bf16.msra.mxu0 %v4573_v58 }
 0x235   :  { %4287 = vmatprep.subr.bf16.mxu0 %v4574_v59 }
 0x238   :  { %4288 = vmatpush3.bf16.msra.mxu0 %v4575_v60 }
 0x239   :  { %4289 = vmatprep.subr.bf16.mxu0 %v4576_v61 }
 0x23c   :  { %4290 = vmatpush3.bf16.msra.mxu0 %v4577_v62 }
 0x23f   :  { %1875 = vmatmul.mubr.bf16.vlgmr.msra.gmra.mxu0 %v4902_v15 }
 0x28f   :  { %v4404_v0 = vpop.f32.mrf.mxu0 }
 0x291   :  { %v848_v1 = vpop.f32.mrf.mxu0 }
 0x293   :  { %v4405_v3 = vpop.f32.mrf.mxu0 }
 0x295   :  { %v851_v4 = vpop.f32.mrf.mxu0 }
 0x297   :  { %v4410_v5 = vpop.f32.mrf.mxu0 }
 0x298   :  { %v5191_v6 = vadd.f32 %v4410_v5, %v4404_v0 }
 0x299   :  { %v913_v7 = vpop.f32.mrf.mxu0 }
 0x29a   :  { %v5193_v8 = vadd.f32 %v913_v7, %v848_v1  ;;  %v4598_v7 = vld [vmem:[%s5789_s3 + $0x3c8] sm:$0xff]  }
 0x29b   :  { %v4411_v9 = vpop.f32.mrf.mxu0 }
 0x29c   :  { %v5195_v10 = vadd.f32 %v4411_v9, %v4405_v3  ;;  %v4600_v9 = vld [vmem:[%s5789_s3 + $0x3b8] sm:$0xff]  }
 0x29d   :  { %v916_v13 = vpop.f32.mrf.mxu0 }
 0x29e   :  { %v5197_v14 = vadd.f32 %v916_v13, %v851_v4  ;;  %v4602_v13 = vld [vmem:[%s5789_s3 + $0x3a8] sm:$0xff]  }
 0x2bb   :  { %v1203_v21 = vpop.f32.mrf.mxu0 }
 0x2bc   :  { %v1204_v26 = vadd.f32 %v4243_v23, %v1203_v21  ;;  %v4607_v21 = vld [vmem:[%s5789_s3 + $0x44c] sm:$0xff]   ;;  %v4609_v23 = vld [vmem:[%s5789_s3 + $0x444] sm:$0xff]  }
 0x2bd   :  { %v1205_v22 = vpop.f32.mrf.mxu0 }
 0x2be   :  { %v4608_v22 = vld [vmem:[%s5789_s3 + $0x40c] sm:$0xff]  }
 0x2bf   :  { %v1206_v25 = vpop.f32.mrf.mxu0 }
 0x2c0   :  { %v1207_v27 = vadd.f32 %v4246_v24, %v1206_v25  ;;  %v4610_v24 = vld [vmem:[%s5789_s3 + $0x404] sm:$0xff]   ;;  %v4611_v25 = vld [vmem:[%s5789_s3 + $0x43c] sm:$0xff]  }
 0x2c1   :  { %v1208_v28 = vpop.f32.mrf.mxu0 }
 0x2c2   :  { %v1215_v29 = vpack.c.bf16 %v1207_v27, %v1204_v26  ;;  %v4612_v26 = vld [vmem:[%s5789_s3 + $0x3fc] sm:$0xff]   ;;  %v4613_v27 = vld [vmem:[%s5789_s3 + $0x434] sm:$0xff]  }
 0x2c3   :  { %v4614_v28 = vld [vmem:[%s5789_s3 + $0x3f4] sm:$0xff]  }
 0x2c4   :  { %4412 = vmatprep.subr.bf16.mxu1 %v1215_v29 }
 0x2c5   :  { %4413 = vmatpush3.bf16.msra.mxu1 %v1215_v29  ;;  %v4615_v29 = vld [vmem:[%s5789_s3 + $0x42c] sm:$0xff]  }
 0x2c6   :  { %4250 = vmatprep.subr.bf16.mxu1 %v4580_v30  ;;  %v4616_v30 = vld [vmem:[%s5789_s3 + $0x3ec] sm:$0xff]  }
 0x2c8   :  { %4415 = vmatmul.mubr.msk.bf16.vlgmr.msra.gmra.mxu1 %vm807_vm4, %v4579_v31  ;;  %v4617_v31 = vld [vmem:[%s5789_s3 + $0x424] sm:$0xff]  }
 0x2c9   :  { %4251 = vmatpush3.bf16.msra.mxu1 %v4581_v32  ;;  %1517 = vmatprep.mubr.bf16.mxu1 %v4892_v11  ;;  %v4618_v32 = vld [vmem:[%s5789_s3 + $0x3e4] sm:$0xff]  }
 0x2ca   :  { %4252 = vmatprep.subr.bf16.mxu1 %v4582_v33  ;;  %v4619_v33 = vld [vmem:[%s5789_s3 + $0x41c] sm:$0xff]  }
 0x2cd   :  { %4253 = vmatpush3.bf16.msra.mxu1 %v4583_v34  ;;  %v4620_v34 = vld [vmem:[%s5789_s3 + $0x3dc] sm:$0xff]  }
 0x2ce   :  { %4254 = vmatprep.subr.bf16.mxu1 %v4584_v35  ;;  %v4621_v35 = vld [vmem:[%s5789_s3 + $0x414] sm:$0xff]  }
 0x2d1   :  { %4255 = vmatpush3.bf16.msra.mxu1 %v4585_v36  ;;  %v4622_v36 = vld [vmem:[%s5789_s3 + $0x3d4] sm:$0xff]  }
 0x2d2   :  { %4256 = vmatprep.subr.bf16.mxu1 %v4586_v37  ;;  %v4623_v37 = vld [vmem:[%s5791_s4 + $0x40] sm:$0xff]  }
 0x2d3   :  { %4426 = vmatprep.mubr.msk.bf16.mxu0 %vm807_vm4, %v4623_v37 }
 0x2d5   :  { %4257 = vmatpush3.bf16.msra.mxu1 %v4587_v38 }
 0x2d6   :  { %4258 = vmatprep.subr.bf16.mxu1 %v4588_v39 }
 0x2d9   :  { %4259 = vmatpush3.bf16.msra.mxu1 %v4589_v40 }
 0x2da   :  { %4260 = vmatprep.subr.bf16.mxu1 %v4590_v41 }
 0x2dd   :  { %4261 = vmatpush3.bf16.msra.mxu1 %v4591_v42 }
 0x2de   :  { %4262 = vmatprep.subr.bf16.mxu1 %v4592_v43 }
 0x2df   :  { %v1560_v46 = vpop.f32.mrf.mxu0 }
 0x2e1   :  { %4263 = vmatpush3.bf16.msra.mxu1 %v4593_v44  ;;  %v1562_v47 = vpop.f32.mrf.mxu0 }
 0x2e2   :  { %4264 = vmatprep.subr.bf16.mxu1 %v4594_v45 }
 0x2e3   :  { %v1563_v49 = vpop.f32.mrf.mxu0 }
 0x2e5   :  { %4265 = vmatpush3.bf16.msra.mxu1 %v4595_v48  ;;  %v1565_v50 = vpop.f32.mrf.mxu0 }
 0x2e8   :  { %1518 = vmatmul.mubr.bf16.vlgmr.msra.gmra.mxu1 %v4902_v15 }
 0x2e9   :  { %4420 = vmatprep.mubr.msk.bf16.mxu1 %vm807_vm4, %v4596_v51 }
 0x388   :  { %v4416_v52 = vpop.f32.mrf.mxu1 }
 0x389   :  { %v5258_v53 = vadd.f32 %v4416_v52, %v5191_v6  ;;  %v4597_v6 = vld [vmem:[%s5791_s4 + $0x38] sm:$0xff]  }
 0x38a   :  { %v1266_v54 = vpop.f32.mrf.mxu1 }
 0x38b   :  { %v5261_v55 = vadd.f32 %v1266_v54, %v5193_v8  ;;  %v4599_v8 = vld [vmem:[%s5789_s3 + $0x3c0] sm:$0xff]  }
 0x38c   :  { %v4417_v56 = vpop.f32.mrf.mxu1 }
 0x38d   :  { %v5264_v57 = vadd.f32 %v4417_v56, %v5195_v10  ;;  %v4601_v10 = vld [vmem:[%s5789_s3 + $0x3b0] sm:$0xff]  }
 0x38e   :  { %v1269_v58 = vpop.f32.mrf.mxu1 }
 0x38f   :  { %v5267_v59 = vadd.f32 %v1269_v58, %v5197_v14  ;;  %v4603_v14 = vld [vmem:[%s5789_s3 + $0x3a0] sm:$0xff]  }
 0x3a8   :  { %v4266_v60 = vpop.f32.mrf.mxu1 }
 0x3aa   :  { %v4267_v61 = vpop.f32.mrf.mxu1 }
 0x3ab   :  { %v4268_v63 = vadd.f32 %v4267_v61, %v4266_v60  ;;  %v4626_v61 = vld [vmem:[%s5789_s3 + $0x484] sm:$0xff]  }
 0x3ac   :  { %v4269_v62 = vpop.f32.mrf.mxu1 }
 0x3ad   :  { %v1561_v3 = vadd.f32 %v4268_v63, %v1560_v46  ;;  %v4291_v46 = vpop.f32.mrf.mxu0  ;;  %v4628_v63 = vld [vmem:[%s5789_s3 + $0x474] sm:$0xff]  }
 0x3ae   :  { %v4270_v0 = vpop.f32.mrf.mxu1 }
 0x3af   :  { %v4271_v1 = vadd.f32 %v4270_v0, %v4269_v62  ;;  %v4292_v47 = vpop.f32.mrf.mxu0  ;;  %v4627_v62 = vld [vmem:[%s5789_s3 + $0x47c] sm:$0xff]   ;;  %v4629_v0 = vld [vmem:[%s5789_s3 + $0x46c] sm:$0xff]  }
 0x3b0   :  { %v4293_v52 = vadd.f32 %v4292_v47, %v4291_v46 }
 0x3b1   :  { %v1564_v4 = vadd.f32 %v4271_v1, %v1563_v49  ;;  %v4294_v48 = vpop.f32.mrf.mxu0  ;;  %v4630_v1 = vld [vmem:[%s5789_s3 + $0x464] sm:$0xff]  }
 0x3b3   :  { %v1572_v5 = vpack.c.bf16 %v1564_v4, %v1561_v3  ;;  %v4295_v49 = vpop.f32.mrf.mxu0  ;;  %v4631_v3 = vld [vmem:[%s5789_s3 + $0x45c] sm:$0xff]   ;;  %v4632_v4 = vld [vmem:[%s5789_s3 + $0x454] sm:$0xff]  }
 0x3b5   :  { %4418 = vmatprep.subr.bf16.mxu1 %v1572_v5 }
 0x3b6   :  { %4419 = vmatpush3.bf16.msra.mxu1 %v1572_v5  ;;  %v4633_v5 = vld [vmem:[%s5789_s3 + $0x494] ss:$0 sps:$4 sm:$0xff]  }
 0x3b7   :  { %1883 = vmatprep.subr.bf16.mxu1 %v4717_v2 }
 0x3b9   :  { %4421 = vmatmul.mubr.msk.bf16.vlgmr.msra.gmra.mxu1 %vm807_vm4, %v4597_v6  ;;  %v2197_v6 = vsel %vm418_vm2, %v4633_v5, 0  ;;  %v4669_v5 = vld [vmem:[%s5789_s3 + $0x5b4] sm:$0xff]  }
 0x3ba   :  { %1884 = vmatpush1.bf16.msra.mxu1 %v4598_v7  ;;  %3834 = vmatprep.mubr.msk.bf16.mxu1 %vm414_vm3, %v4894_v12  ;;  %v4634_v7 = vld [vmem:[%s5789_s3 + $0x510] sm:$0xff]  }
 0x3bb   :  { %1885 = vmatprep.subr.bf16.mxu1 %v4717_v2 }
 0x3be   :  { %1886 = vmatpush1.bf16.msra.mxu1 %v4599_v8  ;;  %v4635_v8 = vld [vmem:[%s5789_s3 + $0x4d0] sm:$0xff]  }
 0x3bf   :  { %1887 = vmatprep.subr.bf16.mxu1 %v4717_v2 }
 0x3c2   :  { %1888 = vmatpush1.bf16.msra.mxu1 %v4600_v9  ;;  %v4636_v9 = vld [vmem:[%s5789_s3 + $0x508] sm:$0xff]  }
 0x3c3   :  { %1889 = vmatprep.subr.bf16.mxu1 %v4717_v2 }
 0x3c6   :  { %1890 = vmatpush1.bf16.msra.mxu1 %v4601_v10  ;;  %v4637_v10 = vld [vmem:[%s5789_s3 + $0x4c8] sm:$0xff]  }
 0x3c7   :  { %1891 = vmatprep.subr.bf16.mxu1 %v4717_v2 }
 0x3ca   :  { %1892 = vmatpush1.bf16.msra.mxu1 %v4602_v13  ;;  %v4638_v13 = vld [vmem:[%s5789_s3 + $0x500] sm:$0xff]  }
 0x3cb   :  { %1893 = vmatprep.subr.bf16.mxu1 %v4717_v2 }
 0x3ce   :  { %1894 = vmatpush1.bf16.msra.mxu1 %v4603_v14  ;;  %v4639_v14 = vld [vmem:[%s5789_s3 + $0x4c0] sm:$0xff]  }
 0x3cf   :  { %1895 = vmatprep.subr.bf16.mxu1 %v4717_v2 }
 0x3d2   :  { %1896 = vmatpush1.bf16.msra.mxu1 %v4604_v17  ;;  %v4640_v17 = vld [vmem:[%s5789_s3 + $0x4f8] sm:$0xff]  }
 0x3d3   :  { %1897 = vmatprep.subr.bf16.mxu1 %v4717_v2 }
 0x3d6   :  { %1898 = vmatpush1.bf16.msra.mxu1 %v4605_v18  ;;  %v4641_v18 = vld [vmem:[%s5789_s3 + $0x4b8] sm:$0xff]  }
 0x3d7   :  { %1913 = vmatprep.subr.bf16.mxu1 %v4717_v2 }
 0x3da   :  { %1914 = vmatpush2.bf16.msra.mxu1 %v1840_v20  ;;  %v4643_v20 = vld [vmem:[%s5789_s3 + $0x4b0] sm:$0xff]  }
 0x3db   :  { %4300 = vmatprep.subr.bf16.mxu1 %v4607_v21  ;;  %v4644_v21 = vld [vmem:[%s5789_s3 + $0x4e8] sm:$0xff]  }
 0x3dd   :  { %1916 = vmatmul.mubr.bf16.vlgmr.msra.gmra.mxu1 %v4904_v16 }
 0x3de   :  { %4301 = vmatpush3.bf16.msra.mxu1 %v4608_v22  ;;  %2231 = vmatprep.mubr.bf16.mxu1 %v4892_v11  ;;  %v4645_v22 = vld [vmem:[%s5789_s3 + $0x4a8] sm:$0xff]  }
 0x3df   :  { %4302 = vmatprep.subr.bf16.mxu1 %v4609_v23  ;;  %v4646_v23 = vld [vmem:[%s5789_s3 + $0x4e0] sm:$0xff]  }
 0x3e2   :  { %4303 = vmatpush3.bf16.msra.mxu1 %v4610_v24  ;;  %v4647_v24 = vld [vmem:[%s5789_s3 + $0x4a0] sm:$0xff]  }
 0x3e3   :  { %4304 = vmatprep.subr.bf16.mxu1 %v4611_v25  ;;  %v4648_v25 = vld [vmem:[%s5789_s3 + $0x4d8] sm:$0xff]  }
 0x3e6   :  { %4305 = vmatpush3.bf16.msra.mxu1 %v4612_v26  ;;  %v4649_v26 = vld [vmem:[%s5789_s3 + $0x498] sm:$0xff]  }
 0x3e7   :  { %4306 = vmatprep.subr.bf16.mxu1 %v4613_v27  ;;  %v4650_v27 = vld [vmem:[%s5791_s4 + $0x50] sm:$0xff]  }
 0x3ea   :  { %4307 = vmatpush3.bf16.msra.mxu1 %v4614_v28 }
 0x3eb   :  { %4308 = vmatprep.subr.bf16.mxu1 %v4615_v29 }
 0x3ee   :  { %4309 = vmatpush3.bf16.msra.mxu1 %v4616_v30 }
 0x3ef   :  { %4310 = vmatprep.subr.bf16.mxu1 %v4617_v31 }
 0x3f2   :  { %4311 = vmatpush3.bf16.msra.mxu1 %v4618_v32 }
 0x3f3   :  { %4312 = vmatprep.subr.bf16.mxu1 %v4619_v33 }
 0x3f6   :  { %4313 = vmatpush3.bf16.msra.mxu1 %v4620_v34 }
 0x3f7   :  { %4314 = vmatprep.subr.bf16.mxu1 %v4621_v35 }
 0x3fa   :  { %4315 = vmatpush3.bf16.msra.mxu1 %v4622_v36 }
 0x3fd   :  { %2232 = vmatmul.mubr.bf16.vlgmr.msra.gmra.mxu1 %v4902_v15 }
 0x3fe   :  { %4432 = vmatprep.mubr.msk.bf16.mxu1 %vm807_vm4, %v4650_v27 }
 0x479   :  { %v4422_v38 = vpop.f32.mrf.mxu1 }
 0x47a   :  { %v5368_v39 = vadd.f32 %v4422_v38, %v5258_v53  ;;  %v4296_v53 = vadd.f32 %v4295_v49, %v4294_v48 }
 0x47b   :  { %v1623_v40 = vpop.f32.mrf.mxu1 }
 0x47c   :  { %v5371_v41 = vadd.f32 %v1623_v40, %v5261_v55 }
 0x47d   :  { %v4423_v42 = vpop.f32.mrf.mxu1 }
 0x47e   :  { %v5374_v43 = vadd.f32 %v4423_v42, %v5264_v57  ;;  %v4624_v57 = vld [vmem:[%s5791_s4 + $0x48] sm:$0xff]  }
 0x47f   :  { %v1626_v44 = vpop.f32.mrf.mxu1 }
 0x480   :  { %v5377_v45 = vadd.f32 %v1626_v44, %v5267_v59  ;;  %v4625_v59 = vld [vmem:[%s5789_s3 + $0x48c] sm:$0xff]  }
 0x49d   :  { %v1917_v50 = vpop.f32.mrf.mxu1 }
 0x49e   :  { %v1918_v56 = vadd.f32 %v4293_v52, %v1917_v50  ;;  %v4654_v52 = vld [vmem:[%s5789_s3 + $0x540] sm:$0xff]  }
 0x49f   :  { %v1919_v51 = vpop.f32.mrf.mxu1 }
 0x4a0   :  { %v4653_v51 = vld [vmem:[%s5789_s3 + $0x548] sm:$0xff]  }
 0x4a1   :  { %v1920_v54 = vpop.f32.mrf.mxu1 }
 0x4a2   :  { %v1921_v55 = vadd.f32 %v4296_v53, %v1920_v54  ;;  %v4655_v53 = vld [vmem:[%s5789_s3 + $0x538] sm:$0xff]   ;;  %v4656_v54 = vld [vmem:[%s5789_s3 + $0x530] sm:$0xff]  }
 0x4a3   :  { %v1922_v58 = vpop.f32.mrf.mxu1 }
 0x4a4   :  { %v1929_v60 = vpack.c.bf16 %v1921_v55, %v1918_v56  ;;  %v4657_v56 = vld [vmem:[%s5789_s3 + $0x528] sm:$0xff]   ;;  %v4658_v55 = vld [vmem:[%s5789_s3 + $0x520] sm:$0xff]   ;;  %v4659_v58 = vld [vmem:[%s5789_s3 + $0x518] sm:$0xff]  }
 0x4a6   :  { %4424 = vmatprep.subr.bf16.mxu0 %v1929_v60 }
 0x4a7   :  { %4425 = vmatpush3.bf16.msra.mxu0 %v1929_v60  ;;  %v4660_v60 = vld [vmem:[%s5789_s3 + $0x558] ss:$0 sps:$4 sm:$0xff]  }
 0x4a8   :  { %2240 = vmatprep.subr.bf16.mxu0 %v4717_v2 }
 0x4aa   :  { %4427 = vmatmul.mubr.msk.bf16.vlgmr.msra.gmra.mxu0 %vm807_vm4, %v4624_v57  ;;  %v2554_v57 = vsel %vm418_vm2, %v4660_v60, 0  ;;  %v4697_v60 = vld [vmem:[%s5789_s3 + $0x638] sm:$0xff]  }
 0x4ab   :  { %2241 = vmatpush1.bf16.msra.mxu0 %v4625_v59  ;;  %3917 = vmatprep.mubr.msk.bf16.mxu0 %vm414_vm3, %v4894_v12  ;;  %v4661_v59 = vld [vmem:[%s5789_s3 + $0x5d4] sm:$0xff]  }
 0x4ac   :  { %2242 = vmatprep.subr.bf16.mxu0 %v4717_v2 }
 0x4af   :  { %2243 = vmatpush1.bf16.msra.mxu0 %v4626_v61  ;;  %v4662_v61 = vld [vmem:[%s5789_s3 + $0x594] sm:$0xff]  }
 0x4b0   :  { %2244 = vmatprep.subr.bf16.mxu0 %v4717_v2 }
 0x4b3   :  { %2245 = vmatpush1.bf16.msra.mxu0 %v4627_v62  ;;  %v4663_v62 = vld [vmem:[%s5789_s3 + $0x5cc] sm:$0xff]  }
 0x4b4   :  { %2246 = vmatprep.subr.bf16.mxu0 %v4717_v2 }
 0x4b7   :  { %2247 = vmatpush1.bf16.msra.mxu0 %v4628_v63  ;;  %v4664_v63 = vld [vmem:[%s5789_s3 + $0x58c] sm:$0xff]  }
 0x4b8   :  { %2248 = vmatprep.subr.bf16.mxu0 %v4717_v2 }
 0x4bb   :  { %2249 = vmatpush1.bf16.msra.mxu0 %v4629_v0  ;;  %v4665_v0 = vld [vmem:[%s5789_s3 + $0x5c4] sm:$0xff]  }
 0x4bc   :  { %2250 = vmatprep.subr.bf16.mxu0 %v4717_v2 }
 0x4bd   :  { %v4316_v36 = vpop.f32.mrf.mxu1 }
 0x4bf   :  { %2251 = vmatpush1.bf16.msra.mxu0 %v4630_v1  ;;  %v4317_v37 = vpop.f32.mrf.mxu1  ;;  %v4666_v1 = vld [vmem:[%s5789_s3 + $0x584] sm:$0xff]  }
 0x4c0   :  { %2252 = vmatprep.subr.bf16.mxu0 %v4717_v2 }
 0x4c1   :  { %v4319_v38 = vpop.f32.mrf.mxu1 }
 0x4c3   :  { %2253 = vmatpush1.bf16.msra.mxu0 %v4631_v3  ;;  %v4320_v40 = vpop.f32.mrf.mxu1  ;;  %v4667_v3 = vld [vmem:[%s5789_s3 + $0x5bc] sm:$0xff]  }
 0x4c4   :  { %2254 = vmatprep.subr.bf16.mxu0 %v4717_v2  ;;  %v4321_v46 = vadd.f32 %v4320_v40, %v4319_v38 }
 0x4c7   :  { %2255 = vmatpush1.bf16.msra.mxu0 %v4632_v4  ;;  %v4668_v4 = vld [vmem:[%s5789_s3 + $0x57c] sm:$0xff]  }
 0x4c8   :  { %2270 = vmatprep.subr.bf16.mxu0 %v4717_v2 }
 0x4cb   :  { %2271 = vmatpush2.bf16.msra.mxu0 %v2197_v6  ;;  %v4670_v6 = vld [vmem:[%s5789_s3 + $0x574] sm:$0xff]  }
 0x4cc   :  { %4325 = vmatprep.subr.bf16.mxu0 %v4634_v7  ;;  %v4671_v7 = vld [vmem:[%s5789_s3 + $0x5ac] sm:$0xff]  }
 0x4ce   :  { %2273 = vmatmul.mubr.bf16.vlgmr.msra.gmra.mxu0 %v4904_v16 }
 0x4cf   :  { %4326 = vmatpush3.bf16.msra.mxu0 %v4635_v8  ;;  %2588 = vmatprep.mubr.bf16.mxu0 %v4892_v11  ;;  %v4672_v8 = vld [vmem:[%s5789_s3 + $0x56c] sm:$0xff]  }
 0x4d0   :  { %4327 = vmatprep.subr.bf16.mxu0 %v4636_v9  ;;  %v4673_v9 = vld [vmem:[%s5789_s3 + $0x5a4] sm:$0xff]  }
 0x4d3   :  { %4328 = vmatpush3.bf16.msra.mxu0 %v4637_v10  ;;  %v4674_v10 = vld [vmem:[%s5789_s3 + $0x564] sm:$0xff]  }
 0x4d4   :  { %4329 = vmatprep.subr.bf16.mxu0 %v4638_v13  ;;  %v4675_v13 = vld [vmem:[%s5789_s3 + $0x59c] sm:$0xff]  }
 0x4d7   :  { %4330 = vmatpush3.bf16.msra.mxu0 %v4639_v14  ;;  %v4676_v14 = vld [vmem:[%s5789_s3 + $0x55c] sm:$0xff]  }
 0x4d8   :  { %4331 = vmatprep.subr.bf16.mxu0 %v4640_v17  ;;  %v4677_v17 = vld [vmem:[%s5791_s4 + $0x60] sm:$0xff]  }
 0x4db   :  { %4332 = vmatpush3.bf16.msra.mxu0 %v4641_v18 }
 0x4dc   :  { %4333 = vmatprep.subr.bf16.mxu0 %v4642_v19 }
 0x4df   :  { %4334 = vmatpush3.bf16.msra.mxu0 %v4643_v20 }
 0x4e0   :  { %4335 = vmatprep.subr.bf16.mxu0 %v4644_v21 }
 0x4e3   :  { %4336 = vmatpush3.bf16.msra.mxu0 %v4645_v22 }
 0x4e4   :  { %4337 = vmatprep.subr.bf16.mxu0 %v4646_v23 }
 0x4e7   :  { %4338 = vmatpush3.bf16.msra.mxu0 %v4647_v24 }
 0x4e8   :  { %4339 = vmatprep.subr.bf16.mxu0 %v4648_v25 }
 0x4eb   :  { %4340 = vmatpush3.bf16.msra.mxu0 %v4649_v26 }
 0x4ee   :  { %2589 = vmatmul.mubr.bf16.vlgmr.msra.gmra.mxu0 %v4902_v15 }
 0x4ef   :  { %4438 = vmatprep.mubr.msk.bf16.mxu0 %vm807_vm4, %v4677_v17 }
 0x56a   :  { %v4428_v28 = vpop.f32.mrf.mxu0 }
 0x56b   :  { %v5478_v29 = vadd.f32 %v4428_v28, %v5368_v39  ;;  %v4318_v39 = vadd.f32 %v4317_v37, %v4316_v36 }
 0x56c   :  { %v1980_v30 = vpop.f32.mrf.mxu0 }
 0x56d   :  { %v5481_v31 = vadd.f32 %v1980_v30, %v5371_v41 }
 0x56e   :  { %v4429_v32 = vpop.f32.mrf.mxu0 }
 0x56f   :  { %v5484_v33 = vadd.f32 %v4429_v32, %v5374_v43  ;;  %v4651_v43 = vld [vmem:[%s5791_s4 + $0x58] sm:$0xff]  }
 0x570   :  { %v1983_v34 = vpop.f32.mrf.mxu0 }
 0x571   :  { %v5487_v35 = vadd.f32 %v1983_v34, %v5377_v45  ;;  %v4652_v45 = vld [vmem:[%s5789_s3 + $0x550] sm:$0xff]  }
 0x58e   :  { %v2274_v42 = vpop.f32.mrf.mxu0 }
 0x58f   :  { %v2275_v48 = vadd.f32 %v4318_v39, %v2274_v42  ;;  %v4681_v39 = vld [vmem:[%s5789_s3 + $0x604] sm:$0xff]  }
 0x590   :  { %v2276_v44 = vpop.f32.mrf.mxu0 }
 0x591   :  { %v4680_v44 = vld [vmem:[%s5789_s3 + $0x60c] sm:$0xff]  }
 0x592   :  { %v2277_v47 = vpop.f32.mrf.mxu0 }
 0x593   :  { %v2278_v41 = vadd.f32 %v4321_v46, %v2277_v47  ;;  %v4682_v46 = vld [vmem:[%s5789_s3 + $0x5fc] sm:$0xff]   ;;  %v4683_v47 = vld [vmem:[%s5789_s3 + $0x5f4] sm:$0xff]  }
 0x594   :  { %v2279_v49 = vpop.f32.mrf.mxu0 }
 0x595   :  { %v2286_v50 = vpack.c.bf16 %v2278_v41, %v2275_v48  ;;  %v4684_v48 = vld [vmem:[%s5789_s3 + $0x5ec] sm:$0xff]   ;;  %v4685_v41 = vld [vmem:[%s5789_s3 + $0x5e4] sm:$0xff]   ;;  %v4686_v49 = vld [vmem:[%s5789_s3 + $0x5dc] sm:$0xff]  }
 0x597   :  { %4430 = vmatprep.subr.bf16.mxu1 %v2286_v50 }
 0x598   :  { %4431 = vmatpush3.bf16.msra.mxu1 %v2286_v50  ;;  %v4687_v50 = vld [vmem:[%s5789_s3 + $0x61c] ss:$0 sps:$4 sm:$0xff]  }
 0x599   :  { %2597 = vmatprep.subr.bf16.mxu1 %v4717_v2 }
 0x59b   :  { %4433 = vmatmul.mubr.msk.bf16.vlgmr.msra.gmra.mxu1 %vm807_vm4, %v4651_v43  ;;  %v2911_v43 = vsel %vm418_vm2, %v4687_v50, 0 }
 0x59c   :  { %2598 = vmatpush1.bf16.msra.mxu1 %v4652_v45  ;;  %4000 = vmatprep.mubr.msk.bf16.mxu1 %vm414_vm3, %v4894_v12  ;;  %v4688_v45 = vld [vmem:[%s5789_s3 + $0x698] sm:$0xff]  }
 0x59d   :  { %2599 = vmatprep.subr.bf16.mxu1 %v4717_v2 }
 0x5a0   :  { %2600 = vmatpush1.bf16.msra.mxu1 %v4653_v51  ;;  %v4689_v51 = vld [vmem:[%s5789_s3 + $0x658] sm:$0xff]  }
 0x5a1   :  { %2601 = vmatprep.subr.bf16.mxu1 %v4717_v2 }
 0x5a4   :  { %2602 = vmatpush1.bf16.msra.mxu1 %v4654_v52  ;;  %v4690_v52 = vld [vmem:[%s5789_s3 + $0x690] sm:$0xff]  }
 0x5a5   :  { %2603 = vmatprep.subr.bf16.mxu1 %v4717_v2 }
 0x5a8   :  { %2604 = vmatpush1.bf16.msra.mxu1 %v4655_v53  ;;  %v4691_v53 = vld [vmem:[%s5789_s3 + $0x650] sm:$0xff]  }
 0x5a9   :  { %2605 = vmatprep.subr.bf16.mxu1 %v4717_v2 }
 0x5ac   :  { %2606 = vmatpush1.bf16.msra.mxu1 %v4656_v54  ;;  %v4692_v54 = vld [vmem:[%s5789_s3 + $0x688] sm:$0xff]  }
 0x5ad   :  { %2607 = vmatprep.subr.bf16.mxu1 %v4717_v2 }
 0x5ae   :  { %v4341_v26 = vpop.f32.mrf.mxu0 }
 0x5b0   :  { %2608 = vmatpush1.bf16.msra.mxu1 %v4657_v56  ;;  %v4342_v27 = vpop.f32.mrf.mxu0  ;;  %v4693_v56 = vld [vmem:[%s5789_s3 + $0x648] sm:$0xff]  }
 0x5b1   :  { %2609 = vmatprep.subr.bf16.mxu1 %v4717_v2 }
 0x5b2   :  { %v4344_v28 = vpop.f32.mrf.mxu0 }
 0x5b4   :  { %2610 = vmatpush1.bf16.msra.mxu1 %v4658_v55  ;;  %v4345_v30 = vpop.f32.mrf.mxu0  ;;  %v4694_v55 = vld [vmem:[%s5789_s3 + $0x680] sm:$0xff]  }
 0x5b5   :  { %2611 = vmatprep.subr.bf16.mxu1 %v4717_v2  ;;  %v4346_v36 = vadd.f32 %v4345_v30, %v4344_v28  ;;  %v4707_v30 = vld [vmem:[%s5789_s3 + $0x6d0] sm:$0xff]  }
 0x5b8   :  { %2612 = vmatpush1.bf16.msra.mxu1 %v4659_v58  ;;  %v4696_v58 = vld [vmem:[%s5789_s3 + $0x678] sm:$0xff]  }
 0x5b9   :  { %2627 = vmatprep.subr.bf16.mxu1 %v4717_v2 }
 0x5bc   :  { %2628 = vmatpush2.bf16.msra.mxu1 %v2554_v57  ;;  %v4698_v57 = vld [vmem:[%s5789_s3 + $0x670] sm:$0xff]  }
 0x5bd   :  { %4350 = vmatprep.subr.bf16.mxu1 %v4661_v59  ;;  %v4699_v59 = vld [vmem:[%s5789_s3 + $0x630] sm:$0xff]  }
 0x5bf   :  { %2630 = vmatmul.mubr.bf16.vlgmr.msra.gmra.mxu1 %v4904_v16 }
 0x5c0   :  { %4351 = vmatpush3.bf16.msra.mxu1 %v4662_v61  ;;  %2945 = vmatprep.mubr.bf16.mxu1 %v4892_v11  ;;  %v4700_v61 = vld [vmem:[%s5789_s3 + $0x668] sm:$0xff]  }
 0x5c1   :  { %4352 = vmatprep.subr.bf16.mxu1 %v4663_v62  ;;  %v4701_v62 = vld [vmem:[%s5789_s3 + $0x628] sm:$0xff]  }
 0x5c4   :  { %4353 = vmatpush3.bf16.msra.mxu1 %v4664_v63  ;;  %v4702_v63 = vld [vmem:[%s5789_s3 + $0x660] sm:$0xff]  }
 0x5c5   :  { %4354 = vmatprep.subr.bf16.mxu1 %v4665_v0  ;;  %v4703_v0 = vld [vmem:[%s5789_s3 + $0x620] sm:$0xff]  }
 0x5c8   :  { %4355 = vmatpush3.bf16.msra.mxu1 %v4666_v1  ;;  %v4704_v1 = vld [vmem:[%s5791_s4 + $0x70] sm:$0xff]  }
 0x5c9   :  { %4356 = vmatprep.subr.bf16.mxu1 %v4667_v3 }
 0x5cc   :  { %4357 = vmatpush3.bf16.msra.mxu1 %v4668_v4 }
 0x5cd   :  { %4358 = vmatprep.subr.bf16.mxu1 %v4669_v5 }
 0x5d0   :  { %4359 = vmatpush3.bf16.msra.mxu1 %v4670_v6 }
 0x5d1   :  { %4360 = vmatprep.subr.bf16.mxu1 %v4671_v7 }
 0x5d4   :  { %4361 = vmatpush3.bf16.msra.mxu1 %v4672_v8 }
 0x5d5   :  { %4362 = vmatprep.subr.bf16.mxu1 %v4673_v9 }
 0x5d8   :  { %4363 = vmatpush3.bf16.msra.mxu1 %v4674_v10 }
 0x5d9   :  { %4364 = vmatprep.subr.bf16.mxu1 %v4675_v13 }
 0x5dc   :  { %4365 = vmatpush3.bf16.msra.mxu1 %v4676_v14 }
 0x5df   :  { %2946 = vmatmul.mubr.bf16.vlgmr.msra.gmra.mxu1 %v4902_v15 }
 0x5e0   :  { %4444 = vmatprep.mubr.msk.bf16.mxu1 %vm807_vm4, %v4704_v1 }
 0x65b   :  { %v4434_v18 = vpop.f32.mrf.mxu1 }
 0x65c   :  { %v5588_v19 = vadd.f32 %v4434_v18, %v5478_v29  ;;  %v4343_v29 = vadd.f32 %v4342_v27, %v4341_v26 }
 0x65d   :  { %v2337_v20 = vpop.f32.mrf.mxu1 }
 0x65e   :  { %v5591_v21 = vadd.f32 %v2337_v20, %v5481_v31 }
 0x65f   :  { %v4435_v22 = vpop.f32.mrf.mxu1 }
 0x660   :  { %v5594_v23 = vadd.f32 %v4435_v22, %v5484_v33  ;;  %v4678_v33 = vld [vmem:[%s5791_s4 + $0x68] sm:$0xff]  }
 0x661   :  { %v2340_v24 = vpop.f32.mrf.mxu1 }
 0x662   :  { %v5597_v25 = vadd.f32 %v2340_v24, %v5487_v35  ;;  %v4679_v35 = vld [vmem:[%s5789_s3 + $0x614] sm:$0xff]  }
 0x67f   :  { %v2631_v32 = vpop.f32.mrf.mxu1 }
 0x680   :  { %v2632_v38 = vadd.f32 %v4343_v29, %v2631_v32  ;;  %v4708_v32 = vld [vmem:[%s5789_s3 + $0x6c8] sm:$0xff]   ;;  %v4711_v29 = vld [vmem:[%s5789_s3 + $0x6b0] sm:$0xff]  }
 0x681   :  { %v2633_v34 = vpop.f32.mrf.mxu1 }
 0x682   :  { %v4709_v34 = vld [vmem:[%s5789_s3 + $0x6c0] sm:$0xff]  }
 0x683   :  { %v2634_v37 = vpop.f32.mrf.mxu1 }
 0x684   :  { %v2635_v31 = vadd.f32 %v4346_v36, %v2634_v37  ;;  %v4712_v36 = vld [vmem:[%s5789_s3 + $0x6a8] sm:$0xff]   ;;  %v4713_v37 = vld [vmem:[%s5789_s3 + $0x6a0] sm:$0xff]  }
 0x685   :  { %v2636_v40 = vpop.f32.mrf.mxu1 }
 0x686   :  { %v2643_v42 = vpack.c.bf16 %v2635_v31, %v2632_v38  ;;  %v4714_v38 = vld [vmem:[%s5789_s3 + $0x6e0] ss:$0 sps:$4 sm:$0xff]  }
 0x687   :  { %v3268_v31 = vsel %vm418_vm2, %v4714_v38, 0  ;;  %v4715_v40 = vld [vmem:[%s5791_s4 + $0x80] sm:$0xff]  }
 0x688   :  { %4436 = vmatprep.subr.bf16.mxu0 %v2643_v42 }
 0x689   :  { %4437 = vmatpush3.bf16.msra.mxu0 %v2643_v42  ;;  %v3427_v42 = vld [vmem:[%s5790_s5] sm:$0xff] }
 0x68a   :  { %2954 = vmatprep.subr.bf16.mxu0 %v4717_v2  ;;  %3433 = vperm.xlu1 %4456, %v3427_v42  }
 0x68c   :  { %4439 = vmatmul.mubr.msk.bf16.vlgmr.msra.gmra.mxu0 %vm807_vm4, %v4678_v33 }
 0x68d   :  { %2955 = vmatpush1.bf16.msra.mxu0 %v4679_v35  ;;  %4083 = vmatprep.mubr.msk.bf16.mxu0 %vm414_vm3, %v4894_v12 }
 0x68e   :  { %2956 = vmatprep.subr.bf16.mxu0 %v4717_v2 }
 0x691   :  { %2957 = vmatpush1.bf16.msra.mxu0 %v4680_v44 }
 0x692   :  { %2958 = vmatprep.subr.bf16.mxu0 %v4717_v2 }
 0x695   :  { %2959 = vmatpush1.bf16.msra.mxu0 %v4681_v39 }
 0x696   :  { %2960 = vmatprep.subr.bf16.mxu0 %v4717_v2 }
 0x699   :  { %2961 = vmatpush1.bf16.msra.mxu0 %v4682_v46 }
 0x69a   :  { %2962 = vmatprep.subr.bf16.mxu0 %v4717_v2 }
 0x69d   :  { %2963 = vmatpush1.bf16.msra.mxu0 %v4683_v47 }
 0x69e   :  { %2964 = vmatprep.subr.bf16.mxu0 %v4717_v2 }
 0x69f   :  { %v4366_v10 = vpop.f32.mrf.mxu1 }
 0x6a1   :  { %2965 = vmatpush1.bf16.msra.mxu0 %v4684_v48  ;;  %v4367_v13 = vpop.f32.mrf.mxu1 }
 0x6a2   :  { %2966 = vmatprep.subr.bf16.mxu0 %v4717_v2 }
 0x6a3   :  { %v4369_v14 = vpop.f32.mrf.mxu1 }
 0x6a5   :  { %2967 = vmatpush1.bf16.msra.mxu0 %v4685_v41  ;;  %v4370_v17 = vpop.f32.mrf.mxu1 }
 0x6a6   :  { %2968 = vmatprep.subr.bf16.mxu0 %v4717_v2  ;;  %v4371_v22 = vadd.f32 %v4370_v17, %v4369_v14 }
 0x6a9   :  { %2969 = vmatpush1.bf16.msra.mxu0 %v4686_v49 }
 0x6aa   :  { %2984 = vmatprep.subr.bf16.mxu0 %v4717_v2 }
 0x6ad   :  { %2985 = vmatpush2.bf16.msra.mxu0 %v2911_v43 }
 0x6ae   :  { %4375 = vmatprep.subr.bf16.mxu0 %v4688_v45 }
 0x6b0   :  { %2987 = vmatmul.mubr.bf16.vlgmr.msra.gmra.mxu0 %v4904_v16 }
 0x6b1   :  { %4376 = vmatpush3.bf16.msra.mxu0 %v4689_v51  ;;  %3302 = vmatprep.mubr.bf16.mxu0 %v4892_v11  ;;  %v4695_v11 = vld [vmem:[%s5789_s3 + $0x640] sm:$0xff]  }
 0x6b2   :  { %4377 = vmatprep.subr.bf16.mxu0 %v4690_v52 }
 0x6b5   :  { %4378 = vmatpush3.bf16.msra.mxu0 %v4691_v53 }
 0x6b6   :  { %4379 = vmatprep.subr.bf16.mxu0 %v4692_v54 }
 0x6b9   :  { %4380 = vmatpush3.bf16.msra.mxu0 %v4693_v56 }
 0x6ba   :  { %4381 = vmatprep.subr.bf16.mxu0 %v4694_v55 }
 0x6bd   :  { %4382 = vmatpush3.bf16.msra.mxu0 %v4695_v11 }
 0x6be   :  { %4383 = vmatprep.subr.bf16.mxu0 %v4696_v58 }
 0x6c1   :  { %4384 = vmatpush3.bf16.msra.mxu0 %v4697_v60 }
 0x6c2   :  { %4385 = vmatprep.subr.bf16.mxu0 %v4698_v57  ;;  %v4716_v57 = vld [vmem:[%s5791_s4 + $0x88] sm:$0xff]  }
 0x6c5   :  { %4386 = vmatpush3.bf16.msra.mxu0 %v4699_v59 }
 0x6c6   :  { %4387 = vmatprep.subr.bf16.mxu0 %v4700_v61 }
 0x6c9   :  { %4388 = vmatpush3.bf16.msra.mxu0 %v4701_v62 }
 0x6ca   :  { %4389 = vmatprep.subr.bf16.mxu0 %v4702_v63 }
 0x6cd   :  { %4390 = vmatpush3.bf16.msra.mxu0 %v4703_v0  ;;  %v3444_v0 = vpop.permute.xlu0 %3443 }
 0x6d0   :  { %3303 = vmatmul.mubr.bf16.vlgmr.msra.gmra.mxu0 %v4902_v15 }
 0x6d1   :  { %4450 = vmatprep.mubr.msk.bf16.mxu0 %vm807_vm4, %v4715_v40 }
 0x705   :  { %v3434_v59 = vpop.permute.xlu1 %3433 }
 0x74c   :  { %v4440_v3 = vpop.f32.mrf.mxu0 }
 0x74d   :  { %v5698_v4 = vadd.f32 %v4440_v3, %v5588_v19  ;;  %v4368_v19 = vadd.f32 %v4367_v13, %v4366_v10 }
 0x74e   :  { %v2694_v5 = vpop.f32.mrf.mxu0 }
 0x74f   :  { %v5701_v6 = vadd.f32 %v2694_v5, %v5591_v21 }
 0x750   :  { %v4441_v7 = vpop.f32.mrf.mxu0 }
 0x751   :  { %v5704_v8 = vadd.f32 %v4441_v7, %v5594_v23  ;;  %v4705_v23 = vld [vmem:[%s5791_s4 + $0x78] sm:$0xff]  }
 0x752   :  { %v2697_v9 = vpop.f32.mrf.mxu0 }
 0x753   :  { %v5707_v15 = vadd.f32 %v2697_v9, %v5597_v25  ;;  %v4706_v25 = vld [vmem:[%s5789_s3 + $0x6d8] sm:$0xff]  }
 0x770   :  { %v2988_v18 = vpop.f32.mrf.mxu0 }
 0x771   :  { %v2989_v26 = vadd.f32 %v4368_v19, %v2988_v18 }
 0x772   :  { %v2990_v20 = vpop.f32.mrf.mxu0 }
 0x774   :  { %v2991_v24 = vpop.f32.mrf.mxu0 }
 0x775   :  { %v2992_v21 = vadd.f32 %v4371_v22, %v2991_v24 }
 0x776   :  { %v2993_v27 = vpop.f32.mrf.mxu0 }
 0x777   :  { %v3000_v28 = vpack.c.bf16 %v2992_v21, %v2989_v26 }
 0x779   :  { %4442 = vmatprep.subr.bf16.mxu1 %v3000_v28 }
 0x77a   :  { %4443 = vmatpush3.bf16.msra.mxu1 %v3000_v28 }
 0x77b   :  { %3311 = vmatprep.subr.bf16.mxu1 %v4717_v2 }
 0x77d   :  { %4445 = vmatmul.mubr.msk.bf16.vlgmr.msra.gmra.mxu1 %vm807_vm4, %v4705_v23 }
 0x77e   :  { %3312 = vmatpush1.bf16.msra.mxu1 %v4706_v25  ;;  %4166 = vmatprep.mubr.msk.bf16.mxu1 %vm414_vm3, %v4894_v12  ;;  %v4710_v12 = vld [vmem:[%s5789_s3 + $0x6b8] sm:$0xff]  }
 0x77f   :  { %3313 = vmatprep.subr.bf16.mxu1 %v4717_v2 }
 0x782   :  { %3314 = vmatpush1.bf16.msra.mxu1 %v4707_v30 }
 0x783   :  { %3315 = vmatprep.subr.bf16.mxu1 %v4717_v2 }
 0x786   :  { %3316 = vmatpush1.bf16.msra.mxu1 %v4708_v32 }
 0x787   :  { %3317 = vmatprep.subr.bf16.mxu1 %v4717_v2 }
 0x78a   :  { %3318 = vmatpush1.bf16.msra.mxu1 %v4709_v34 }
 0x78b   :  { %3319 = vmatprep.subr.bf16.mxu1 %v4717_v2 }
 0x78e   :  { %3320 = vmatpush1.bf16.msra.mxu1 %v4710_v12 }
 0x78f   :  { %3321 = vmatprep.subr.bf16.mxu1 %v4717_v2 }
 0x790   :  { %v4391_v49 = vpop.f32.mrf.mxu0 }
 0x792   :  { %3322 = vmatpush1.bf16.msra.mxu1 %v4711_v29  ;;  %v4392_v50 = vpop.f32.mrf.mxu0 }
 0x793   :  { %3323 = vmatprep.subr.bf16.mxu1 %v4717_v2  ;;  %v4393_v53 = vadd.f32 %v4392_v50, %v4391_v49 }
 0x794   :  { %v4394_v43 = vpop.f32.mrf.mxu0 }
 0x796   :  { %3324 = vmatpush1.bf16.msra.mxu1 %v4712_v36  ;;  %v4395_v45 = vpop.f32.mrf.mxu0 }
 0x797   :  { %3325 = vmatprep.subr.bf16.mxu1 %v4717_v2  ;;  %v4396_v54 = vadd.f32 %v4395_v45, %v4394_v43 }
 0x79a   :  { %3326 = vmatpush1.bf16.msra.mxu1 %v4713_v37 }
 0x79b   :  { %3341 = vmatprep.subr.bf16.mxu1 %v4717_v2  ;;  %v3428_v2 = vld [vmem:[%s5790_s5 + $0x8] sm:$0xff] }
 0x79c   :  { %3438 = vperm.xlu1 %4456, %v3428_v2  }
 0x79e   :  { %3342 = vmatpush2.bf16.msra.mxu1 %v3268_v31 }
 0x7a1   :  { %3344 = vmatmul.mubr.bf16.vlgmr.msra.gmra.mxu1 %v4904_v16  ;;  %v3430_v16 = vld [vmem:[%s5790_s5 + $0x18] sm:$0xff] }
 0x7a2   :  { %3448 = vperm.xlu1 %4456, %v3430_v16  }
 0x817   :  { %v3439_v62 = vpop.permute.xlu1 %3438 }
 0x83d   :  { %v4446_v33 = vpop.f32.mrf.mxu1 }
 0x83e   :  { %v3068_v35 = vadd.f32 %v4446_v33, %v5698_v4 }
 0x83f   :  { %v3051_v44 = vpop.f32.mrf.mxu1 }
 0x840   :  { %v3066_v39 = vadd.f32 %v3051_v44, %v5701_v6 }
 0x841   :  { %v4447_v46 = vpop.f32.mrf.mxu1 }
 0x842   :  { %v3069_v47 = vadd.f32 %v4447_v46, %v5704_v8  ;;  %v3449_v8 = vpop.permute.xlu1 %3448 }
 0x843   :  { %v3054_v48 = vpop.f32.mrf.mxu1 }
 0x844   :  { %v3067_v41 = vadd.f32 %v3054_v48, %v5707_v15 }
 0x861   :  { %v3345_v51 = vpop.f32.mrf.mxu1 }
 0x862   :  { %v3346_v55 = vadd.f32 %v4393_v53, %v3345_v51 }
 0x863   :  { %v3347_v52 = vpop.f32.mrf.mxu1 }
 0x865   :  { %v3348_v56 = vpop.f32.mrf.mxu1 }
 0x866   :  { %v3349_v11 = vadd.f32 %v4396_v54, %v3348_v56 }
 0x867   :  { %v3350_v58 = vpop.f32.mrf.mxu1 }
 0x868   :  { %v3357_v60 = vpack.c.bf16 %v3349_v11, %v3346_v55 }
 0x86a   :  { %4448 = vmatprep.subr.bf16.mxu0 %v3357_v60 }
 0x86b   :  { %4449 = vmatpush3.bf16.msra.mxu0 %v3357_v60 }
 0x86e   :  { %4451 = vmatmul.mubr.msk.bf16.vlgmr.msra.gmra.mxu0 %vm807_vm4, %v4716_v57 }
 0x92e   :  { %v4452_v61 = vpop.f32.mrf.mxu0 }
 0x92f   :  { %v3425_v63 = vadd.f32 %v4452_v61, %v3068_v35 }
 0x930   :  { %v3408_v1 = vpop.f32.mrf.mxu0 }
 0x931   :  { %v3453_v3 = vadd.f32 %v3444_v0, %v3425_v63  ;;  %v3423_v4 = vadd.f32 %v3408_v1, %v3066_v39 }
 0x932   :  { %v4453_v5 = vpop.f32.mrf.mxu0 }
 0x933   :  { %3458 = vst.msk [vmem:[%s5792_s6 + $0x10] sm:$0xff] %vm3455_vm5, %v3453_v3  ;;  %v3451_v6 = vadd.f32 %v3434_v59, %v3423_v4  ;;  %v3426_v7 = vadd.f32 %v4453_v5, %v3069_v47 }
 0x934   :  { %v3411_v9 = vpop.f32.mrf.mxu0 }
 0x935   :  { %3456 = vst.msk [vmem:[%s5792_s6] sm:$0xff] %vm3455_vm5, %v3451_v6  ;;  %v3454_v15 = vadd.f32 %v3449_v8, %v3426_v7  ;;  %v3424_v10 = vadd.f32 %v3411_v9, %v3067_v41 }
 0x937   :  { %3459 = vst.msk [vmem:[%s5792_s6 + $0x18] sm:$0xff] %vm3455_vm5, %v3454_v15  ;;  %v3452_v13 = vadd.f32 %v3439_v62, %v3424_v10 }
 0x939   :  { %3457 = vst.msk [vmem:[%s5792_s6 + $0x8] sm:$0xff] %vm3455_vm5, %v3452_v13 }

// kernel: _lambda_.3
= control target key start
LH: loop header
LB: loop body
LE: loop exit
PB: predicated region body
PF: predicated region fallthrough
CT: control target
= control target key end

     0   :  { %vm25_vm0 = vcmask 130048   ;;  %v130_v19 = vlaneseq  ;;  %vm4426_vm9 = vcmask 7168   ;;  %s10472_s0 = inlined_call_operand.vmem [shape: f32[2,8,144], index: 0, kind: input, shape index: {}]   ;;  %s10473_s1 = inlined_call_operand.vmem [shape: f32[8,10,16,144], index: 1, kind: input, shape index: {}]   ;;  %s10474_s2 = inlined_call_operand.vmem [shape: f32[2,10,16,1], index: 2, kind: output, shape index: {}]  }
   0x1   :  { %v11_v0 = vld [vmem:[%s10472_s0] sm:$0xff]  ;;  %v12_v1 = vld [vmem:[%s10472_s0 + $0x8] sm:$0xff] }
   0x2   :  { %v15_v2 = vmul.f32 %v11_v0, %v11_v0  ;;  %v16_v3 = vmul.f32 %v12_v1, %v12_v1  ;;  %v131_v22 = vshrl.u32 %v130_v19, 7  ;;  %v94_v40 = vld [vmem:[%s10473_s1 + $0x20] sm:$0xff]  ;;  %v95_v41 = vld [vmem:[%s10473_s1 + $0x28] sm:$0xff] }
   0x3   :  { %v4475_v44 = vld [vmem:[%s10473_s1 + $0x160] sm:$0xff]  ;;  %v4476_v51 = vld [vmem:[%s10473_s1 + $0x168] sm:$0xff] }
   0x4   :  { %v19_v4 = vrot.slane %v15_v2, 4  ;;  %v26_v5 = vsel %vm25_vm0, %v16_v3, 0.0  ;;  %v5469_v31 = vsub.s32 0, %v131_v22  ;;  %v5471_v32 = vsub.s32 1, %v131_v22  ;;  %v4515_v45 = vld [vmem:[%s10473_s1 + $0x2a0] sm:$0xff]  ;;  %v4516_v53 = vld [vmem:[%s10473_s1 + $0x2a8] sm:$0xff] }
   0x5   :  { %v27_v6 = vrot.slane %v26_v5, 4  ;;  %v5473_v36 = vsub.s32 2, %v131_v22  ;;  %v5475_v37 = vsub.s32 3, %v131_v22  ;;  %v5483_v42 = vsub.s32 4, %v131_v22  ;;  %v4555_v46 = vld [vmem:[%s10473_s1 + $0x3e0] sm:$0xff]  ;;  %v4556_v55 = vld [vmem:[%s10473_s1 + $0x3e8] sm:$0xff] }
   0x6   :  { %v20_v7 = vadd.f32 %v19_v4, %v15_v2  ;;  %v5494_v47 = vsub.s32 5, %v131_v22  ;;  %v5496_v48 = vsub.s32 6, %v131_v22  ;;  %v5498_v49 = vsub.s32 7, %v131_v22  ;;  %v90_v19 = vld [vmem:[%s10473_s1] sm:$0xff] }
   0x7   :  { %v28_v8 = vadd.f32 %v27_v6, %v26_v5  ;;  %v4595_v5 = vld [vmem:[%s10473_s1 + $0x520] sm:$0xff]  ;;  %v4596_v6 = vld [vmem:[%s10473_s1 + $0x528] sm:$0xff] }
   0x8   :  { %v21_v9 = vrot.slane %v20_v7, 2 }
   0x9   :  { %v29_v10 = vrot.slane %v28_v8, 2 }
   0xa   :  { %v22_v11 = vadd.f32 %v21_v9, %v20_v7  ;;  %v4635_v7 = vld [vmem:[%s10473_s1 + $0x660] sm:$0xff] }
   0xb   :  { %v30_v12 = vadd.f32 %v29_v10, %v28_v8 }
   0xc   :  { %v23_v13 = vrot.slane %v22_v11, 1 }
   0xd   :  { %v31_v14 = vrot.slane %v30_v12, 1 }
   0xe   :  { %v24_v15 = vadd.f32 %v23_v13, %v22_v11  ;;  %v4636_v11 = vld [vmem:[%s10473_s1 + $0x668] sm:$0xff]  ;;  %v4675_v13 = vld [vmem:[%s10473_s1 + $0x7a0] sm:$0xff] }
   0xf   :  { %v32_v16 = vadd.f32 %v31_v14, %v30_v12  ;;  %v4676_v14 = vld [vmem:[%s10473_s1 + $0x7a8] sm:$0xff] }
  0x10   :  { %4751 = vrsqrt.f32 %v24_v15  ;;  %v74_v17 = vadd.f32 1.0, %v24_v15  ;;  %vm48_vm1 = vcmp.eq.f32.partialorder %v24_v15, inf  ;;  %v51_v21 = vand.u32 2147483648, %v24_v15 }
  0x11   :  { %4753 = vrsqrt.f32 %v32_v16  ;;  %v75_v18 = vadd.f32 1.0, %v32_v16  ;;  %vm50_vm2 = vcmp.eq.f32.partialorder %v24_v15, 0.0  ;;  %vm55_vm3 = vcmp.eq.f32.partialorder %v32_v16, inf }
  0x12   :  { %4755 = vrcp.f32 %v74_v17  ;;  %v58_v25 = vand.u32 2147483648, %v32_v16  ;;  %vm57_vm4 = vcmp.eq.f32.partialorder %v32_v16, 0.0 }
  0x13   :  { %4757 = vrcp.f32 %v75_v18 }
  0x1d   :  { %v4752_v20 = vpop.eup %4751 }
  0x1e   :  { %v4754_v23 = vpop.eup %4753  ;;  %v47_v24 = vmul.f32 %v4752_v20, %v24_v15 }
  0x1f   :  { %v54_v26 = vmul.f32 %v4754_v23, %v32_v16  ;;  %v4756_v28 = vpop.eup %4755 }
  0x20   :  { %v49_v27 = vsel %vm48_vm1, %v24_v15, %v47_v24  ;;  %v4758_v33 = vpop.eup %4757  ;;  %v91_v24 = vld [vmem:[%s10473_s1 + $0x8] sm:$0xff] }
  0x21   :  { %v52_v29 = vsel %vm50_vm2, %v51_v21, %v49_v27  ;;  %v56_v30 = vsel %vm55_vm3, %v32_v16, %v54_v26  ;;  %v4472_v26 = vld [vmem:[%s10473_s1 + $0x148] sm:$0xff] }
  0x22   :  { %v59_v34 = vsel %vm57_vm4, %v58_v25, %v56_v30  ;;  %v82_v35 = vmul.f32 %v4756_v28, %v52_v29  ;;  %v4471_v25 = vld [vmem:[%s10473_s1 + $0x140] sm:$0xff] }
  0x23   :  { %v83_v38 = vmul.f32 %v4758_v33, %v59_v34  ;;  %v4715_v33 = vld [vmem:[%s10473_s1 + $0x8e0] sm:$0xff]  ;;  %v4716_v34 = vld [vmem:[%s10473_s1 + $0x8e8] sm:$0xff] }
  0x24   :  { %v86_v39 = vmul.f32 %v82_v35, %v11_v0  ;;  %v4511_v35 = vld [vmem:[%s10473_s1 + $0x280] sm:$0xff] }
  0x25   :  { %v87_v43 = vmul.f32 %v83_v38, %v12_v1 }
  0x26   :  { %v5501_v50 = vrot.slane %v86_v39, %v5469_v31  ;;  %v5507_v52 = vrot.slane %v86_v39, %v5471_v32  ;;  %v5513_v54 = vrot.slane %v86_v39, %v5473_v36  ;;  %v5519_v56 = vrot.slane %v86_v39, %v5475_v37 }
  0x27   :  { %v5522_v57 = vrot.slane %v87_v43, %v5469_v31  ;;  %v5525_v58 = vrot.slane %v87_v43, %v5471_v32  ;;  %v5528_v59 = vrot.slane %v87_v43, %v5473_v36  ;;  %v5531_v60 = vrot.slane %v87_v43, %v5475_v37 }
  0x28   :  { %v150_v61 = vmul.f32 %v5501_v50, %v94_v40  ;;  %v287_v62 = vmul.f32 %v4475_v44, %v5507_v52  ;;  %v504_v63 = vmul.f32 %v4515_v45, %v5513_v54  ;;  %v721_v0 = vmul.f32 %v4555_v46, %v5519_v56  ;;  %v4512_v45 = vld [vmem:[%s10473_s1 + $0x288] sm:$0xff] }
  0x29   :  { %v151_v1 = vmul.f32 %v5522_v57, %v95_v41  ;;  %v288_v2 = vmul.f32 %v4476_v51, %v5525_v58  ;;  %v505_v3 = vmul.f32 %v4516_v53, %v5528_v59  ;;  %v722_v4 = vmul.f32 %v4556_v55, %v5531_v60 }
  0x2a   :  { %v367_v8 = vadd.f32 %v287_v62, %v150_v61  ;;  %v5551_v9 = vrot.slane %v86_v39, %v5483_v42  ;;  %v5554_v10 = vrot.slane %v87_v43, %v5483_v42  ;;  %v5560_v12 = vrot.slane %v86_v39, %v5494_v47  ;;  %v4591_v61 = vld [vmem:[%s10473_s1 + $0x500] sm:$0xff] }
  0x2b   :  { %v368_v15 = vadd.f32 %v288_v2, %v151_v1  ;;  %v5569_v16 = vrot.slane %v87_v43, %v5494_v47  ;;  %v5572_v17 = vrot.slane %v86_v39, %v5496_v48  ;;  %v5575_v18 = vrot.slane %v87_v43, %v5496_v48  ;;  %v4592_v2 = vld [vmem:[%s10473_s1 + $0x508] sm:$0xff] }
  0x2c   :  { %v584_v20 = vadd.f32 %v504_v63, %v367_v8  ;;  %v938_v21 = vmul.f32 %v4595_v5, %v5551_v9  ;;  %v939_v22 = vmul.f32 %v4596_v6, %v5554_v10  ;;  %v1155_v23 = vmul.f32 %v4635_v7, %v5560_v12  ;;  %v4631_v7 = vld [vmem:[%s10473_s1 + $0x640] sm:$0xff]  ;;  %v4632_v8 = vld [vmem:[%s10473_s1 + $0x648] sm:$0xff] }
  0x2d   :  { %v585_v27 = vadd.f32 %v505_v3, %v368_v15  ;;  %v1156_v28 = vmul.f32 %v4636_v11, %v5569_v16  ;;  %v1372_v29 = vmul.f32 %v4675_v13, %v5572_v17  ;;  %v1373_v30 = vmul.f32 %v4676_v14, %v5575_v18  ;;  %v4671_v11 = vld [vmem:[%s10473_s1 + $0x780] sm:$0xff] }
  0x2e   :  { %v801_v38 = vadd.f32 %v721_v0, %v584_v20  ;;  %v5605_v40 = vrot.slane %v86_v39, %v5498_v49  ;;  %v5608_v41 = vrot.slane %v87_v43, %v5498_v49  ;;  %v146_v44 = vmul.f32 %v5501_v50, %v90_v19  ;;  %v4551_v39 = vld [vmem:[%s10473_s1 + $0x3c0] sm:$0xff]  ;;  %v4552_v43 = vld [vmem:[%s10473_s1 + $0x3c8] sm:$0xff] }
  0x2f   :  { %v802_v46 = vadd.f32 %v722_v4, %v585_v27  ;;  %v147_v51 = vmul.f32 %v5522_v57, %v91_v24  ;;  %v283_v53 = vmul.f32 %v4471_v25, %v5507_v52  ;;  %v284_v55 = vmul.f32 %v4472_v26, %v5525_v58  ;;  %v4672_v20 = vld [vmem:[%s10473_s1 + $0x788] sm:$0xff]  ;;  %v4711_v26 = vld [vmem:[%s10473_s1 + $0x8c0] sm:$0xff]  ;;  %v96_v27 = vld [vmem:[%s10473_s1 + $0x30] sm:$0xff] }
  0x30   :  { %v1018_v62 = vadd.f32 %v938_v21, %v801_v38  ;;  %v1589_v63 = vmul.f32 %v4715_v33, %v5605_v40  ;;  %v1590_v0 = vmul.f32 %v4716_v34, %v5608_v41  ;;  %v500_v1 = vmul.f32 %v4511_v35, %v5513_v54  ;;  %v97_v38 = vld [vmem:[%s10473_s1 + $0x38] sm:$0xff] }
  0x31   :  { %v1019_v3 = vadd.f32 %v939_v22, %v802_v46  ;;  %v363_v4 = vadd.f32 %v283_v53, %v146_v44  ;;  %v364_v5 = vadd.f32 %v284_v55, %v147_v51  ;;  %v501_v6 = vmul.f32 %v4512_v45, %v5528_v59  ;;  %v4477_v44 = vld [vmem:[%s10473_s1 + $0x170] sm:$0xff] }
  0x32   :  { %v1235_v13 = vadd.f32 %v1155_v23, %v1018_v62  ;;  %v717_v14 = vmul.f32 %v4551_v39, %v5519_v56  ;;  %v718_v15 = vmul.f32 %v4552_v43, %v5531_v60  ;;  %v934_v19 = vmul.f32 %v4591_v61, %v5551_v9  ;;  %v4712_v23 = vld [vmem:[%s10473_s1 + $0x8c8] sm:$0xff]  ;;  %v4517_v55 = vld [vmem:[%s10473_s1 + $0x2b0] sm:$0xff]  ;;  %v4518_v39 = vld [vmem:[%s10473_s1 + $0x2b8] sm:$0xff] }
  0x33   :  { %v1236_v21 = vadd.f32 %v1156_v28, %v1019_v3  ;;  %v580_v22 = vadd.f32 %v500_v1, %v363_v4  ;;  %v581_v24 = vadd.f32 %v501_v6, %v364_v5  ;;  %v935_v25 = vmul.f32 %v4592_v2, %v5554_v10  ;;  %v4557_v1 = vld [vmem:[%s10473_s1 + $0x3f0] sm:$0xff] }
  0x34   :  { %v1452_v33 = vadd.f32 %v1372_v29, %v1235_v13  ;;  %v1151_v34 = vmul.f32 %v4631_v7, %v5560_v12  ;;  %v1152_v28 = vmul.f32 %v4632_v8, %v5569_v16  ;;  %v1368_v35 = vmul.f32 %v4671_v11, %v5572_v17  ;;  %v4478_v29 = vld [vmem:[%s10473_s1 + $0x178] sm:$0xff] }
  0x35   :  { %v1453_v45 = vadd.f32 %v1373_v30, %v1236_v21  ;;  %v797_v46 = vadd.f32 %v717_v14, %v580_v22  ;;  %v798_v51 = vadd.f32 %v718_v15, %v581_v24  ;;  %v1369_v53 = vmul.f32 %v4672_v20, %v5575_v18  ;;  %v4598_v13 = vld [vmem:[%s10473_s1 + $0x538] sm:$0xff]  ;;  %v4637_v21 = vld [vmem:[%s10473_s1 + $0x670] sm:$0xff] }
  0x36   :  { %v5677_v43 = vadd.f32 %v1589_v63, %v1452_v33  ;;  %v1585_v30 = vmul.f32 %v4711_v26, %v5605_v40  ;;  %v1586_v61 = vmul.f32 %v4712_v23, %v5608_v41  ;;  %v152_v62 = vmul.f32 %v5501_v50, %v96_v27  ;;  %v4558_v63 = vld [vmem:[%s10473_s1 + $0x3f8] sm:$0xff]  ;;  %v4677_v27 = vld [vmem:[%s10473_s1 + $0x7b0] sm:$0xff] }
  0x37   :  { %v5685_v2 = vadd.f32 %v1590_v0, %v1453_v45  ;;  %v1014_v3 = vadd.f32 %v934_v19, %v797_v46  ;;  %v1015_v4 = vadd.f32 %v935_v25, %v798_v51  ;;  %v153_v5 = vmul.f32 %v5522_v57, %v97_v38  ;;  %v4597_v0 = vld [vmem:[%s10473_s1 + $0x530] sm:$0xff]  ;;  %v4638_v22 = vld [vmem:[%s10473_s1 + $0x678] sm:$0xff] }
  0x38   :  { %10694 = vst [vmem:[#allocation2_spill] sm:$0xff] %v5677_v43  ;;  %v289_v6 = vmul.f32 %v4477_v44, %v5507_v52  ;;  %v290_v7 = vmul.f32 %v4478_v29, %v5525_v58  ;;  %v506_v8 = vmul.f32 %v4517_v55, %v5513_v54  ;;  %v507_v11 = vmul.f32 %v4518_v39, %v5528_v59  ;;  %v4678_v33 = vld [vmem:[%s10473_s1 + $0x7b8] sm:$0xff]  ;;  %v4717_v45 = vld [vmem:[%s10473_s1 + $0x8f0] sm:$0xff] }
  0x39   :  { %10695 = vst [vmem:[#allocation3_spill] sm:$0xff] %v5685_v2  ;;  %v1753_v14 = vsel %vm25_vm0, %v5685_v2, 0.0  ;;  %v1231_v15 = vadd.f32 %v1151_v34, %v1014_v3  ;;  %v1232_v19 = vadd.f32 %v1152_v28, %v1015_v4  ;;  %v723_v20 = vmul.f32 %v4557_v1, %v5519_v56  ;;  %v4718_v46 = vld [vmem:[%s10473_s1 + $0x8f8] sm:$0xff] }
  0x3a   :  { %v1754_v24 = vadd.f32 %v1753_v14, %v5677_v43  ;;  %v369_v25 = vadd.f32 %v289_v6, %v152_v62  ;;  %v370_v26 = vadd.f32 %v290_v7, %v153_v5  ;;  %v724_v23 = vmul.f32 %v4558_v63, %v5531_v60  ;;  %v93_v39 = vld [vmem:[%s10473_s1 + $0x18] sm:$0xff]  ;;  %v4473_v62 = vld [vmem:[%s10473_s1 + $0x150] sm:$0xff] }
  0x3b   :  { %v1448_v34 = vadd.f32 %v1368_v35, %v1231_v15  ;;  %v1449_v28 = vadd.f32 %v1369_v53, %v1232_v19  ;;  %v940_v38 = vmul.f32 %v4597_v0, %v5551_v9  ;;  %v941_v44 = vmul.f32 %v4598_v13, %v5554_v10  ;;  %v92_v53 = vld [vmem:[%s10473_s1 + $0x10] sm:$0xff]  ;;  %v4474_v63 = vld [vmem:[%s10473_s1 + $0x158] sm:$0xff] }
  0x3c   :  { %1755 = vadd.xlane.f32.xlu1 %v1754_v24  ;;  %v586_v51 = vadd.f32 %v506_v8, %v369_v25  ;;  %v587_v29 = vadd.f32 %v507_v11, %v370_v26  ;;  %v1157_v55 = vmul.f32 %v4637_v21, %v5560_v12  ;;  %v1158_v35 = vmul.f32 %v4638_v22, %v5569_v16  ;;  %v4553_v0 = vld [vmem:[%s10473_s1 + $0x3d0] sm:$0xff] }
  0x3d   :  { %v5737_v1 = vadd.f32 %v1585_v30, %v1448_v34  ;;  %v5739_v3 = vadd.f32 %v1586_v61, %v1449_v28  ;;  %v1374_v4 = vmul.f32 %v4677_v27, %v5572_v17  ;;  %v1375_v5 = vmul.f32 %v4678_v33, %v5575_v18  ;;  %v4513_v30 = vld [vmem:[%s10473_s1 + $0x290] sm:$0xff]  ;;  %v4514_v61 = vld [vmem:[%s10473_s1 + $0x298] sm:$0xff] }
  0x3e   :  { %v803_v6 = vadd.f32 %v723_v20, %v586_v51  ;;  %v804_v7 = vadd.f32 %v724_v23, %v587_v29  ;;  %v1591_v8 = vmul.f32 %v4717_v45, %v5605_v40  ;;  %v1592_v11 = vmul.f32 %v4718_v46, %v5608_v41  ;;  %v4554_v20 = vld [vmem:[%s10473_s1 + $0x3d8] sm:$0xff]  ;;  %v4593_v26 = vld [vmem:[%s10473_s1 + $0x510] sm:$0xff] }
  0x3f   :  { %10696 = vst [vmem:[#allocation4_spill] sm:$0xff] %v5737_v1  ;;  %10697 = vst [vmem:[#allocation5_spill] sm:$0xff] %v5739_v3  ;;  %v1745_v13 = vsel %vm25_vm0, %v5739_v3, 0.0  ;;  %v148_v14 = vmul.f32 %v5501_v50, %v92_v53  ;;  %v149_v15 = vmul.f32 %v5522_v57, %v93_v39  ;;  %v285_v19 = vmul.f32 %v4473_v62, %v5507_v52  ;;  %v4594_v23 = vld [vmem:[%s10473_s1 + $0x518] sm:$0xff]  ;;  %v4633_v27 = vld [vmem:[%s10473_s1 + $0x650] sm:$0xff] }
  0x40   :  { %v1746_v21 = vadd.f32 %v1745_v13, %v5737_v1  ;;  %v1020_v22 = vadd.f32 %v940_v38, %v803_v6  ;;  %v1021_v24 = vadd.f32 %v941_v44, %v804_v7  ;;  %v286_v25 = vmul.f32 %v4474_v63, %v5525_v58  ;;  %v4634_v44 = vld [vmem:[%s10473_s1 + $0x658] sm:$0xff]  ;;  %v4673_v53 = vld [vmem:[%s10473_s1 + $0x790] sm:$0xff] }
  0x41   :  { %v365_v33 = vadd.f32 %v285_v19, %v148_v14  ;;  %v502_v34 = vmul.f32 %v4513_v30, %v5513_v54  ;;  %v503_v28 = vmul.f32 %v4514_v61, %v5528_v59  ;;  %v719_v38 = vmul.f32 %v4553_v0, %v5519_v56  ;;  %v4674_v39 = vld [vmem:[%s10473_s1 + $0x798] sm:$0xff]  ;;  %v4713_v62 = vld [vmem:[%s10473_s1 + $0x8d0] sm:$0xff] }
  0x42   :  { %1747 = vadd.xlane.f32.xlu0 %v1746_v21  ;;  %v1237_v45 = vadd.f32 %v1157_v55, %v1020_v22  ;;  %v1238_v46 = vadd.f32 %v1158_v35, %v1021_v24  ;;  %v366_v51 = vadd.f32 %v286_v25, %v149_v15  ;;  %v720_v29 = vmul.f32 %v4554_v20, %v5531_v60  ;;  %v4714_v7 = vld [vmem:[%s10473_s1 + $0x8d8] sm:$0xff]  ;;  %v100_v14 = vld [vmem:[%s10473_s1 + $0x50] sm:$0xff] }
  0x43   :  { %v582_v63 = vadd.f32 %v502_v34, %v365_v33  ;;  %v936_v6 = vmul.f32 %v4593_v26, %v5551_v9  ;;  %v937_v55 = vmul.f32 %v4594_v23, %v5554_v10  ;;  %v1153_v35 = vmul.f32 %v4633_v27, %v5560_v12  ;;  %v101_v15 = vld [vmem:[%s10473_s1 + $0x58] sm:$0xff]  ;;  %v4481_v19 = vld [vmem:[%s10473_s1 + $0x190] sm:$0xff] }
  0x44   :  { %v1454_v30 = vadd.f32 %v1374_v4, %v1237_v45  ;;  %v1455_v61 = vadd.f32 %v1375_v5, %v1238_v46  ;;  %v583_v0 = vadd.f32 %v503_v28, %v366_v51  ;;  %v1154_v13 = vmul.f32 %v4634_v44, %v5569_v16  ;;  %v4482_v22 = vld [vmem:[%s10473_s1 + $0x198] sm:$0xff]  ;;  %v4521_v24 = vld [vmem:[%s10473_s1 + $0x2d0] sm:$0xff] }
  0x45   :  { %v799_v20 = vadd.f32 %v719_v38, %v582_v63  ;;  %v1370_v21 = vmul.f32 %v4673_v53, %v5572_v17  ;;  %v1371_v4 = vmul.f32 %v4674_v39, %v5575_v18  ;;  %v1587_v5 = vmul.f32 %v4713_v62, %v5605_v40  ;;  %v4522_v33 = vld [vmem:[%s10473_s1 + $0x2d8] sm:$0xff]  ;;  %v4601_v53 = vld [vmem:[%s10473_s1 + $0x550] sm:$0xff] }
  0x46   :  { %v5817_v25 = vadd.f32 %v1591_v8, %v1454_v30  ;;  %v5819_v26 = vadd.f32 %v1592_v11, %v1455_v61  ;;  %v800_v23 = vadd.f32 %v720_v29, %v583_v0  ;;  %v1588_v27 = vmul.f32 %v4714_v7, %v5608_v41  ;;  %v4561_v8 = vld [vmem:[%s10473_s1 + $0x410] sm:$0xff]  ;;  %v4562_v11 = vld [vmem:[%s10473_s1 + $0x418] sm:$0xff] }
  0x47   :  { %v1016_v34 = vadd.f32 %v936_v6, %v799_v20  ;;  %v156_v28 = vmul.f32 %v5501_v50, %v100_v14  ;;  %v157_v38 = vmul.f32 %v5522_v57, %v101_v15  ;;  %v293_v44 = vmul.f32 %v4481_v19, %v5507_v52  ;;  %v4602_v39 = vld [vmem:[%s10473_s1 + $0x558] sm:$0xff] }
  0x48   :  { %10698 = vst [vmem:[#allocation6_spill] sm:$0xff] %v5817_v25  ;;  %10699 = vst [vmem:[#allocation7_spill] sm:$0xff] %v5819_v26  ;;  %v1757_v45 = vsel %vm25_vm0, %v5819_v26, 0.0  ;;  %v1017_v46 = vadd.f32 %v937_v55, %v800_v23  ;;  %v294_v51 = vmul.f32 %v4482_v22, %v5525_v58  ;;  %v510_v29 = vmul.f32 %v4521_v24, %v5513_v54  ;;  %v4641_v55 = vld [vmem:[%s10473_s1 + $0x690] sm:$0xff]  ;;  %v4642_v30 = vld [vmem:[%s10473_s1 + $0x698] sm:$0xff] }
  0x49   :  { %v1758_v62 = vadd.f32 %v1757_v45, %v5817_v25  ;;  %v1233_v63 = vadd.f32 %v1153_v35, %v1016_v34  ;;  %v373_v6 = vadd.f32 %v293_v44, %v156_v28  ;;  %v511_v7 = vmul.f32 %v4522_v33, %v5528_v59  ;;  %v4681_v35 = vld [vmem:[%s10473_s1 + $0x7d0] sm:$0xff]  ;;  %v4682_v19 = vld [vmem:[%s10473_s1 + $0x7d8] sm:$0xff] }
  0x4a   :  { %v1234_v61 = vadd.f32 %v1154_v13, %v1017_v46  ;;  %v374_v0 = vadd.f32 %v294_v51, %v157_v38  ;;  %v727_v14 = vmul.f32 %v4561_v8, %v5519_v56  ;;  %v728_v15 = vmul.f32 %v4562_v11, %v5531_v60  ;;  %v4721_v23 = vld [vmem:[%s10473_s1 + $0x910] sm:$0xff]  ;;  %v4722_v33 = vld [vmem:[%s10473_s1 + $0x918] sm:$0xff]  ;;  %v99_v8 = vld [vmem:[%s10473_s1 + $0x48] sm:$0xff] }
  0x4b   :  { %1759 = vadd.xlane.f32.xlu1 %v1758_v62  ;;  %v1450_v20 = vadd.f32 %v1370_v21, %v1233_v63  ;;  %v590_v22 = vadd.f32 %v510_v29, %v373_v6  ;;  %v944_v24 = vmul.f32 %v4601_v53, %v5551_v9  ;;  %v945_v13 = vmul.f32 %v4602_v39, %v5554_v10  ;;  %v98_v21 = vld [vmem:[%s10473_s1 + $0x40] sm:$0xff]  ;;  %v4480_v29 = vld [vmem:[%s10473_s1 + $0x188] sm:$0xff] }
  0x4c   :  { %v1451_v34 = vadd.f32 %v1371_v4, %v1234_v61  ;;  %v591_v28 = vadd.f32 %v511_v7, %v374_v0  ;;  %v1161_v38 = vmul.f32 %v4641_v55, %v5560_v12  ;;  %v1162_v44 = vmul.f32 %v4642_v30, %v5569_v16  ;;  %v4479_v11 = vld [vmem:[%s10473_s1 + $0x180] sm:$0xff]  ;;  %v4520_v6 = vld [vmem:[%s10473_s1 + $0x2c8] sm:$0xff] }
  0x4d   :  { %v5879_v45 = vadd.f32 %v1587_v5, %v1450_v20  ;;  %v807_v4 = vadd.f32 %v727_v14, %v590_v22  ;;  %v1378_v46 = vmul.f32 %v4681_v35, %v5572_v17  ;;  %v1379_v51 = vmul.f32 %v4682_v19, %v5575_v18  ;;  %v4519_v53 = vld [vmem:[%s10473_s1 + $0x2c0] sm:$0xff]  ;;  %v4560_v0 = vld [vmem:[%s10473_s1 + $0x408] sm:$0xff] }
  0x4e   :  { %v5889_v39 = vadd.f32 %v1588_v27, %v1451_v34  ;;  %v808_v62 = vadd.f32 %v728_v15, %v591_v28  ;;  %v1595_v63 = vmul.f32 %v4721_v23, %v5605_v40  ;;  %v1596_v5 = vmul.f32 %v4722_v33, %v5608_v41  ;;  %v4559_v27 = vld [vmem:[%s10473_s1 + $0x400] sm:$0xff]  ;;  %v4600_v22 = vld [vmem:[%s10473_s1 + $0x548] sm:$0xff] }
  0x4f   :  { %10700 = vst [vmem:[#allocation8_spill] sm:$0xff] %v5879_v45  ;;  %v1024_v7 = vadd.f32 %v944_v24, %v807_v4  ;;  %v154_v55 = vmul.f32 %v5501_v50, %v98_v21  ;;  %v155_v30 = vmul.f32 %v5522_v57, %v99_v8  ;;  %v291_v61 = vmul.f32 %v4479_v11, %v5507_v52  ;;  %v4599_v20 = vld [vmem:[%s10473_s1 + $0x540] sm:$0xff]  ;;  %v4640_v28 = vld [vmem:[%s10473_s1 + $0x688] sm:$0xff] }
  0x50   :  { %10701 = vst [vmem:[#allocation9_spill] sm:$0xff] %v5889_v39  ;;  %v1749_v14 = vsel %vm25_vm0, %v5889_v39, 0.0  ;;  %v1025_v15 = vadd.f32 %v945_v13, %v808_v62  ;;  %v292_v35 = vmul.f32 %v4480_v29, %v5525_v58  ;;  %v508_v19 = vmul.f32 %v4519_v53, %v5513_v54  ;;  %v4639_v13 = vld [vmem:[%s10473_s1 + $0x680] sm:$0xff]  ;;  %v4680_v29 = vld [vmem:[%s10473_s1 + $0x7c8] sm:$0xff] }
  0x51   :  { %v1750_v24 = vadd.f32 %v1749_v14, %v5879_v45  ;;  %v1241_v23 = vadd.f32 %v1161_v38, %v1024_v7  ;;  %v371_v33 = vadd.f32 %v291_v61, %v154_v55  ;;  %v509_v34 = vmul.f32 %v4520_v6, %v5528_v59  ;;  %v4679_v38 = vld [vmem:[%s10473_s1 + $0x7c0] sm:$0xff]  ;;  %v4720_v55 = vld [vmem:[%s10473_s1 + $0x908] sm:$0xff]  ;;  %v105_v14 = vld [vmem:[%s10473_s1 + $0x78] sm:$0xff] }
  0x52   :  { %v1242_v21 = vadd.f32 %v1162_v44, %v1025_v15  ;;  %v372_v8 = vadd.f32 %v292_v35, %v155_v30  ;;  %v725_v11 = vmul.f32 %v4559_v27, %v5519_v56  ;;  %v726_v4 = vmul.f32 %v4560_v0, %v5531_v60  ;;  %v4719_v7 = vld [vmem:[%s10473_s1 + $0x900] sm:$0xff]  ;;  %v4485_v15 = vld [vmem:[%s10473_s1 + $0x1b0] sm:$0xff] }
  0x53   :  { %1751 = vadd.xlane.f32.xlu0 %v1750_v24  ;;  %v1458_v53 = vadd.f32 %v1378_v46, %v1241_v23  ;;  %v588_v62 = vadd.f32 %v508_v19, %v371_v33  ;;  %v942_v6 = vmul.f32 %v4599_v20, %v5551_v9  ;;  %v943_v44 = vmul.f32 %v4600_v22, %v5554_v10  ;;  %v104_v46 = vld [vmem:[%s10473_s1 + $0x70] sm:$0xff]  ;;  %v4486_v22 = vld [vmem:[%s10473_s1 + $0x1b8] sm:$0xff] }
  0x54   :  { %v1459_v30 = vadd.f32 %v1379_v51, %v1242_v21  ;;  %v589_v61 = vadd.f32 %v509_v34, %v372_v8  ;;  %v1159_v27 = vmul.f32 %v4639_v13, %v5560_v12  ;;  %v1160_v0 = vmul.f32 %v4640_v28, %v5569_v16  ;;  %v4525_v24 = vld [vmem:[%s10473_s1 + $0x2f0] sm:$0xff]  ;;  %v4526_v13 = vld [vmem:[%s10473_s1 + $0x2f8] sm:$0xff] }
  0x55   :  { %v5950_v35 = vadd.f32 %v1595_v63, %v1458_v53  ;;  %v805_v51 = vadd.f32 %v725_v11, %v588_v62  ;;  %v1376_v19 = vmul.f32 %v4679_v38, %v5572_v17  ;;  %v1377_v20 = vmul.f32 %v4680_v29, %v5575_v18 }
  0x56   :  { %v5960_v23 = vadd.f32 %v1596_v5, %v1459_v30  ;;  %v806_v33 = vadd.f32 %v726_v4, %v589_v61  ;;  %v1593_v34 = vmul.f32 %v4719_v7, %v5605_v40  ;;  %v1594_v63 = vmul.f32 %v4720_v55, %v5608_v41  ;;  %v4565_v5 = vld [vmem:[%s10473_s1 + $0x430] sm:$0xff]  ;;  %v4566_v4 = vld [vmem:[%s10473_s1 + $0x438] sm:$0xff] }
  0x57   :  { %10702 = vst [vmem:[#allocation10_spill] sm:$0xff] %v5950_v35  ;;  %v1022_v28 = vadd.f32 %v942_v6, %v805_v51  ;;  %v160_v21 = vmul.f32 %v5501_v50, %v104_v46  ;;  %v161_v8 = vmul.f32 %v5522_v57, %v105_v14  ;;  %v297_v11 = vmul.f32 %v4485_v15, %v5507_v52  ;;  %v4605_v6 = vld [vmem:[%s10473_s1 + $0x570] sm:$0xff]  ;;  %v4606_v7 = vld [vmem:[%s10473_s1 + $0x578] sm:$0xff] }
  0x58   :  { %10703 = vst [vmem:[#allocation11_spill] sm:$0xff] %v5960_v23  ;;  %v1765_v38 = vsel %vm25_vm0, %v5960_v23, 0.0  ;;  %v1023_v29 = vadd.f32 %v943_v44, %v806_v33  ;;  %v298_v53 = vmul.f32 %v4486_v22, %v5525_v58  ;;  %v514_v62 = vmul.f32 %v4525_v24, %v5513_v54  ;;  %v4645_v44 = vld [vmem:[%s10473_s1 + $0x6b0] sm:$0xff]  ;;  %v4646_v14 = vld [vmem:[%s10473_s1 + $0x6b8] sm:$0xff] }
  0x59   :  { %v1766_v55 = vadd.f32 %v1765_v38, %v5950_v35  ;;  %v1239_v30 = vadd.f32 %v1159_v27, %v1022_v28  ;;  %v377_v61 = vadd.f32 %v297_v11, %v160_v21  ;;  %v515_v46 = vmul.f32 %v4526_v13, %v5528_v59  ;;  %v4685_v27 = vld [vmem:[%s10473_s1 + $0x7f0] sm:$0xff]  ;;  %v4686_v33 = vld [vmem:[%s10473_s1 + $0x7f8] sm:$0xff] }
  0x5a   :  { %v1240_v15 = vadd.f32 %v1160_v0, %v1023_v29  ;;  %v378_v51 = vadd.f32 %v298_v53, %v161_v8  ;;  %v731_v22 = vmul.f32 %v4565_v5, %v5519_v56  ;;  %v732_v24 = vmul.f32 %v4566_v4, %v5531_v60  ;;  %v4725_v8 = vld [vmem:[%s10473_s1 + $0x930] sm:$0xff]  ;;  %v4726_v11 = vld [vmem:[%s10473_s1 + $0x938] sm:$0xff]  ;;  %v103_v53 = vld [vmem:[%s10473_s1 + $0x68] sm:$0xff] }
  0x5b   :  { %1767 = vadd.xlane.f32.xlu1 %v1766_v55  ;;  %v1456_v13 = vadd.f32 %v1376_v19, %v1239_v30  ;;  %v594_v28 = vadd.f32 %v514_v62, %v377_v61  ;;  %v948_v21 = vmul.f32 %v4605_v6, %v5551_v9  ;;  %v949_v0 = vmul.f32 %v4606_v7, %v5554_v10  ;;  %v102_v19 = vld [vmem:[%s10473_s1 + $0x60] sm:$0xff]  ;;  %v4484_v30 = vld [vmem:[%s10473_s1 + $0x1a8] sm:$0xff] }
  0x5c   :  { %v1457_v5 = vadd.f32 %v1377_v20, %v1240_v15  ;;  %v595_v4 = vadd.f32 %v515_v46, %v378_v51  ;;  %v1165_v38 = vmul.f32 %v4645_v44, %v5560_v12  ;;  %v1166_v29 = vmul.f32 %v4646_v14, %v5569_v16  ;;  %v4483_v62 = vld [vmem:[%s10473_s1 + $0x1a0] sm:$0xff]  ;;  %v4524_v15 = vld [vmem:[%s10473_s1 + $0x2e8] sm:$0xff] }
  0x5d   :  { %v6021_v6 = vadd.f32 %v1593_v34, %v1456_v13  ;;  %v811_v20 = vadd.f32 %v731_v22, %v594_v28  ;;  %v1382_v7 = vmul.f32 %v4685_v27, %v5572_v17  ;;  %v1383_v55 = vmul.f32 %v4686_v33, %v5575_v18  ;;  %v4523_v61 = vld [vmem:[%s10473_s1 + $0x2e0] sm:$0xff] }
  0x5e   :  { %v6031_v46 = vadd.f32 %v1594_v63, %v1457_v5  ;;  %v812_v44 = vadd.f32 %v732_v24, %v595_v4  ;;  %v1599_v14 = vmul.f32 %v4725_v8, %v5605_v40  ;;  %v1600_v34 = vmul.f32 %v4726_v11, %v5608_v41  ;;  %v4563_v63 = vld [vmem:[%s10473_s1 + $0x420] sm:$0xff]  ;;  %v4564_v24 = vld [vmem:[%s10473_s1 + $0x428] sm:$0xff] }
  0x5f   :  { %10704 = vst [vmem:[#allocation12_spill] sm:$0xff] %v6021_v6  ;;  %v1028_v51 = vadd.f32 %v948_v21, %v811_v20  ;;  %v158_v22 = vmul.f32 %v5501_v50, %v102_v19  ;;  %v159_v27 = vmul.f32 %v5522_v57, %v103_v53  ;;  %v295_v33 = vmul.f32 %v4483_v62, %v5507_v52  ;;  %v4603_v11 = vld [vmem:[%s10473_s1 + $0x560] sm:$0xff]  ;;  %v4604_v5 = vld [vmem:[%s10473_s1 + $0x568] sm:$0xff] }
  0x60   :  { %10705 = vst [vmem:[#allocation13_spill] sm:$0xff] %v6031_v46  ;;  %v1761_v13 = vsel %vm25_vm0, %v6031_v46, 0.0  ;;  %v1029_v28 = vadd.f32 %v949_v0, %v812_v44  ;;  %v296_v21 = vmul.f32 %v4484_v30, %v5525_v58  ;;  %v512_v8 = vmul.f32 %v4523_v61, %v5513_v54  ;;  %v4643_v0 = vld [vmem:[%s10473_s1 + $0x6a0] sm:$0xff]  ;;  %v4644_v20 = vld [vmem:[%s10473_s1 + $0x6a8] sm:$0xff] }
  0x61   :  { %v1762_v4 = vadd.f32 %v1761_v13, %v6021_v6  ;;  %v1245_v19 = vadd.f32 %v1165_v38, %v1028_v51  ;;  %v375_v53 = vadd.f32 %v295_v33, %v158_v22  ;;  %v513_v62 = vmul.f32 %v4524_v15, %v5528_v59  ;;  %v4683_v38 = vld [vmem:[%s10473_s1 + $0x7e0] sm:$0xff]  ;;  %v4684_v15 = vld [vmem:[%s10473_s1 + $0x7e8] sm:$0xff] }
  0x62   :  { %v1246_v30 = vadd.f32 %v1166_v29, %v1029_v28  ;;  %v376_v61 = vadd.f32 %v296_v21, %v159_v27  ;;  %v729_v44 = vmul.f32 %v4563_v63, %v5519_v56  ;;  %v730_v46 = vmul.f32 %v4564_v24, %v5531_v60  ;;  %v4723_v27 = vld [vmem:[%s10473_s1 + $0x920] sm:$0xff]  ;;  %v4724_v63 = vld [vmem:[%s10473_s1 + $0x928] sm:$0xff] }
  0x63   :  { %1763 = vadd.xlane.f32.xlu0 %v1762_v4  ;;  %v1462_v51 = vadd.f32 %v1382_v7, %v1245_v19  ;;  %v592_v22 = vadd.f32 %v512_v8, %v375_v53  ;;  %v946_v33 = vmul.f32 %v4603_v11, %v5551_v9  ;;  %v947_v29 = vmul.f32 %v4604_v5, %v5554_v10  ;;  %v108_v7 = vld [vmem:[%s10473_s1 + $0x90] sm:$0xff]  ;;  %v109_v8 = vld [vmem:[%s10473_s1 + $0x98] sm:$0xff] }
  0x64   :  { %v1463_v24 = vadd.f32 %v1383_v55, %v1246_v30  ;;  %v593_v13 = vadd.f32 %v513_v62, %v376_v61  ;;  %v1163_v28 = vmul.f32 %v4643_v0, %v5560_v12  ;;  %v1164_v21 = vmul.f32 %v4644_v20, %v5569_v16  ;;  %v4489_v11 = vld [vmem:[%s10473_s1 + $0x1d0] sm:$0xff]  ;;  %v4490_v53 = vld [vmem:[%s10473_s1 + $0x1d8] sm:$0xff] }
  0x65   :  { %v6092_v5 = vadd.f32 %v1599_v14, %v1462_v51  ;;  %v809_v55 = vadd.f32 %v729_v44, %v592_v22  ;;  %v1380_v4 = vmul.f32 %v4683_v38, %v5572_v17  ;;  %v1381_v19 = vmul.f32 %v4684_v15, %v5575_v18  ;;  %v4529_v62 = vld [vmem:[%s10473_s1 + $0x310] sm:$0xff]  ;;  %v4530_v61 = vld [vmem:[%s10473_s1 + $0x318] sm:$0xff] }
  0x66   :  { %v6102_v0 = vadd.f32 %v1600_v34, %v1463_v24  ;;  %v810_v20 = vadd.f32 %v730_v46, %v593_v13  ;;  %v1597_v30 = vmul.f32 %v4723_v27, %v5605_v40  ;;  %v1598_v14 = vmul.f32 %v4724_v63, %v5608_v41  ;;  %v4569_v34 = vld [vmem:[%s10473_s1 + $0x450] sm:$0xff]  ;;  %v4570_v46 = vld [vmem:[%s10473_s1 + $0x458] sm:$0xff] }
  0x67   :  { %10706 = vst [vmem:[#allocation14_spill] sm:$0xff] %v6092_v5  ;;  %v1026_v44 = vadd.f32 %v946_v33, %v809_v55  ;;  %v164_v38 = vmul.f32 %v5501_v50, %v108_v7  ;;  %v165_v15 = vmul.f32 %v5522_v57, %v109_v8  ;;  %v301_v51 = vmul.f32 %v4489_v11, %v5507_v52  ;;  %v4609_v24 = vld [vmem:[%s10473_s1 + $0x590] sm:$0xff]  ;;  %v4610_v13 = vld [vmem:[%s10473_s1 + $0x598] sm:$0xff] }
  0x68   :  { %10707 = vst [vmem:[#allocation15_spill] sm:$0xff] %v6102_v0  ;;  %v1773_v22 = vsel %vm25_vm0, %v6102_v0, 0.0  ;;  %v1027_v27 = vadd.f32 %v947_v29, %v810_v20  ;;  %v302_v33 = vmul.f32 %v4490_v53, %v5525_v58  ;;  %v518_v63 = vmul.f32 %v4529_v62, %v5513_v54  ;;  %v4649_v29 = vld [vmem:[%s10473_s1 + $0x6d0] sm:$0xff]  ;;  %v4650_v53 = vld [vmem:[%s10473_s1 + $0x6d8] sm:$0xff] }
  0x69   :  { %v1774_v7 = vadd.f32 %v1773_v22, %v6092_v5  ;;  %v1243_v8 = vadd.f32 %v1163_v28, %v1026_v44  ;;  %v381_v11 = vadd.f32 %v301_v51, %v164_v38  ;;  %v519_v55 = vmul.f32 %v4530_v61, %v5528_v59  ;;  %v4689_v28 = vld [vmem:[%s10473_s1 + $0x810] sm:$0xff]  ;;  %v4690_v61 = vld [vmem:[%s10473_s1 + $0x818] sm:$0xff] }
  0x6a   :  { %v1244_v62 = vadd.f32 %v1164_v21, %v1027_v27  ;;  %v382_v20 = vadd.f32 %v302_v33, %v165_v15  ;;  %v735_v0 = vmul.f32 %v4569_v34, %v5519_v56  ;;  %v736_v6 = vmul.f32 %v4570_v46, %v5531_v60  ;;  %v4729_v15 = vld [vmem:[%s10473_s1 + $0x950] sm:$0xff]  ;;  %v4730_v34 = vld [vmem:[%s10473_s1 + $0x958] sm:$0xff] }
  0x6b   :  { %1775 = vadd.xlane.f32.xlu1 %v1774_v7  ;;  %v1460_v44 = vadd.f32 %v1380_v4, %v1243_v8  ;;  %v598_v38 = vadd.f32 %v518_v63, %v381_v11  ;;  %v952_v51 = vmul.f32 %v4609_v24, %v5551_v9  ;;  %v953_v21 = vmul.f32 %v4610_v13, %v5554_v10  ;;  %v106_v4 = vld [vmem:[%s10473_s1 + $0x80] sm:$0xff]  ;;  %v107_v63 = vld [vmem:[%s10473_s1 + $0x88] sm:$0xff] }
  0x6c   :  { %v1461_v46 = vadd.f32 %v1381_v19, %v1244_v62  ;;  %v599_v22 = vadd.f32 %v519_v55, %v382_v20  ;;  %v1169_v27 = vmul.f32 %v4649_v29, %v5560_v12  ;;  %v1170_v33 = vmul.f32 %v4650_v53, %v5569_v16  ;;  %v4487_v24 = vld [vmem:[%s10473_s1 + $0x1c0] sm:$0xff]  ;;  %v4488_v11 = vld [vmem:[%s10473_s1 + $0x1c8] sm:$0xff] }
  0x6d   :  { %v6163_v13 = vadd.f32 %v1597_v30, %v1460_v44  ;;  %v815_v19 = vadd.f32 %v735_v0, %v598_v38  ;;  %v1386_v7 = vmul.f32 %v4689_v28, %v5572_v17  ;;  %v1387_v8 = vmul.f32 %v4690_v61, %v5575_v18  ;;  %v4527_v55 = vld [vmem:[%s10473_s1 + $0x300] sm:$0xff]  ;;  %v4528_v0 = vld [vmem:[%s10473_s1 + $0x308] sm:$0xff] }
  0x6e   :  { %v6173_v29 = vadd.f32 %v1598_v14, %v1461_v46  ;;  %v816_v53 = vadd.f32 %v736_v6, %v599_v22  ;;  %v1603_v62 = vmul.f32 %v4729_v15, %v5605_v40  ;;  %v1604_v30 = vmul.f32 %v4730_v34, %v5608_v41  ;;  %v4567_v14 = vld [vmem:[%s10473_s1 + $0x440] sm:$0xff]  ;;  %v4568_v6 = vld [vmem:[%s10473_s1 + $0x448] sm:$0xff] }
  0x6f   :  { %10708 = vst [vmem:[#allocation16_spill] sm:$0xff] %v6163_v13  ;;  %v1032_v20 = vadd.f32 %v952_v51, %v815_v19  ;;  %v162_v28 = vmul.f32 %v5501_v50, %v106_v4  ;;  %v163_v61 = vmul.f32 %v5522_v57, %v107_v63  ;;  %v299_v44 = vmul.f32 %v4487_v24, %v5507_v52  ;;  %v4607_v46 = vld [vmem:[%s10473_s1 + $0x580] sm:$0xff]  ;;  %v4608_v22 = vld [vmem:[%s10473_s1 + $0x588] sm:$0xff] }
  0x70   :  { %10709 = vst [vmem:[#allocation17_spill] sm:$0xff] %v6173_v29  ;;  %v1769_v38 = vsel %vm25_vm0, %v6173_v29, 0.0  ;;  %v1033_v15 = vadd.f32 %v953_v21, %v816_v53  ;;  %v300_v51 = vmul.f32 %v4488_v11, %v5525_v58  ;;  %v516_v34 = vmul.f32 %v4527_v55, %v5513_v54  ;;  %v4647_v21 = vld [vmem:[%s10473_s1 + $0x6c0] sm:$0xff]  ;;  %v4648_v11 = vld [vmem:[%s10473_s1 + $0x6c8] sm:$0xff] }
  0x71   :  { %v1770_v4 = vadd.f32 %v1769_v38, %v6163_v13  ;;  %v1249_v63 = vadd.f32 %v1169_v27, %v1032_v20  ;;  %v379_v24 = vadd.f32 %v299_v44, %v162_v28  ;;  %v517_v19 = vmul.f32 %v4528_v0, %v5528_v59  ;;  %v4687_v27 = vld [vmem:[%s10473_s1 + $0x800] sm:$0xff]  ;;  %v4688_v0 = vld [vmem:[%s10473_s1 + $0x808] sm:$0xff] }
  0x72   :  { %v1250_v55 = vadd.f32 %v1170_v33, %v1033_v15  ;;  %v380_v53 = vadd.f32 %v300_v51, %v163_v61  ;;  %v733_v29 = vmul.f32 %v4567_v14, %v5519_v56  ;;  %v734_v5 = vmul.f32 %v4568_v6, %v5531_v60  ;;  %v4727_v61 = vld [vmem:[%s10473_s1 + $0x940] sm:$0xff]  ;;  %v4728_v14 = vld [vmem:[%s10473_s1 + $0x948] sm:$0xff] }
  0x73   :  { %1771 = vadd.xlane.f32.xlu0 %v1770_v4  ;;  %v1466_v20 = vadd.f32 %v1386_v7, %v1249_v63  ;;  %v596_v28 = vadd.f32 %v516_v34, %v379_v24  ;;  %v950_v44 = vmul.f32 %v4607_v46, %v5551_v9  ;;  %v951_v33 = vmul.f32 %v4608_v22, %v5554_v10  ;;  %v112_v7 = vld [vmem:[%s10473_s1 + $0xb0] sm:$0xff]  ;;  %v113_v34 = vld [vmem:[%s10473_s1 + $0xb8] sm:$0xff] }
  0x74   :  { %v1467_v6 = vadd.f32 %v1387_v8, %v1250_v55  ;;  %v597_v38 = vadd.f32 %v517_v19, %v380_v53  ;;  %v1167_v15 = vmul.f32 %v4647_v21, %v5560_v12  ;;  %v1168_v51 = vmul.f32 %v4648_v11, %v5569_v16  ;;  %v4493_v46 = vld [vmem:[%s10473_s1 + $0x1f0] sm:$0xff]  ;;  %v4494_v24 = vld [vmem:[%s10473_s1 + $0x1f8] sm:$0xff] }
  0x75   :  { %v6234_v22 = vadd.f32 %v1603_v62, %v1466_v20  ;;  %v813_v8 = vadd.f32 %v733_v29, %v596_v28  ;;  %v1384_v4 = vmul.f32 %v4687_v27, %v5572_v17  ;;  %v1385_v63 = vmul.f32 %v4688_v0, %v5575_v18  ;;  %v4533_v19 = vld [vmem:[%s10473_s1 + $0x330] sm:$0xff]  ;;  %v4534_v29 = vld [vmem:[%s10473_s1 + $0x338] sm:$0xff] }
  0x76   :  { %v6244_v21 = vadd.f32 %v1604_v30, %v1467_v6  ;;  %v814_v11 = vadd.f32 %v734_v5, %v597_v38  ;;  %v1601_v55 = vmul.f32 %v4727_v61, %v5605_v40  ;;  %v1602_v62 = vmul.f32 %v4728_v14, %v5608_v41  ;;  %v4573_v30 = vld [vmem:[%s10473_s1 + $0x470] sm:$0xff]  ;;  %v4574_v5 = vld [vmem:[%s10473_s1 + $0x478] sm:$0xff] }
  0x77   :  { %10710 = vst [vmem:[#allocation18_spill] sm:$0xff] %v6234_v22  ;;  %v1030_v53 = vadd.f32 %v950_v44, %v813_v8  ;;  %v168_v27 = vmul.f32 %v5501_v50, %v112_v7  ;;  %v169_v0 = vmul.f32 %v5522_v57, %v113_v34  ;;  %v305_v20 = vmul.f32 %v4493_v46, %v5507_v52  ;;  %v4613_v6 = vld [vmem:[%s10473_s1 + $0x5b0] sm:$0xff]  ;;  %v4614_v38 = vld [vmem:[%s10473_s1 + $0x5b8] sm:$0xff] }
  0x78   :  { %10711 = vst [vmem:[#allocation19_spill] sm:$0xff] %v6244_v21  ;;  %v1781_v28 = vsel %vm25_vm0, %v6244_v21, 0.0  ;;  %v1031_v61 = vadd.f32 %v951_v33, %v814_v11  ;;  %v306_v44 = vmul.f32 %v4494_v24, %v5525_v58  ;;  %v522_v14 = vmul.f32 %v4533_v19, %v5513_v54  ;;  %v4653_v33 = vld [vmem:[%s10473_s1 + $0x6f0] sm:$0xff]  ;;  %v4654_v24 = vld [vmem:[%s10473_s1 + $0x6f8] sm:$0xff] }
  0x79   :  { %v1782_v7 = vadd.f32 %v1781_v28, %v6234_v22  ;;  %v1247_v34 = vadd.f32 %v1167_v15, %v1030_v53  ;;  %v385_v46 = vadd.f32 %v305_v20, %v168_v27  ;;  %v523_v8 = vmul.f32 %v4534_v29, %v5528_v59  ;;  %v4693_v15 = vld [vmem:[%s10473_s1 + $0x830] sm:$0xff]  ;;  %v4694_v29 = vld [vmem:[%s10473_s1 + $0x838] sm:$0xff] }
  0x7a   :  { %v1248_v19 = vadd.f32 %v1168_v51, %v1031_v61  ;;  %v386_v11 = vadd.f32 %v306_v44, %v169_v0  ;;  %v739_v21 = vmul.f32 %v4573_v30, %v5519_v56  ;;  %v740_v13 = vmul.f32 %v4574_v5, %v5531_v60  ;;  %v4733_v0 = vld [vmem:[%s10473_s1 + $0x970] sm:$0xff]  ;;  %v4734_v30 = vld [vmem:[%s10473_s1 + $0x978] sm:$0xff] }
  0x7b   :  { %1783 = vadd.xlane.f32.xlu1 %v1782_v7  ;;  %v1464_v53 = vadd.f32 %v1384_v4, %v1247_v34  ;;  %v602_v27 = vadd.f32 %v522_v14, %v385_v46  ;;  %v956_v20 = vmul.f32 %v4613_v6, %v5551_v9  ;;  %v957_v51 = vmul.f32 %v4614_v38, %v5554_v10  ;;  %v110_v4 = vld [vmem:[%s10473_s1 + $0xa0] sm:$0xff]  ;;  %v111_v14 = vld [vmem:[%s10473_s1 + $0xa8] sm:$0xff] }
  0x7c   :  { %v1465_v5 = vadd.f32 %v1385_v63, %v1248_v19  ;;  %v603_v28 = vadd.f32 %v523_v8, %v386_v11  ;;  %v1173_v61 = vmul.f32 %v4653_v33, %v5560_v12  ;;  %v1174_v44 = vmul.f32 %v4654_v24, %v5569_v16  ;;  %v4491_v6 = vld [vmem:[%s10473_s1 + $0x1e0] sm:$0xff]  ;;  %v4492_v46 = vld [vmem:[%s10473_s1 + $0x1e8] sm:$0xff] }
  0x7d   :  { %v6305_v38 = vadd.f32 %v1601_v55, %v1464_v53  ;;  %v819_v63 = vadd.f32 %v739_v21, %v602_v27  ;;  %v1390_v7 = vmul.f32 %v4693_v15, %v5572_v17  ;;  %v1391_v34 = vmul.f32 %v4694_v29, %v5575_v18  ;;  %v4531_v8 = vld [vmem:[%s10473_s1 + $0x320] sm:$0xff]  ;;  %v4532_v21 = vld [vmem:[%s10473_s1 + $0x328] sm:$0xff] }
  0x7e   :  { %v6315_v33 = vadd.f32 %v1602_v62, %v1465_v5  ;;  %v820_v24 = vadd.f32 %v740_v13, %v603_v28  ;;  %v1607_v19 = vmul.f32 %v4733_v0, %v5605_v40  ;;  %v1608_v55 = vmul.f32 %v4734_v30, %v5608_v41  ;;  %v4571_v62 = vld [vmem:[%s10473_s1 + $0x460] sm:$0xff]  ;;  %v4572_v13 = vld [vmem:[%s10473_s1 + $0x468] sm:$0xff] }
  0x7f   :  { %10712 = vst [vmem:[#allocation20_spill] sm:$0xff] %v6305_v38  ;;  %v1036_v11 = vadd.f32 %v956_v20, %v819_v63  ;;  %v166_v15 = vmul.f32 %v5501_v50, %v110_v4  ;;  %v167_v29 = vmul.f32 %v5522_v57, %v111_v14  ;;  %v303_v53 = vmul.f32 %v4491_v6, %v5507_v52  ;;  %v4611_v5 = vld [vmem:[%s10473_s1 + $0x5a0] sm:$0xff]  ;;  %v4612_v28 = vld [vmem:[%s10473_s1 + $0x5a8] sm:$0xff] }
  0x80   :  { %10713 = vst [vmem:[#allocation21_spill] sm:$0xff] %v6315_v33  ;;  %v1777_v27 = vsel %vm25_vm0, %v6315_v33, 0.0  ;;  %v1037_v0 = vadd.f32 %v957_v51, %v820_v24  ;;  %v304_v20 = vmul.f32 %v4492_v46, %v5525_v58  ;;  %v520_v30 = vmul.f32 %v4531_v8, %v5513_v54  ;;  %v4651_v51 = vld [vmem:[%s10473_s1 + $0x6e0] sm:$0xff]  ;;  %v4652_v46 = vld [vmem:[%s10473_s1 + $0x6e8] sm:$0xff] }
  0x81   :  { %v1778_v4 = vadd.f32 %v1777_v27, %v6305_v38  ;;  %v1253_v14 = vadd.f32 %v1173_v61, %v1036_v11  ;;  %v383_v6 = vadd.f32 %v303_v53, %v166_v15  ;;  %v521_v63 = vmul.f32 %v4532_v21, %v5528_v59  ;;  %v4691_v61 = vld [vmem:[%s10473_s1 + $0x820] sm:$0xff]  ;;  %v4692_v21 = vld [vmem:[%s10473_s1 + $0x828] sm:$0xff] }
  0x82   :  { %v1254_v8 = vadd.f32 %v1174_v44, %v1037_v0  ;;  %v384_v24 = vadd.f32 %v304_v20, %v167_v29  ;;  %v737_v33 = vmul.f32 %v4571_v62, %v5519_v56  ;;  %v738_v22 = vmul.f32 %v4572_v13, %v5531_v60  ;;  %v4731_v29 = vld [vmem:[%s10473_s1 + $0x960] sm:$0xff]  ;;  %v4732_v62 = vld [vmem:[%s10473_s1 + $0x968] sm:$0xff] }
  0x83   :  { %1779 = vadd.xlane.f32.xlu0 %v1778_v4  ;;  %v1470_v11 = vadd.f32 %v1390_v7, %v1253_v14  ;;  %v600_v15 = vadd.f32 %v520_v30, %v383_v6  ;;  %v954_v53 = vmul.f32 %v4611_v5, %v5551_v9  ;;  %v955_v44 = vmul.f32 %v4612_v28, %v5554_v10  ;;  %v116_v7 = vld [vmem:[%s10473_s1 + $0xd0] sm:$0xff]  ;;  %v117_v30 = vld [vmem:[%s10473_s1 + $0xd8] sm:$0xff] }
  0x84   :  { %v1471_v13 = vadd.f32 %v1391_v34, %v1254_v8  ;;  %v601_v27 = vadd.f32 %v521_v63, %v384_v24  ;;  %v1171_v0 = vmul.f32 %v4651_v51, %v5560_v12  ;;  %v1172_v20 = vmul.f32 %v4652_v46, %v5569_v16  ;;  %v4497_v5 = vld [vmem:[%s10473_s1 + $0x210] sm:$0xff]  ;;  %v4498_v6 = vld [vmem:[%s10473_s1 + $0x218] sm:$0xff] }
  0x85   :  { %v6376_v28 = vadd.f32 %v1607_v19, %v1470_v11  ;;  %v817_v34 = vadd.f32 %v737_v33, %v600_v15  ;;  %v1388_v4 = vmul.f32 %v4691_v61, %v5572_v17  ;;  %v1389_v14 = vmul.f32 %v4692_v21, %v5575_v18  ;;  %v4537_v63 = vld [vmem:[%s10473_s1 + $0x350] sm:$0xff]  ;;  %v4538_v33 = vld [vmem:[%s10473_s1 + $0x358] sm:$0xff] }
  0x86   :  { %v6386_v51 = vadd.f32 %v1608_v55, %v1471_v13  ;;  %v818_v46 = vadd.f32 %v738_v22, %v601_v27  ;;  %v1605_v8 = vmul.f32 %v4731_v29, %v5605_v40  ;;  %v1606_v19 = vmul.f32 %v4732_v62, %v5608_v41  ;;  %v4577_v55 = vld [vmem:[%s10473_s1 + $0x490] sm:$0xff]  ;;  %v4578_v22 = vld [vmem:[%s10473_s1 + $0x498] sm:$0xff] }
  0x87   :  { %10714 = vst [vmem:[#allocation22_spill] sm:$0xff] %v6376_v28  ;;  %v1034_v24 = vadd.f32 %v954_v53, %v817_v34  ;;  %v172_v61 = vmul.f32 %v5501_v50, %v116_v7  ;;  %v173_v21 = vmul.f32 %v5522_v57, %v117_v30  ;;  %v309_v11 = vmul.f32 %v4497_v5, %v5507_v52  ;;  %v4617_v13 = vld [vmem:[%s10473_s1 + $0x5d0] sm:$0xff]  ;;  %v4618_v27 = vld [vmem:[%s10473_s1 + $0x5d8] sm:$0xff] }
  0x88   :  { %10715 = vst [vmem:[#allocation23_spill] sm:$0xff] %v6386_v51  ;;  %v1789_v15 = vsel %vm25_vm0, %v6386_v51, 0.0  ;;  %v1035_v29 = vadd.f32 %v955_v44, %v818_v46  ;;  %v310_v53 = vmul.f32 %v4498_v6, %v5525_v58  ;;  %v526_v62 = vmul.f32 %v4537_v63, %v5513_v54  ;;  %v4657_v44 = vld [vmem:[%s10473_s1 + $0x710] sm:$0xff]  ;;  %v4658_v6 = vld [vmem:[%s10473_s1 + $0x718] sm:$0xff] }
  0x89   :  { %v1790_v7 = vadd.f32 %v1789_v15, %v6376_v28  ;;  %v1251_v30 = vadd.f32 %v1171_v0, %v1034_v24  ;;  %v389_v5 = vadd.f32 %v309_v11, %v172_v61  ;;  %v527_v34 = vmul.f32 %v4538_v33, %v5528_v59  ;;  %v4697_v0 = vld [vmem:[%s10473_s1 + $0x850] sm:$0xff]  ;;  %v4698_v33 = vld [vmem:[%s10473_s1 + $0x858] sm:$0xff] }
  0x8a   :  { %v1252_v63 = vadd.f32 %v1172_v20, %v1035_v29  ;;  %v390_v46 = vadd.f32 %v310_v53, %v173_v21  ;;  %v743_v51 = vmul.f32 %v4577_v55, %v5519_v56  ;;  %v744_v38 = vmul.f32 %v4578_v22, %v5531_v60  ;;  %v4737_v21 = vld [vmem:[%s10473_s1 + $0x990] sm:$0xff]  ;;  %v4738_v55 = vld [vmem:[%s10473_s1 + $0x998] sm:$0xff] }
  0x8b   :  { %1791 = vadd.xlane.f32.xlu1 %v1790_v7  ;;  %v1468_v24 = vadd.f32 %v1388_v4, %v1251_v30  ;;  %v606_v61 = vadd.f32 %v526_v62, %v389_v5  ;;  %v960_v11 = vmul.f32 %v4617_v13, %v5551_v9  ;;  %v961_v20 = vmul.f32 %v4618_v27, %v5554_v10  ;;  %v114_v4 = vld [vmem:[%s10473_s1 + $0xc0] sm:$0xff]  ;;  %v115_v62 = vld [vmem:[%s10473_s1 + $0xc8] sm:$0xff] }
  0x8c   :  { %v1469_v22 = vadd.f32 %v1389_v14, %v1252_v63  ;;  %v607_v15 = vadd.f32 %v527_v34, %v390_v46  ;;  %v1177_v29 = vmul.f32 %v4657_v44, %v5560_v12  ;;  %v1178_v53 = vmul.f32 %v4658_v6, %v5569_v16  ;;  %v4495_v13 = vld [vmem:[%s10473_s1 + $0x200] sm:$0xff]  ;;  %v4496_v5 = vld [vmem:[%s10473_s1 + $0x208] sm:$0xff] }
  0x8d   :  { %v6447_v27 = vadd.f32 %v1605_v8, %v1468_v24  ;;  %v823_v14 = vadd.f32 %v743_v51, %v606_v61  ;;  %v1394_v7 = vmul.f32 %v4697_v0, %v5572_v17  ;;  %v1395_v30 = vmul.f32 %v4698_v33, %v5575_v18  ;;  %v4535_v34 = vld [vmem:[%s10473_s1 + $0x340] sm:$0xff]  ;;  %v4536_v51 = vld [vmem:[%s10473_s1 + $0x348] sm:$0xff] }
  0x8e   :  { %v6457_v44 = vadd.f32 %v1606_v19, %v1469_v22  ;;  %v824_v6 = vadd.f32 %v744_v38, %v607_v15  ;;  %v1611_v63 = vmul.f32 %v4737_v21, %v5605_v40  ;;  %v1612_v8 = vmul.f32 %v4738_v55, %v5608_v41  ;;  %v4575_v19 = vld [vmem:[%s10473_s1 + $0x480] sm:$0xff]  ;;  %v4576_v38 = vld [vmem:[%s10473_s1 + $0x488] sm:$0xff] }
  0x8f   :  { %10716 = vst [vmem:[#allocation24_spill] sm:$0xff] %v6447_v27  ;;  %v1040_v46 = vadd.f32 %v960_v11, %v823_v14  ;;  %v170_v0 = vmul.f32 %v5501_v50, %v114_v4  ;;  %v171_v33 = vmul.f32 %v5522_v57, %v115_v62  ;;  %v307_v24 = vmul.f32 %v4495_v13, %v5507_v52  ;;  %v4615_v22 = vld [vmem:[%s10473_s1 + $0x5c0] sm:$0xff]  ;;  %v4616_v15 = vld [vmem:[%s10473_s1 + $0x5c8] sm:$0xff] }
  0x90   :  { %10717 = vst [vmem:[#allocation25_spill] sm:$0xff] %v6457_v44  ;;  %v1785_v61 = vsel %vm25_vm0, %v6457_v44, 0.0  ;;  %v1041_v21 = vadd.f32 %v961_v20, %v824_v6  ;;  %v308_v11 = vmul.f32 %v4496_v5, %v5525_v58  ;;  %v524_v55 = vmul.f32 %v4535_v34, %v5513_v54  ;;  %v4655_v20 = vld [vmem:[%s10473_s1 + $0x700] sm:$0xff]  ;;  %v4656_v5 = vld [vmem:[%s10473_s1 + $0x708] sm:$0xff] }
  0x91   :  { %v1786_v4 = vadd.f32 %v1785_v61, %v6447_v27  ;;  %v1257_v62 = vadd.f32 %v1177_v29, %v1040_v46  ;;  %v387_v13 = vadd.f32 %v307_v24, %v170_v0  ;;  %v525_v14 = vmul.f32 %v4536_v51, %v5528_v59  ;;  %v4695_v29 = vld [vmem:[%s10473_s1 + $0x840] sm:$0xff]  ;;  %v4696_v51 = vld [vmem:[%s10473_s1 + $0x848] sm:$0xff] }
  0x92   :  { %v1258_v34 = vadd.f32 %v1178_v53, %v1041_v21  ;;  %v388_v6 = vadd.f32 %v308_v11, %v171_v33  ;;  %v741_v44 = vmul.f32 %v4575_v19, %v5519_v56  ;;  %v742_v28 = vmul.f32 %v4576_v38, %v5531_v60  ;;  %v4735_v33 = vld [vmem:[%s10473_s1 + $0x980] sm:$0xff]  ;;  %v4736_v19 = vld [vmem:[%s10473_s1 + $0x988] sm:$0xff] }
  0x93   :  { %1787 = vadd.xlane.f32.xlu0 %v1786_v4  ;;  %v1474_v46 = vadd.f32 %v1394_v7, %v1257_v62  ;;  %v604_v0 = vadd.f32 %v524_v55, %v387_v13  ;;  %v958_v24 = vmul.f32 %v4615_v22, %v5551_v9  ;;  %v959_v53 = vmul.f32 %v4616_v15, %v5554_v10  ;;  %v120_v7 = vld [vmem:[%s10473_s1 + $0xf0] sm:$0xff]  ;;  %v121_v55 = vld [vmem:[%s10473_s1 + $0xf8] sm:$0xff] }
  0x94   :  { %v1475_v38 = vadd.f32 %v1395_v30, %v1258_v34  ;;  %v605_v61 = vadd.f32 %v525_v14, %v388_v6  ;;  %v1175_v21 = vmul.f32 %v4655_v20, %v5560_v12  ;;  %v1176_v11 = vmul.f32 %v4656_v5, %v5569_v16  ;;  %v4501_v22 = vld [vmem:[%s10473_s1 + $0x230] sm:$0xff]  ;;  %v4502_v13 = vld [vmem:[%s10473_s1 + $0x238] sm:$0xff] }
  0x95   :  { %v6518_v15 = vadd.f32 %v1611_v63, %v1474_v46  ;;  %v821_v30 = vadd.f32 %v741_v44, %v604_v0  ;;  %v1392_v4 = vmul.f32 %v4695_v29, %v5572_v17  ;;  %v1393_v62 = vmul.f32 %v4696_v51, %v5575_v18  ;;  %v4541_v14 = vld [vmem:[%s10473_s1 + $0x370] sm:$0xff]  ;;  %v4542_v44 = vld [vmem:[%s10473_s1 + $0x378] sm:$0xff] }
  0x96   :  { %v6528_v20 = vadd.f32 %v1612_v8, %v1475_v38  ;;  %v822_v5 = vadd.f32 %v742_v28, %v605_v61  ;;  %v1609_v34 = vmul.f32 %v4735_v33, %v5605_v40  ;;  %v1610_v63 = vmul.f32 %v4736_v19, %v5608_v41  ;;  %v4581_v8 = vld [vmem:[%s10473_s1 + $0x4b0] sm:$0xff]  ;;  %v4582_v28 = vld [vmem:[%s10473_s1 + $0x4b8] sm:$0xff] }
  0x97   :  { %10718 = vst [vmem:[#allocation26_spill] sm:$0xff] %v6518_v15  ;;  %v1038_v6 = vadd.f32 %v958_v24, %v821_v30  ;;  %v176_v29 = vmul.f32 %v5501_v50, %v120_v7  ;;  %v177_v51 = vmul.f32 %v5522_v57, %v121_v55  ;;  %v313_v46 = vmul.f32 %v4501_v22, %v5507_v52  ;;  %v4621_v38 = vld [vmem:[%s10473_s1 + $0x5f0] sm:$0xff]  ;;  %v4622_v61 = vld [vmem:[%s10473_s1 + $0x5f8] sm:$0xff] }
  0x98   :  { %10719 = vst [vmem:[#allocation27_spill] sm:$0xff] %v6528_v20  ;;  %v1797_v0 = vsel %vm25_vm0, %v6528_v20, 0.0  ;;  %v1039_v33 = vadd.f32 %v959_v53, %v822_v5  ;;  %v314_v24 = vmul.f32 %v4502_v13, %v5525_v58  ;;  %v530_v19 = vmul.f32 %v4541_v14, %v5513_v54  ;;  %v4661_v53 = vld [vmem:[%s10473_s1 + $0x730] sm:$0xff]  ;;  %v4662_v13 = vld [vmem:[%s10473_s1 + $0x738] sm:$0xff] }
  0x99   :  { %v1798_v7 = vadd.f32 %v1797_v0, %v6518_v15  ;;  %v1255_v55 = vadd.f32 %v1175_v21, %v1038_v6  ;;  %v393_v22 = vadd.f32 %v313_v46, %v176_v29  ;;  %v531_v30 = vmul.f32 %v4542_v44, %v5528_v59  ;;  %v4701_v21 = vld [vmem:[%s10473_s1 + $0x870] sm:$0xff]  ;;  %v4702_v44 = vld [vmem:[%s10473_s1 + $0x878] sm:$0xff] }
  0x9a   :  { %v1256_v14 = vadd.f32 %v1176_v11, %v1039_v33  ;;  %v394_v5 = vadd.f32 %v314_v24, %v177_v51  ;;  %v747_v20 = vmul.f32 %v4581_v8, %v5519_v56  ;;  %v748_v27 = vmul.f32 %v4582_v28, %v5531_v60  ;;  %v4741_v51 = vld [vmem:[%s10473_s1 + $0x9b0] sm:$0xff]  ;;  %v4742_v8 = vld [vmem:[%s10473_s1 + $0x9b8] sm:$0xff] }
  0x9b   :  { %1799 = vadd.xlane.f32.xlu1 %v1798_v7  ;;  %v1472_v6 = vadd.f32 %v1392_v4, %v1255_v55  ;;  %v610_v29 = vadd.f32 %v530_v19, %v393_v22  ;;  %v964_v46 = vmul.f32 %v4621_v38, %v5551_v9  ;;  %v965_v11 = vmul.f32 %v4622_v61, %v5554_v10  ;;  %v118_v4 = vld [vmem:[%s10473_s1 + $0xe0] sm:$0xff]  ;;  %v119_v19 = vld [vmem:[%s10473_s1 + $0xe8] sm:$0xff] }
  0x9c   :  { %v1473_v28 = vadd.f32 %v1393_v62, %v1256_v14  ;;  %v611_v0 = vadd.f32 %v531_v30, %v394_v5  ;;  %v1181_v33 = vmul.f32 %v4661_v53, %v5560_v12  ;;  %v1182_v24 = vmul.f32 %v4662_v13, %v5569_v16  ;;  %v4499_v38 = vld [vmem:[%s10473_s1 + $0x220] sm:$0xff]  ;;  %v4500_v22 = vld [vmem:[%s10473_s1 + $0x228] sm:$0xff] }
  0x9d   :  { %v6589_v61 = vadd.f32 %v1609_v34, %v1472_v6  ;;  %v827_v62 = vadd.f32 %v747_v20, %v610_v29  ;;  %v1398_v7 = vmul.f32 %v4701_v21, %v5572_v17  ;;  %v1399_v55 = vmul.f32 %v4702_v44, %v5575_v18  ;;  %v4539_v30 = vld [vmem:[%s10473_s1 + $0x360] sm:$0xff]  ;;  %v4540_v20 = vld [vmem:[%s10473_s1 + $0x368] sm:$0xff] }
  0x9e   :  { %v6599_v53 = vadd.f32 %v1610_v63, %v1473_v28  ;;  %v828_v13 = vadd.f32 %v748_v27, %v611_v0  ;;  %v1615_v14 = vmul.f32 %v4741_v51, %v5605_v40  ;;  %v1616_v34 = vmul.f32 %v4742_v8, %v5608_v41  ;;  %v4579_v63 = vld [vmem:[%s10473_s1 + $0x4a0] sm:$0xff]  ;;  %v4580_v27 = vld [vmem:[%s10473_s1 + $0x4a8] sm:$0xff] }
  0x9f   :  { %10720 = vst [vmem:[#allocation28_spill] sm:$0xff] %v6589_v61  ;;  %v1044_v5 = vadd.f32 %v964_v46, %v827_v62  ;;  %v174_v21 = vmul.f32 %v5501_v50, %v118_v4  ;;  %v175_v44 = vmul.f32 %v5522_v57, %v119_v19  ;;  %v311_v6 = vmul.f32 %v4499_v38, %v5507_v52  ;;  %v4619_v28 = vld [vmem:[%s10473_s1 + $0x5e0] sm:$0xff]  ;;  %v4620_v0 = vld [vmem:[%s10473_s1 + $0x5e8] sm:$0xff] }
  0xa0   :  { %10721 = vst [vmem:[#allocation29_spill] sm:$0xff] %v6599_v53  ;;  %v1793_v29 = vsel %vm25_vm0, %v6599_v53, 0.0  ;;  %v1045_v51 = vadd.f32 %v965_v11, %v828_v13  ;;  %v312_v46 = vmul.f32 %v4500_v22, %v5525_v58  ;;  %v528_v8 = vmul.f32 %v4539_v30, %v5513_v54  ;;  %v4659_v11 = vld [vmem:[%s10473_s1 + $0x720] sm:$0xff]  ;;  %v4660_v22 = vld [vmem:[%s10473_s1 + $0x728] sm:$0xff] }
  0xa1   :  { %v1794_v4 = vadd.f32 %v1793_v29, %v6589_v61  ;;  %v1261_v19 = vadd.f32 %v1181_v33, %v1044_v5  ;;  %v391_v38 = vadd.f32 %v311_v6, %v174_v21  ;;  %v529_v62 = vmul.f32 %v4540_v20, %v5528_v59  ;;  %v4699_v33 = vld [vmem:[%s10473_s1 + $0x860] sm:$0xff]  ;;  %v4700_v20 = vld [vmem:[%s10473_s1 + $0x868] sm:$0xff] }
  0xa2   :  { %v1262_v30 = vadd.f32 %v1182_v24, %v1045_v51  ;;  %v392_v13 = vadd.f32 %v312_v46, %v175_v44  ;;  %v745_v53 = vmul.f32 %v4579_v63, %v5519_v56  ;;  %v746_v15 = vmul.f32 %v4580_v27, %v5531_v60  ;;  %v4739_v44 = vld [vmem:[%s10473_s1 + $0x9a0] sm:$0xff]  ;;  %v4740_v63 = vld [vmem:[%s10473_s1 + $0x9a8] sm:$0xff] }
  0xa3   :  { %1795 = vadd.xlane.f32.xlu0 %v1794_v4  ;;  %v1478_v5 = vadd.f32 %v1398_v7, %v1261_v19  ;;  %v608_v21 = vadd.f32 %v528_v8, %v391_v38  ;;  %v962_v6 = vmul.f32 %v4619_v28, %v5551_v9  ;;  %v963_v24 = vmul.f32 %v4620_v0, %v5554_v10  ;;  %v124_v7 = vld [vmem:[%s10473_s1 + $0x110] sm:$0xff]  ;;  %v125_v8 = vld [vmem:[%s10473_s1 + $0x118] sm:$0xff] }
  0xa4   :  { %v1479_v27 = vadd.f32 %v1399_v55, %v1262_v30  ;;  %v609_v29 = vadd.f32 %v529_v62, %v392_v13  ;;  %v1179_v51 = vmul.f32 %v4659_v11, %v5560_v12  ;;  %v1180_v46 = vmul.f32 %v4660_v22, %v5569_v16  ;;  %v4505_v28 = vld [vmem:[%s10473_s1 + $0x250] sm:$0xff]  ;;  %v4506_v38 = vld [vmem:[%s10473_s1 + $0x258] sm:$0xff] }
  0xa5   :  { %v6660_v0 = vadd.f32 %v1615_v14, %v1478_v5  ;;  %v825_v55 = vadd.f32 %v745_v53, %v608_v21  ;;  %v1396_v4 = vmul.f32 %v4699_v33, %v5572_v17  ;;  %v1397_v19 = vmul.f32 %v4700_v20, %v5575_v18  ;;  %v4545_v62 = vld [vmem:[%s10473_s1 + $0x390] sm:$0xff]  ;;  %v4546_v53 = vld [vmem:[%s10473_s1 + $0x398] sm:$0xff] }
  0xa6   :  { %v6670_v11 = vadd.f32 %v1616_v34, %v1479_v27  ;;  %v826_v22 = vadd.f32 %v746_v15, %v609_v29  ;;  %v1613_v30 = vmul.f32 %v4739_v44, %v5605_v40  ;;  %v1614_v14 = vmul.f32 %v4740_v63, %v5608_v41  ;;  %v4585_v34 = vld [vmem:[%s10473_s1 + $0x4d0] sm:$0xff]  ;;  %v4586_v15 = vld [vmem:[%s10473_s1 + $0x4d8] sm:$0xff] }
  0xa7   :  { %10722 = vst [vmem:[#allocation30_spill] sm:$0xff] %v6660_v0  ;;  %v1042_v13 = vadd.f32 %v962_v6, %v825_v55  ;;  %v180_v33 = vmul.f32 %v5501_v50, %v124_v7  ;;  %v181_v20 = vmul.f32 %v5522_v57, %v125_v8  ;;  %v317_v5 = vmul.f32 %v4505_v28, %v5507_v52  ;;  %v4625_v27 = vld [vmem:[%s10473_s1 + $0x610] sm:$0xff]  ;;  %v4626_v29 = vld [vmem:[%s10473_s1 + $0x618] sm:$0xff] }
  0xa8   :  { %10723 = vst [vmem:[#allocation31_spill] sm:$0xff] %v6670_v11  ;;  %v1805_v21 = vsel %vm25_vm0, %v6670_v11, 0.0  ;;  %v1043_v44 = vadd.f32 %v963_v24, %v826_v22  ;;  %v318_v6 = vmul.f32 %v4506_v38, %v5525_v58  ;;  %v534_v63 = vmul.f32 %v4545_v62, %v5513_v54  ;;  %v4665_v24 = vld [vmem:[%s10473_s1 + $0x750] sm:$0xff]  ;;  %v4666_v38 = vld [vmem:[%s10473_s1 + $0x758] sm:$0xff] }
  0xa9   :  { %v1806_v7 = vadd.f32 %v1805_v21, %v6660_v0  ;;  %v1259_v8 = vadd.f32 %v1179_v51, %v1042_v13  ;;  %v397_v28 = vadd.f32 %v317_v5, %v180_v33  ;;  %v535_v55 = vmul.f32 %v4546_v53, %v5528_v59  ;;  %v4705_v51 = vld [vmem:[%s10473_s1 + $0x890] sm:$0xff]  ;;  %v4706_v53 = vld [vmem:[%s10473_s1 + $0x898] sm:$0xff] }
  0xaa   :  { %v1260_v62 = vadd.f32 %v1180_v46, %v1043_v44  ;;  %v398_v22 = vadd.f32 %v318_v6, %v181_v20  ;;  %v751_v11 = vmul.f32 %v4585_v34, %v5519_v56  ;;  %v752_v61 = vmul.f32 %v4586_v15, %v5531_v60  ;;  %v4745_v20 = vld [vmem:[%s10473_s1 + $0x9d0] sm:$0xff]  ;;  %v4746_v34 = vld [vmem:[%s10473_s1 + $0x9d8] sm:$0xff] }
  0xab   :  { %1807 = vadd.xlane.f32.xlu1 %v1806_v7  ;;  %v1476_v13 = vadd.f32 %v1396_v4, %v1259_v8  ;;  %v614_v33 = vadd.f32 %v534_v63, %v397_v28  ;;  %v968_v5 = vmul.f32 %v4625_v27, %v5551_v9  ;;  %v969_v46 = vmul.f32 %v4626_v29, %v5554_v10  ;;  %v122_v4 = vld [vmem:[%s10473_s1 + $0x100] sm:$0xff]  ;;  %v123_v63 = vld [vmem:[%s10473_s1 + $0x108] sm:$0xff] }
  0xac   :  { %v1477_v15 = vadd.f32 %v1397_v19, %v1260_v62  ;;  %v615_v21 = vadd.f32 %v535_v55, %v398_v22  ;;  %v1185_v44 = vmul.f32 %v4665_v24, %v5560_v12  ;;  %v1186_v6 = vmul.f32 %v4666_v38, %v5569_v16  ;;  %v4503_v27 = vld [vmem:[%s10473_s1 + $0x240] sm:$0xff]  ;;  %v4504_v28 = vld [vmem:[%s10473_s1 + $0x248] sm:$0xff] }
  0xad   :  { %v6731_v29 = vadd.f32 %v1613_v30, %v1476_v13  ;;  %v831_v19 = vadd.f32 %v751_v11, %v614_v33  ;;  %v1402_v7 = vmul.f32 %v4705_v51, %v5572_v17  ;;  %v1403_v8 = vmul.f32 %v4706_v53, %v5575_v18  ;;  %v4543_v55 = vld [vmem:[%s10473_s1 + $0x380] sm:$0xff]  ;;  %v4544_v11 = vld [vmem:[%s10473_s1 + $0x388] sm:$0xff] }
  0xae   :  { %v6741_v24 = vadd.f32 %v1614_v14, %v1477_v15  ;;  %v832_v38 = vadd.f32 %v752_v61, %v615_v21  ;;  %v1619_v62 = vmul.f32 %v4745_v20, %v5605_v40  ;;  %v1620_v30 = vmul.f32 %v4746_v34, %v5608_v41  ;;  %v4583_v14 = vld [vmem:[%s10473_s1 + $0x4c0] sm:$0xff]  ;;  %v4584_v61 = vld [vmem:[%s10473_s1 + $0x4c8] sm:$0xff] }
  0xaf   :  { %10724 = vst [vmem:[#allocation32_spill] sm:$0xff] %v6731_v29  ;;  %v1048_v22 = vadd.f32 %v968_v5, %v831_v19  ;;  %v178_v51 = vmul.f32 %v5501_v50, %v122_v4  ;;  %v179_v53 = vmul.f32 %v5522_v57, %v123_v63  ;;  %v315_v13 = vmul.f32 %v4503_v27, %v5507_v52  ;;  %v4623_v15 = vld [vmem:[%s10473_s1 + $0x600] sm:$0xff]  ;;  %v4624_v21 = vld [vmem:[%s10473_s1 + $0x608] sm:$0xff] }
  0xb0   :  { %10725 = vst [vmem:[#allocation33_spill] sm:$0xff] %v6741_v24  ;;  %v1801_v33 = vsel %vm25_vm0, %v6741_v24, 0.0  ;;  %v1049_v20 = vadd.f32 %v969_v46, %v832_v38  ;;  %v316_v5 = vmul.f32 %v4504_v28, %v5525_v58  ;;  %v532_v34 = vmul.f32 %v4543_v55, %v5513_v54  ;;  %v4663_v46 = vld [vmem:[%s10473_s1 + $0x740] sm:$0xff]  ;;  %v4664_v28 = vld [vmem:[%s10473_s1 + $0x748] sm:$0xff] }
  0xb1   :  { %v1802_v4 = vadd.f32 %v1801_v33, %v6731_v29  ;;  %v1265_v63 = vadd.f32 %v1185_v44, %v1048_v22  ;;  %v395_v27 = vadd.f32 %v315_v13, %v178_v51  ;;  %v533_v19 = vmul.f32 %v4544_v11, %v5528_v59  ;;  %v4703_v44 = vld [vmem:[%s10473_s1 + $0x880] sm:$0xff]  ;;  %v4704_v11 = vld [vmem:[%s10473_s1 + $0x888] sm:$0xff] }
  0xb2   :  { %v1266_v55 = vadd.f32 %v1186_v6, %v1049_v20  ;;  %v396_v38 = vadd.f32 %v316_v5, %v179_v53  ;;  %v749_v24 = vmul.f32 %v4583_v14, %v5519_v56  ;;  %v750_v0 = vmul.f32 %v4584_v61, %v5531_v60  ;;  %v4743_v53 = vld [vmem:[%s10473_s1 + $0x9c0] sm:$0xff]  ;;  %v4744_v14 = vld [vmem:[%s10473_s1 + $0x9c8] sm:$0xff] }
  0xb3   :  { %1803 = vadd.xlane.f32.xlu0 %v1802_v4  ;;  %v1482_v22 = vadd.f32 %v1402_v7, %v1265_v63  ;;  %v612_v51 = vadd.f32 %v532_v34, %v395_v27  ;;  %v966_v13 = vmul.f32 %v4623_v15, %v5551_v9  ;;  %v967_v6 = vmul.f32 %v4624_v21, %v5554_v10  ;;  %v128_v7 = vld [vmem:[%s10473_s1 + $0x130] sm:$0xff]  ;;  %v129_v34 = vld [vmem:[%s10473_s1 + $0x138] sm:$0xff] }
  0xb4   :  { %v1483_v61 = vadd.f32 %v1403_v8, %v1266_v55  ;;  %v613_v33 = vadd.f32 %v533_v19, %v396_v38  ;;  %v1183_v20 = vmul.f32 %v4663_v46, %v5560_v12  ;;  %v1184_v5 = vmul.f32 %v4664_v28, %v5569_v16  ;;  %v4509_v15 = vld [vmem:[%s10473_s1 + $0x270] sm:$0xff]  ;;  %v4510_v27 = vld [vmem:[%s10473_s1 + $0x278] sm:$0xff] }
  0xb5   :  { %v6802_v21 = vadd.f32 %v1619_v62, %v1482_v22  ;;  %v829_v8 = vadd.f32 %v749_v24, %v612_v51  ;;  %v1400_v4 = vmul.f32 %v4703_v44, %v5572_v17  ;;  %v1401_v63 = vmul.f32 %v4704_v11, %v5575_v18  ;;  %v4549_v19 = vld [vmem:[%s10473_s1 + $0x3b0] sm:$0xff]  ;;  %v4550_v24 = vld [vmem:[%s10473_s1 + $0x3b8] sm:$0xff] }
  0xb6   :  { %v6812_v46 = vadd.f32 %v1620_v30, %v1483_v61  ;;  %v830_v28 = vadd.f32 %v750_v0, %v613_v33  ;;  %v1617_v55 = vmul.f32 %v4743_v53, %v5605_v40  ;;  %v1618_v62 = vmul.f32 %v4744_v14, %v5608_v41  ;;  %v4589_v30 = vld [vmem:[%s10473_s1 + $0x4f0] sm:$0xff]  ;;  %v4590_v0 = vld [vmem:[%s10473_s1 + $0x4f8] sm:$0xff] }
  0xb7   :  { %10726 = vst [vmem:[#allocation34_spill] sm:$0xff] %v6802_v21  ;;  %v1046_v38 = vadd.f32 %v966_v13, %v829_v8  ;;  %v184_v44 = vmul.f32 %v5501_v50, %v128_v7  ;;  %v185_v11 = vmul.f32 %v5522_v57, %v129_v34  ;;  %v321_v22 = vmul.f32 %v4509_v15, %v5507_v52  ;;  %v4629_v61 = vld [vmem:[%s10473_s1 + $0x630] sm:$0xff]  ;;  %v4630_v33 = vld [vmem:[%s10473_s1 + $0x638] sm:$0xff] }
  0xb8   :  { %10727 = vst [vmem:[#allocation35_spill] sm:$0xff] %v6812_v46  ;;  %v1813_v51 = vsel %vm25_vm0, %v6812_v46, 0.0  ;;  %v1047_v53 = vadd.f32 %v967_v6, %v830_v28  ;;  %v322_v13 = vmul.f32 %v4510_v27, %v5525_v58  ;;  %v538_v14 = vmul.f32 %v4549_v19, %v5513_v54  ;;  %v4669_v6 = vld [vmem:[%s10473_s1 + $0x770] sm:$0xff]  ;;  %v4670_v27 = vld [vmem:[%s10473_s1 + $0x778] sm:$0xff] }
  0xb9   :  { %v1814_v7 = vadd.f32 %v1813_v51, %v6802_v21  ;;  %v1263_v34 = vadd.f32 %v1183_v20, %v1046_v38  ;;  %v401_v15 = vadd.f32 %v321_v22, %v184_v44  ;;  %v539_v8 = vmul.f32 %v4550_v24, %v5528_v59  ;;  %v4709_v20 = vld [vmem:[%s10473_s1 + $0x8b0] sm:$0xff]  ;;  %v4710_v24 = vld [vmem:[%s10473_s1 + $0x8b8] sm:$0xff] }
  0xba   :  { %v1264_v19 = vadd.f32 %v1184_v5, %v1047_v53  ;;  %v402_v28 = vadd.f32 %v322_v13, %v185_v11  ;;  %v755_v46 = vmul.f32 %v4589_v30, %v5519_v56  ;;  %v756_v29 = vmul.f32 %v4590_v0, %v5531_v60  ;;  %v4749_v11 = vld [vmem:[%s10473_s1 + $0x9f0] sm:$0xff]  ;;  %v4750_v30 = vld [vmem:[%s10473_s1 + $0x9f8] sm:$0xff] }
  0xbb   :  { %1815 = vadd.xlane.f32.xlu1 %v1814_v7  ;;  %v1480_v38 = vadd.f32 %v1400_v4, %v1263_v34  ;;  %v618_v44 = vadd.f32 %v538_v14, %v401_v15  ;;  %v972_v22 = vmul.f32 %v4629_v61, %v5551_v9  ;;  %v973_v5 = vmul.f32 %v4630_v33, %v5554_v10  ;;  %v126_v4 = vld [vmem:[%s10473_s1 + $0x120] sm:$0xff]  ;;  %v127_v14 = vld [vmem:[%s10473_s1 + $0x128] sm:$0xff] }
  0xbc   :  { %v1481_v0 = vadd.f32 %v1401_v63, %v1264_v19  ;;  %v619_v51 = vadd.f32 %v539_v8, %v402_v28  ;;  %v1189_v53 = vmul.f32 %v4669_v6, %v5560_v12  ;;  %v1190_v13 = vmul.f32 %v4670_v27, %v5569_v16  ;;  %v4507_v61 = vld [vmem:[%s10473_s1 + $0x260] sm:$0xff]  ;;  %v4508_v15 = vld [vmem:[%s10473_s1 + $0x268] sm:$0xff] }
  0xbd   :  { %v6873_v33 = vadd.f32 %v1617_v55, %v1480_v38  ;;  %v835_v63 = vadd.f32 %v755_v46, %v618_v44  ;;  %v1406_v7 = vmul.f32 %v4709_v20, %v5572_v17  ;;  %v1407_v34 = vmul.f32 %v4710_v24, %v5575_v18  ;;  %v4547_v8 = vld [vmem:[%s10473_s1 + $0x3a0] sm:$0xff]  ;;  %v4548_v46 = vld [vmem:[%s10473_s1 + $0x3a8] sm:$0xff] }
  0xbe   :  { %v6883_v6 = vadd.f32 %v1618_v62, %v1481_v0  ;;  %v836_v27 = vadd.f32 %v756_v29, %v619_v51  ;;  %v1623_v19 = vmul.f32 %v4749_v11, %v5605_v40  ;;  %v1624_v55 = vmul.f32 %v4750_v30, %v5608_v41  ;;  %v4587_v62 = vld [vmem:[%s10473_s1 + $0x4e0] sm:$0xff]  ;;  %v4588_v29 = vld [vmem:[%s10473_s1 + $0x4e8] sm:$0xff] }
  0xbf   :  { %10728 = vst [vmem:[#allocation36_spill] sm:$0xff] %v6873_v33  ;;  %v1052_v28 = vadd.f32 %v972_v22, %v835_v63  ;;  %v182_v20 = vmul.f32 %v5501_v50, %v126_v4  ;;  %v183_v24 = vmul.f32 %v5522_v57, %v127_v14  ;;  %v319_v38 = vmul.f32 %v4507_v61, %v5507_v52  ;;  %v4627_v52 = vld [vmem:[%s10473_s1 + $0x620] sm:$0xff]  ;;  %v4628_v4 = vld [vmem:[%s10473_s1 + $0x628] sm:$0xff] }
  0xc0   :  { %10729 = vst [vmem:[#allocation37_spill] sm:$0xff] %v6883_v6  ;;  %v1809_v44 = vsel %vm25_vm0, %v6883_v6, 0.0  ;;  %v1053_v11 = vadd.f32 %v973_v5, %v836_v27  ;;  %v320_v22 = vmul.f32 %v4508_v15, %v5525_v58  ;;  %v536_v50 = vmul.f32 %v4547_v8, %v5513_v54  ;;  %v4667_v61 = vld [vmem:[%s10473_s1 + $0x760] sm:$0xff] }
  0xc1   :  { %v1810_v57 = vadd.f32 %v1809_v44, %v6873_v33  ;;  %v1269_v30 = vadd.f32 %v1189_v53, %v1052_v28  ;;  %v399_v0 = vadd.f32 %v319_v38, %v182_v20  ;;  %v537_v51 = vmul.f32 %v4548_v46, %v5528_v59  ;;  %v4668_v59 = vld [vmem:[%s10473_s1 + $0x768] sm:$0xff]  ;;  %v4747_v28 = vld [vmem:[%s10473_s1 + $0x9e0] sm:$0xff] }
  0xc2   :  { %v1270_v14 = vadd.f32 %v1190_v13, %v1053_v11  ;;  %v400_v5 = vadd.f32 %v320_v22, %v183_v24  ;;  %v753_v58 = vmul.f32 %v4587_v62, %v5519_v56  ;;  %v754_v54 = vmul.f32 %v4588_v29, %v5531_v60  ;;  %v4707_v56 = vld [vmem:[%s10473_s1 + $0x8a0] sm:$0xff]  ;;  %v6927_v60 = vld [vmem:[%s10472_s0 + $0x10] sm:$0xff] }
  0xc3   :  { %1811 = vadd.xlane.f32.xlu0 %v1810_v57  ;;  %v1486_v63 = vadd.f32 %v1406_v7, %v1269_v30  ;;  %v616_v53 = vadd.f32 %v536_v50, %v399_v0  ;;  %v970_v15 = vmul.f32 %v4627_v52, %v5551_v9  ;;  %v971_v27 = vmul.f32 %v4628_v4, %v5554_v10  ;;  %v6932_v9 = vld [vmem:[%s10472_s0 + $0x18] sm:$0xff]  ;;  %v4708_v10 = vld [vmem:[%s10473_s1 + $0x8a8] sm:$0xff] }
  0xc4   :  { %v1487_v8 = vadd.f32 %v1407_v34, %v1270_v14  ;;  %v617_v13 = vadd.f32 %v537_v51, %v400_v5  ;;  %v1187_v46 = vmul.f32 %v4667_v61, %v5560_v12  ;;  %v1188_v38 = vmul.f32 %v4668_v59, %v5569_v16  ;;  %v4748_v12 = vld [vmem:[%s10473_s1 + $0x9e8] sm:$0xff] }
  0xc5   :  { %v6934_v7 = vadd.f32 %v1623_v19, %v1486_v63  ;;  %v833_v34 = vadd.f32 %v753_v58, %v616_v53  ;;  %v1404_v19 = vmul.f32 %v4707_v56, %v5572_v17  ;;  %v17_v29 = vmul.f32 %v6927_v60, %v6927_v60 }
  0xc6   :  { %v6943_v20 = vadd.f32 %v1624_v55, %v1487_v8  ;;  %v834_v24 = vadd.f32 %v754_v54, %v617_v13  ;;  %v18_v44 = vmul.f32 %v6932_v9, %v6932_v9  ;;  %v1405_v22 = vmul.f32 %v4708_v10, %v5575_v18 }
  0xc7   :  { %10730 = vst [vmem:[#allocation38_spill] sm:$0xff] %v6934_v7  ;;  %v1050_v62 = vadd.f32 %v970_v15, %v833_v34  ;;  %v1621_v16 = vmul.f32 %v4747_v28, %v5605_v40  ;;  %v33_v52 = vrot.slane %v17_v29, 4  ;;  %v1622_v0 = vmul.f32 %v4748_v12, %v5608_v41 }
  0xc8   :  { %10731 = vst [vmem:[#allocation39_spill] sm:$0xff] %v6943_v20  ;;  %v1821_v55 = vsel %vm25_vm0, %v6943_v20, 0.0  ;;  %v1051_v11 = vadd.f32 %v971_v27, %v834_v24  ;;  %v39_v57 = vsel %vm25_vm0, %v18_v44, 0.0 }
  0xc9   :  { %v1822_v17 = vadd.f32 %v1821_v55, %v6934_v7  ;;  %v1267_v50 = vadd.f32 %v1187_v46, %v1050_v62  ;;  %v40_v51 = vrot.slane %v39_v57, 4  ;;  %v34_v14 = vadd.f32 %v33_v52, %v17_v29 }
  0xca   :  { %v1268_v30 = vadd.f32 %v1188_v38, %v1051_v11 }
  0xcb   :  { %1823 = vadd.xlane.f32.xlu1 %v1822_v17  ;;  %v1484_v4 = vadd.f32 %v1404_v19, %v1267_v50  ;;  %v41_v58 = vadd.f32 %v40_v51, %v39_v57  ;;  %v35_v18 = vrot.slane %v34_v14, 2 }
  0xcc   :  { %v1485_v5 = vadd.f32 %v1405_v22, %v1268_v30 }
  0xcd   :  { %v6961_v54 = vadd.f32 %v1621_v16, %v1484_v4  ;;  %v42_v40 = vrot.slane %v41_v58, 2  ;;  %v36_v63 = vadd.f32 %v35_v18, %v34_v14  ;;  %v5127_v14 = vld [vmem:[%s10473_s1 + $0x10] sm:$0xff] }
  0xce   :  { %v6963_v61 = vadd.f32 %v1622_v0, %v1485_v5 }
  0xcf   :  { %10732 = vst [vmem:[#allocation40_spill] sm:$0xff] %v6961_v54  ;;  %v43_v15 = vadd.f32 %v42_v40, %v41_v58  ;;  %v37_v41 = vrot.slane %v36_v63, 1  ;;  %v5131_v40 = vld [vmem:[%s10473_s1 + $0x18] sm:$0xff] }
  0xd0   :  { %10733 = vst [vmem:[#allocation41_spill] sm:$0xff] %v6963_v61  ;;  %v1817_v53 = vsel %vm25_vm0, %v6963_v61, 0.0 }
  0xd1   :  { %v1818_v59 = vadd.f32 %v1817_v53, %v6961_v54  ;;  %v44_v8 = vrot.slane %v43_v15, 1  ;;  %v38_v13 = vadd.f32 %v37_v41, %v36_v63  ;;  %v5132_v53 = vld [vmem:[%s10473_s1 + $0x158] sm:$0xff] }
  0xd3   :  { %1819 = vadd.xlane.f32.xlu0 %v1818_v59  ;;  %v45_v27 = vadd.f32 %v44_v8, %v43_v15  ;;  %4759 = vrsqrt.f32 %v38_v13  ;;  %v76_v56 = vadd.f32 1.0, %v38_v13  ;;  %vm62_vm5 = vcmp.eq.f32.partialorder %v38_v13, inf  ;;  %v5133_v59 = vld [vmem:[%s10473_s1 + $0x298] sm:$0xff] }
  0xd4   :  { %v65_v10 = vand.u32 2147483648, %v38_v13  ;;  %vm64_vm6 = vcmp.eq.f32.partialorder %v38_v13, 0.0  ;;  %v5134_v8 = vld [vmem:[%s10473_s1 + $0x3d8] sm:$0xff] }
  0xd5   :  { %4761 = vrsqrt.f32 %v45_v27  ;;  %v77_v34 = vadd.f32 1.0, %v45_v27  ;;  %vm69_vm7 = vcmp.eq.f32.partialorder %v45_v27, inf  ;;  %v72_v38 = vand.u32 2147483648, %v45_v27 }
  0xd6   :  { %4763 = vrcp.f32 %v76_v56  ;;  %vm71_vm8 = vcmp.eq.f32.partialorder %v45_v27, 0.0 }
  0xd7   :  { %4765 = vrcp.f32 %v77_v34 }
  0xe0   :  { %v4760_v46 = vpop.eup %4759 }
  0xe1   :  { %v61_v24 = vmul.f32 %v4760_v46, %v38_v13 }
  0xe2   :  { %v4762_v28 = vpop.eup %4761 }
  0xe3   :  { %v68_v62 = vmul.f32 %v4762_v28, %v45_v27  ;;  %v63_v19 = vsel %vm62_vm5, %v38_v13, %v61_v24  ;;  %v4764_v12 = vpop.eup %4763 }
  0xe4   :  { %v66_v29 = vsel %vm64_vm6, %v65_v10, %v63_v19  ;;  %v4766_v55 = vpop.eup %4765  ;;  %v5135_v19 = vld [vmem:[%s10473_s1 + $0x510] sm:$0xff] }
  0xe5   :  { %v70_v44 = vsel %vm69_vm7, %v45_v27, %v68_v62  ;;  %v84_v22 = vmul.f32 %v4764_v12, %v66_v29  ;;  %v5136_v12 = vld [vmem:[%s10473_s1 + $0x518] sm:$0xff]  ;;  %v5137_v29 = vld [vmem:[%s10473_s1 + $0x650] sm:$0xff] }
  0xe6   :  { %v73_v11 = vsel %vm71_vm8, %v72_v38, %v70_v44 }
  0xe7   :  { %v85_v16 = vmul.f32 %v4766_v55, %v73_v11  ;;  %v88_v17 = vmul.f32 %v84_v22, %v6927_v60  ;;  %v5138_v55 = vld [vmem:[%s10473_s1 + $0x658] sm:$0xff]  ;;  %v5139_v22 = vld [vmem:[%s10473_s1 + $0x790] sm:$0xff] }
  0xe9   :  { %v89_v50 = vmul.f32 %v85_v16, %v6932_v9  ;;  %v6971_v52 = vrot.slane %v88_v17, %v5469_v31  ;;  %v6974_v57 = vrot.slane %v88_v17, %v5471_v32  ;;  %v6977_v30 = vrot.slane %v88_v17, %v5473_v36 }
  0xea   :  { %v6980_v0 = vrot.slane %v88_v17, %v5475_v37  ;;  %v7027_v56 = vrot.slane %v88_v17, %v5483_v42  ;;  %v7033_v46 = vrot.slane %v88_v17, %v5494_v47  ;;  %v7039_v24 = vrot.slane %v88_v17, %v5496_v48 }
  0xeb   :  { %v6983_v51 = vrot.slane %v89_v50, %v5469_v31  ;;  %v6986_v4 = vrot.slane %v89_v50, %v5471_v32  ;;  %v6989_v60 = vrot.slane %v89_v50, %v5473_v36  ;;  %v6992_v9 = vrot.slane %v89_v50, %v5475_v37  ;;  %v5128_v31 = vld [vmem:[%s10473_s1 + $0x150] sm:$0xff] }
  0xec   :  { %v188_v5 = vmul.f32 %v5127_v14, %v6971_v52  ;;  %v325_v58 = vmul.f32 %v5128_v31, %v6974_v57  ;;  %v5129_v32 = vld [vmem:[%s10473_s1 + $0x290] sm:$0xff]  ;;  %v7030_v34 = vrot.slane %v89_v50, %v5483_v42  ;;  %v7036_v28 = vrot.slane %v89_v50, %v5494_v47  ;;  %v5140_v14 = vld [vmem:[%s10473_s1 + $0x798] sm:$0xff] }
  0xed   :  { %v542_v36 = vmul.f32 %v5129_v32, %v6977_v30  ;;  %v5130_v37 = vld [vmem:[%s10473_s1 + $0x3d0] sm:$0xff]  ;;  %v189_v63 = vmul.f32 %v5131_v40, %v6983_v51  ;;  %v326_v15 = vmul.f32 %v5132_v53, %v6986_v4  ;;  %v543_v41 = vmul.f32 %v5133_v59, %v6989_v60 }
  0xee   :  { %v759_v18 = vmul.f32 %v5130_v37, %v6980_v0  ;;  %v760_v13 = vmul.f32 %v5134_v8, %v6992_v9  ;;  %v405_v27 = vadd.f32 %v325_v58, %v188_v5  ;;  %v7042_v38 = vrot.slane %v89_v50, %v5496_v48  ;;  %v5145_v59 = vld [vmem:[%s10473_s1 + $0x8d0] sm:$0xff]  ;;  %v5146_v8 = vld [vmem:[%s10473_s1 + $0x8d8] sm:$0xff] }
  0xef   :  { %v406_v10 = vadd.f32 %v326_v15, %v189_v63  ;;  %v976_v42 = vmul.f32 %v5135_v19, %v7027_v56  ;;  %v977_v47 = vmul.f32 %v5136_v12, %v7030_v34  ;;  %v1193_v48 = vmul.f32 %v5137_v29, %v7033_v46  ;;  %v5142_v63 = vld [vmem:[%s10473_s1 + $0x8] sm:$0xff] }
  0xf0   :  { %v622_v62 = vadd.f32 %v542_v36, %v405_v27  ;;  %v1194_v11 = vmul.f32 %v5138_v55, %v7036_v28  ;;  %v1410_v16 = vmul.f32 %v5139_v22, %v7039_v24  ;;  %v1411_v5 = vmul.f32 %v5140_v14, %v7042_v38  ;;  %v5141_v36 = vld [vmem:[%s10473_s1] sm:$0xff]  ;;  %v5148_v12 = vld [vmem:[%s10473_s1 + $0x288] sm:$0xff] }
  0xf1   :  { %v623_v44 = vadd.f32 %v543_v41, %v406_v10  ;;  %v7069_v58 = vrot.slane %v88_v17, %v5498_v49  ;;  %v7072_v32 = vrot.slane %v89_v50, %v5498_v49  ;;  %v186_v37 = vmul.f32 %v5141_v36, %v6971_v52  ;;  %v5143_v17 = vld [vmem:[%s10473_s1 + $0x140] sm:$0xff]  ;;  %v5144_v50 = vld [vmem:[%s10473_s1 + $0x148] sm:$0xff] }
  0xf2   :  { %v839_v31 = vadd.f32 %v759_v18, %v622_v62  ;;  %v187_v53 = vmul.f32 %v5142_v63, %v6983_v51  ;;  %v323_v49 = vmul.f32 %v5143_v17, %v6974_v57  ;;  %v324_v18 = vmul.f32 %v5144_v50, %v6986_v4  ;;  %v5147_v27 = vld [vmem:[%s10473_s1 + $0x280] sm:$0xff]  ;;  %v5150_v14 = vld [vmem:[%s10473_s1 + $0x3c8] sm:$0xff] }
  0xf3   :  { %v840_v40 = vadd.f32 %v760_v13, %v623_v44  ;;  %v1627_v41 = vmul.f32 %v5145_v59, %v7069_v58  ;;  %v1628_v13 = vmul.f32 %v5146_v8, %v7072_v32  ;;  %v540_v10 = vmul.f32 %v5147_v27, %v6977_v30  ;;  %v5149_v55 = vld [vmem:[%s10473_s1 + $0x3c0] sm:$0xff]  ;;  %v5152_v63 = vld [vmem:[%s10473_s1 + $0x508] sm:$0xff] }
  0xf4   :  { %v1056_v15 = vadd.f32 %v976_v42, %v839_v31  ;;  %v403_v19 = vadd.f32 %v323_v49, %v186_v37  ;;  %v404_v42 = vadd.f32 %v324_v18, %v187_v53  ;;  %v541_v29 = vmul.f32 %v5148_v12, %v6989_v60  ;;  %v5151_v31 = vld [vmem:[%s10473_s1 + $0x500] sm:$0xff]  ;;  %v5154_v18 = vld [vmem:[%s10473_s1 + $0x648] sm:$0xff] }
  0xf5   :  { %v1057_v62 = vadd.f32 %v977_v47, %v840_v40  ;;  %v757_v22 = vmul.f32 %v5149_v55, %v6980_v0  ;;  %v758_v47 = vmul.f32 %v5150_v14, %v6992_v9  ;;  %v974_v36 = vmul.f32 %v5151_v31, %v7027_v56  ;;  %v5153_v49 = vld [vmem:[%s10473_s1 + $0x640] sm:$0xff] }
  0xf6   :  { %v1273_v44 = vadd.f32 %v1193_v48, %v1056_v15  ;;  %v620_v48 = vadd.f32 %v540_v10, %v403_v19  ;;  %v621_v40 = vadd.f32 %v541_v29, %v404_v42  ;;  %v975_v53 = vmul.f32 %v5152_v63, %v7030_v34  ;;  %v5155_v15 = vld [vmem:[%s10473_s1 + $0x780] sm:$0xff]  ;;  %v5156_v10 = vld [vmem:[%s10473_s1 + $0x788] sm:$0xff] }
  0xf7   :  { %v1274_v37 = vadd.f32 %v1194_v11, %v1057_v62  ;;  %v1191_v50 = vmul.f32 %v5153_v49, %v7033_v46  ;;  %v1192_v11 = vmul.f32 %v5154_v18, %v7036_v28  ;;  %v1408_v59 = vmul.f32 %v5155_v15, %v7039_v24  ;;  %v5157_v42 = vld [vmem:[%s10473_s1 + $0x8c0] sm:$0xff] }
  0xf8   :  { %v1490_v17 = vadd.f32 %v1410_v16, %v1273_v44  ;;  %v837_v16 = vadd.f32 %v757_v22, %v620_v48  ;;  %v838_v27 = vadd.f32 %v758_v47, %v621_v40  ;;  %v1409_v62 = vmul.f32 %v5156_v10, %v7042_v38  ;;  %v5159_v44 = vld [vmem:[%s10473_s1 + $0x30] sm:$0xff]  ;;  %v5160_v47 = vld [vmem:[%s10473_s1 + $0x38] sm:$0xff] }
  0xf9   :  { %v1491_v8 = vadd.f32 %v1411_v5, %v1274_v37  ;;  %v1625_v12 = vmul.f32 %v5157_v42, %v7069_v58  ;;  %v5158_v5 = vld [vmem:[%s10473_s1 + $0x8c8] sm:$0xff]  ;;  %v192_v55 = vmul.f32 %v5159_v44, %v6971_v52  ;;  %v193_v31 = vmul.f32 %v5160_v47, %v6983_v51  ;;  %v5161_v37 = vld [vmem:[%s10473_s1 + $0x170] sm:$0xff]  ;;  %v5162_v40 = vld [vmem:[%s10473_s1 + $0x178] sm:$0xff] }
  0xfa   :  { %v7138_v19 = vadd.f32 %v1627_v41, %v1490_v17  ;;  %v1626_v29 = vmul.f32 %v5158_v5, %v7072_v32  ;;  %v1054_v22 = vadd.f32 %v974_v36, %v837_v16  ;;  %v1055_v14 = vadd.f32 %v975_v53, %v838_v27  ;;  %v5163_v36 = vld [vmem:[%s10473_s1 + $0x2b0] sm:$0xff]  ;;  %v5164_v53 = vld [vmem:[%s10473_s1 + $0x2b8] sm:$0xff] }
  0xfb   :  { %v7152_v41 = vadd.f32 %v1628_v13, %v1491_v8  ;;  %v329_v48 = vmul.f32 %v5161_v37, %v6974_v57  ;;  %v330_v13 = vmul.f32 %v5162_v40, %v6986_v4  ;;  %v546_v63 = vmul.f32 %v5163_v36, %v6977_v30  ;;  %v5165_v8 = vld [vmem:[%s10473_s1 + $0x3f0] sm:$0xff]  ;;  %v5166_v5 = vld [vmem:[%s10473_s1 + $0x3f8] sm:$0xff] }
  0xfc   :  { %10734 = vst [vmem:[#allocation42_spill] sm:$0xff] %v7138_v19  ;;  %v547_v17 = vmul.f32 %v5164_v53, %v6989_v60  ;;  %v1271_v18 = vadd.f32 %v1191_v50, %v1054_v22  ;;  %v1272_v15 = vadd.f32 %v1192_v11, %v1055_v14  ;;  %v763_v16 = vmul.f32 %v5165_v8, %v6980_v0  ;;  %v5167_v50 = vld [vmem:[%s10473_s1 + $0x530] sm:$0xff]  ;;  %v5168_v22 = vld [vmem:[%s10473_s1 + $0x538] sm:$0xff] }
  0xfd   :  { %10735 = vst [vmem:[#allocation43_spill] sm:$0xff] %v7152_v41  ;;  %v1829_v49 = vsel %vm25_vm0, %v7152_v41, 0.0  ;;  %v409_v10 = vadd.f32 %v329_v48, %v192_v55  ;;  %v410_v42 = vadd.f32 %v330_v13, %v193_v31  ;;  %v764_v44 = vmul.f32 %v5166_v5, %v6992_v9  ;;  %v5170_v48 = vld [vmem:[%s10473_s1 + $0x678] sm:$0xff]  ;;  %v5176_v5 = vld [vmem:[%s10473_s1 + $0x28] sm:$0xff] }
  0xfe   :  { %v1830_v27 = vadd.f32 %v1829_v49, %v7138_v19  ;;  %v1488_v47 = vadd.f32 %v1408_v59, %v1271_v18  ;;  %v1489_v37 = vadd.f32 %v1409_v62, %v1272_v15  ;;  %v980_v11 = vmul.f32 %v5167_v50, %v7027_v56  ;;  %v5169_v59 = vld [vmem:[%s10473_s1 + $0x670] sm:$0xff]  ;;  %v5174_v8 = vld [vmem:[%s10473_s1 + $0x8f8] sm:$0xff] }
  0xff   :  { %v981_v55 = vmul.f32 %v5168_v22, %v7030_v34  ;;  %v626_v14 = vadd.f32 %v546_v63, %v409_v10  ;;  %v627_v31 = vadd.f32 %v547_v17, %v410_v42  ;;  %v1197_v62 = vmul.f32 %v5169_v59, %v7033_v46  ;;  %v5171_v63 = vld [vmem:[%s10473_s1 + $0x7b0] sm:$0xff]  ;;  %v5172_v17 = vld [vmem:[%s10473_s1 + $0x7b8] sm:$0xff] }
 0x100   :  { %1831 = vadd.xlane.f32.xlu1 %v1830_v27  ;;  %v1198_v40 = vmul.f32 %v5170_v48, %v7036_v28  ;;  %v7201_v13 = vadd.f32 %v1625_v12, %v1488_v47  ;;  %v7203_v36 = vadd.f32 %v1626_v29, %v1489_v37  ;;  %v1414_v53 = vmul.f32 %v5171_v63, %v7039_v24  ;;  %v5173_v12 = vld [vmem:[%s10473_s1 + $0x8f0] sm:$0xff]  ;;  %v5177_v47 = vld [vmem:[%s10473_s1 + $0x160] sm:$0xff] }
 0x101   :  { %v1415_v49 = vmul.f32 %v5172_v17, %v7042_v38  ;;  %v843_v18 = vadd.f32 %v763_v16, %v626_v14  ;;  %v844_v15 = vadd.f32 %v764_v44, %v627_v31  ;;  %v1631_v29 = vmul.f32 %v5173_v12, %v7069_v58  ;;  %v5175_v16 = vld [vmem:[%s10473_s1 + $0x20] sm:$0xff]  ;;  %v5178_v31 = vld [vmem:[%s10473_s1 + $0x168] sm:$0xff] }
 0x102   :  { %10736 = vst [vmem:[#allocation44_spill] sm:$0xff] %v7201_v13  ;;  %10737 = vst [vmem:[#allocation45_spill] sm:$0xff] %v7203_v36  ;;  %v1632_v27 = vmul.f32 %v5174_v8, %v7072_v32  ;;  %v1825_v10 = vsel %vm25_vm0, %v7203_v36, 0.0  ;;  %v190_v42 = vmul.f32 %v5175_v16, %v6971_v52  ;;  %v191_v44 = vmul.f32 %v5176_v5, %v6983_v51  ;;  %v5179_v63 = vld [vmem:[%s10473_s1 + $0x2a0] sm:$0xff]  ;;  %v5180_v12 = vld [vmem:[%s10473_s1 + $0x2a8] sm:$0xff] }
 0x103   :  { %v327_v37 = vmul.f32 %v5177_v47, %v6974_v57  ;;  %v1826_v50 = vadd.f32 %v1825_v10, %v7201_v13  ;;  %v1060_v22 = vadd.f32 %v980_v11, %v843_v18  ;;  %v1061_v14 = vadd.f32 %v981_v55, %v844_v15  ;;  %v5181_v55 = vld [vmem:[%s10473_s1 + $0x3e0] sm:$0xff]  ;;  %v5182_v16 = vld [vmem:[%s10473_s1 + $0x3e8] sm:$0xff] }
 0x104   :  { %v328_v59 = vmul.f32 %v5178_v31, %v6986_v4  ;;  %v544_v17 = vmul.f32 %v5179_v63, %v6977_v30  ;;  %v545_v11 = vmul.f32 %v5180_v12, %v6989_v60  ;;  %v761_v18 = vmul.f32 %v5181_v55, %v6980_v0  ;;  %v5183_v47 = vld [vmem:[%s10473_s1 + $0x520] sm:$0xff]  ;;  %v5188_v55 = vld [vmem:[%s10473_s1 + $0x7a8] sm:$0xff] }
 0x105   :  { %v407_v48 = vadd.f32 %v327_v37, %v190_v42  ;;  %1827 = vadd.xlane.f32.xlu0 %v1826_v50  ;;  %v1277_v15 = vadd.f32 %v1197_v62, %v1060_v22  ;;  %v1278_v8 = vadd.f32 %v1198_v40, %v1061_v14  ;;  %v762_v42 = vmul.f32 %v5182_v16, %v6992_v9  ;;  %v5184_v50 = vld [vmem:[%s10473_s1 + $0x528] sm:$0xff]  ;;  %v5185_v40 = vld [vmem:[%s10473_s1 + $0x660] sm:$0xff] }
 0x106   :  { %v408_v10 = vadd.f32 %v328_v59, %v191_v44  ;;  %v978_v37 = vmul.f32 %v5183_v47, %v7027_v56  ;;  %v979_v62 = vmul.f32 %v5184_v50, %v7030_v34  ;;  %v1195_v44 = vmul.f32 %v5185_v40, %v7033_v46  ;;  %v5186_v59 = vld [vmem:[%s10473_s1 + $0x668] sm:$0xff]  ;;  %v5191_v47 = vld [vmem:[%s10473_s1 + $0x50] sm:$0xff] }
 0x107   :  { %v624_v5 = vadd.f32 %v544_v17, %v407_v48  ;;  %v1494_v22 = vadd.f32 %v1414_v53, %v1277_v15  ;;  %v1495_v14 = vadd.f32 %v1415_v49, %v1278_v8  ;;  %v1196_v48 = vmul.f32 %v5186_v59, %v7036_v28  ;;  %v5187_v17 = vld [vmem:[%s10473_s1 + $0x7a0] sm:$0xff]  ;;  %v5195_v59 = vld [vmem:[%s10473_s1 + $0x2d0] sm:$0xff] }
 0x108   :  { %v625_v31 = vadd.f32 %v545_v11, %v408_v10  ;;  %v1412_v12 = vmul.f32 %v5187_v17, %v7039_v24  ;;  %v1413_v53 = vmul.f32 %v5188_v55, %v7042_v38  ;;  %v5189_v49 = vld [vmem:[%s10473_s1 + $0x8e0] sm:$0xff]  ;;  %v5190_v10 = vld [vmem:[%s10473_s1 + $0x8e8] sm:$0xff]  ;;  %v196_v50 = vmul.f32 %v5191_v47, %v6971_v52 }
 0x109   :  { %v841_v63 = vadd.f32 %v761_v18, %v624_v5  ;;  %v1629_v11 = vmul.f32 %v5189_v49, %v7069_v58  ;;  %v7284_v15 = vadd.f32 %v1631_v29, %v1494_v22  ;;  %v7286_v18 = vadd.f32 %v1632_v27, %v1495_v14  ;;  %v5192_v29 = vld [vmem:[%s10473_s1 + $0x58] sm:$0xff] }
 0x10a   :  { %v842_v8 = vadd.f32 %v762_v42, %v625_v31  ;;  %v1630_v16 = vmul.f32 %v5190_v10, %v7072_v32  ;;  %v197_v27 = vmul.f32 %v5192_v29, %v6983_v51  ;;  %v5193_v42 = vld [vmem:[%s10473_s1 + $0x190] sm:$0xff]  ;;  %v5194_v14 = vld [vmem:[%s10473_s1 + $0x198] sm:$0xff] }
 0x10b   :  { %10738 = vst [vmem:[#allocation46_spill] sm:$0xff] %v7284_v15  ;;  %10739 = vst [vmem:[#allocation47_spill] sm:$0xff] %v7286_v18  ;;  %v1058_v5 = vadd.f32 %v978_v37, %v841_v63  ;;  %v333_v40 = vmul.f32 %v5193_v42, %v6974_v57  ;;  %v1837_v37 = vsel %vm25_vm0, %v7286_v18, 0.0  ;;  %v334_v31 = vmul.f32 %v5194_v14, %v6986_v4  ;;  %v5197_v29 = vld [vmem:[%s10473_s1 + $0x410] sm:$0xff] }
 0x10c   :  { %v1059_v22 = vadd.f32 %v979_v62, %v842_v8  ;;  %v550_v63 = vmul.f32 %v5195_v59, %v6977_v30  ;;  %v1838_v17 = vadd.f32 %v1837_v37, %v7284_v15  ;;  %v5196_v62 = vld [vmem:[%s10473_s1 + $0x2d8] sm:$0xff]  ;;  %v767_v42 = vmul.f32 %v5197_v29, %v6980_v0  ;;  %v5201_v59 = vld [vmem:[%s10473_s1 + $0x690] sm:$0xff] }
 0x10d   :  { %v1275_v55 = vadd.f32 %v1195_v44, %v1058_v5  ;;  %v413_v49 = vadd.f32 %v333_v40, %v196_v50  ;;  %v551_v8 = vmul.f32 %v5196_v62, %v6989_v60  ;;  %v414_v47 = vadd.f32 %v334_v31, %v197_v27  ;;  %v5198_v37 = vld [vmem:[%s10473_s1 + $0x418] sm:$0xff]  ;;  %v5421_v18 = vld [vmem:[%s10473_s1 + $0x4f0] sm:$0xff] }
 0x10e   :  { %v1276_v10 = vadd.f32 %v1196_v48, %v1059_v22  ;;  %v768_v44 = vmul.f32 %v5198_v37, %v6992_v9  ;;  %1839 = vadd.xlane.f32.xlu1 %v1838_v17  ;;  %v5199_v48 = vld [vmem:[%s10473_s1 + $0x550] sm:$0xff]  ;;  %v5200_v40 = vld [vmem:[%s10473_s1 + $0x558] sm:$0xff] }
 0x10f   :  { %v1492_v5 = vadd.f32 %v1412_v12, %v1275_v55  ;;  %v630_v50 = vadd.f32 %v550_v63, %v413_v49  ;;  %v984_v27 = vmul.f32 %v5199_v48, %v7027_v56  ;;  %v985_v22 = vmul.f32 %v5200_v40, %v7030_v34  ;;  %v5202_v63 = vld [vmem:[%s10473_s1 + $0x698] sm:$0xff]  ;;  %v5207_v48 = vld [vmem:[%s10473_s1 + $0x40] sm:$0xff] }
 0x110   :  { %v1493_v14 = vadd.f32 %v1413_v53, %v1276_v10  ;;  %v631_v31 = vadd.f32 %v551_v8, %v414_v47  ;;  %v1201_v12 = vmul.f32 %v5201_v59, %v7033_v46  ;;  %v1202_v17 = vmul.f32 %v5202_v63, %v7036_v28  ;;  %v5203_v53 = vld [vmem:[%s10473_s1 + $0x7d0] sm:$0xff]  ;;  %v5204_v8 = vld [vmem:[%s10473_s1 + $0x7d8] sm:$0xff]  ;;  %v5210_v63 = vld [vmem:[%s10473_s1 + $0x188] sm:$0xff] }
 0x111   :  { %v7343_v55 = vadd.f32 %v1629_v11, %v1492_v5  ;;  %v847_v49 = vadd.f32 %v767_v42, %v630_v50  ;;  %v1418_v62 = vmul.f32 %v5203_v53, %v7039_v24  ;;  %v1419_v10 = vmul.f32 %v5204_v8, %v7042_v38  ;;  %v5205_v11 = vld [vmem:[%s10473_s1 + $0x910] sm:$0xff]  ;;  %v5206_v37 = vld [vmem:[%s10473_s1 + $0x918] sm:$0xff]  ;;  %v5211_v53 = vld [vmem:[%s10473_s1 + $0x2c0] sm:$0xff] }
 0x112   :  { %v7353_v47 = vadd.f32 %v1630_v16, %v1493_v14  ;;  %v848_v29 = vadd.f32 %v768_v44, %v631_v31  ;;  %v1635_v42 = vmul.f32 %v5205_v11, %v7069_v58  ;;  %v1636_v5 = vmul.f32 %v5206_v37, %v7072_v32  ;;  %v5208_v44 = vld [vmem:[%s10473_s1 + $0x48] sm:$0xff]  ;;  %v5209_v14 = vld [vmem:[%s10473_s1 + $0x180] sm:$0xff] }
 0x113   :  { %10740 = vst [vmem:[#allocation48_spill] sm:$0xff] %v7343_v55  ;;  %v1064_v50 = vadd.f32 %v984_v27, %v847_v49  ;;  %v194_v16 = vmul.f32 %v5207_v48, %v6971_v52  ;;  %v195_v40 = vmul.f32 %v5208_v44, %v6983_v51  ;;  %v331_v31 = vmul.f32 %v5209_v14, %v6974_v57 }
 0x114   :  { %10741 = vst [vmem:[#allocation49_spill] sm:$0xff] %v7353_v47  ;;  %v1833_v27 = vsel %vm25_vm0, %v7353_v47, 0.0  ;;  %v1065_v59 = vadd.f32 %v985_v22, %v848_v29  ;;  %v332_v49 = vmul.f32 %v5210_v63, %v6986_v4  ;;  %v548_v8 = vmul.f32 %v5211_v53, %v6977_v30  ;;  %v5212_v22 = vld [vmem:[%s10473_s1 + $0x2c8] sm:$0xff]  ;;  %v5213_v63 = vld [vmem:[%s10473_s1 + $0x400] sm:$0xff] }
 0x115   :  { %v1834_v11 = vadd.f32 %v1833_v27, %v7343_v55  ;;  %v1281_v37 = vadd.f32 %v1201_v12, %v1064_v50  ;;  %v411_v48 = vadd.f32 %v331_v31, %v194_v16  ;;  %v549_v29 = vmul.f32 %v5212_v22, %v6989_v60  ;;  %v5214_v27 = vld [vmem:[%s10473_s1 + $0x408] sm:$0xff] }
 0x116   :  { %v1282_v44 = vadd.f32 %v1202_v17, %v1065_v59  ;;  %v412_v14 = vadd.f32 %v332_v49, %v195_v40  ;;  %v765_v47 = vmul.f32 %v5213_v63, %v6980_v0  ;;  %v766_v12 = vmul.f32 %v5214_v27, %v6992_v9  ;;  %v5215_v17 = vld [vmem:[%s10473_s1 + $0x540] sm:$0xff]  ;;  %v5216_v31 = vld [vmem:[%s10473_s1 + $0x548] sm:$0xff] }
 0x117   :  { %1835 = vadd.xlane.f32.xlu0 %v1834_v11  ;;  %v1498_v50 = vadd.f32 %v1418_v62, %v1281_v37  ;;  %v628_v16 = vadd.f32 %v548_v8, %v411_v48  ;;  %v982_v40 = vmul.f32 %v5215_v17, %v7027_v56  ;;  %v983_v59 = vmul.f32 %v5216_v31, %v7030_v34  ;;  %v5217_v11 = vld [vmem:[%s10473_s1 + $0x680] sm:$0xff]  ;;  %v5218_v8 = vld [vmem:[%s10473_s1 + $0x688] sm:$0xff]  ;;  %v5223_v31 = vld [vmem:[%s10473_s1 + $0x70] sm:$0xff] }
 0x118   :  { %v1499_v49 = vadd.f32 %v1419_v10, %v1282_v44  ;;  %v629_v53 = vadd.f32 %v549_v29, %v412_v14  ;;  %v1199_v62 = vmul.f32 %v5217_v11, %v7033_v46  ;;  %v1200_v37 = vmul.f32 %v5218_v8, %v7036_v28  ;;  %v5219_v10 = vld [vmem:[%s10473_s1 + $0x7c0] sm:$0xff]  ;;  %v5220_v44 = vld [vmem:[%s10473_s1 + $0x7c8] sm:$0xff] }
 0x119   :  { %v7414_v48 = vadd.f32 %v1635_v42, %v1498_v50  ;;  %v845_v22 = vadd.f32 %v765_v47, %v628_v16  ;;  %v1416_v29 = vmul.f32 %v5219_v10, %v7039_v24  ;;  %v1417_v14 = vmul.f32 %v5220_v44, %v7042_v38  ;;  %v5221_v42 = vld [vmem:[%s10473_s1 + $0x900] sm:$0xff]  ;;  %v5222_v50 = vld [vmem:[%s10473_s1 + $0x908] sm:$0xff]  ;;  %v5227_v44 = vld [vmem:[%s10473_s1 + $0x2f0] sm:$0xff] }
 0x11a   :  { %v7424_v63 = vadd.f32 %v1636_v5, %v1499_v49  ;;  %v846_v27 = vadd.f32 %v766_v12, %v629_v53  ;;  %v1633_v47 = vmul.f32 %v5221_v42, %v7069_v58  ;;  %v1634_v16 = vmul.f32 %v5222_v50, %v7072_v32  ;;  %v5224_v12 = vld [vmem:[%s10473_s1 + $0x78] sm:$0xff]  ;;  %v5225_v53 = vld [vmem:[%s10473_s1 + $0x1b0] sm:$0xff] }
 0x11b   :  { %10742 = vst [vmem:[#allocation50_spill] sm:$0xff] %v7414_v48  ;;  %v1062_v17 = vadd.f32 %v982_v40, %v845_v22  ;;  %v200_v5 = vmul.f32 %v5223_v31, %v6971_v52  ;;  %v201_v49 = vmul.f32 %v5224_v12, %v6983_v51  ;;  %v337_v11 = vmul.f32 %v5225_v53, %v6974_v57  ;;  %v5226_v22 = vld [vmem:[%s10473_s1 + $0x1b8] sm:$0xff] }
 0x11c   :  { %10743 = vst [vmem:[#allocation51_spill] sm:$0xff] %v7424_v63  ;;  %v1845_v40 = vsel %vm25_vm0, %v7424_v63, 0.0  ;;  %v1063_v8 = vadd.f32 %v983_v59, %v846_v27  ;;  %v338_v10 = vmul.f32 %v5226_v22, %v6986_v4  ;;  %v554_v42 = vmul.f32 %v5227_v44, %v6977_v30  ;;  %v5228_v59 = vld [vmem:[%s10473_s1 + $0x2f8] sm:$0xff]  ;;  %v5229_v22 = vld [vmem:[%s10473_s1 + $0x430] sm:$0xff] }
 0x11d   :  { %v1846_v50 = vadd.f32 %v1845_v40, %v7414_v48  ;;  %v1279_v31 = vadd.f32 %v1199_v62, %v1062_v17  ;;  %v417_v12 = vadd.f32 %v337_v11, %v200_v5  ;;  %v555_v27 = vmul.f32 %v5228_v59, %v6989_v60  ;;  %v5230_v40 = vld [vmem:[%s10473_s1 + $0x438] sm:$0xff] }
 0x11e   :  { %v1280_v53 = vadd.f32 %v1200_v37, %v1063_v8  ;;  %v418_v63 = vadd.f32 %v338_v10, %v201_v49  ;;  %v771_v55 = vmul.f32 %v5229_v22, %v6980_v0  ;;  %v772_v62 = vmul.f32 %v5230_v40, %v6992_v9  ;;  %v5231_v37 = vld [vmem:[%s10473_s1 + $0x570] sm:$0xff]  ;;  %v5232_v11 = vld [vmem:[%s10473_s1 + $0x578] sm:$0xff] }
 0x11f   :  { %1847 = vadd.xlane.f32.xlu1 %v1846_v50  ;;  %v1496_v17 = vadd.f32 %v1416_v29, %v1279_v31  ;;  %v634_v5 = vadd.f32 %v554_v42, %v417_v12  ;;  %v988_v49 = vmul.f32 %v5231_v37, %v7027_v56  ;;  %v989_v8 = vmul.f32 %v5232_v11, %v7030_v34  ;;  %v5233_v50 = vld [vmem:[%s10473_s1 + $0x6b0] sm:$0xff]  ;;  %v5234_v42 = vld [vmem:[%s10473_s1 + $0x6b8] sm:$0xff]  ;;  %v5239_v11 = vld [vmem:[%s10473_s1 + $0x60] sm:$0xff] }
 0x120   :  { %v1497_v10 = vadd.f32 %v1417_v14, %v1280_v53  ;;  %v635_v44 = vadd.f32 %v555_v27, %v418_v63  ;;  %v1205_v29 = vmul.f32 %v5233_v50, %v7033_v46  ;;  %v1206_v31 = vmul.f32 %v5234_v42, %v7036_v28  ;;  %v5235_v14 = vld [vmem:[%s10473_s1 + $0x7f0] sm:$0xff]  ;;  %v5236_v27 = vld [vmem:[%s10473_s1 + $0x7f8] sm:$0xff] }
 0x121   :  { %v7485_v12 = vadd.f32 %v1633_v47, %v1496_v17  ;;  %v851_v59 = vadd.f32 %v771_v55, %v634_v5  ;;  %v1422_v63 = vmul.f32 %v5235_v14, %v7039_v24  ;;  %v1423_v53 = vmul.f32 %v5236_v27, %v7042_v38  ;;  %v5237_v47 = vld [vmem:[%s10473_s1 + $0x930] sm:$0xff]  ;;  %v5238_v17 = vld [vmem:[%s10473_s1 + $0x938] sm:$0xff]  ;;  %v5243_v27 = vld [vmem:[%s10473_s1 + $0x2e0] sm:$0xff] }
 0x122   :  { %v7495_v22 = vadd.f32 %v1634_v16, %v1497_v10  ;;  %v852_v40 = vadd.f32 %v772_v62, %v635_v44  ;;  %v1639_v55 = vmul.f32 %v5237_v47, %v7069_v58  ;;  %v1640_v5 = vmul.f32 %v5238_v17, %v7072_v32  ;;  %v5240_v62 = vld [vmem:[%s10473_s1 + $0x68] sm:$0xff]  ;;  %v5241_v44 = vld [vmem:[%s10473_s1 + $0x1a0] sm:$0xff] }
 0x123   :  { %10744 = vst [vmem:[#allocation52_spill] sm:$0xff] %v7485_v12  ;;  %v1068_v37 = vadd.f32 %v988_v49, %v851_v59  ;;  %v198_v16 = vmul.f32 %v5239_v11, %v6971_v52  ;;  %v199_v10 = vmul.f32 %v5240_v62, %v6983_v51  ;;  %v335_v50 = vmul.f32 %v5241_v44, %v6974_v57  ;;  %v5242_v59 = vld [vmem:[%s10473_s1 + $0x1a8] sm:$0xff] }
 0x124   :  { %10745 = vst [vmem:[#allocation53_spill] sm:$0xff] %v7495_v22  ;;  %v1841_v49 = vsel %vm25_vm0, %v7495_v22, 0.0  ;;  %v1069_v42 = vadd.f32 %v989_v8, %v852_v40  ;;  %v336_v14 = vmul.f32 %v5242_v59, %v6986_v4  ;;  %v552_v47 = vmul.f32 %v5243_v27, %v6977_v30  ;;  %v5244_v8 = vld [vmem:[%s10473_s1 + $0x2e8] sm:$0xff]  ;;  %v5245_v59 = vld [vmem:[%s10473_s1 + $0x420] sm:$0xff] }
 0x125   :  { %v1842_v17 = vadd.f32 %v1841_v49, %v7485_v12  ;;  %v1285_v11 = vadd.f32 %v1205_v29, %v1068_v37  ;;  %v415_v62 = vadd.f32 %v335_v50, %v198_v16  ;;  %v553_v40 = vmul.f32 %v5244_v8, %v6989_v60  ;;  %v5246_v49 = vld [vmem:[%s10473_s1 + $0x428] sm:$0xff] }
 0x126   :  { %v1286_v44 = vadd.f32 %v1206_v31, %v1069_v42  ;;  %v416_v22 = vadd.f32 %v336_v14, %v199_v10  ;;  %v769_v48 = vmul.f32 %v5245_v59, %v6980_v0  ;;  %v770_v29 = vmul.f32 %v5246_v49, %v6992_v9  ;;  %v5247_v31 = vld [vmem:[%s10473_s1 + $0x560] sm:$0xff]  ;;  %v5248_v50 = vld [vmem:[%s10473_s1 + $0x568] sm:$0xff] }
 0x127   :  { %1843 = vadd.xlane.f32.xlu0 %v1842_v17  ;;  %v1502_v37 = vadd.f32 %v1422_v63, %v1285_v11  ;;  %v632_v16 = vadd.f32 %v552_v47, %v415_v62  ;;  %v986_v10 = vmul.f32 %v5247_v31, %v7027_v56  ;;  %v987_v42 = vmul.f32 %v5248_v50, %v7030_v34  ;;  %v5249_v17 = vld [vmem:[%s10473_s1 + $0x6a0] sm:$0xff]  ;;  %v5250_v47 = vld [vmem:[%s10473_s1 + $0x6a8] sm:$0xff]  ;;  %v5255_v50 = vld [vmem:[%s10473_s1 + $0x90] sm:$0xff] }
 0x128   :  { %v1503_v14 = vadd.f32 %v1423_v53, %v1286_v44  ;;  %v633_v27 = vadd.f32 %v553_v40, %v416_v22  ;;  %v1203_v63 = vmul.f32 %v5249_v17, %v7033_v46  ;;  %v1204_v11 = vmul.f32 %v5250_v47, %v7036_v28  ;;  %v5251_v53 = vld [vmem:[%s10473_s1 + $0x7e0] sm:$0xff]  ;;  %v5252_v40 = vld [vmem:[%s10473_s1 + $0x7e8] sm:$0xff] }
 0x129   :  { %v7556_v62 = vadd.f32 %v1639_v55, %v1502_v37  ;;  %v849_v8 = vadd.f32 %v769_v48, %v632_v16  ;;  %v1420_v22 = vmul.f32 %v5251_v53, %v7039_v24  ;;  %v1421_v44 = vmul.f32 %v5252_v40, %v7042_v38  ;;  %v5253_v55 = vld [vmem:[%s10473_s1 + $0x920] sm:$0xff]  ;;  %v5254_v37 = vld [vmem:[%s10473_s1 + $0x928] sm:$0xff]  ;;  %v5259_v40 = vld [vmem:[%s10473_s1 + $0x310] sm:$0xff] }
 0x12a   :  { %v7566_v59 = vadd.f32 %v1640_v5, %v1503_v14  ;;  %v850_v49 = vadd.f32 %v770_v29, %v633_v27  ;;  %v1637_v48 = vmul.f32 %v5253_v55, %v7069_v58  ;;  %v1638_v16 = vmul.f32 %v5254_v37, %v7072_v32  ;;  %v5256_v29 = vld [vmem:[%s10473_s1 + $0x98] sm:$0xff]  ;;  %v5257_v27 = vld [vmem:[%s10473_s1 + $0x1d0] sm:$0xff] }
 0x12b   :  { %10746 = vst [vmem:[#allocation54_spill] sm:$0xff] %v7556_v62  ;;  %v1066_v31 = vadd.f32 %v986_v10, %v849_v8  ;;  %v204_v5 = vmul.f32 %v5255_v50, %v6971_v52  ;;  %v205_v14 = vmul.f32 %v5256_v29, %v6983_v51  ;;  %v341_v17 = vmul.f32 %v5257_v27, %v6974_v57  ;;  %v5258_v8 = vld [vmem:[%s10473_s1 + $0x1d8] sm:$0xff] }
 0x12c   :  { %10747 = vst [vmem:[#allocation55_spill] sm:$0xff] %v7566_v59  ;;  %v1853_v10 = vsel %vm25_vm0, %v7566_v59, 0.0  ;;  %v1067_v47 = vadd.f32 %v987_v42, %v850_v49  ;;  %v342_v53 = vmul.f32 %v5258_v8, %v6986_v4  ;;  %v558_v55 = vmul.f32 %v5259_v40, %v6977_v30  ;;  %v5260_v42 = vld [vmem:[%s10473_s1 + $0x318] sm:$0xff]  ;;  %v5261_v8 = vld [vmem:[%s10473_s1 + $0x450] sm:$0xff] }
 0x12d   :  { %v1854_v37 = vadd.f32 %v1853_v10, %v7556_v62  ;;  %v1283_v50 = vadd.f32 %v1203_v63, %v1066_v31  ;;  %v421_v29 = vadd.f32 %v341_v17, %v204_v5  ;;  %v559_v49 = vmul.f32 %v5260_v42, %v6989_v60  ;;  %v5262_v10 = vld [vmem:[%s10473_s1 + $0x458] sm:$0xff] }
 0x12e   :  { %v1284_v27 = vadd.f32 %v1204_v11, %v1067_v47  ;;  %v422_v59 = vadd.f32 %v342_v53, %v205_v14  ;;  %v775_v12 = vmul.f32 %v5261_v8, %v6980_v0  ;;  %v776_v63 = vmul.f32 %v5262_v10, %v6992_v9  ;;  %v5263_v11 = vld [vmem:[%s10473_s1 + $0x590] sm:$0xff]  ;;  %v5264_v17 = vld [vmem:[%s10473_s1 + $0x598] sm:$0xff] }
 0x12f   :  { %1855 = vadd.xlane.f32.xlu1 %v1854_v37  ;;  %v1500_v31 = vadd.f32 %v1420_v22, %v1283_v50  ;;  %v638_v5 = vadd.f32 %v558_v55, %v421_v29  ;;  %v992_v14 = vmul.f32 %v5263_v11, %v7027_v56  ;;  %v993_v47 = vmul.f32 %v5264_v17, %v7030_v34  ;;  %v5265_v37 = vld [vmem:[%s10473_s1 + $0x6d0] sm:$0xff]  ;;  %v5266_v55 = vld [vmem:[%s10473_s1 + $0x6d8] sm:$0xff]  ;;  %v5271_v17 = vld [vmem:[%s10473_s1 + $0x80] sm:$0xff] }
 0x130   :  { %v1501_v53 = vadd.f32 %v1421_v44, %v1284_v27  ;;  %v639_v40 = vadd.f32 %v559_v49, %v422_v59  ;;  %v1209_v22 = vmul.f32 %v5265_v37, %v7033_v46  ;;  %v1210_v50 = vmul.f32 %v5266_v55, %v7036_v28  ;;  %v5267_v44 = vld [vmem:[%s10473_s1 + $0x810] sm:$0xff]  ;;  %v5268_v49 = vld [vmem:[%s10473_s1 + $0x818] sm:$0xff] }
 0x131   :  { %v7627_v29 = vadd.f32 %v1637_v48, %v1500_v31  ;;  %v855_v42 = vadd.f32 %v775_v12, %v638_v5  ;;  %v1426_v59 = vmul.f32 %v5267_v44, %v7039_v24  ;;  %v1427_v27 = vmul.f32 %v5268_v49, %v7042_v38  ;;  %v5269_v48 = vld [vmem:[%s10473_s1 + $0x950] sm:$0xff]  ;;  %v5270_v31 = vld [vmem:[%s10473_s1 + $0x958] sm:$0xff]  ;;  %v5275_v49 = vld [vmem:[%s10473_s1 + $0x300] sm:$0xff] }
 0x132   :  { %v7637_v8 = vadd.f32 %v1638_v16, %v1501_v53  ;;  %v856_v10 = vadd.f32 %v776_v63, %v639_v40  ;;  %v1643_v12 = vmul.f32 %v5269_v48, %v7069_v58  ;;  %v1644_v5 = vmul.f32 %v5270_v31, %v7072_v32  ;;  %v5272_v63 = vld [vmem:[%s10473_s1 + $0x88] sm:$0xff]  ;;  %v5273_v40 = vld [vmem:[%s10473_s1 + $0x1c0] sm:$0xff] }
 0x133   :  { %10748 = vst [vmem:[#allocation56_spill] sm:$0xff] %v7627_v29  ;;  %v1072_v11 = vadd.f32 %v992_v14, %v855_v42  ;;  %v202_v16 = vmul.f32 %v5271_v17, %v6971_v52  ;;  %v203_v53 = vmul.f32 %v5272_v63, %v6983_v51  ;;  %v339_v37 = vmul.f32 %v5273_v40, %v6974_v57  ;;  %v5274_v42 = vld [vmem:[%s10473_s1 + $0x1c8] sm:$0xff] }
 0x134   :  { %10749 = vst [vmem:[#allocation57_spill] sm:$0xff] %v7637_v8  ;;  %v1849_v14 = vsel %vm25_vm0, %v7637_v8, 0.0  ;;  %v1073_v55 = vadd.f32 %v993_v47, %v856_v10  ;;  %v340_v44 = vmul.f32 %v5274_v42, %v6986_v4  ;;  %v556_v48 = vmul.f32 %v5275_v49, %v6977_v30  ;;  %v5276_v47 = vld [vmem:[%s10473_s1 + $0x308] sm:$0xff]  ;;  %v5277_v42 = vld [vmem:[%s10473_s1 + $0x440] sm:$0xff] }
 0x135   :  { %v1850_v31 = vadd.f32 %v1849_v14, %v7627_v29  ;;  %v1289_v17 = vadd.f32 %v1209_v22, %v1072_v11  ;;  %v419_v63 = vadd.f32 %v339_v37, %v202_v16  ;;  %v557_v10 = vmul.f32 %v5276_v47, %v6989_v60  ;;  %v5278_v14 = vld [vmem:[%s10473_s1 + $0x448] sm:$0xff] }
 0x136   :  { %v1290_v40 = vadd.f32 %v1210_v50, %v1073_v55  ;;  %v420_v8 = vadd.f32 %v340_v44, %v203_v53  ;;  %v773_v62 = vmul.f32 %v5277_v42, %v6980_v0  ;;  %v774_v22 = vmul.f32 %v5278_v14, %v6992_v9  ;;  %v5279_v50 = vld [vmem:[%s10473_s1 + $0x580] sm:$0xff]  ;;  %v5280_v37 = vld [vmem:[%s10473_s1 + $0x588] sm:$0xff] }
 0x137   :  { %1851 = vadd.xlane.f32.xlu0 %v1850_v31  ;;  %v1506_v11 = vadd.f32 %v1426_v59, %v1289_v17  ;;  %v636_v16 = vadd.f32 %v556_v48, %v419_v63  ;;  %v990_v53 = vmul.f32 %v5279_v50, %v7027_v56  ;;  %v991_v55 = vmul.f32 %v5280_v37, %v7030_v34  ;;  %v5281_v31 = vld [vmem:[%s10473_s1 + $0x6c0] sm:$0xff]  ;;  %v5282_v48 = vld [vmem:[%s10473_s1 + $0x6c8] sm:$0xff]  ;;  %v5287_v37 = vld [vmem:[%s10473_s1 + $0xb0] sm:$0xff] }
 0x138   :  { %v1507_v44 = vadd.f32 %v1427_v27, %v1290_v40  ;;  %v637_v49 = vadd.f32 %v557_v10, %v420_v8  ;;  %v1207_v59 = vmul.f32 %v5281_v31, %v7033_v46  ;;  %v1208_v17 = vmul.f32 %v5282_v48, %v7036_v28  ;;  %v5283_v27 = vld [vmem:[%s10473_s1 + $0x800] sm:$0xff]  ;;  %v5284_v10 = vld [vmem:[%s10473_s1 + $0x808] sm:$0xff] }
 0x139   :  { %v7698_v63 = vadd.f32 %v1643_v12, %v1506_v11  ;;  %v853_v47 = vadd.f32 %v773_v62, %v636_v16  ;;  %v1424_v8 = vmul.f32 %v5283_v27, %v7039_v24  ;;  %v1425_v40 = vmul.f32 %v5284_v10, %v7042_v38  ;;  %v5285_v12 = vld [vmem:[%s10473_s1 + $0x940] sm:$0xff]  ;;  %v5286_v11 = vld [vmem:[%s10473_s1 + $0x948] sm:$0xff]  ;;  %v5291_v10 = vld [vmem:[%s10473_s1 + $0x330] sm:$0xff] }
 0x13a   :  { %v7708_v42 = vadd.f32 %v1644_v5, %v1507_v44  ;;  %v854_v14 = vadd.f32 %v774_v22, %v637_v49  ;;  %v1641_v62 = vmul.f32 %v5285_v12, %v7069_v58  ;;  %v1642_v16 = vmul.f32 %v5286_v11, %v7072_v32  ;;  %v5288_v22 = vld [vmem:[%s10473_s1 + $0xb8] sm:$0xff]  ;;  %v5289_v49 = vld [vmem:[%s10473_s1 + $0x1f0] sm:$0xff] }
 0x13b   :  { %10750 = vst [vmem:[#allocation58_spill] sm:$0xff] %v7698_v63  ;;  %v1070_v50 = vadd.f32 %v990_v53, %v853_v47  ;;  %v208_v5 = vmul.f32 %v5287_v37, %v6971_v52  ;;  %v209_v44 = vmul.f32 %v5288_v22, %v6983_v51  ;;  %v345_v31 = vmul.f32 %v5289_v49, %v6974_v57  ;;  %v5290_v47 = vld [vmem:[%s10473_s1 + $0x1f8] sm:$0xff] }
 0x13c   :  { %10751 = vst [vmem:[#allocation59_spill] sm:$0xff] %v7708_v42  ;;  %v1861_v53 = vsel %vm25_vm0, %v7708_v42, 0.0  ;;  %v1071_v48 = vadd.f32 %v991_v55, %v854_v14  ;;  %v346_v27 = vmul.f32 %v5290_v47, %v6986_v4  ;;  %v562_v12 = vmul.f32 %v5291_v10, %v6977_v30  ;;  %v5292_v55 = vld [vmem:[%s10473_s1 + $0x338] sm:$0xff]  ;;  %v5293_v47 = vld [vmem:[%s10473_s1 + $0x470] sm:$0xff] }
 0x13d   :  { %v1862_v11 = vadd.f32 %v1861_v53, %v7698_v63  ;;  %v1287_v37 = vadd.f32 %v1207_v59, %v1070_v50  ;;  %v425_v22 = vadd.f32 %v345_v31, %v208_v5  ;;  %v563_v14 = vmul.f32 %v5292_v55, %v6989_v60  ;;  %v5294_v53 = vld [vmem:[%s10473_s1 + $0x478] sm:$0xff] }
 0x13e   :  { %v1288_v49 = vadd.f32 %v1208_v17, %v1071_v48  ;;  %v426_v42 = vadd.f32 %v346_v27, %v209_v44  ;;  %v779_v29 = vmul.f32 %v5293_v47, %v6980_v0  ;;  %v780_v59 = vmul.f32 %v5294_v53, %v6992_v9  ;;  %v5295_v17 = vld [vmem:[%s10473_s1 + $0x5b0] sm:$0xff]  ;;  %v5296_v31 = vld [vmem:[%s10473_s1 + $0x5b8] sm:$0xff] }
 0x13f   :  { %1863 = vadd.xlane.f32.xlu1 %v1862_v11  ;;  %v1504_v50 = vadd.f32 %v1424_v8, %v1287_v37  ;;  %v642_v5 = vadd.f32 %v562_v12, %v425_v22  ;;  %v996_v44 = vmul.f32 %v5295_v17, %v7027_v56  ;;  %v997_v48 = vmul.f32 %v5296_v31, %v7030_v34  ;;  %v5297_v11 = vld [vmem:[%s10473_s1 + $0x6f0] sm:$0xff]  ;;  %v5298_v12 = vld [vmem:[%s10473_s1 + $0x6f8] sm:$0xff]  ;;  %v5303_v31 = vld [vmem:[%s10473_s1 + $0xa0] sm:$0xff] }
 0x140   :  { %v1505_v27 = vadd.f32 %v1425_v40, %v1288_v49  ;;  %v643_v10 = vadd.f32 %v563_v14, %v426_v42  ;;  %v1213_v8 = vmul.f32 %v5297_v11, %v7033_v46  ;;  %v1214_v37 = vmul.f32 %v5298_v12, %v7036_v28  ;;  %v5299_v40 = vld [vmem:[%s10473_s1 + $0x830] sm:$0xff]  ;;  %v5300_v14 = vld [vmem:[%s10473_s1 + $0x838] sm:$0xff] }
 0x141   :  { %v7769_v22 = vadd.f32 %v1641_v62, %v1504_v50  ;;  %v859_v55 = vadd.f32 %v779_v29, %v642_v5  ;;  %v1430_v42 = vmul.f32 %v5299_v40, %v7039_v24  ;;  %v1431_v49 = vmul.f32 %v5300_v14, %v7042_v38  ;;  %v5301_v62 = vld [vmem:[%s10473_s1 + $0x970] sm:$0xff]  ;;  %v5302_v50 = vld [vmem:[%s10473_s1 + $0x978] sm:$0xff]  ;;  %v5307_v14 = vld [vmem:[%s10473_s1 + $0x320] sm:$0xff] }
 0x142   :  { %v7779_v47 = vadd.f32 %v1642_v16, %v1505_v27  ;;  %v860_v53 = vadd.f32 %v780_v59, %v643_v10  ;;  %v1647_v29 = vmul.f32 %v5301_v62, %v7069_v58  ;;  %v1648_v5 = vmul.f32 %v5302_v50, %v7072_v32  ;;  %v5304_v59 = vld [vmem:[%s10473_s1 + $0xa8] sm:$0xff]  ;;  %v5305_v10 = vld [vmem:[%s10473_s1 + $0x1e0] sm:$0xff] }
 0x143   :  { %10752 = vst [vmem:[#allocation60_spill] sm:$0xff] %v7769_v22  ;;  %v1076_v17 = vadd.f32 %v996_v44, %v859_v55  ;;  %v206_v16 = vmul.f32 %v5303_v31, %v6971_v52  ;;  %v207_v27 = vmul.f32 %v5304_v59, %v6983_v51  ;;  %v343_v11 = vmul.f32 %v5305_v10, %v6974_v57  ;;  %v5306_v55 = vld [vmem:[%s10473_s1 + $0x1e8] sm:$0xff] }
 0x144   :  { %10753 = vst [vmem:[#allocation61_spill] sm:$0xff] %v7779_v47  ;;  %v1857_v44 = vsel %vm25_vm0, %v7779_v47, 0.0  ;;  %v1077_v12 = vadd.f32 %v997_v48, %v860_v53  ;;  %v344_v40 = vmul.f32 %v5306_v55, %v6986_v4  ;;  %v560_v62 = vmul.f32 %v5307_v14, %v6977_v30  ;;  %v5308_v48 = vld [vmem:[%s10473_s1 + $0x328] sm:$0xff]  ;;  %v5309_v55 = vld [vmem:[%s10473_s1 + $0x460] sm:$0xff] }
 0x145   :  { %v1858_v50 = vadd.f32 %v1857_v44, %v7769_v22  ;;  %v1293_v31 = vadd.f32 %v1213_v8, %v1076_v17  ;;  %v423_v59 = vadd.f32 %v343_v11, %v206_v16  ;;  %v561_v53 = vmul.f32 %v5308_v48, %v6989_v60  ;;  %v5310_v44 = vld [vmem:[%s10473_s1 + $0x468] sm:$0xff] }
 0x146   :  { %v1294_v10 = vadd.f32 %v1214_v37, %v1077_v12  ;;  %v424_v47 = vadd.f32 %v344_v40, %v207_v27  ;;  %v777_v63 = vmul.f32 %v5309_v55, %v6980_v0  ;;  %v778_v8 = vmul.f32 %v5310_v44, %v6992_v9  ;;  %v5311_v37 = vld [vmem:[%s10473_s1 + $0x5a0] sm:$0xff]  ;;  %v5312_v11 = vld [vmem:[%s10473_s1 + $0x5a8] sm:$0xff] }
 0x147   :  { %1859 = vadd.xlane.f32.xlu0 %v1858_v50  ;;  %v1510_v17 = vadd.f32 %v1430_v42, %v1293_v31  ;;  %v640_v16 = vadd.f32 %v560_v62, %v423_v59  ;;  %v994_v27 = vmul.f32 %v5311_v37, %v7027_v56  ;;  %v995_v12 = vmul.f32 %v5312_v11, %v7030_v34  ;;  %v5313_v50 = vld [vmem:[%s10473_s1 + $0x6e0] sm:$0xff]  ;;  %v5314_v62 = vld [vmem:[%s10473_s1 + $0x6e8] sm:$0xff]  ;;  %v5319_v11 = vld [vmem:[%s10473_s1 + $0xd0] sm:$0xff] }
 0x148   :  { %v1511_v40 = vadd.f32 %v1431_v49, %v1294_v10  ;;  %v641_v14 = vadd.f32 %v561_v53, %v424_v47  ;;  %v1211_v42 = vmul.f32 %v5313_v50, %v7033_v46  ;;  %v1212_v31 = vmul.f32 %v5314_v62, %v7036_v28  ;;  %v5315_v49 = vld [vmem:[%s10473_s1 + $0x820] sm:$0xff]  ;;  %v5316_v53 = vld [vmem:[%s10473_s1 + $0x828] sm:$0xff] }
 0x149   :  { %v7840_v59 = vadd.f32 %v1647_v29, %v1510_v17  ;;  %v857_v48 = vadd.f32 %v777_v63, %v640_v16  ;;  %v1428_v47 = vmul.f32 %v5315_v49, %v7039_v24  ;;  %v1429_v10 = vmul.f32 %v5316_v53, %v7042_v38  ;;  %v5317_v29 = vld [vmem:[%s10473_s1 + $0x960] sm:$0xff]  ;;  %v5318_v17 = vld [vmem:[%s10473_s1 + $0x968] sm:$0xff]  ;;  %v5323_v53 = vld [vmem:[%s10473_s1 + $0x350] sm:$0xff] }
 0x14a   :  { %v7850_v55 = vadd.f32 %v1648_v5, %v1511_v40  ;;  %v858_v44 = vadd.f32 %v778_v8, %v641_v14  ;;  %v1645_v63 = vmul.f32 %v5317_v29, %v7069_v58  ;;  %v1646_v16 = vmul.f32 %v5318_v17, %v7072_v32  ;;  %v5320_v8 = vld [vmem:[%s10473_s1 + $0xd8] sm:$0xff]  ;;  %v5321_v14 = vld [vmem:[%s10473_s1 + $0x210] sm:$0xff] }
 0x14b   :  { %10754 = vst [vmem:[#allocation62_spill] sm:$0xff] %v7840_v59  ;;  %v1074_v37 = vadd.f32 %v994_v27, %v857_v48  ;;  %v212_v5 = vmul.f32 %v5319_v11, %v6971_v52  ;;  %v213_v40 = vmul.f32 %v5320_v8, %v6983_v51  ;;  %v349_v50 = vmul.f32 %v5321_v14, %v6974_v57  ;;  %v5322_v48 = vld [vmem:[%s10473_s1 + $0x218] sm:$0xff] }
 0x14c   :  { %10755 = vst [vmem:[#allocation63_spill] sm:$0xff] %v7850_v55  ;;  %v1869_v27 = vsel %vm25_vm0, %v7850_v55, 0.0  ;;  %v1075_v62 = vadd.f32 %v995_v12, %v858_v44  ;;  %v350_v49 = vmul.f32 %v5322_v48, %v6986_v4  ;;  %v566_v29 = vmul.f32 %v5323_v53, %v6977_v30  ;;  %v5324_v12 = vld [vmem:[%s10473_s1 + $0x358] sm:$0xff]  ;;  %v5325_v48 = vld [vmem:[%s10473_s1 + $0x490] sm:$0xff] }
 0x14d   :  { %v1870_v17 = vadd.f32 %v1869_v27, %v7840_v59  ;;  %v1291_v11 = vadd.f32 %v1211_v42, %v1074_v37  ;;  %v429_v8 = vadd.f32 %v349_v50, %v212_v5  ;;  %v567_v44 = vmul.f32 %v5324_v12, %v6989_v60  ;;  %v5326_v27 = vld [vmem:[%s10473_s1 + $0x498] sm:$0xff] }
 0x14e   :  { %v1292_v14 = vadd.f32 %v1212_v31, %v1075_v62  ;;  %v430_v55 = vadd.f32 %v350_v49, %v213_v40  ;;  %v783_v22 = vmul.f32 %v5325_v48, %v6980_v0  ;;  %v784_v42 = vmul.f32 %v5326_v27, %v6992_v9  ;;  %v5327_v31 = vld [vmem:[%s10473_s1 + $0x5d0] sm:$0xff]  ;;  %v5328_v50 = vld [vmem:[%s10473_s1 + $0x5d8] sm:$0xff] }
 0x14f   :  { %1871 = vadd.xlane.f32.xlu1 %v1870_v17  ;;  %v1508_v37 = vadd.f32 %v1428_v47, %v1291_v11  ;;  %v646_v5 = vadd.f32 %v566_v29, %v429_v8  ;;  %v1000_v40 = vmul.f32 %v5327_v31, %v7027_v56  ;;  %v1001_v62 = vmul.f32 %v5328_v50, %v7030_v34  ;;  %v5329_v17 = vld [vmem:[%s10473_s1 + $0x710] sm:$0xff]  ;;  %v5330_v29 = vld [vmem:[%s10473_s1 + $0x718] sm:$0xff]  ;;  %v5335_v50 = vld [vmem:[%s10473_s1 + $0xc0] sm:$0xff] }
 0x150   :  { %v1509_v49 = vadd.f32 %v1429_v10, %v1292_v14  ;;  %v647_v53 = vadd.f32 %v567_v44, %v430_v55  ;;  %v1217_v47 = vmul.f32 %v5329_v17, %v7033_v46  ;;  %v1218_v11 = vmul.f32 %v5330_v29, %v7036_v28  ;;  %v5331_v10 = vld [vmem:[%s10473_s1 + $0x850] sm:$0xff]  ;;  %v5332_v44 = vld [vmem:[%s10473_s1 + $0x858] sm:$0xff] }
 0x151   :  { %v7911_v8 = vadd.f32 %v1645_v63, %v1508_v37  ;;  %v863_v12 = vadd.f32 %v783_v22, %v646_v5  ;;  %v1434_v55 = vmul.f32 %v5331_v10, %v7039_v24  ;;  %v1435_v14 = vmul.f32 %v5332_v44, %v7042_v38  ;;  %v5333_v63 = vld [vmem:[%s10473_s1 + $0x990] sm:$0xff]  ;;  %v5334_v37 = vld [vmem:[%s10473_s1 + $0x998] sm:$0xff]  ;;  %v5339_v44 = vld [vmem:[%s10473_s1 + $0x340] sm:$0xff] }
 0x152   :  { %v7921_v48 = vadd.f32 %v1646_v16, %v1509_v49  ;;  %v864_v27 = vadd.f32 %v784_v42, %v647_v53  ;;  %v1651_v22 = vmul.f32 %v5333_v63, %v7069_v58  ;;  %v1652_v5 = vmul.f32 %v5334_v37, %v7072_v32  ;;  %v5336_v42 = vld [vmem:[%s10473_s1 + $0xc8] sm:$0xff]  ;;  %v5337_v53 = vld [vmem:[%s10473_s1 + $0x200] sm:$0xff] }
 0x153   :  { %10756 = vst [vmem:[#allocation64_spill] sm:$0xff] %v7911_v8  ;;  %v1080_v31 = vadd.f32 %v1000_v40, %v863_v12  ;;  %v210_v16 = vmul.f32 %v5335_v50, %v6971_v52  ;;  %v211_v49 = vmul.f32 %v5336_v42, %v6983_v51  ;;  %v347_v17 = vmul.f32 %v5337_v53, %v6974_v57  ;;  %v5338_v12 = vld [vmem:[%s10473_s1 + $0x208] sm:$0xff] }
 0x154   :  { %10757 = vst [vmem:[#allocation65_spill] sm:$0xff] %v7921_v48  ;;  %v1865_v40 = vsel %vm25_vm0, %v7921_v48, 0.0  ;;  %v1081_v29 = vadd.f32 %v1001_v62, %v864_v27  ;;  %v348_v10 = vmul.f32 %v5338_v12, %v6986_v4  ;;  %v564_v63 = vmul.f32 %v5339_v44, %v6977_v30  ;;  %v5340_v62 = vld [vmem:[%s10473_s1 + $0x348] sm:$0xff]  ;;  %v5341_v12 = vld [vmem:[%s10473_s1 + $0x480] sm:$0xff] }
 0x155   :  { %v1866_v37 = vadd.f32 %v1865_v40, %v7911_v8  ;;  %v1297_v50 = vadd.f32 %v1217_v47, %v1080_v31  ;;  %v427_v42 = vadd.f32 %v347_v17, %v210_v16  ;;  %v565_v27 = vmul.f32 %v5340_v62, %v6989_v60  ;;  %v5342_v40 = vld [vmem:[%s10473_s1 + $0x488] sm:$0xff] }
 0x156   :  { %v1298_v53 = vadd.f32 %v1218_v11, %v1081_v29  ;;  %v428_v48 = vadd.f32 %v348_v10, %v211_v49  ;;  %v781_v59 = vmul.f32 %v5341_v12, %v6980_v0  ;;  %v782_v47 = vmul.f32 %v5342_v40, %v6992_v9  ;;  %v5343_v11 = vld [vmem:[%s10473_s1 + $0x5c0] sm:$0xff]  ;;  %v5344_v17 = vld [vmem:[%s10473_s1 + $0x5c8] sm:$0xff] }
 0x157   :  { %1867 = vadd.xlane.f32.xlu0 %v1866_v37  ;;  %v1514_v31 = vadd.f32 %v1434_v55, %v1297_v50  ;;  %v644_v16 = vadd.f32 %v564_v63, %v427_v42  ;;  %v998_v49 = vmul.f32 %v5343_v11, %v7027_v56  ;;  %v999_v29 = vmul.f32 %v5344_v17, %v7030_v34  ;;  %v5345_v37 = vld [vmem:[%s10473_s1 + $0x700] sm:$0xff]  ;;  %v5346_v63 = vld [vmem:[%s10473_s1 + $0x708] sm:$0xff]  ;;  %v5351_v17 = vld [vmem:[%s10473_s1 + $0xf0] sm:$0xff] }
 0x158   :  { %v1515_v10 = vadd.f32 %v1435_v14, %v1298_v53  ;;  %v645_v44 = vadd.f32 %v565_v27, %v428_v48  ;;  %v1215_v55 = vmul.f32 %v5345_v37, %v7033_v46  ;;  %v1216_v50 = vmul.f32 %v5346_v63, %v7036_v28  ;;  %v5347_v14 = vld [vmem:[%s10473_s1 + $0x840] sm:$0xff]  ;;  %v5348_v27 = vld [vmem:[%s10473_s1 + $0x848] sm:$0xff] }
 0x159   :  { %v7982_v42 = vadd.f32 %v1651_v22, %v1514_v31  ;;  %v861_v62 = vadd.f32 %v781_v59, %v644_v16  ;;  %v1432_v48 = vmul.f32 %v5347_v14, %v7039_v24  ;;  %v1433_v53 = vmul.f32 %v5348_v27, %v7042_v38  ;;  %v5349_v22 = vld [vmem:[%s10473_s1 + $0x980] sm:$0xff]  ;;  %v5350_v31 = vld [vmem:[%s10473_s1 + $0x988] sm:$0xff]  ;;  %v5355_v27 = vld [vmem:[%s10473_s1 + $0x370] sm:$0xff] }
 0x15a   :  { %v7992_v12 = vadd.f32 %v1652_v5, %v1515_v10  ;;  %v862_v40 = vadd.f32 %v782_v47, %v645_v44  ;;  %v1649_v59 = vmul.f32 %v5349_v22, %v7069_v58  ;;  %v1650_v16 = vmul.f32 %v5350_v31, %v7072_v32  ;;  %v5352_v47 = vld [vmem:[%s10473_s1 + $0xf8] sm:$0xff]  ;;  %v5353_v44 = vld [vmem:[%s10473_s1 + $0x230] sm:$0xff] }
 0x15b   :  { %10758 = vst [vmem:[#allocation66_spill] sm:$0xff] %v7982_v42  ;;  %v1078_v11 = vadd.f32 %v998_v49, %v861_v62  ;;  %v216_v5 = vmul.f32 %v5351_v17, %v6971_v52  ;;  %v217_v10 = vmul.f32 %v5352_v47, %v6983_v51  ;;  %v353_v37 = vmul.f32 %v5353_v44, %v6974_v57  ;;  %v5354_v62 = vld [vmem:[%s10473_s1 + $0x238] sm:$0xff] }
 0x15c   :  { %10759 = vst [vmem:[#allocation67_spill] sm:$0xff] %v7992_v12  ;;  %v1877_v49 = vsel %vm25_vm0, %v7992_v12, 0.0  ;;  %v1079_v63 = vadd.f32 %v999_v29, %v862_v40  ;;  %v354_v14 = vmul.f32 %v5354_v62, %v6986_v4  ;;  %v570_v22 = vmul.f32 %v5355_v27, %v6977_v30  ;;  %v5356_v29 = vld [vmem:[%s10473_s1 + $0x378] sm:$0xff]  ;;  %v5357_v62 = vld [vmem:[%s10473_s1 + $0x4b0] sm:$0xff] }
 0x15d   :  { %v1878_v31 = vadd.f32 %v1877_v49, %v7982_v42  ;;  %v1295_v17 = vadd.f32 %v1215_v55, %v1078_v11  ;;  %v433_v47 = vadd.f32 %v353_v37, %v216_v5  ;;  %v571_v40 = vmul.f32 %v5356_v29, %v6989_v60  ;;  %v5358_v49 = vld [vmem:[%s10473_s1 + $0x4b8] sm:$0xff] }
 0x15e   :  { %v1296_v44 = vadd.f32 %v1216_v50, %v1079_v63  ;;  %v434_v12 = vadd.f32 %v354_v14, %v217_v10  ;;  %v787_v8 = vmul.f32 %v5357_v62, %v6980_v0  ;;  %v788_v55 = vmul.f32 %v5358_v49, %v6992_v9  ;;  %v5359_v50 = vld [vmem:[%s10473_s1 + $0x5f0] sm:$0xff]  ;;  %v5360_v37 = vld [vmem:[%s10473_s1 + $0x5f8] sm:$0xff] }
 0x15f   :  { %1879 = vadd.xlane.f32.xlu1 %v1878_v31  ;;  %v1512_v11 = vadd.f32 %v1432_v48, %v1295_v17  ;;  %v650_v5 = vadd.f32 %v570_v22, %v433_v47  ;;  %v1004_v10 = vmul.f32 %v5359_v50, %v7027_v56  ;;  %v1005_v63 = vmul.f32 %v5360_v37, %v7030_v34  ;;  %v5361_v31 = vld [vmem:[%s10473_s1 + $0x730] sm:$0xff]  ;;  %v5362_v22 = vld [vmem:[%s10473_s1 + $0x738] sm:$0xff]  ;;  %v5367_v37 = vld [vmem:[%s10473_s1 + $0xe0] sm:$0xff] }
 0x160   :  { %v1513_v14 = vadd.f32 %v1433_v53, %v1296_v44  ;;  %v651_v27 = vadd.f32 %v571_v40, %v434_v12  ;;  %v1221_v48 = vmul.f32 %v5361_v31, %v7033_v46  ;;  %v1222_v17 = vmul.f32 %v5362_v22, %v7036_v28  ;;  %v5363_v53 = vld [vmem:[%s10473_s1 + $0x870] sm:$0xff]  ;;  %v5364_v40 = vld [vmem:[%s10473_s1 + $0x878] sm:$0xff] }
 0x161   :  { %v8053_v47 = vadd.f32 %v1649_v59, %v1512_v11  ;;  %v867_v29 = vadd.f32 %v787_v8, %v650_v5  ;;  %v1438_v12 = vmul.f32 %v5363_v53, %v7039_v24  ;;  %v1439_v44 = vmul.f32 %v5364_v40, %v7042_v38  ;;  %v5365_v59 = vld [vmem:[%s10473_s1 + $0x9b0] sm:$0xff]  ;;  %v5366_v11 = vld [vmem:[%s10473_s1 + $0x9b8] sm:$0xff]  ;;  %v5371_v40 = vld [vmem:[%s10473_s1 + $0x360] sm:$0xff] }
 0x162   :  { %v8063_v62 = vadd.f32 %v1650_v16, %v1513_v14  ;;  %v868_v49 = vadd.f32 %v788_v55, %v651_v27  ;;  %v1655_v8 = vmul.f32 %v5365_v59, %v7069_v58  ;;  %v1656_v5 = vmul.f32 %v5366_v11, %v7072_v32  ;;  %v5368_v55 = vld [vmem:[%s10473_s1 + $0xe8] sm:$0xff]  ;;  %v5369_v27 = vld [vmem:[%s10473_s1 + $0x220] sm:$0xff] }
 0x163   :  { %10760 = vst [vmem:[#allocation68_spill] sm:$0xff] %v8053_v47  ;;  %v1084_v50 = vadd.f32 %v1004_v10, %v867_v29  ;;  %v214_v16 = vmul.f32 %v5367_v37, %v6971_v52  ;;  %v215_v14 = vmul.f32 %v5368_v55, %v6983_v51  ;;  %v351_v31 = vmul.f32 %v5369_v27, %v6974_v57  ;;  %v5370_v29 = vld [vmem:[%s10473_s1 + $0x228] sm:$0xff] }
 0x164   :  { %10761 = vst [vmem:[#allocation69_spill] sm:$0xff] %v8063_v62  ;;  %v1873_v10 = vsel %vm25_vm0, %v8063_v62, 0.0  ;;  %v1085_v22 = vadd.f32 %v1005_v63, %v868_v49  ;;  %v352_v53 = vmul.f32 %v5370_v29, %v6986_v4  ;;  %v568_v59 = vmul.f32 %v5371_v40, %v6977_v30  ;;  %v5372_v63 = vld [vmem:[%s10473_s1 + $0x368] sm:$0xff]  ;;  %v5373_v29 = vld [vmem:[%s10473_s1 + $0x4a0] sm:$0xff] }
 0x165   :  { %v1874_v11 = vadd.f32 %v1873_v10, %v8053_v47  ;;  %v1301_v37 = vadd.f32 %v1221_v48, %v1084_v50  ;;  %v431_v55 = vadd.f32 %v351_v31, %v214_v16  ;;  %v569_v49 = vmul.f32 %v5372_v63, %v6989_v60  ;;  %v5374_v10 = vld [vmem:[%s10473_s1 + $0x4a8] sm:$0xff] }
 0x166   :  { %v1302_v27 = vadd.f32 %v1222_v17, %v1085_v22  ;;  %v432_v62 = vadd.f32 %v352_v53, %v215_v14  ;;  %v785_v42 = vmul.f32 %v5373_v29, %v6980_v0  ;;  %v786_v48 = vmul.f32 %v5374_v10, %v6992_v9  ;;  %v5375_v17 = vld [vmem:[%s10473_s1 + $0x5e0] sm:$0xff]  ;;  %v5376_v31 = vld [vmem:[%s10473_s1 + $0x5e8] sm:$0xff] }
 0x167   :  { %1875 = vadd.xlane.f32.xlu0 %v1874_v11  ;;  %v1518_v50 = vadd.f32 %v1438_v12, %v1301_v37  ;;  %v648_v16 = vadd.f32 %v568_v59, %v431_v55  ;;  %v1002_v14 = vmul.f32 %v5375_v17, %v7027_v56  ;;  %v1003_v22 = vmul.f32 %v5376_v31, %v7030_v34  ;;  %v5377_v11 = vld [vmem:[%s10473_s1 + $0x720] sm:$0xff]  ;;  %v5378_v59 = vld [vmem:[%s10473_s1 + $0x728] sm:$0xff]  ;;  %v5383_v31 = vld [vmem:[%s10473_s1 + $0x110] sm:$0xff] }
 0x168   :  { %v1519_v53 = vadd.f32 %v1439_v44, %v1302_v27  ;;  %v649_v40 = vadd.f32 %v569_v49, %v432_v62  ;;  %v1219_v12 = vmul.f32 %v5377_v11, %v7033_v46  ;;  %v1220_v37 = vmul.f32 %v5378_v59, %v7036_v28  ;;  %v5379_v44 = vld [vmem:[%s10473_s1 + $0x860] sm:$0xff]  ;;  %v5380_v49 = vld [vmem:[%s10473_s1 + $0x868] sm:$0xff] }
 0x169   :  { %v8124_v55 = vadd.f32 %v1655_v8, %v1518_v50  ;;  %v865_v63 = vadd.f32 %v785_v42, %v648_v16  ;;  %v1436_v62 = vmul.f32 %v5379_v44, %v7039_v24  ;;  %v1437_v27 = vmul.f32 %v5380_v49, %v7042_v38  ;;  %v5381_v8 = vld [vmem:[%s10473_s1 + $0x9a0] sm:$0xff]  ;;  %v5382_v50 = vld [vmem:[%s10473_s1 + $0x9a8] sm:$0xff]  ;;  %v5387_v49 = vld [vmem:[%s10473_s1 + $0x390] sm:$0xff] }
 0x16a   :  { %v8134_v29 = vadd.f32 %v1656_v5, %v1519_v53  ;;  %v866_v10 = vadd.f32 %v786_v48, %v649_v40  ;;  %v1653_v42 = vmul.f32 %v5381_v8, %v7069_v58  ;;  %v1654_v16 = vmul.f32 %v5382_v50, %v7072_v32  ;;  %v5384_v48 = vld [vmem:[%s10473_s1 + $0x118] sm:$0xff]  ;;  %v5385_v40 = vld [vmem:[%s10473_s1 + $0x250] sm:$0xff] }
 0x16b   :  { %10762 = vst [vmem:[#allocation70_spill] sm:$0xff] %v8124_v55  ;;  %v1082_v17 = vadd.f32 %v1002_v14, %v865_v63  ;;  %v220_v5 = vmul.f32 %v5383_v31, %v6971_v52  ;;  %v221_v53 = vmul.f32 %v5384_v48, %v6983_v51  ;;  %v357_v11 = vmul.f32 %v5385_v40, %v6974_v57  ;;  %v5386_v63 = vld [vmem:[%s10473_s1 + $0x258] sm:$0xff] }
 0x16c   :  { %10763 = vst [vmem:[#allocation71_spill] sm:$0xff] %v8134_v29  ;;  %v1885_v14 = vsel %vm25_vm0, %v8134_v29, 0.0  ;;  %v1083_v59 = vadd.f32 %v1003_v22, %v866_v10  ;;  %v358_v44 = vmul.f32 %v5386_v63, %v6986_v4  ;;  %v574_v8 = vmul.f32 %v5387_v49, %v6977_v30  ;;  %v5388_v22 = vld [vmem:[%s10473_s1 + $0x398] sm:$0xff]  ;;  %v5389_v63 = vld [vmem:[%s10473_s1 + $0x4d0] sm:$0xff] }
 0x16d   :  { %v1886_v50 = vadd.f32 %v1885_v14, %v8124_v55  ;;  %v1299_v31 = vadd.f32 %v1219_v12, %v1082_v17  ;;  %v437_v48 = vadd.f32 %v357_v11, %v220_v5  ;;  %v575_v10 = vmul.f32 %v5388_v22, %v6989_v60  ;;  %v5390_v14 = vld [vmem:[%s10473_s1 + $0x4d8] sm:$0xff] }
 0x16e   :  { %v1300_v40 = vadd.f32 %v1220_v37, %v1083_v59  ;;  %v438_v29 = vadd.f32 %v358_v44, %v221_v53  ;;  %v791_v47 = vmul.f32 %v5389_v63, %v6980_v0  ;;  %v792_v12 = vmul.f32 %v5390_v14, %v6992_v9  ;;  %v5391_v37 = vld [vmem:[%s10473_s1 + $0x610] sm:$0xff]  ;;  %v5392_v11 = vld [vmem:[%s10473_s1 + $0x618] sm:$0xff] }
 0x16f   :  { %1887 = vadd.xlane.f32.xlu1 %v1886_v50  ;;  %v1516_v17 = vadd.f32 %v1436_v62, %v1299_v31  ;;  %v654_v5 = vadd.f32 %v574_v8, %v437_v48  ;;  %v1008_v53 = vmul.f32 %v5391_v37, %v7027_v56  ;;  %v1009_v59 = vmul.f32 %v5392_v11, %v7030_v34  ;;  %v5393_v50 = vld [vmem:[%s10473_s1 + $0x750] sm:$0xff]  ;;  %v5394_v8 = vld [vmem:[%s10473_s1 + $0x758] sm:$0xff]  ;;  %v5399_v11 = vld [vmem:[%s10473_s1 + $0x100] sm:$0xff] }
 0x170   :  { %v1517_v44 = vadd.f32 %v1437_v27, %v1300_v40  ;;  %v655_v49 = vadd.f32 %v575_v10, %v438_v29  ;;  %v1225_v62 = vmul.f32 %v5393_v50, %v7033_v46  ;;  %v1226_v31 = vmul.f32 %v5394_v8, %v7036_v28  ;;  %v5395_v27 = vld [vmem:[%s10473_s1 + $0x890] sm:$0xff]  ;;  %v5396_v10 = vld [vmem:[%s10473_s1 + $0x898] sm:$0xff] }
 0x171   :  { %v8195_v48 = vadd.f32 %v1653_v42, %v1516_v17  ;;  %v871_v22 = vadd.f32 %v791_v47, %v654_v5  ;;  %v1442_v29 = vmul.f32 %v5395_v27, %v7039_v24  ;;  %v1443_v40 = vmul.f32 %v5396_v10, %v7042_v38  ;;  %v5397_v42 = vld [vmem:[%s10473_s1 + $0x9d0] sm:$0xff]  ;;  %v5398_v17 = vld [vmem:[%s10473_s1 + $0x9d8] sm:$0xff]  ;;  %v5403_v10 = vld [vmem:[%s10473_s1 + $0x380] sm:$0xff] }
 0x172   :  { %v8205_v63 = vadd.f32 %v1654_v16, %v1517_v44  ;;  %v872_v14 = vadd.f32 %v792_v12, %v655_v49  ;;  %v1659_v47 = vmul.f32 %v5397_v42, %v7069_v58  ;;  %v1660_v5 = vmul.f32 %v5398_v17, %v7072_v32  ;;  %v5400_v12 = vld [vmem:[%s10473_s1 + $0x108] sm:$0xff]  ;;  %v5401_v49 = vld [vmem:[%s10473_s1 + $0x240] sm:$0xff] }
 0x173   :  { %10764 = vst [vmem:[#allocation72_spill] sm:$0xff] %v8195_v48  ;;  %v1088_v37 = vadd.f32 %v1008_v53, %v871_v22  ;;  %v218_v16 = vmul.f32 %v5399_v11, %v6971_v52  ;;  %v219_v44 = vmul.f32 %v5400_v12, %v6983_v51  ;;  %v355_v50 = vmul.f32 %v5401_v49, %v6974_v57  ;;  %v5402_v22 = vld [vmem:[%s10473_s1 + $0x248] sm:$0xff] }
 0x174   :  { %10765 = vst [vmem:[#allocation73_spill] sm:$0xff] %v8205_v63  ;;  %v1881_v53 = vsel %vm25_vm0, %v8205_v63, 0.0  ;;  %v1089_v8 = vadd.f32 %v1009_v59, %v872_v14  ;;  %v356_v27 = vmul.f32 %v5402_v22, %v6986_v4  ;;  %v572_v42 = vmul.f32 %v5403_v10, %v6977_v30  ;;  %v5404_v59 = vld [vmem:[%s10473_s1 + $0x388] sm:$0xff]  ;;  %v5405_v22 = vld [vmem:[%s10473_s1 + $0x4c0] sm:$0xff] }
 0x175   :  { %v1882_v17 = vadd.f32 %v1881_v53, %v8195_v48  ;;  %v1305_v11 = vadd.f32 %v1225_v62, %v1088_v37  ;;  %v435_v12 = vadd.f32 %v355_v50, %v218_v16  ;;  %v573_v14 = vmul.f32 %v5404_v59, %v6989_v60  ;;  %v5406_v53 = vld [vmem:[%s10473_s1 + $0x4c8] sm:$0xff]  ;;  %v8250_v37 = vpop.xlane.xlu1 %1755 }
 0x176   :  { %v1306_v49 = vadd.f32 %v1226_v31, %v1089_v8  ;;  %v436_v63 = vadd.f32 %v356_v27, %v219_v44  ;;  %v789_v55 = vmul.f32 %v5405_v22, %v6980_v0  ;;  %v790_v62 = vmul.f32 %v5406_v53, %v6992_v9  ;;  %v5407_v31 = vld [vmem:[%s10473_s1 + $0x600] sm:$0xff]  ;;  %v5408_v8 = vld [vmem:[%s10473_s1 + $0x608] sm:$0xff]  ;;  %v8278_v53 = vpop.xlane.xlu0 %1747 }
 0x177   :  { %1883 = vadd.xlane.f32.xlu0 %v1882_v17  ;;  %v1522_v16 = vadd.f32 %v1442_v29, %v1305_v11  ;;  %v652_v50 = vadd.f32 %v572_v42, %v435_v12  ;;  %v1006_v44 = vmul.f32 %v5407_v31, %v7027_v56  ;;  %v1007_v27 = vmul.f32 %v5408_v8, %v7030_v34  ;;  %v5409_v17 = vld [vmem:[%s10473_s1 + $0x740] sm:$0xff]  ;;  %v5410_v42 = vld [vmem:[%s10473_s1 + $0x748] sm:$0xff] }
 0x178   :  { %v1523_v10 = vadd.f32 %v1443_v40, %v1306_v49  ;;  %v653_v59 = vadd.f32 %v573_v14, %v436_v63  ;;  %v1223_v29 = vmul.f32 %v5409_v17, %v7033_v46  ;;  %v1224_v11 = vmul.f32 %v5410_v42, %v7036_v28  ;;  %v5411_v40 = vld [vmem:[%s10473_s1 + $0x880] sm:$0xff]  ;;  %v5412_v14 = vld [vmem:[%s10473_s1 + $0x888] sm:$0xff]  ;;  %v5415_v42 = vld [vmem:[%s10473_s1 + $0x130] sm:$0xff] }
 0x179   :  { %v8268_v12 = vadd.f32 %v1659_v47, %v1522_v16  ;;  %v869_v22 = vadd.f32 %v789_v55, %v652_v50  ;;  %v1440_v63 = vmul.f32 %v5411_v40, %v7039_v24  ;;  %v1441_v49 = vmul.f32 %v5412_v14, %v7042_v38  ;;  %v5413_v55 = vld [vmem:[%s10473_s1 + $0x9c0] sm:$0xff]  ;;  %v5414_v16 = vld [vmem:[%s10473_s1 + $0x9c8] sm:$0xff]  ;;  %v5418_v14 = vld [vmem:[%s10473_s1 + $0x278] sm:$0xff] }
 0x17a   :  { %v8280_v31 = vadd.f32 %v1660_v5, %v1523_v10  ;;  %v870_v8 = vadd.f32 %v790_v62, %v653_v59  ;;  %v1657_v47 = vmul.f32 %v5413_v55, %v7069_v58  ;;  %v1658_v50 = vmul.f32 %v5414_v16, %v7072_v32  ;;  %v5416_v62 = vld [vmem:[%s10473_s1 + $0x138] sm:$0xff]  ;;  %v5417_v59 = vld [vmem:[%s10473_s1 + $0x270] sm:$0xff] }
 0x17b   :  { %10766 = vst [vmem:[#allocation74_spill] sm:$0xff] %v8268_v12  ;;  %v1086_v17 = vadd.f32 %v1006_v44, %v869_v22  ;;  %v224_v5 = vmul.f32 %v5415_v42, %v6971_v52  ;;  %v225_v10 = vmul.f32 %v5416_v62, %v6983_v51  ;;  %v361_v40 = vmul.f32 %v5417_v59, %v6974_v57  ;;  %v5419_v16 = vld [vmem:[%s10473_s1 + $0x3b0] sm:$0xff]  ;;  %v8312_v62 = vpop.xlane.xlu1 %1759 }
 0x17c   :  { %10767 = vst [vmem:[#allocation75_spill] sm:$0xff] %v8280_v31  ;;  %v1893_v44 = vsel %vm25_vm0, %v8280_v31, 0.0  ;;  %v1087_v22 = vadd.f32 %v1007_v27, %v870_v8  ;;  %v362_v55 = vmul.f32 %v5418_v14, %v6986_v4  ;;  %v578_v42 = vmul.f32 %v5419_v16, %v6977_v30  ;;  %v5420_v27 = vld [vmem:[%s10473_s1 + $0x3b8] sm:$0xff] }
 0x17d   :  { %v1894_v59 = vadd.f32 %v1893_v44, %v8268_v12  ;;  %v1303_v48 = vadd.f32 %v1223_v29, %v1086_v17  ;;  %v441_v15 = vadd.f32 %v361_v40, %v224_v5  ;;  %v579_v8 = vmul.f32 %v5420_v27, %v6989_v60  ;;  %v5422_v44 = vld [vmem:[%s10473_s1 + $0x4f8] sm:$0xff] }
 0x17e   :  { %v1304_v31 = vadd.f32 %v1224_v11, %v1087_v22  ;;  %v442_v14 = vadd.f32 %v362_v55, %v225_v10  ;;  %v795_v16 = vmul.f32 %v5421_v18, %v6980_v0  ;;  %v796_v29 = vmul.f32 %v5422_v44, %v6992_v9  ;;  %v5423_v11 = vld [vmem:[%s10473_s1 + $0x630] sm:$0xff]  ;;  %v5424_v40 = vld [vmem:[%s10473_s1 + $0x638] sm:$0xff]  ;;  %v8335_v22 = vpop.xlane.xlu0 %1751 }
 0x17f   :  { %1895 = vadd.xlane.f32.xlu1 %v1894_v59  ;;  %v1520_v17 = vadd.f32 %v1440_v63, %v1303_v48  ;;  %v658_v5 = vadd.f32 %v578_v42, %v441_v15  ;;  %v1012_v10 = vmul.f32 %v5423_v11, %v7027_v56  ;;  %v1013_v18 = vmul.f32 %v5424_v40, %v7030_v34  ;;  %v5425_v15 = vld [vmem:[%s10473_s1 + $0x770] sm:$0xff]  ;;  %v5426_v63 = vld [vmem:[%s10473_s1 + $0x778] sm:$0xff] }
 0x180   :  { %v1521_v55 = vadd.f32 %v1441_v49, %v1304_v31  ;;  %v659_v27 = vadd.f32 %v579_v8, %v442_v14  ;;  %v1229_v48 = vmul.f32 %v5425_v15, %v7033_v46  ;;  %v1230_v42 = vmul.f32 %v5426_v63, %v7036_v28  ;;  %v5427_v49 = vld [vmem:[%s10473_s1 + $0x8b0] sm:$0xff]  ;;  %v5428_v8 = vld [vmem:[%s10473_s1 + $0x8b8] sm:$0xff]  ;;  %v8365_v15 = vpop.xlane.xlu1 %1767 }
 0x181   :  { %v8345_v59 = vadd.f32 %v1657_v47, %v1520_v17  ;;  %v875_v44 = vadd.f32 %v795_v16, %v658_v5  ;;  %v1446_v31 = vmul.f32 %v5427_v49, %v7039_v24  ;;  %v1447_v14 = vmul.f32 %v5428_v8, %v7042_v38  ;;  %v5429_v47 = vld [vmem:[%s10473_s1 + $0x9f0] sm:$0xff]  ;;  %v5430_v17 = vld [vmem:[%s10473_s1 + $0x9f8] sm:$0xff]  ;;  %v5433_v49 = vld [vmem:[%s10473_s1 + $0x260] sm:$0xff] }
 0x182   :  { %v8355_v11 = vadd.f32 %v1658_v50, %v1521_v55  ;;  %v876_v40 = vadd.f32 %v796_v29, %v659_v27  ;;  %v1663_v16 = vmul.f32 %v5429_v47, %v7069_v58  ;;  %v1664_v5 = vmul.f32 %v5430_v17, %v7072_v32  ;;  %v5431_v50 = vld [vmem:[%s10473_s1 + $0x120] sm:$0xff]  ;;  %v5432_v55 = vld [vmem:[%s10473_s1 + $0x128] sm:$0xff] }
 0x183   :  { %v1092_v63 = vadd.f32 %v1012_v10, %v875_v44  ;;  %v222_v29 = vmul.f32 %v5431_v50, %v6971_v52  ;;  %v223_v27 = vmul.f32 %v5432_v55, %v6983_v51  ;;  %v359_v8 = vmul.f32 %v5433_v49, %v6974_v57  ;;  %v5434_v52 = vld [vmem:[%s10473_s1 + $0x268] sm:$0xff]  ;;  %v5435_v51 = vld [vmem:[%s10473_s1 + $0x3a0] sm:$0xff]  ;;  %v8394_v49 = vpop.xlane.xlu0 %1763 }
 0x184   :  { %10768 = vst [vmem:[#allocation76_spill] sm:$0xff] %v8355_v11  ;;  %v1889_v10 = vsel %vm25_vm0, %v8355_v11, 0.0  ;;  %v1093_v44 = vadd.f32 %v1013_v18, %v876_v40  ;;  %v360_v47 = vmul.f32 %v5434_v52, %v6986_v4  ;;  %v576_v17 = vmul.f32 %v5435_v51, %v6977_v30  ;;  %v5436_v18 = vld [vmem:[%s10473_s1 + $0x3a8] sm:$0xff]  ;;  %v5437_v52 = vld [vmem:[%s10473_s1 + $0x4e0] sm:$0xff] }
 0x185   :  { %v1890_v50 = vadd.f32 %v1889_v10, %v8345_v59  ;;  %v1309_v55 = vadd.f32 %v1229_v48, %v1092_v63  ;;  %v439_v57 = vadd.f32 %v359_v8, %v222_v29  ;;  %v577_v40 = vmul.f32 %v5436_v18, %v6989_v60  ;;  %v5438_v48 = vld [vmem:[%s10473_s1 + $0x4e8] sm:$0xff]  ;;  %v5439_v60 = vld [vmem:[%s10473_s1 + $0x620] sm:$0xff] }
 0x186   :  { %v1310_v11 = vadd.f32 %v1230_v42, %v1093_v44  ;;  %v440_v4 = vadd.f32 %v360_v47, %v223_v27  ;;  %v793_v30 = vmul.f32 %v5437_v52, %v6980_v0  ;;  %v794_v63 = vmul.f32 %v5438_v48, %v6992_v9  ;;  %v5440_v0 = vld [vmem:[%s10473_s1 + $0x628] sm:$0xff]  ;;  %v5441_v9 = vld [vmem:[%s10473_s1 + $0x760] sm:$0xff]  ;;  %v1776_v47 = vpop.xlane.xlu1 %1775 }
 0x187   :  { %1891 = vadd.xlane.f32.xlu0 %v1890_v50  ;;  %v1526_v29 = vadd.f32 %v1446_v31, %v1309_v55  ;;  %v656_v8 = vadd.f32 %v576_v17, %v439_v57  ;;  %v1010_v42 = vmul.f32 %v5439_v60, %v7027_v56  ;;  %v1011_v44 = vmul.f32 %v5440_v0, %v7030_v34  ;;  %v5442_v56 = vld [vmem:[%s10473_s1 + $0x768] sm:$0xff]  ;;  %v5443_v34 = vld [vmem:[%s10473_s1 + $0x8a0] sm:$0xff] }
 0x188   :  { %v1527_v27 = vadd.f32 %v1447_v14, %v1310_v11  ;;  %v657_v10 = vadd.f32 %v577_v40, %v440_v4  ;;  %v1227_v31 = vmul.f32 %v5441_v9, %v7033_v46  ;;  %v1228_v14 = vmul.f32 %v5442_v56, %v7036_v28  ;;  %v5444_v46 = vld [vmem:[%s10473_s1 + $0x8a8] sm:$0xff]  ;;  %v5445_v57 = vld [vmem:[%s10473_s1 + $0x9e0] sm:$0xff]  ;;  %v1772_v4 = vpop.xlane.xlu0 %1771 }
 0x189   :  { %v8416_v51 = vadd.f32 %v1663_v16, %v1526_v29  ;;  %v873_v17 = vadd.f32 %v793_v30, %v656_v8  ;;  %v1444_v11 = vmul.f32 %v5443_v34, %v7039_v24  ;;  %v1445_v16 = vmul.f32 %v5444_v46, %v7042_v38  ;;  %v5446_v38 = vld [vmem:[%s10473_s1 + $0x9e8] sm:$0xff] }
 0x18a   :  { %v8426_v50 = vadd.f32 %v1664_v5, %v1527_v27  ;;  %v874_v55 = vadd.f32 %v794_v63, %v657_v10  ;;  %v1661_v28 = vmul.f32 %v5445_v57, %v7069_v58  ;;  %v1907_v40 = vmul.f32 0.0069444445, %v8250_v37  ;;  %v1784_v27 = vpop.xlane.xlu1 %1783 }
 0x18b   :  { %10769 = vst [vmem:[#allocation77_spill] sm:$0xff] %v8416_v51  ;;  %v1090_v18 = vadd.f32 %v1010_v42, %v873_v17  ;;  %v1905_v24 = vmul.f32 0.0069444445, %v8278_v53  ;;  %v1908_v5 = vmul.f32 0.0069444445, %v8312_v62  ;;  %v1662_v48 = vmul.f32 %v5446_v38, %v7072_v32 }
 0x18c   :  { %10770 = vst [vmem:[#allocation78_spill] sm:$0xff] %v8426_v50  ;;  %v1901_v52 = vsel %vm25_vm0, %v8426_v50, 0.0  ;;  %v1091_v30 = vadd.f32 %v1011_v44, %v874_v55  ;;  %v1906_v58 = vmul.f32 0.0069444445, %v8335_v22  ;;  %v1947_v29 = vand.u32 2147483647, %v1907_v40  ;;  %v1780_v55 = vpop.xlane.xlu0 %1779 }
 0x18d   :  { %v1902_v63 = vadd.f32 %v1901_v52, %v8416_v51  ;;  %v1307_v37 = vadd.f32 %v1227_v31, %v1090_v18  ;;  %v2027_v53 = vmul.f32 %v1907_v40, %v1907_v40  ;;  %v1945_v62 = vand.u32 2147483647, %v1905_v24 }
 0x18e   :  { %v1308_v8 = vadd.f32 %v1228_v14, %v1091_v30  ;;  %v2025_v60 = vmul.f32 %v1905_v24, %v1905_v24  ;;  %v1948_v42 = vand.u32 2147483647, %v1908_v5  ;;  %v2028_v44 = vmul.f32 %v1908_v5, %v1908_v5  ;;  %v1792_v30 = vpop.xlane.xlu1 %1791 }
 0x18f   :  { %1903 = vadd.xlane.f32.xlu1 %v1902_v63  ;;  %v1524_v10 = vadd.f32 %v1444_v11, %v1307_v37  ;;  %v2067_v0 = vadd.f32 1.0, %v2027_v53  ;;  %v1910_v9 = vmul.f32 0.0069444445, %v8365_v15  ;;  %v8448_v32 = vmul.f32 %v1947_v29, %v1907_v40 }
 0x190   :  { %v1525_v17 = vadd.f32 %v1445_v16, %v1308_v8  ;;  %v8450_v22 = vmul.f32 %v1945_v62, %v1905_v24  ;;  %v2065_v56 = vadd.f32 1.0, %v2025_v60  ;;  %v2068_v14 = vadd.f32 1.0, %v2028_v44 }
 0x191   :  { %v8452_v31 = vadd.f32 %v1661_v28, %v1524_v10  ;;  %4767 = vrcp.f32 %v2067_v0  ;;  %v1946_v34 = vand.u32 2147483647, %v1906_v58  ;;  %v8456_v11 = vmul.f32 %v1948_v42, %v1908_v5 }
 0x192   :  { %v8454_v46 = vadd.f32 %v1662_v48, %v1525_v17  ;;  %4769 = vrcp.f32 %v2065_v56  ;;  %v2026_v57 = vmul.f32 %v1906_v58, %v1906_v58  ;;  %v1950_v15 = vand.u32 2147483647, %v1910_v9 }
 0x193   :  { %10771 = vst [vmem:[#allocation79_spill] sm:$0xff] %v8452_v31  ;;  %4771 = vrcp.f32 %v2068_v14  ;;  %v2030_v16 = vmul.f32 %v1910_v9, %v1910_v9  ;;  %v1909_v18 = vmul.f32 0.0069444445, %v8394_v49  ;;  %v8461_v28 = vmul.f32 %v1946_v34, %v1906_v58  ;;  %v1788_v58 = vpop.xlane.xlu0 %1787 }
 0x194   :  { %10772 = vst [vmem:[#allocation80_spill] sm:$0xff] %v8454_v46  ;;  %v1897_v40 = vsel %vm25_vm0, %v8454_v46, 0.0  ;;  %v2066_v24 = vadd.f32 1.0, %v2026_v57  ;;  %v1912_v52 = vmul.f32 0.0069444445, %v1776_v47  ;;  %v8464_v8 = vmul.f32 %v1950_v15, %v1910_v9  ;;  %v1800_v9 = vpop.xlane.xlu1 %1799  ;;  %v10790_v46 = vld [vmem:[#allocation29_spill] sm:$0xff] }
 0x195   :  { %v1898_v38 = vadd.f32 %v1897_v40, %v8452_v31  ;;  %v2070_v48 = vadd.f32 1.0, %v2030_v16  ;;  %v1949_v63 = vand.u32 2147483647, %v1909_v18  ;;  %v2029_v5 = vmul.f32 %v1909_v18, %v1909_v18 }
 0x196   :  { %4773 = vrcp.f32 %v2066_v24  ;;  %v1952_v37 = vand.u32 2147483647, %v1912_v52  ;;  %v2032_v29 = vmul.f32 %v1912_v52, %v1912_v52  ;;  %v1911_v53 = vmul.f32 0.0069444445, %v1772_v4 }
 0x197   :  { %1899 = vadd.xlane.f32.xlu0 %v1898_v38  ;;  %4775 = vrcp.f32 %v2070_v48  ;;  %v2069_v49 = vadd.f32 1.0, %v2029_v5  ;;  %v1914_v62 = vmul.f32 0.0069444445, %v1784_v27  ;;  %v8466_v60 = vmul.f32 %v1949_v63, %v1909_v18 }
 0x198   :  { %v2072_v47 = vadd.f32 1.0, %v2032_v29  ;;  %v1951_v42 = vand.u32 2147483647, %v1911_v53  ;;  %v2031_v10 = vmul.f32 %v1911_v53, %v1911_v53  ;;  %v1913_v17 = vmul.f32 0.0069444445, %v1780_v55 }
 0x199   :  { %4777 = vrcp.f32 %v2069_v49  ;;  %v1954_v0 = vand.u32 2147483647, %v1914_v62  ;;  %v2034_v44 = vmul.f32 %v1914_v62, %v1914_v62  ;;  %v8468_v56 = vmul.f32 %v1952_v37, %v1912_v52  ;;  %v1796_v52 = vpop.xlane.xlu0 %1795 }
 0x19a   :  { %4779 = vrcp.f32 %v2072_v47  ;;  %v2071_v4 = vadd.f32 1.0, %v2031_v10  ;;  %v1916_v14 = vmul.f32 0.0069444445, %v1792_v30  ;;  %v8470_v34 = vmul.f32 %v1951_v42, %v1911_v53 }
 0x19b   :  { %v2074_v57 = vadd.f32 1.0, %v2034_v44  ;;  %v1953_v27 = vand.u32 2147483647, %v1913_v17  ;;  %v2033_v15 = vmul.f32 %v1913_v17, %v1913_v17  ;;  %v1915_v40 = vmul.f32 0.0069444445, %v1788_v58 }
 0x19c   :  { %4781 = vrcp.f32 %v2071_v4  ;;  %v1956_v16 = vand.u32 2147483647, %v1916_v14  ;;  %v2036_v18 = vmul.f32 %v1916_v14, %v1916_v14  ;;  %v8472_v24 = vmul.f32 %v1954_v0, %v1914_v62  ;;  %v1808_v0 = vpop.xlane.xlu1 %1807 }
 0x19d   :  { %4783 = vrcp.f32 %v2074_v57  ;;  %v2073_v38 = vadd.f32 1.0, %v2033_v15  ;;  %v1918_v55 = vmul.f32 0.0069444445, %v1800_v9  ;;  %v8474_v63 = vmul.f32 %v1953_v27, %v1913_v17 }
 0x19e   :  { %v4768_v48 = vpop.eup %4767  ;;  %v2076_v30 = vadd.f32 1.0, %v2036_v18  ;;  %v1955_v5 = vand.u32 2147483647, %v1915_v40  ;;  %v2035_v37 = vmul.f32 %v1915_v40, %v1915_v40  ;;  %v8478_v58 = vmul.f32 %v1956_v16, %v1916_v14 }
 0x19f   :  { %v4770_v29 = vpop.eup %4769  ;;  %v2147_v53 = vmul.f32 %v4768_v48, %v8448_v32  ;;  %4785 = vrcp.f32 %v2073_v38  ;;  %v1958_v49 = vand.u32 2147483647, %v1918_v55  ;;  %v2038_v47 = vmul.f32 %v1918_v55, %v1918_v55  ;;  %v8493_v38 = vpop.xlane.xlu0 %1803 }
 0x1a0   :  { %v4772_v42 = vpop.eup %4771  ;;  %v2145_v62 = vmul.f32 %v4770_v29, %v8450_v22  ;;  %4787 = vrcp.f32 %v2076_v30  ;;  %v2075_v10 = vadd.f32 1.0, %v2035_v37  ;;  %v8483_v9 = vmul.f32 %v1955_v5, %v1915_v40 }
 0x1a1   :  { %v2189_v44 = vmul.f32 %v2147_v53, %v5677_v43  ;;  %v2190_v17 = vmul.f32 %v2147_v53, %v5685_v2  ;;  %v2148_v4 = vmul.f32 %v4772_v42, %v8456_v11  ;;  %v8486_v57 = vmul.f32 %v1958_v49, %v1918_v55 }
 0x1a2   :  { %v2186_v32 = vmul.f32 %v2145_v62, %v5739_v3  ;;  %4789 = vrcp.f32 %v2075_v10  ;;  %v2078_v27 = vadd.f32 1.0, %v2038_v47  ;;  %v2185_v14 = vmul.f32 %v2145_v62, %v5737_v1  ;;  %v8509_v62 = vpop.xlane.xlu1 %1815 }
 0x1a3   :  { %v4774_v22 = vpop.eup %4773  ;;  %v2191_v15 = vmul.f32 %v2148_v4, %v5817_v25  ;;  %v2192_v16 = vmul.f32 %v2148_v4, %v5819_v26  ;;  %v8491_v18 = vmul.f32 0.0069444445, %v1796_v52  ;;  %v2288_v40 = vsel %vm25_vm0, %v2190_v17, 0.0  ;;  %v10776_v17 = vld [vmem:[#allocation15_spill] sm:$0xff] }
 0x1a4   :  { %v4776_v11 = vpop.eup %4775  ;;  %v2272_v48 = vsel %vm25_vm0, %v2186_v32, 0.0  ;;  %v2146_v55 = vmul.f32 %v4774_v22, %v8461_v28  ;;  %4791 = vrcp.f32 %v2078_v27  ;;  %v8502_v29 = vmul.f32 0.0069444445, %v1808_v0 }
 0x1a5   :  { %v8498_v30 = vadd.f32 %v2191_v15, %v2189_v44  ;;  %v2289_v5 = vsel %vm25_vm0, %v2192_v16, 0.0  ;;  %v2150_v37 = vmul.f32 %v4776_v11, %v8464_v8  ;;  %v1957_v42 = vand.u32 2147483647, %v8491_v18  ;;  %v10773_v11 = vld [vmem:[#allocation12_spill] sm:$0xff] }
 0x1a6   :  { %v4778_v52 = vpop.eup %4777  ;;  %v8504_v53 = vadd.f32 %v2289_v5, %v2288_v40  ;;  %v2187_v49 = vmul.f32 %v2146_v55, %v5879_v45  ;;  %v2188_v47 = vmul.f32 %v2146_v55, %v5889_v39  ;;  %v2037_v0 = vmul.f32 %v8491_v18, %v8491_v18  ;;  %v10774_v55 = vld [vmem:[#allocation13_spill] sm:$0xff]  ;;  %v8526_v5 = vpop.xlane.xlu0 %1811  ;;  %v10789_v39 = vld [vmem:[#allocation28_spill] sm:$0xff] }
 0x1a7   :  { %v4780_v28 = vpop.eup %4779  ;;  %v2195_v10 = vmul.f32 %v2150_v37, %v5950_v35  ;;  %v2196_v44 = vmul.f32 %v2150_v37, %v5960_v23  ;;  %v2149_v8 = vmul.f32 %v4778_v52, %v8466_v60  ;;  %v10777_v52 = vld [vmem:[#allocation16_spill] sm:$0xff] }
 0x1a8   :  { %v8517_v4 = vadd.f32 %v2187_v49, %v2185_v14  ;;  %v2273_v32 = vsel %vm25_vm0, %v2188_v47, 0.0  ;;  %v2152_v27 = vmul.f32 %v4780_v28, %v8468_v56  ;;  %v10775_v14 = vld [vmem:[#allocation14_spill] sm:$0xff] }
 0x1a9   :  { %v4782_v22 = vpop.eup %4781  ;;  %v8521_v15 = vadd.f32 %v2273_v32, %v2272_v48  ;;  %v2305_v16 = vsel %vm25_vm0, %v2196_v44, 0.0  ;;  %v2193_v40 = vmul.f32 %v2149_v8, %v10773_v11  ;;  %v2194_v60 = vmul.f32 %v2149_v8, %v10774_v55 }
 0x1aa   :  { %v4784_v37 = vpop.eup %4783  ;;  %v2199_v49 = vmul.f32 %v2152_v27, %v10775_v14  ;;  %v2200_v47 = vmul.f32 %v2152_v27, %v10776_v17  ;;  %v2151_v56 = vmul.f32 %v4782_v22, %v8470_v34  ;;  %v10778_v14 = vld [vmem:[#allocation17_spill] sm:$0xff]  ;;  %v1824_v27 = vpop.xlane.xlu1 %1823  ;;  %v10779_v22 = vld [vmem:[#allocation18_spill] sm:$0xff]  ;;  %v10781_v34 = vld [vmem:[#allocation20_spill] sm:$0xff] }
 0x1ab   :  { %v8533_v28 = vadd.f32 %v2195_v10, %v2193_v40  ;;  %v2304_v44 = vsel %vm25_vm0, %v2194_v60, 0.0  ;;  %v2154_v32 = vmul.f32 %v4784_v37, %v8472_v24  ;;  %v10780_v40 = vld [vmem:[#allocation19_spill] sm:$0xff] }
 0x1ac   :  { %v4786_v8 = vpop.eup %4785  ;;  %v8537_v55 = vadd.f32 %v2305_v16, %v2304_v44  ;;  %v2321_v11 = vsel %vm25_vm0, %v2200_v47, 0.0  ;;  %v2197_v23 = vmul.f32 %v2151_v56, %v10777_v52  ;;  %v2198_v35 = vmul.f32 %v2151_v56, %v10778_v14 }
 0x1ad   :  { %v4788_v17 = vpop.eup %4787  ;;  %v2203_v10 = vmul.f32 %v2154_v32, %v10779_v22  ;;  %v2204_v48 = vmul.f32 %v2154_v32, %v10780_v40  ;;  %v2153_v60 = vmul.f32 %v4786_v8, %v8474_v63  ;;  %v10782_v22 = vld [vmem:[#allocation21_spill] sm:$0xff]  ;;  %v1820_v32 = vpop.xlane.xlu0 %1819  ;;  %v10783_v8 = vld [vmem:[#allocation22_spill] sm:$0xff]  ;;  %v10785_v63 = vld [vmem:[#allocation24_spill] sm:$0xff] }
 0x1ae   :  { %v8547_v16 = vadd.f32 %v2199_v49, %v2197_v23  ;;  %v2320_v37 = vsel %vm25_vm0, %v2198_v35, 0.0  ;;  %v2156_v47 = vmul.f32 %v4788_v17, %v8478_v58  ;;  %v10784_v23 = vld [vmem:[#allocation23_spill] sm:$0xff]  ;;  %v2077_v58 = vadd.f32 1.0, %v2037_v0 }
 0x1af   :  { %v4790_v44 = vpop.eup %4789  ;;  %v8551_v56 = vadd.f32 %v2321_v11, %v2320_v37  ;;  %v2337_v14 = vsel %vm25_vm0, %v2204_v48, 0.0  ;;  %v2201_v52 = vmul.f32 %v2153_v60, %v10781_v34  ;;  %v2202_v2 = vmul.f32 %v2153_v60, %v10782_v22  ;;  %v10788_v0 = vld [vmem:[#allocation27_spill] sm:$0xff] }
 0x1b0   :  { %v2207_v24 = vmul.f32 %v2156_v47, %v10783_v8  ;;  %v2208_v49 = vmul.f32 %v2156_v47, %v10784_v23  ;;  %v2155_v35 = vmul.f32 %v4790_v44, %v8483_v9  ;;  %v10786_v8 = vld [vmem:[#allocation25_spill] sm:$0xff]  ;;  %v1832_v47 = vpop.xlane.xlu1 %1831  ;;  %v8572_v44 = vmul.f32 %v1957_v42, %v8491_v18 }
 0x1b1   :  { %v4792_v40 = vpop.eup %4791  ;;  %v8562_v11 = vadd.f32 %v2203_v10, %v2201_v52  ;;  %v2336_v48 = vsel %vm25_vm0, %v2202_v2, 0.0  ;;  %v1960_v52 = vand.u32 2147483647, %v8502_v29  ;;  %4793 = vrcp.f32 %v2077_v58  ;;  %v1828_v18 = vpop.xlane.xlu0 %1827 }
 0x1b2   :  { %v8565_v37 = vadd.f32 %v2337_v14, %v2336_v48  ;;  %v2353_v60 = vsel %vm25_vm0, %v2208_v49, 0.0  ;;  %v2205_v22 = vmul.f32 %v2155_v35, %v10785_v63  ;;  %v2206_v34 = vmul.f32 %v2155_v35, %v10786_v8 }
 0x1b3   :  { %v2158_v9 = vmul.f32 %v4792_v40, %v8486_v57  ;;  %v2040_v49 = vmul.f32 %v8502_v29, %v8502_v29  ;;  %v10787_v57 = vld [vmem:[#allocation26_spill] sm:$0xff]  ;;  %v8592_v17 = vmul.f32 %v1960_v52, %v8502_v29  ;;  %v1923_v26 = vmul.f32 0.0069444445, %v1820_v32 }
 0x1b4   :  { %v8576_v2 = vadd.f32 %v2207_v24, %v2205_v22  ;;  %v2352_v14 = vsel %vm25_vm0, %v2206_v34, 0.0  ;;  %v1919_v24 = vmul.f32 0.0069444445, %v8493_v38  ;;  %v1840_v8 = vpop.xlane.xlu1 %1839  ;;  %v1926_v25 = vmul.f32 0.0069444445, %v1832_v47 }
 0x1b5   :  { %v8582_v48 = vadd.f32 %v2353_v60, %v2352_v14  ;;  %v8585_v40 = vmul.f32 %v2158_v9, %v10787_v57  ;;  %v2212_v10 = vmul.f32 %v2158_v9, %v10788_v0  ;;  %v2080_v22 = vadd.f32 1.0, %v2040_v49 }
 0x1b6   :  { %v1922_v60 = vmul.f32 0.0069444445, %v8509_v62  ;;  %v1921_v14 = vmul.f32 0.0069444445, %v8526_v5  ;;  %v1959_v35 = vand.u32 2147483647, %v1919_v24  ;;  %v2039_v58 = vmul.f32 %v1919_v24, %v1919_v24 }
 0x1b7   :  { %4795 = vrcp.f32 %v2080_v22  ;;  %v1924_v57 = vmul.f32 0.0069444445, %v1824_v27  ;;  %v2369_v38 = vsel %vm25_vm0, %v2212_v10, 0.0  ;;  %v1836_v22 = vpop.xlane.xlu0 %1835  ;;  %v1925_v3 = vmul.f32 0.0069444445, %v1828_v18 }
 0x1b8   :  { %v1962_v42 = vand.u32 2147483647, %v1922_v60  ;;  %v2042_v63 = vmul.f32 %v1922_v60, %v1922_v60  ;;  %v1961_v9 = vand.u32 2147483647, %v1921_v14  ;;  %v2041_v49 = vmul.f32 %v1921_v14, %v1921_v14 }
 0x1b9   :  { %v8597_v0 = vmul.f32 %v1959_v35, %v1919_v24  ;;  %v2079_v34 = vadd.f32 1.0, %v2039_v58  ;;  %v2044_v29 = vmul.f32 %v1924_v57, %v1924_v57  ;;  %v1964_v5 = vand.u32 2147483647, %v1924_v57  ;;  %v1848_v58 = vpop.xlane.xlu1 %1847 }
 0x1ba   :  { %v8599_v52 = vmul.f32 %v1962_v42, %v1922_v60  ;;  %v2082_v62 = vadd.f32 1.0, %v2042_v63  ;;  %v2081_v23 = vadd.f32 1.0, %v2041_v49  ;;  %v8601_v43 = vmul.f32 %v1961_v9, %v1921_v14 }
 0x1bb   :  { %4797 = vrcp.f32 %v2079_v34  ;;  %v2084_v27 = vadd.f32 1.0, %v2044_v29  ;;  %v1928_v1 = vmul.f32 0.0069444445, %v1840_v8  ;;  %v1963_v10 = vand.u32 2147483647, %v1923_v26 }
 0x1bc   :  { %4799 = vrcp.f32 %v2082_v62  ;;  %v2043_v35 = vmul.f32 %v1923_v26, %v1923_v26  ;;  %v1927_v24 = vmul.f32 0.0069444445, %v1836_v22  ;;  %v1966_v42 = vand.u32 2147483647, %v1926_v25 }
 0x1bd   :  { %4801 = vrcp.f32 %v2081_v23  ;;  %v2046_v63 = vmul.f32 %v1926_v25, %v1926_v25  ;;  %v1965_v60 = vand.u32 2147483647, %v1925_v3  ;;  %v8603_v49 = vmul.f32 %v1964_v5, %v1924_v57  ;;  %v1844_v23 = vpop.xlane.xlu0 %1843 }
 0x1be   :  { %4803 = vrcp.f32 %v2084_v27  ;;  %v2083_v34 = vadd.f32 1.0, %v2043_v35  ;;  %v2045_v14 = vmul.f32 %v1925_v3, %v1925_v3  ;;  %v1968_v9 = vand.u32 2147483647, %v1928_v1  ;;  %v4794_v18 = vpop.eup %4793 }
 0x1bf   :  { %v8605_v29 = vmul.f32 %v1963_v10, %v1923_v26  ;;  %v8607_v32 = vmul.f32 %v1966_v42, %v1926_v25  ;;  %v2086_v47 = vadd.f32 1.0, %v2046_v63  ;;  %v2048_v8 = vmul.f32 %v1928_v1, %v1928_v1  ;;  %v1856_v42 = vpop.xlane.xlu1 %1855 }
 0x1c0   :  { %4805 = vrcp.f32 %v2083_v34  ;;  %v8609_v62 = vmul.f32 %v1965_v60, %v1925_v3  ;;  %v2085_v22 = vadd.f32 1.0, %v2045_v14  ;;  %v8611_v27 = vmul.f32 %v1968_v9, %v1928_v1 }
 0x1c1   :  { %v2157_v57 = vmul.f32 %v4794_v18, %v8572_v44  ;;  %4807 = vrcp.f32 %v2086_v47  ;;  %v2088_v5 = vadd.f32 1.0, %v2048_v8  ;;  %v2047_v35 = vmul.f32 %v1927_v24, %v1927_v24 }
 0x1c2   :  { %4809 = vrcp.f32 %v2085_v22  ;;  %v1967_v26 = vand.u32 2147483647, %v1927_v24  ;;  %v1930_v10 = vmul.f32 0.0069444445, %v1848_v58  ;;  %v1929_v25 = vmul.f32 0.0069444445, %v1844_v23 }
 0x1c3   :  { %v2209_v45 = vmul.f32 %v2157_v57, %v10789_v39  ;;  %v2210_v34 = vmul.f32 %v2157_v57, %v10790_v46  ;;  %4811 = vrcp.f32 %v2088_v5  ;;  %v2087_v3 = vadd.f32 1.0, %v2047_v35  ;;  %v10791_v23 = vld [vmem:[#allocation30_spill] sm:$0xff]  ;;  %v10792_v22 = vld [vmem:[#allocation31_spill] sm:$0xff]  ;;  %v1852_v35 = vpop.xlane.xlu0 %1851 }
 0x1c4   :  { %v4796_v63 = vpop.eup %4795  ;;  %v1970_v60 = vand.u32 2147483647, %v1930_v10  ;;  %v2050_v14 = vmul.f32 %v1930_v10, %v1930_v10  ;;  %v1969_v44 = vand.u32 2147483647, %v1929_v25  ;;  %v2049_v58 = vmul.f32 %v1929_v25, %v1929_v25 }
 0x1c5   :  { %v2160_v1 = vmul.f32 %v4796_v63, %v8592_v17  ;;  %v8618_v9 = vadd.f32 %v8585_v40, %v2209_v45  ;;  %v2368_v47 = vsel %vm25_vm0, %v2210_v34, 0.0  ;;  %4813 = vrcp.f32 %v2087_v3 }
 0x1c6   :  { %v8621_v8 = vadd.f32 %v2369_v38, %v2368_v47  ;;  %v8625_v5 = vmul.f32 %v1967_v26, %v1927_v24  ;;  %v8628_v46 = vmul.f32 %v1970_v60, %v1930_v10  ;;  %v2090_v45 = vadd.f32 1.0, %v2050_v14  ;;  %v10793_v60 = vld [vmem:[#allocation32_spill] sm:$0xff] }
 0x1c7   :  { %v2215_v18 = vmul.f32 %v2160_v1, %v10791_v23  ;;  %v2216_v57 = vmul.f32 %v2160_v1, %v10792_v22  ;;  %v2089_v40 = vadd.f32 1.0, %v2049_v58  ;;  %v8633_v47 = vmul.f32 %v1969_v44, %v1929_v25  ;;  %v10794_v58 = vld [vmem:[#allocation33_spill] sm:$0xff]  ;;  %v10795_v25 = vld [vmem:[#allocation35_spill] sm:$0xff] }
 0x1c8   :  { %v4798_v17 = vpop.eup %4797  ;;  %v1864_v1 = vpop.xlane.xlu1 %1863  ;;  %4815 = vrcp.f32 %v2090_v45  ;;  %v1932_v22 = vmul.f32 0.0069444445, %v1856_v42  ;;  %v8636_v63 = vmul.f32 0.0069444445, %v1852_v35 }
 0x1c9   :  { %v4800_v39 = vpop.eup %4799  ;;  %v2385_v38 = vsel %vm25_vm0, %v2216_v57, 0.0  ;;  %v2159_v3 = vmul.f32 %v4798_v17, %v8597_v0  ;;  %4817 = vrcp.f32 %v2089_v40  ;;  %v8644_v17 = vmul.f32 0.0069444445, %v1864_v1 }
 0x1ca   :  { %v4802_v24 = vpop.eup %4801  ;;  %v2162_v26 = vmul.f32 %v4800_v39, %v8599_v52 }
 0x1cb   :  { %v4804_v10 = vpop.eup %4803  ;;  %v2213_v14 = vmul.f32 %v2159_v3, %v10793_v60  ;;  %v2214_v23 = vmul.f32 %v2159_v3, %v10794_v58  ;;  %v2161_v34 = vmul.f32 %v4802_v24, %v8601_v43  ;;  %v1972_v24 = vand.u32 2147483647, %v1932_v22  ;;  %v10803_v58 = vld [vmem:[#allocation53_spill] sm:$0xff] }
 0x1cc   :  { %v2219_v0 = vmul.f32 %v2162_v26, %v6802_v21  ;;  %v2220_v44 = vmul.f32 %v2162_v26, %v10795_v25  ;;  %v2164_v57 = vmul.f32 %v4804_v10, %v8603_v49  ;;  %v10801_v25 = vld [vmem:[#allocation51_spill] sm:$0xff] }
 0x1cd   :  { %v8646_v39 = vadd.f32 %v2215_v18, %v2213_v14  ;;  %v2384_v52 = vsel %vm25_vm0, %v2214_v23, 0.0  ;;  %v2217_v42 = vmul.f32 %v2161_v34, %v6873_v33  ;;  %v2218_v35 = vmul.f32 %v2161_v34, %v6883_v6  ;;  %v4806_v45 = vpop.eup %4805 }
 0x1ce   :  { %v8651_v3 = vadd.f32 %v2385_v38, %v2384_v52  ;;  %v2401_v43 = vsel %vm25_vm0, %v2220_v44, 0.0  ;;  %v2224_v40 = vmul.f32 %v2164_v57, %v6943_v20  ;;  %v4808_v26 = vpop.eup %4807  ;;  %v2223_v1 = vmul.f32 %v2164_v57, %v6934_v7 }
 0x1cf   :  { %v8655_v49 = vadd.f32 %v2219_v0, %v2217_v42  ;;  %v2400_v18 = vsel %vm25_vm0, %v2218_v35, 0.0  ;;  %v2163_v23 = vmul.f32 %v4806_v45, %v8605_v29  ;;  %v4810_v10 = vpop.eup %4809  ;;  %v2166_v44 = vmul.f32 %v4808_v26, %v8607_v32  ;;  %v10796_v29 = vld [vmem:[#allocation47_spill] sm:$0xff] }
 0x1d0   :  { %v8662_v14 = vadd.f32 %v2401_v43, %v2400_v18  ;;  %v4812_v52 = vpop.eup %4811  ;;  %v2417_v20 = vsel %vm25_vm0, %v2224_v40, 0.0  ;;  %v2165_v57 = vmul.f32 %v4810_v10, %v8609_v62 }
 0x1d1   :  { %v2221_v0 = vmul.f32 %v2163_v23, %v6961_v54  ;;  %v2222_v42 = vmul.f32 %v2163_v23, %v6963_v61  ;;  %v2227_v35 = vmul.f32 %v2166_v44, %v7138_v19  ;;  %v2228_v45 = vmul.f32 %v2166_v44, %v7152_v41  ;;  %v10798_v23 = vld [vmem:[#allocation48_spill] sm:$0xff]  ;;  %v10799_v54 = vld [vmem:[#allocation49_spill] sm:$0xff] }
 0x1d2   :  { %v2168_v43 = vmul.f32 %v4812_v52, %v8611_v27  ;;  %v4814_v18 = vpop.eup %4813  ;;  %v2225_v40 = vmul.f32 %v2165_v57, %v7201_v13  ;;  %v2226_v26 = vmul.f32 %v2165_v57, %v7203_v36  ;;  %v10808_v36 = vld [vmem:[#allocation55_spill] sm:$0xff]  ;;  %v10811_v13 = vld [vmem:[#allocation57_spill] sm:$0xff] }
 0x1d3   :  { %v8673_v38 = vadd.f32 %v2223_v1, %v2221_v0  ;;  %v2416_v32 = vsel %vm25_vm0, %v2222_v42, 0.0  ;;  %v2433_v10 = vsel %vm25_vm0, %v2228_v45, 0.0  ;;  %v10797_v1 = vld [vmem:[#allocation46_spill] sm:$0xff]  ;;  %v2167_v0 = vmul.f32 %v4814_v18, %v8625_v5 }
 0x1d4   :  { %v8679_v62 = vadd.f32 %v2417_v20, %v2416_v32  ;;  %v2232_v34 = vmul.f32 %v2168_v43, %v10796_v29  ;;  %v8683_v44 = vadd.f32 %v2227_v35, %v2225_v40  ;;  %v2432_v27 = vsel %vm25_vm0, %v2226_v26, 0.0 }
 0x1d5   :  { %v2231_v52 = vmul.f32 %v2168_v43, %v10797_v1  ;;  %v2434_v61 = vadd.f32 %v2433_v10, %v2432_v27  ;;  %v4816_v32 = vpop.eup %4815  ;;  %v2229_v45 = vmul.f32 %v2167_v0, %v10798_v23  ;;  %v2230_v7 = vmul.f32 %v2167_v0, %v10799_v54  ;;  %v1860_v0 = vpop.xlane.xlu0 %1859 }
 0x1d6   :  { %v2449_v20 = vsel %vm25_vm0, %v2232_v34, 0.0  ;;  %v8693_v35 = vmul.f32 %v1972_v24, %v1932_v22  ;;  %v2052_v40 = vmul.f32 %v1932_v22, %v1932_v22  ;;  %v4818_v26 = vpop.eup %4817  ;;  %v2426_v43 = vrot.slane %v8683_v44, 4  ;;  %v10800_v22 = vld [vmem:[#allocation50_spill] sm:$0xff] }
 0x1d7   :  { %v2170_v5 = vmul.f32 %v4816_v32, %v8628_v46  ;;  %v1971_v18 = vand.u32 2147483647, %v8636_v63  ;;  %v2051_v10 = vmul.f32 %v8636_v63, %v8636_v63  ;;  %v2441_v27 = vadd.f32 %v2231_v52, %v2229_v45  ;;  %v10802_v46 = vld [vmem:[#allocation52_spill] sm:$0xff] }
 0x1d8   :  { %v2448_v34 = vsel %vm25_vm0, %v2230_v7, 0.0  ;;  %v2169_v57 = vmul.f32 %v4818_v26, %v8633_v47  ;;  %v2092_v42 = vadd.f32 1.0, %v2052_v40  ;;  %v2435_v24 = vrot.slane %v2434_v61, 4  ;;  %v1872_v7 = vpop.xlane.xlu1 %1871 }
 0x1d9   :  { %v8702_v6 = vadd.f32 %v2449_v20, %v2448_v34  ;;  %v2235_v33 = vmul.f32 %v2170_v5, %v10800_v22  ;;  %v2236_v21 = vmul.f32 %v2170_v5, %v10801_v25  ;;  %v8709_v52 = vmul.f32 %v1971_v18, %v8636_v63 }
 0x1da   :  { %v2233_v32 = vmul.f32 %v2169_v57, %v10802_v46  ;;  %v2234_v60 = vmul.f32 %v2169_v57, %v10803_v58  ;;  %4819 = vrcp.f32 %v2092_v42  ;;  %v2442_v45 = vrot.slane %v2441_v27, 4 }
 0x1db   :  { %v2465_v47 = vsel %vm25_vm0, %v2236_v21, 0.0  ;;  %v2091_v40 = vadd.f32 1.0, %v2051_v10  ;;  %v1974_v20 = vand.u32 2147483647, %v8644_v17  ;;  %v2054_v5 = vmul.f32 %v8644_v17, %v8644_v17 }
 0x1dc   :  { %v8713_v26 = vadd.f32 %v2235_v33, %v2233_v32  ;;  %v2464_v34 = vsel %vm25_vm0, %v2234_v60, 0.0  ;;  %v1933_v46 = vmul.f32 0.0069444445, %v1860_v0  ;;  %v1936_v63 = vmul.f32 0.0069444445, %v1872_v7 }
 0x1dd   :  { %v8719_v57 = vadd.f32 %v2465_v47, %v2464_v34  ;;  %4821 = vrcp.f32 %v2091_v40  ;;  %v8722_v18 = vmul.f32 %v1974_v20, %v8644_v17  ;;  %v2094_v21 = vadd.f32 1.0, %v2054_v5 }
 0x1de   :  { %v1973_v10 = vand.u32 2147483647, %v1933_v46  ;;  %v2053_v58 = vmul.f32 %v1933_v46, %v1933_v46  ;;  %v1976_v60 = vand.u32 2147483647, %v1936_v63  ;;  %v2056_v25 = vmul.f32 %v1936_v63, %v1936_v63 }
 0x1df   :  { %4823 = vrcp.f32 %v2094_v21  ;;  %v10804_v47 = vrot.slane %v8517_v4, 4  ;;  %v10805_v32 = vrot.slane %v8521_v15, 4  ;;  %v2427_v0 = vadd.f32 %v2426_v43, %v8683_v44 }
 0x1e0   :  { %v1868_v33 = vpop.xlane.xlu0 %1867  ;;  %v2093_v42 = vadd.f32 1.0, %v2053_v58  ;;  %v8729_v40 = vmul.f32 %v1973_v10, %v1933_v46  ;;  %v8731_v17 = vmul.f32 %v1976_v60, %v1936_v63  ;;  %v2096_v20 = vadd.f32 1.0, %v2056_v25 }
 0x1e1   :  { %v1935_v22 = vmul.f32 0.0069444445, %v1868_v33  ;;  %v2267_v7 = vadd.f32 %v10804_v47, %v8517_v4  ;;  %v2276_v33 = vadd.f32 %v10805_v32, %v8521_v15  ;;  %v2436_v54 = vadd.f32 %v2435_v24, %v2434_v61 }
 0x1e2   :  { %4825 = vrcp.f32 %v2093_v42  ;;  %v2428_v46 = vrot.slane %v2427_v0, 2  ;;  %v10806_v63 = vrot.slane %v8498_v30, 4  ;;  %v10807_v10 = vrot.slane %v8504_v53, 4 }
 0x1e3   :  { %v2055_v34 = vmul.f32 %v1935_v22, %v1935_v22  ;;  %v2268_v5 = vrot.slane %v2267_v7, 2  ;;  %4827 = vrcp.f32 %v2096_v20  ;;  %v1975_v58 = vand.u32 2147483647, %v1935_v22 }
 0x1e4   :  { %v2277_v4 = vrot.slane %v2276_v33, 2  ;;  %v2283_v25 = vadd.f32 %v10806_v63, %v8498_v30  ;;  %v2437_v42 = vrot.slane %v2436_v54, 2  ;;  %v2292_v60 = vadd.f32 %v10807_v10, %v8504_v53 }
 0x1e5   :  { %v2095_v21 = vadd.f32 1.0, %v2055_v34  ;;  %v2269_v23 = vadd.f32 %v2268_v5, %v2267_v7  ;;  %v8743_v15 = vadd.f32 %v2442_v45, %v2441_v27  ;;  %v2429_v47 = vadd.f32 %v2428_v46, %v2427_v0 }
 0x1e6   :  { %v2278_v32 = vadd.f32 %v2277_v4, %v2276_v33  ;;  %v2284_v61 = vrot.slane %v2283_v25, 2  ;;  %v2015_v7 = vmul.f32 %v1975_v58, %v1935_v22  ;;  %v2438_v34 = vadd.f32 %v2437_v42, %v2436_v54  ;;  %v10809_v22 = vld [vmem:[#allocation54_spill] sm:$0xff] }
 0x1e7   :  { %4829 = vrcp.f32 %v2095_v21  ;;  %v2270_v43 = vrot.slane %v2269_v23, 1  ;;  %v4820_v24 = vpop.eup %4819  ;;  %v2293_v5 = vrot.slane %v2292_v60, 2  ;;  %v2430_v63 = vrot.slane %v2429_v47, 1 }
 0x1e8   :  { %v1880_v44 = vpop.xlane.xlu1 %1879  ;;  %v2172_v30 = vmul.f32 %v4820_v24, %v8693_v35  ;;  %v2279_v21 = vrot.slane %v2278_v32, 1  ;;  %v2439_v27 = vrot.slane %v2438_v34, 1  ;;  %v2285_v45 = vadd.f32 %v2284_v61, %v2283_v25  ;;  %v10810_v25 = vld [vmem:[#allocation56_spill] sm:$0xff] }
 0x1e9   :  { %v1938_v20 = vmul.f32 0.0069444445, %v1880_v44  ;;  %v2271_v53 = vadd.f32 %v2270_v43, %v2269_v23  ;;  %v2431_v46 = vadd.f32 %v2430_v63, %v2429_v47 }
 0x1ea   :  { %v4822_v10 = vpop.eup %4821  ;;  %v2240_v33 = vmul.f32 %v2172_v30, %v10808_v36  ;;  %v2280_v4 = vadd.f32 %v2279_v21, %v2278_v32  ;;  %v2239_v58 = vmul.f32 %v2172_v30, %v10809_v22  ;;  %v2440_v35 = vadd.f32 %v2439_v27, %v2438_v34 }
 0x1eb   :  { %v2058_v1 = vmul.f32 %v1938_v20, %v1938_v20  ;;  %v1978_v0 = vand.u32 2147483647, %v1938_v20  ;;  %v2171_v54 = vmul.f32 %v4822_v10, %v8709_v52  ;;  %v2585_v24 = vadd.f32 %v2431_v46, %v2271_v53  ;;  %v10813_v46 = vld [vmem:[#allocation58_spill] sm:$0xff] }
 0x1ec   :  { %v2481_v44 = vsel %vm25_vm0, %v2240_v33, 0.0  ;;  %v2586_v29 = vsel %vm25_vm0, %v2280_v4, 0.0  ;;  %v2286_v23 = vrot.slane %v2285_v45, 1  ;;  %v4824_v43 = vpop.eup %4823  ;;  %v2587_v32 = vsel %vm25_vm0, %v2440_v35, 0.0 }
 0x1ed   :  { %v2098_v42 = vadd.f32 1.0, %v2058_v1  ;;  %v2237_v61 = vmul.f32 %v2171_v54, %v10810_v25  ;;  %v2238_v36 = vmul.f32 %v2171_v54, %v10811_v13  ;;  %v2174_v47 = vmul.f32 %v4824_v43, %v8722_v18  ;;  %v10816_v43 = vld [vmem:[#allocation61_spill] sm:$0xff]  ;;  %v10833_v25 = vld [vmem:[#allocation68_spill] sm:$0xff] }
 0x1ee   :  { %v2018_v30 = vmul.f32 %v1978_v0, %v1938_v20  ;;  %v2588_v1 = vadd.f32 %v2587_v32, %v2586_v29  ;;  %v8756_v34 = vmul.f32 0.5, %v2585_v24  ;;  %v8761_v10 = vadd.f32 %v2286_v23, %v2285_v45  ;;  %v10815_v45 = vld [vmem:[#allocation60_spill] sm:$0xff] }
 0x1ef   :  { %4831 = vrcp.f32 %v2098_v42  ;;  %v4826_v21 = vpop.eup %4825  ;;  %v8758_v63 = vadd.f32 %v2239_v58, %v2237_v61  ;;  %v2480_v53 = vsel %vm25_vm0, %v2238_v36, 0.0  ;;  %v2243_v54 = vmul.f32 %v2174_v47, %v10813_v46  ;;  %v10814_v42 = vld [vmem:[#allocation59_spill] sm:$0xff]  ;;  %v10821_v46 = vld [vmem:[#allocation65_spill] sm:$0xff] }
 0x1f0   :  { %v1876_v52 = vpop.xlane.xlu0 %1875  ;;  %10812 = vst [vmem:[#allocation81_spill] sm:$0xff] %v8756_v34  ;;  %v4828_v33 = vpop.eup %4827  ;;  %v8763_v4 = vadd.f32 %v2481_v44, %v2480_v53  ;;  %v2244_v18 = vmul.f32 %v2174_v47, %v10814_v42  ;;  %v2173_v20 = vmul.f32 %v4826_v21, %v8729_v40  ;;  %v2294_v35 = vadd.f32 %v2293_v5, %v2292_v60  ;;  %v10818_v53 = vld [vmem:[#allocation63_spill] sm:$0xff] }
 0x1f1   :  { %v1937_v27 = vmul.f32 0.0069444445, %v1876_v52  ;;  %v2176_v0 = vmul.f32 %v4828_v33, %v8731_v17  ;;  %v10817_v52 = vld [vmem:[#allocation62_spill] sm:$0xff]  ;;  %v8779_v5 = vmul.f32 0.5, %v2588_v1 }
 0x1f2   :  { %v2497_v36 = vsel %vm25_vm0, %v2244_v18, 0.0  ;;  %v2241_v23 = vmul.f32 %v2173_v20, %v10815_v45  ;;  %v2242_v44 = vmul.f32 %v2173_v20, %v10816_v43  ;;  %v10820_v20 = vld [vmem:[#allocation64_spill] sm:$0xff] }
 0x1f3   :  { %v2057_v58 = vmul.f32 %v1937_v27, %v1937_v27  ;;  %v1977_v61 = vand.u32 2147483647, %v1937_v27  ;;  %v2247_v47 = vmul.f32 %v2176_v0, %v10817_v52  ;;  %v2248_v40 = vmul.f32 %v2176_v0, %v10818_v53  ;;  %10819 = vst [vmem:[#allocation82_spill] sm:$0xff] %v8779_v5 }
 0x1f4   :  { %v4830_v24 = vpop.eup %4829  ;;  %v8776_v29 = vadd.f32 %v2243_v54, %v2241_v23  ;;  %v2496_v17 = vsel %vm25_vm0, %v2242_v44, 0.0  ;;  %v2295_v54 = vrot.slane %v2294_v35, 1 }
 0x1f5   :  { %v2175_v21 = vmul.f32 %v4830_v24, %v2015_v7  ;;  %v2097_v60 = vadd.f32 1.0, %v2057_v58  ;;  %v8781_v33 = vadd.f32 %v2497_v36, %v2496_v17  ;;  %v2513_v18 = vsel %vm25_vm0, %v2248_v40, 0.0 }
 0x1f6   :  { %v2017_v43 = vmul.f32 %v1977_v61, %v1937_v27  ;;  %v2646_v7 = vsel %vm25_vm0, %v8779_v5, -inf  ;;  %v2296_v44 = vadd.f32 %v2295_v54, %v2294_v35  ;;  %v10822_v27 = vrot.slane %v8743_v15, 2 }
 0x1f7   :  { %v2245_v45 = vmul.f32 %v2175_v21, %v10820_v20  ;;  %v2246_v32 = vmul.f32 %v2175_v21, %v10821_v46  ;;  %4833 = vrcp.f32 %v2097_v60  ;;  %v2647_v23 = vmax.f32 %v8756_v34, %v2646_v7 }
 0x1f8   :  { %v1888_v52 = vpop.xlane.xlu1 %1887  ;;  %v2445_v61 = vadd.f32 %v10822_v27, %v8743_v15  ;;  %v10824_v35 = vrot.slane %v8533_v28, 4  ;;  %v2590_v27 = vsel %vm25_vm0, %v2296_v44, 0.0 }
 0x1f9   :  { %v8789_v58 = vadd.f32 %v2247_v47, %v2245_v45  ;;  %v2512_v1 = vsel %vm25_vm0, %v2246_v32, 0.0  ;;  %v1940_v24 = vmul.f32 0.0069444445, %v1888_v52  ;;  %v10823_v45 = vrot.slane %v8702_v6, 4  ;;  %2648 = vmax.xlane.f32.xlu0 %v2647_v23  ;;  %v10827_v32 = vld [vmem:[#allocation67_spill] sm:$0xff] }
 0x1fa   :  { %v8792_v36 = vadd.f32 %v2513_v18, %v2512_v1  ;;  %v2446_v18 = vrot.slane %v2445_v61, 1  ;;  %v2299_v7 = vadd.f32 %v10824_v35, %v8533_v28  ;;  %v10826_v52 = vrot.slane %v8713_v26, 4 }
 0x1fb   :  { %v1980_v21 = vand.u32 2147483647, %v1940_v24  ;;  %v2060_v17 = vmul.f32 %v1940_v24, %v1940_v24  ;;  %v2452_v47 = vadd.f32 %v10823_v45, %v8702_v6  ;;  %v10825_v6 = vrot.slane %v8537_v55, 4 }
 0x1fc   :  { %v4832_v60 = vpop.eup %4831  ;;  %v2447_v40 = vadd.f32 %v2446_v18, %v2445_v61  ;;  %v2300_v0 = vrot.slane %v2299_v7, 2  ;;  %v2459_v23 = vadd.f32 %v10826_v52, %v8713_v26  ;;  %v10828_v18 = vld [vmem:[#allocation66_spill] sm:$0xff] }
 0x1fd   :  { %v2178_v15 = vmul.f32 %v4832_v60, %v2018_v30  ;;  %v2100_v54 = vadd.f32 1.0, %v2060_v17  ;;  %v2453_v1 = vrot.slane %v2452_v47, 2  ;;  %v2308_v45 = vadd.f32 %v10825_v6, %v8537_v55 }
 0x1fe   :  { %v2020_v46 = vmul.f32 %v1980_v21, %v1940_v24  ;;  %v2589_v17 = vadd.f32 %v2447_v40, %v8761_v10  ;;  %v2301_v60 = vadd.f32 %v2300_v0, %v2299_v7  ;;  %v2460_v61 = vrot.slane %v2459_v23, 2 }
 0x1ff   :  { %v2252_v20 = vmul.f32 %v2178_v15, %v10827_v32  ;;  %4835 = vrcp.f32 %v2100_v54  ;;  %v2454_v28 = vadd.f32 %v2453_v1, %v2452_v47  ;;  %v2309_v44 = vrot.slane %v2308_v45, 2 }
 0x200   :  { %v1884_v30 = vpop.xlane.xlu0 %1883  ;;  %v2251_v35 = vmul.f32 %v2178_v15, %v10828_v18  ;;  %v10829_v55 = vrot.slane %v8719_v57, 4  ;;  %v2302_v52 = vrot.slane %v2301_v60, 1  ;;  %v2461_v21 = vadd.f32 %v2460_v61, %v2459_v23 }
 0x201   :  { %v1939_v53 = vmul.f32 0.0069444445, %v1884_v30  ;;  %v2455_v42 = vrot.slane %v2454_v28, 1  ;;  %v2529_v26 = vsel %vm25_vm0, %v2252_v20, 0.0  ;;  %v2310_v24 = vadd.f32 %v2309_v44, %v2308_v45 }
 0x202   :  { %v2468_v6 = vadd.f32 %v10829_v55, %v8719_v57  ;;  %v8821_v1 = vmul.f32 0.5, %v2589_v17  ;;  %v2462_v7 = vrot.slane %v2461_v21, 1  ;;  %v10831_v15 = vrot.slane %v8547_v16, 4 }
 0x203   :  { %v2059_v47 = vmul.f32 %v1939_v53, %v1939_v53  ;;  %v2456_v54 = vadd.f32 %v2455_v42, %v2454_v28  ;;  %v1979_v0 = vand.u32 2147483647, %v1939_v53  ;;  %v2311_v40 = vrot.slane %v2310_v24, 1 }
 0x204   :  { %10830 = vst [vmem:[#allocation83_spill] sm:$0xff] %v8821_v1  ;;  %v2469_v10 = vrot.slane %v2468_v6, 2  ;;  %v2315_v30 = vadd.f32 %v10831_v15, %v8547_v16  ;;  %v4834_v18 = vpop.eup %4833  ;;  %v2303_v20 = vadd.f32 %v2302_v52, %v2301_v60  ;;  %v2463_v42 = vadd.f32 %v2462_v7, %v2461_v21  ;;  %v10834_v16 = vld [vmem:[#allocation69_spill] sm:$0xff] }
 0x205   :  { %v2099_v32 = vadd.f32 1.0, %v2059_v47  ;;  %v2591_v57 = vsel %vm25_vm0, %v2456_v54, 0.0  ;;  %v2177_v45 = vmul.f32 %v4834_v18, %v2017_v43  ;;  %v2312_v44 = vadd.f32 %v2311_v40, %v2310_v24 }
 0x206   :  { %v2470_v55 = vadd.f32 %v2469_v10, %v2468_v6  ;;  %v2592_v23 = vadd.f32 %v2591_v57, %v2590_v27  ;;  %v2316_v17 = vrot.slane %v2315_v30, 2  ;;  %v10832_v61 = vrot.slane %v8551_v56, 4 }
 0x207   :  { %4837 = vrcp.f32 %v2099_v32  ;;  %v2249_v22 = vmul.f32 %v2177_v45, %v10833_v25  ;;  %v2250_v15 = vmul.f32 %v2177_v45, %v10834_v16  ;;  %v2593_v60 = vadd.f32 %v2463_v42, %v2303_v20 }
 0x208   :  { %v2471_v28 = vrot.slane %v2470_v55, 1  ;;  %v2324_v13 = vadd.f32 %v10832_v61, %v8551_v56  ;;  %v1896_v47 = vpop.xlane.xlu1 %1895  ;;  %v8832_v41 = vmul.f32 0.5, %v2592_v23  ;;  %v2019_v6 = vmul.f32 %v1979_v0, %v1939_v53 }
 0x209   :  { %v1942_v43 = vmul.f32 0.0069444445, %v1896_v47  ;;  %v2317_v18 = vadd.f32 %v2316_v17, %v2315_v30  ;;  %v8834_v52 = vadd.f32 %v2251_v35, %v2249_v22  ;;  %v2528_v32 = vsel %vm25_vm0, %v2250_v15, 0.0 }
 0x20a   :  { %10835 = vst [vmem:[#allocation68_spill] sm:$0xff] %v8832_v41  ;;  %v2472_v27 = vadd.f32 %v2471_v28, %v2470_v55  ;;  %v2650_v24 = vsel %vm25_vm0, %v8832_v41, -inf  ;;  %v2594_v56 = vsel %vm25_vm0, %v2312_v44, 0.0  ;;  %v8840_v21 = vadd.f32 %v2529_v26, %v2528_v32  ;;  %v10838_v28 = vld [vmem:[#allocation71_spill] sm:$0xff] }
 0x20b   :  { %v1982_v54 = vand.u32 2147483647, %v1942_v43  ;;  %v2062_v10 = vmul.f32 %v1942_v43, %v1942_v43  ;;  %v2651_v40 = vmax.f32 %v8821_v1, %v2650_v24  ;;  %v8844_v0 = vmul.f32 0.5, %v2593_v60  ;;  %v10842_v24 = vld [vmem:[#allocation70_spill] sm:$0xff] }
 0x20c   :  { %v4836_v7 = vpop.eup %4835  ;;  %v2595_v53 = vsel %vm25_vm0, %v2472_v27, 0.0  ;;  %v2318_v22 = vrot.slane %v2317_v18, 1  ;;  %v2325_v35 = vrot.slane %v2324_v13, 2  ;;  %v10837_v44 = vrot.slane %v8758_v63, 4 }
 0x20d   :  { %10836 = vst [vmem:[#allocation69_spill] sm:$0xff] %v8844_v0  ;;  %v2180_v20 = vmul.f32 %v4836_v7, %v2020_v46  ;;  %v2102_v55 = vadd.f32 1.0, %v2062_v10  ;;  %2652 = vmax.xlane.f32.xlu1 %v2651_v40  ;;  %v8848_v26 = vmul.f32 %v1982_v54, %v1942_v43  ;;  %v2596_v45 = vadd.f32 %v2595_v53, %v2594_v56 }
 0x20e   :  { %v2326_v23 = vadd.f32 %v2325_v35, %v2324_v13  ;;  %v2475_v42 = vadd.f32 %v10837_v44, %v8758_v63  ;;  %v2319_v61 = vadd.f32 %v2318_v22, %v2317_v18  ;;  %v10839_v15 = vrot.slane %v8763_v4, 4 }
 0x20f   :  { %v2256_v17 = vmul.f32 %v2180_v20, %v10838_v28  ;;  %4839 = vrcp.f32 %v2102_v55  ;;  %v8857_v46 = vmul.f32 0.5, %v2596_v45  ;;  %v10841_v13 = vrot.slane %v8562_v11, 4 }
 0x210   :  { %v2484_v47 = vadd.f32 %v10839_v15, %v8763_v4  ;;  %v1892_v60 = vpop.xlane.xlu0 %1891  ;;  %v2327_v27 = vrot.slane %v2326_v23, 1  ;;  %v2476_v43 = vrot.slane %v2475_v42, 2  ;;  %v2255_v56 = vmul.f32 %v2180_v20, %v10842_v24 }
 0x211   :  { %10840 = vst [vmem:[#allocation71_spill] sm:$0xff] %v8857_v46  ;;  %v2331_v32 = vadd.f32 %v10841_v13, %v8562_v11  ;;  %v1941_v63 = vmul.f32 0.0069444445, %v1892_v60  ;;  %v10843_v18 = vrot.slane %v8565_v37, 4  ;;  %v2654_v4 = vsel %vm25_vm0, %v8857_v46, -inf }
 0x212   :  { %v2485_v54 = vrot.slane %v2484_v47, 2  ;;  %v2328_v40 = vadd.f32 %v2327_v27, %v2326_v23  ;;  %v2477_v7 = vadd.f32 %v2476_v43, %v2475_v42  ;;  %v2545_v22 = vsel %vm25_vm0, %v2256_v17, 0.0 }
 0x213   :  { %v2340_v10 = vadd.f32 %v10843_v18, %v8565_v37  ;;  %v2332_v53 = vrot.slane %v2331_v32, 2  ;;  %v2061_v35 = vmul.f32 %v1941_v63, %v1941_v63  ;;  %v2655_v55 = vmax.f32 %v8844_v0, %v2654_v4  ;;  %v10845_v4 = vld [vmem:[#allocation72_spill] sm:$0xff] }
 0x214   :  { %v2486_v11 = vadd.f32 %v2485_v54, %v2484_v47  ;;  %v4838_v45 = vpop.eup %4837  ;;  %v1981_v20 = vand.u32 2147483647, %v1941_v63  ;;  %v2478_v44 = vrot.slane %v2477_v7, 1  ;;  %v2598_v18 = vsel %vm25_vm0, %v2328_v40, 0.0  ;;  %v10846_v54 = vld [vmem:[#allocation73_spill] sm:$0xff] }
 0x215   :  { %v2333_v15 = vadd.f32 %v2332_v53, %v2331_v32  ;;  %v2341_v60 = vrot.slane %v2340_v10, 2  ;;  %v2179_v13 = vmul.f32 %v4838_v45, %v2019_v6  ;;  %v2101_v57 = vadd.f32 1.0, %v2061_v35  ;;  %2656 = vmax.xlane.f32.xlu0 %v2655_v55 }
 0x216   :  { %v2487_v37 = vrot.slane %v2486_v11, 1  ;;  %v2479_v23 = vadd.f32 %v2478_v44, %v2477_v7  ;;  %v10844_v17 = vrot.slane %v8776_v29, 4  ;;  %v2021_v53 = vmul.f32 %v1981_v20, %v1941_v63 }
 0x217   :  { %v2334_v42 = vrot.slane %v2333_v15, 1  ;;  %v2342_v27 = vadd.f32 %v2341_v60, %v2340_v10  ;;  %v2253_v47 = vmul.f32 %v2179_v13, %v10845_v4  ;;  %v2254_v30 = vmul.f32 %v2179_v13, %v10846_v54 }
 0x218   :  { %v2491_v43 = vadd.f32 %v10844_v17, %v8776_v29  ;;  %4841 = vrcp.f32 %v2101_v57  ;;  %v2488_v32 = vadd.f32 %v2487_v37, %v2486_v11  ;;  %v1904_v6 = vpop.xlane.xlu1 %1903  ;;  %v2597_v35 = vadd.f32 %v2479_v23, %v2319_v61 }
 0x219   :  { %v2343_v55 = vrot.slane %v2342_v27, 1  ;;  %v8876_v24 = vadd.f32 %v2255_v56, %v2253_v47  ;;  %v2544_v40 = vsel %vm25_vm0, %v2254_v30, 0.0  ;;  %v1944_v10 = vmul.f32 0.0069444445, %v1904_v6 }
 0x21a   :  { %v2492_v45 = vrot.slane %v2491_v43, 2  ;;  %v2599_v7 = vsel %vm25_vm0, %v2488_v32, 0.0  ;;  %v8880_v44 = vadd.f32 %v2545_v22, %v2544_v40  ;;  %v2335_v60 = vadd.f32 %v2334_v42, %v2333_v15 }
 0x21b   :  { %v2600_v29 = vadd.f32 %v2599_v7, %v2598_v18  ;;  %v2344_v17 = vadd.f32 %v2343_v55, %v2342_v27  ;;  %v1984_v13 = vand.u32 2147483647, %v1944_v10  ;;  %v2064_v57 = vmul.f32 %v1944_v10, %v1944_v10  ;;  %v10852_v55 = vld [vmem:[#allocation75_spill] sm:$0xff] }
 0x21c   :  { %v8882_v11 = vmul.f32 0.5, %v2597_v35  ;;  %v2493_v63 = vadd.f32 %v2492_v45, %v2491_v43  ;;  %v4840_v61 = vpop.eup %4839  ;;  %v10849_v30 = vrot.slane %v8781_v33, 4  ;;  %v10850_v47 = vrot.slane %v8576_v2, 4 }
 0x21d   :  { %v8886_v37 = vmul.f32 0.5, %v2600_v29  ;;  %v2182_v18 = vmul.f32 %v4840_v61, %v8848_v26  ;;  %v2104_v15 = vadd.f32 1.0, %v2064_v57  ;;  %v2602_v42 = vsel %vm25_vm0, %v2344_v17, 0.0 }
 0x21e   :  { %10847 = vst [vmem:[#allocation72_spill] sm:$0xff] %v8882_v11  ;;  %v2500_v22 = vadd.f32 %v10849_v30, %v8781_v33  ;;  %v2494_v23 = vrot.slane %v2493_v63, 1  ;;  %v2347_v32 = vadd.f32 %v10850_v47, %v8576_v2  ;;  %v10851_v6 = vrot.slane %v8582_v48, 4 }
 0x21f   :  { %10848 = vst [vmem:[#allocation73_spill] sm:$0xff] %v8886_v37  ;;  %v2658_v27 = vsel %vm25_vm0, %v8886_v37, -inf  ;;  %v2260_v33 = vmul.f32 %v2182_v18, %v10852_v55  ;;  %v2024_v45 = vmul.f32 %v1984_v13, %v1944_v10  ;;  %4843 = vrcp.f32 %v2104_v15 }
 0x220   :  { %v2501_v43 = vrot.slane %v2500_v22, 2  ;;  %v2356_v35 = vadd.f32 %v10851_v6, %v8582_v48  ;;  %v2659_v26 = vmax.f32 %v8882_v11, %v2658_v27  ;;  %v1900_v40 = vpop.xlane.xlu0 %1899  ;;  %v2495_v7 = vadd.f32 %v2494_v23, %v2493_v63 }
 0x221   :  { %v2348_v17 = vrot.slane %v2347_v32, 2  ;;  %v2259_v61 = vmul.f32 %v2182_v18, %v8268_v12  ;;  %v1943_v30 = vmul.f32 0.0069444445, %v1900_v40  ;;  %v10853_v2 = vrot.slane %v8789_v58, 4 }
 0x222   :  { %v2502_v29 = vadd.f32 %v2501_v43, %v2500_v22  ;;  %v2357_v57 = vrot.slane %v2356_v35, 2  ;;  %2660 = vmax.xlane.f32.xlu1 %v2659_v26  ;;  %v10854_v48 = vrot.slane %v8792_v36, 4  ;;  %v2601_v15 = vadd.f32 %v2495_v7, %v2335_v60 }
 0x223   :  { %v2507_v47 = vadd.f32 %v10853_v2, %v8789_v58  ;;  %v2349_v27 = vadd.f32 %v2348_v17, %v2347_v32  ;;  %v1983_v63 = vand.u32 2147483647, %v1943_v30  ;;  %v2063_v22 = vmul.f32 %v1943_v30, %v1943_v30  ;;  %v10856_v17 = vld [vmem:[#allocation76_spill] sm:$0xff] }
 0x224   :  { %v2516_v10 = vadd.f32 %v10854_v48, %v8792_v36  ;;  %v2503_v13 = vrot.slane %v2502_v29, 1  ;;  %v2358_v6 = vadd.f32 %v2357_v57, %v2356_v35  ;;  %v2561_v18 = vsel %vm25_vm0, %v2260_v33, 0.0 }
 0x225   :  { %v2508_v23 = vrot.slane %v2507_v47, 2  ;;  %v4842_v56 = vpop.eup %4841  ;;  %v2350_v40 = vrot.slane %v2349_v27, 1  ;;  %v2103_v58 = vadd.f32 1.0, %v2063_v22  ;;  %v8911_v2 = vmul.f32 0.5, %v2601_v15 }
 0x226   :  { %v2517_v43 = vrot.slane %v2516_v10, 2  ;;  %v2504_v26 = vadd.f32 %v2503_v13, %v2502_v29  ;;  %v2359_v20 = vrot.slane %v2358_v6, 1  ;;  %v2181_v12 = vmul.f32 %v4842_v56, %v2021_v53 }
 0x227   :  { %10855 = vst [vmem:[#allocation84_spill] sm:$0xff] %v8911_v2  ;;  %v2509_v55 = vadd.f32 %v2508_v23, %v2507_v47  ;;  %v8913_v36 = vmul.f32 %v1983_v63, %v1943_v30  ;;  %4845 = vrcp.f32 %v2103_v58  ;;  %v2351_v29 = vadd.f32 %v2350_v40, %v2349_v27 }
 0x228   :  { %v2603_v60 = vsel %vm25_vm0, %v2504_v26, 0.0  ;;  %v2360_v32 = vadd.f32 %v2359_v20, %v2358_v6  ;;  %v2518_v35 = vadd.f32 %v2517_v43, %v2516_v10  ;;  %v2257_v7 = vmul.f32 %v2181_v12, %v8345_v59 }
 0x229   :  { %v2258_v57 = vmul.f32 %v2181_v12, %v10856_v17  ;;  %v2604_v33 = vadd.f32 %v2603_v60, %v2602_v42  ;;  %v2510_v48 = vrot.slane %v2509_v55, 1  ;;  %v10857_v53 = vrot.slane %v8618_v9, 4 }
 0x22a   :  { %v2519_v13 = vrot.slane %v2518_v35, 1  ;;  %v8921_v47 = vadd.f32 %v2259_v61, %v2257_v7  ;;  %v10859_v20 = vrot.slane %v8621_v8, 4  ;;  %v10860_v22 = vrot.slane %v8834_v52, 4 }
 0x22b   :  { %v2363_v56 = vadd.f32 %v10857_v53, %v8618_v9  ;;  %v2560_v30 = vsel %vm25_vm0, %v2258_v57, 0.0  ;;  %v8924_v15 = vmul.f32 0.5, %v2604_v33  ;;  %v2511_v42 = vadd.f32 %v2510_v48, %v2509_v55 }
 0x22c   :  { %v2372_v10 = vadd.f32 %v10859_v20, %v8621_v8  ;;  %v8929_v12 = vadd.f32 %v2561_v18, %v2560_v30  ;;  %v2520_v27 = vadd.f32 %v2519_v13, %v2518_v35  ;;  %v2606_v9 = vsel %vm25_vm0, %v2360_v32, 0.0  ;;  %v4844_v43 = vpop.eup %4843 }
 0x22d   :  { %10858 = vst [vmem:[#allocation85_spill] sm:$0xff] %v8924_v15  ;;  %v2364_v6 = vrot.slane %v2363_v56, 2  ;;  %v2662_v63 = vsel %vm25_vm0, %v8924_v15, -inf  ;;  %v2523_v23 = vadd.f32 %v10860_v22, %v8834_v52  ;;  %v2554_v26 = vrot.slane %v8921_v47, 4 }
 0x22e   :  { %v2373_v61 = vrot.slane %v2372_v10, 2  ;;  %v2663_v8 = vmax.f32 %v8911_v2, %v2662_v63  ;;  %v2605_v18 = vadd.f32 %v2511_v42, %v2351_v29  ;;  %v2607_v55 = vsel %vm25_vm0, %v2520_v27, 0.0 }
 0x22f   :  { %v2184_v40 = vmul.f32 %v4844_v43, %v2024_v45  ;;  %v2608_v58 = vadd.f32 %v2607_v55, %v2606_v9  ;;  %v2365_v60 = vadd.f32 %v2364_v6, %v2363_v56  ;;  %v2524_v32 = vrot.slane %v2523_v23, 2 }
 0x230   :  { %v2374_v35 = vadd.f32 %v2373_v61, %v2372_v10  ;;  %2664 = vmax.xlane.f32.xlu0 %v2663_v8  ;;  %v10861_v57 = vrot.slane %v8840_v21, 4  ;;  %v10862_v33 = vrot.slane %v8646_v39, 4  ;;  %v8948_v13 = vmul.f32 0.5, %v2605_v18 }
 0x231   :  { %v2264_v29 = vmul.f32 %v2184_v40, %v8426_v50  ;;  %v8950_v45 = vmul.f32 0.5, %v2608_v58  ;;  %v2366_v53 = vrot.slane %v2365_v60, 1  ;;  %v2525_v30 = vadd.f32 %v2524_v32, %v2523_v23 }
 0x232   :  { %v2532_v52 = vadd.f32 %v10861_v57, %v8840_v21  ;;  %v2379_v48 = vadd.f32 %v10862_v33, %v8646_v39  ;;  %10863 = vst [vmem:[#allocation86_spill] sm:$0xff] %v8948_v13  ;;  %v2375_v56 = vrot.slane %v2374_v35, 1  ;;  %v2263_v42 = vmul.f32 %v2184_v40, %v8416_v51 }
 0x233   :  { %10864 = vst [vmem:[#allocation87_spill] sm:$0xff] %v8950_v45  ;;  %v2577_v27 = vsel %vm25_vm0, %v2264_v29, 0.0  ;;  %v2666_v21 = vsel %vm25_vm0, %v8950_v45, -inf  ;;  %v10865_v39 = vrot.slane %v8651_v3, 4  ;;  %v2526_v61 = vrot.slane %v2525_v30, 1 }
 0x234   :  { %v2533_v20 = vrot.slane %v2532_v52, 2  ;;  %v2380_v10 = vrot.slane %v2379_v48, 2  ;;  %v2667_v63 = vmax.f32 %v8948_v13, %v2666_v21  ;;  %v2376_v9 = vadd.f32 %v2375_v56, %v2374_v35  ;;  %v4846_v58 = vpop.eup %4845 }
 0x235   :  { %v2388_v6 = vadd.f32 %v10865_v39, %v8651_v3  ;;  %v10866_v8 = vrot.slane %v8876_v24, 4  ;;  %v10867_v55 = vrot.slane %v8880_v44, 4  ;;  %v2367_v32 = vadd.f32 %v2366_v53, %v2365_v60  ;;  %v10869_v39 = vld [vmem:[#allocation80_spill] sm:$0xff] }
 0x236   :  { %v2534_v22 = vadd.f32 %v2533_v20, %v2532_v52  ;;  %v2381_v43 = vadd.f32 %v2380_v10, %v2379_v48  ;;  %2668 = vmax.xlane.f32.xlu1 %v2667_v63  ;;  %v2527_v57 = vadd.f32 %v2526_v61, %v2525_v30  ;;  %v10868_v35 = vrot.slane %v8655_v49, 4 }
 0x237   :  { %v2389_v23 = vrot.slane %v2388_v6, 2  ;;  %v2539_v18 = vadd.f32 %v10866_v8, %v8876_v24  ;;  %v2548_v40 = vadd.f32 %v10867_v55, %v8880_v44  ;;  %v2183_v52 = vmul.f32 %v4846_v58, %v8913_v36 }
 0x238   :  { %v2535_v3 = vrot.slane %v2534_v22, 1  ;;  %v2395_v33 = vadd.f32 %v10868_v35, %v8655_v49  ;;  %v2382_v48 = vrot.slane %v2381_v43, 1  ;;  %v2610_v24 = vsel %vm25_vm0, %v2376_v9, 0.0 }
 0x239   :  { %v2390_v29 = vadd.f32 %v2389_v23, %v2388_v6  ;;  %v2540_v56 = vrot.slane %v2539_v18, 2  ;;  %v2549_v10 = vrot.slane %v2548_v40, 2  ;;  %v2261_v44 = vmul.f32 %v2183_v52, %v8452_v31 }
 0x23a   :  { %v2536_v20 = vadd.f32 %v2535_v3, %v2534_v22  ;;  %v2396_v21 = vrot.slane %v2395_v33, 2  ;;  %v2262_v60 = vmul.f32 %v2183_v52, %v10869_v39  ;;  %v2609_v53 = vadd.f32 %v2527_v57, %v2367_v32 }
 0x23b   :  { %v2391_v30 = vrot.slane %v2390_v29, 1  ;;  %v2383_v61 = vadd.f32 %v2382_v48, %v2381_v43  ;;  %v2541_v49 = vadd.f32 %v2540_v56, %v2539_v18  ;;  %v2550_v8 = vadd.f32 %v2549_v10, %v2548_v40 }
 0x23c   :  { %v2611_v63 = vsel %vm25_vm0, %v2536_v20, 0.0  ;;  %v2569_v36 = vadd.f32 %v2263_v42, %v2261_v44  ;;  %v2576_v6 = vsel %vm25_vm0, %v2262_v60, 0.0  ;;  %v2397_v3 = vadd.f32 %v2396_v21, %v2395_v33 }
 0x23d   :  { %v2612_v23 = vadd.f32 %v2611_v63, %v2610_v24  ;;  %v2392_v22 = vadd.f32 %v2391_v30, %v2390_v29  ;;  %v2578_v55 = vadd.f32 %v2577_v27, %v2576_v6  ;;  %v2542_v9 = vrot.slane %v2541_v49, 1 }
 0x23e   :  { %v2551_v58 = vrot.slane %v2550_v8, 1  ;;  %v2570_v35 = vrot.slane %v2569_v36, 4  ;;  %v8975_v7 = vmul.f32 0.5, %v2609_v53  ;;  %v10872_v32 = vrot.slane %v8662_v14, 4 }
 0x23f   :  { %v8977_v52 = vmul.f32 0.5, %v2612_v23  ;;  %v2579_v18 = vrot.slane %v2578_v55, 4  ;;  %v2543_v40 = vadd.f32 %v2542_v9, %v2541_v49  ;;  %v2614_v57 = vsel %vm25_vm0, %v2392_v22, 0.0 }
 0x240   :  { %10870 = vst [vmem:[#allocation88_spill] sm:$0xff] %v8975_v7  ;;  %v2404_v43 = vadd.f32 %v10872_v32, %v8662_v14  ;;  %v2552_v42 = vadd.f32 %v2551_v58, %v2550_v8  ;;  %v2555_v33 = vadd.f32 %v2554_v26, %v8921_v47  ;;  %v10873_v29 = vrot.slane %v8929_v12, 4 }
 0x241   :  { %10871 = vst [vmem:[#allocation89_spill] sm:$0xff] %v8977_v52  ;;  %v2670_v27 = vsel %vm25_vm0, %v8977_v52, -inf  ;;  %v2613_v14 = vadd.f32 %v2543_v40, %v2383_v61  ;;  %v2398_v10 = vrot.slane %v2397_v3, 1  ;;  %v10875_v47 = vrot.slane %v8673_v38, 4 }
 0x242   :  { %v2405_v48 = vrot.slane %v2404_v43, 2  ;;  %v2564_v56 = vadd.f32 %v10873_v29, %v8929_v12  ;;  %v2671_v20 = vmax.f32 %v8975_v7, %v2670_v27  ;;  %v2615_v24 = vsel %vm25_vm0, %v2552_v42, 0.0 }
 0x243   :  { %v2616_v21 = vadd.f32 %v2615_v24, %v2614_v57  ;;  %v2556_v60 = vrot.slane %v2555_v33, 2  ;;  %v8993_v30 = vmul.f32 0.5, %v2613_v14  ;;  %v2411_v26 = vadd.f32 %v10875_v47, %v8673_v38 }
 0x244   :  { %v2406_v44 = vadd.f32 %v2405_v48, %v2404_v43  ;;  %v2565_v53 = vrot.slane %v2564_v56, 2  ;;  %2672 = vmax.xlane.f32.xlu0 %v2671_v20  ;;  %v10876_v12 = vrot.slane %v8679_v62, 4  ;;  %v2571_v49 = vadd.f32 %v2570_v35, %v2569_v36 }
 0x245   :  { %10874 = vst [vmem:[#allocation90_spill] sm:$0xff] %v8993_v30  ;;  %v9001_v61 = vmul.f32 0.5, %v2616_v21  ;;  %v2557_v6 = vadd.f32 %v2556_v60, %v2555_v33  ;;  %v2412_v22 = vrot.slane %v2411_v26, 2  ;;  %v2580_v32 = vadd.f32 %v2579_v18, %v2578_v55 }
 0x246   :  { %v2420_v63 = vadd.f32 %v10876_v12, %v8679_v62  ;;  %v2407_v8 = vrot.slane %v2406_v44, 1  ;;  %v2566_v23 = vadd.f32 %v2565_v53, %v2564_v56  ;;  %v2572_v58 = vrot.slane %v2571_v49, 2 }
 0x247   :  { %10877 = vst [vmem:[#allocation91_spill] sm:$0xff] %v9001_v61  ;;  %v2674_v43 = vsel %vm25_vm0, %v9001_v61, -inf  ;;  %v2558_v42 = vrot.slane %v2557_v6, 1  ;;  %v2413_v27 = vadd.f32 %v2412_v22, %v2411_v26  ;;  %v2399_v35 = vadd.f32 %v2398_v10, %v2397_v3 }
 0x248   :  { %v2421_v9 = vrot.slane %v2420_v63, 2  ;;  %v2408_v40 = vadd.f32 %v2407_v8, %v2406_v44  ;;  %v2567_v38 = vrot.slane %v2566_v23, 1  ;;  %v2675_v57 = vmax.f32 %v8993_v30, %v2674_v43 }
 0x249   :  { %v2573_v36 = vadd.f32 %v2572_v58, %v2571_v49  ;;  %v2559_v48 = vadd.f32 %v2558_v42, %v2557_v6  ;;  %v2581_v33 = vrot.slane %v2580_v32, 2  ;;  %v2414_v24 = vrot.slane %v2413_v27, 1 }
 0x24a   :  { %v2422_v62 = vadd.f32 %v2421_v9, %v2420_v63  ;;  %v2568_v29 = vadd.f32 %v2567_v38, %v2566_v23  ;;  %2676 = vmax.xlane.f32.xlu1 %v2675_v57  ;;  %v2618_v56 = vsel %vm25_vm0, %v2408_v40, 0.0 }
 0x24b   :  { %v2574_v55 = vrot.slane %v2573_v36, 1  ;;  %v2617_v18 = vadd.f32 %v2559_v48, %v2399_v35  ;;  %v2582_v21 = vadd.f32 %v2581_v33, %v2580_v32  ;;  %v2415_v10 = vadd.f32 %v2414_v24, %v2413_v27 }
 0x24c   :  { %v2423_v20 = vrot.slane %v2422_v62, 1  ;;  %v2619_v14 = vsel %vm25_vm0, %v2568_v29, 0.0 }
 0x24d   :  { %v2620_v44 = vadd.f32 %v2619_v14, %v2618_v56  ;;  %v2575_v53 = vadd.f32 %v2574_v55, %v2573_v36  ;;  %v2583_v47 = vrot.slane %v2582_v21, 1  ;;  %v9010_v3 = vmul.f32 0.5, %v2617_v18 }
 0x24e   :  { %v2424_v60 = vadd.f32 %v2423_v20, %v2422_v62 }
 0x24f   :  { %v9008_v26 = vmul.f32 0.5, %v2620_v44  ;;  %10879 = vst [vmem:[#allocation93_spill] sm:$0xff] %v9010_v3  ;;  %v2584_v12 = vadd.f32 %v2583_v47, %v2582_v21  ;;  %v2621_v8 = vadd.f32 %v2575_v53, %v2415_v10 }
 0x250   :  { %v2622_v6 = vsel %vm25_vm0, %v2424_v60, 0.0 }
 0x251   :  { %10878 = vst [vmem:[#allocation92_spill] sm:$0xff] %v9008_v26  ;;  %v2678_v63 = vsel %vm25_vm0, %v9008_v26, -inf  ;;  %v2623_v23 = vsel %vm25_vm0, %v2584_v12, 0.0  ;;  %v9019_v58 = vmul.f32 0.5, %v2621_v8 }
 0x252   :  { %v2679_v49 = vmax.f32 %v9010_v3, %v2678_v63  ;;  %v2624_v22 = vadd.f32 %v2623_v23, %v2622_v6 }
 0x253   :  { %10881 = vst [vmem:[#allocation95_spill] sm:$0xff] %v9019_v58 }
 0x254   :  { %2680 = vmax.xlane.f32.xlu0 %v2679_v49  ;;  %v9017_v9 = vmul.f32 0.5, %v2624_v22 }
 0x256   :  { %10880 = vst [vmem:[#allocation94_spill] sm:$0xff] %v9017_v9  ;;  %v2682_v32 = vsel %vm25_vm0, %v9017_v9, -inf }
 0x257   :  { %v2683_v43 = vmax.f32 %v9019_v58, %v2682_v32 }
 0x259   :  { %2684 = vmax.xlane.f32.xlu1 %v2683_v43 }
 0x282   :  { %v2649_v40 = vpop.xlane.xlu0 %2648 }
 0x283   :  { %v2686_v42 = vsub.f32 %v8756_v34, %v2649_v40  ;;  %v2687_v38 = vsub.f32 %v8779_v5, %v2649_v40 }
 0x285   :  { %v2706_v57 = vmul.f32 1.442695, %v2686_v42  ;;  %v2708_v27 = vmul.f32 1.442695, %v2687_v38 }
 0x287   :  { %4847 = vpow2.f32 %v2706_v57 }
 0x288   :  { %4849 = vpow2.f32 %v2708_v27 }
 0x294   :  { %v9026_v36 = vpop.eup %4847 }
 0x295   :  { %v9030_v29 = vpop.eup %4849 }
 0x296   :  { %v2653_v62 = vpop.xlane.xlu1 %2652  ;;  %v2746_v20 = vsel %vm25_vm0, %v9030_v29, 0.0 }
 0x297   :  { %v2688_v35 = vsub.f32 %v8821_v1, %v2653_v62  ;;  %v2689_v48 = vsub.f32 %v8832_v41, %v2653_v62  ;;  %v2747_v55 = vadd.f32 %v9026_v36, %v2746_v20 }
 0x299   :  { %v2710_v33 = vmul.f32 1.442695, %v2688_v35  ;;  %v2712_v56 = vmul.f32 1.442695, %v2689_v48  ;;  %2748 = vadd.xlane.f32.xlu0 %v2747_v55 }
 0x29b   :  { %4851 = vpow2.f32 %v2710_v33 }
 0x29c   :  { %4853 = vpow2.f32 %v2712_v56 }
 0x29e   :  { %v2657_v18 = vpop.xlane.xlu0 %2656 }
 0x29f   :  { %v2690_v14 = vsub.f32 %v8844_v0, %v2657_v18  ;;  %v2691_v24 = vsub.f32 %v8857_v46, %v2657_v18 }
 0x2a1   :  { %v2714_v21 = vmul.f32 1.442695, %v2690_v14  ;;  %v2716_v44 = vmul.f32 1.442695, %v2691_v24 }
 0x2a3   :  { %4855 = vpow2.f32 %v2714_v21 }
 0x2a4   :  { %4857 = vpow2.f32 %v2716_v44 }
 0x2a8   :  { %v9037_v60 = vpop.eup %4851 }
 0x2a9   :  { %v9039_v53 = vpop.eup %4853 }
 0x2aa   :  { %v2750_v10 = vsel %vm25_vm0, %v9039_v53, 0.0 }
 0x2ab   :  { %v2661_v47 = vpop.xlane.xlu1 %2660  ;;  %v2751_v49 = vadd.f32 %v9037_v60, %v2750_v10 }
 0x2ac   :  { %v2692_v12 = vsub.f32 %v8882_v11, %v2661_v47  ;;  %v2693_v63 = vsub.f32 %v8886_v37, %v2661_v47 }
 0x2ad   :  { %2752 = vadd.xlane.f32.xlu1 %v2751_v49 }
 0x2ae   :  { %v2718_v8 = vmul.f32 1.442695, %v2692_v12  ;;  %v2720_v6 = vmul.f32 1.442695, %v2693_v63 }
 0x2b0   :  { %4859 = vpow2.f32 %v2718_v8  ;;  %v9046_v23 = vpop.eup %4855 }
 0x2b1   :  { %4861 = vpow2.f32 %v2720_v6  ;;  %v9048_v22 = vpop.eup %4857 }
 0x2b2   :  { %v2754_v32 = vsel %vm25_vm0, %v9048_v22, 0.0 }
 0x2b3   :  { %v2755_v43 = vadd.f32 %v9046_v23, %v2754_v32 }
 0x2b5   :  { %2756 = vadd.xlane.f32.xlu0 %v2755_v43 }
 0x2b9   :  { %v2665_v40 = vpop.xlane.xlu0 %2664 }
 0x2ba   :  { %v2694_v42 = vsub.f32 %v8911_v2, %v2665_v40  ;;  %v2695_v38 = vsub.f32 %v8924_v15, %v2665_v40 }
 0x2bc   :  { %v2722_v57 = vmul.f32 1.442695, %v2694_v42  ;;  %v2724_v27 = vmul.f32 1.442695, %v2695_v38 }
 0x2bd   :  { %v9055_v62 = vpop.eup %4859 }
 0x2be   :  { %4863 = vpow2.f32 %v2722_v57  ;;  %v9057_v35 = vpop.eup %4861 }
 0x2bf   :  { %4865 = vpow2.f32 %v2724_v27  ;;  %v2669_v48 = vpop.xlane.xlu1 %2668  ;;  %v2758_v20 = vsel %vm25_vm0, %v9057_v35, 0.0 }
 0x2c0   :  { %v2696_v33 = vsub.f32 %v8948_v13, %v2669_v48  ;;  %v2697_v56 = vsub.f32 %v8950_v45, %v2669_v48  ;;  %v2759_v55 = vadd.f32 %v9055_v62, %v2758_v20 }
 0x2c2   :  { %v2726_v18 = vmul.f32 1.442695, %v2696_v33  ;;  %v2728_v14 = vmul.f32 1.442695, %v2697_v56  ;;  %2760 = vadd.xlane.f32.xlu1 %v2759_v55 }
 0x2c4   :  { %4867 = vpow2.f32 %v2726_v18 }
 0x2c5   :  { %4869 = vpow2.f32 %v2728_v14 }
 0x2cb   :  { %v9064_v24 = vpop.eup %4863 }
 0x2cc   :  { %v9066_v44 = vpop.eup %4865 }
 0x2cd   :  { %v2673_v21 = vpop.xlane.xlu0 %2672  ;;  %v2762_v12 = vsel %vm25_vm0, %v9066_v44, 0.0 }
 0x2ce   :  { %v2698_v47 = vsub.f32 %v8975_v7, %v2673_v21  ;;  %v2699_v10 = vsub.f32 %v8977_v52, %v2673_v21  ;;  %v2763_v8 = vadd.f32 %v9064_v24, %v2762_v12 }
 0x2d0   :  { %v2730_v63 = vmul.f32 1.442695, %v2698_v47  ;;  %v2732_v49 = vmul.f32 1.442695, %v2699_v10  ;;  %2764 = vadd.xlane.f32.xlu0 %v2763_v8 }
 0x2d1   :  { %v9073_v6 = vpop.eup %4867 }
 0x2d2   :  { %4871 = vpow2.f32 %v2730_v63  ;;  %v9075_v43 = vpop.eup %4869 }
 0x2d3   :  { %4873 = vpow2.f32 %v2732_v49  ;;  %v2677_v32 = vpop.xlane.xlu1 %2676  ;;  %v2766_v38 = vsel %vm25_vm0, %v9075_v43, 0.0 }
 0x2d4   :  { %v2700_v40 = vsub.f32 %v8993_v30, %v2677_v32  ;;  %v2701_v42 = vsub.f32 %v9001_v61, %v2677_v32  ;;  %v2767_v48 = vadd.f32 %v9073_v6, %v2766_v38 }
 0x2d6   :  { %v2734_v57 = vmul.f32 1.442695, %v2700_v40  ;;  %v2736_v27 = vmul.f32 1.442695, %v2701_v42  ;;  %2768 = vadd.xlane.f32.xlu1 %v2767_v48 }
 0x2d8   :  { %4875 = vpow2.f32 %v2734_v57 }
 0x2d9   :  { %4877 = vpow2.f32 %v2736_v27 }
 0x2dd   :  { %v2681_v33 = vpop.xlane.xlu0 %2680 }
 0x2de   :  { %v2702_v56 = vsub.f32 %v9010_v3, %v2681_v33  ;;  %v2703_v20 = vsub.f32 %v9008_v26, %v2681_v33 }
 0x2df   :  { %v9084_v55 = vpop.eup %4871 }
 0x2e0   :  { %v2738_v18 = vmul.f32 1.442695, %v2702_v56  ;;  %v2740_v14 = vmul.f32 1.442695, %v2703_v20  ;;  %v9086_v21 = vpop.eup %4873 }
 0x2e1   :  { %v2770_v47 = vsel %vm25_vm0, %v9086_v21, 0.0 }
 0x2e2   :  { %4879 = vpow2.f32 %v2738_v18  ;;  %v2685_v10 = vpop.xlane.xlu1 %2684  ;;  %v2771_v12 = vadd.f32 %v9084_v55, %v2770_v47 }
 0x2e3   :  { %4881 = vpow2.f32 %v2740_v14  ;;  %v2704_v63 = vsub.f32 %v9019_v58, %v2685_v10  ;;  %v2705_v49 = vsub.f32 %v9017_v9, %v2685_v10  ;;  %v10885_v9 = vld [vmem:[#allocation5_spill] sm:$0xff] }
 0x2e4   :  { %2772 = vadd.xlane.f32.xlu0 %v2771_v12 }
 0x2e5   :  { %v9093_v8 = vpop.eup %4875  ;;  %v2742_v32 = vmul.f32 1.442695, %v2704_v63  ;;  %v2744_v40 = vmul.f32 1.442695, %v2705_v49 }
 0x2e6   :  { %v9095_v42 = vpop.eup %4877 }
 0x2e7   :  { %4883 = vpow2.f32 %v2742_v32  ;;  %v2774_v38 = vsel %vm25_vm0, %v9095_v42, 0.0 }
 0x2e8   :  { %4885 = vpow2.f32 %v2744_v40  ;;  %v2775_v57 = vadd.f32 %v9093_v8, %v2774_v38  ;;  %v10882_v40 = vld [vmem:[#allocation8_spill] sm:$0xff] }
 0x2ea   :  { %2776 = vadd.xlane.f32.xlu1 %v2775_v57  ;;  %v10883_v57 = vld [vmem:[#allocation9_spill] sm:$0xff] }
 0x2ef   :  { %v9100_v27 = vpop.eup %4879 }
 0x2f0   :  { %v9102_v48 = vpop.eup %4881 }
 0x2f1   :  { %v2778_v33 = vsel %vm25_vm0, %v9102_v48, 0.0 }
 0x2f2   :  { %v2779_v56 = vadd.f32 %v9100_v27, %v2778_v33 }
 0x2f4   :  { %2780 = vadd.xlane.f32.xlu0 %v2779_v56  ;;  %v9107_v20 = vpop.eup %4883  ;;  %v10884_v56 = vld [vmem:[#allocation4_spill] sm:$0xff] }
 0x2f5   :  { %v9109_v18 = vpop.eup %4885 }
 0x2f6   :  { %v2782_v14 = vsel %vm25_vm0, %v9109_v18, 0.0 }
 0x2f7   :  { %v2783_v47 = vadd.f32 %v9107_v20, %v2782_v14 }
 0x2f9   :  { %2784 = vadd.xlane.f32.xlu1 %v2783_v47  ;;  %v10886_v47 = vld [vmem:[#allocation43_spill] sm:$0xff] }
 0x322   :  { %v2749_v10 = vpop.xlane.xlu0 %2748 }
 0x323   :  { %4887 = vrcp.f32 %v2749_v10  ;;  %v10887_v10 = vld [vmem:[#allocation44_spill] sm:$0xff] }
 0x330   :  { %v4888_v12 = vpop.eup %4887 }
 0x331   :  { %v2796_v63 = vmul.f32 %v4888_v12, %v9026_v36  ;;  %v2797_v49 = vmul.f32 %v4888_v12, %v9030_v29  ;;  %v10888_v12 = vld [vmem:[#allocation45_spill] sm:$0xff] }
 0x333   :  { %v2818_v38 = vmul.f32 %v2796_v63, %v10882_v40  ;;  %v2819_v33 = vmul.f32 %v2797_v49, %v10883_v57  ;;  %v2816_v58 = vmul.f32 %v2796_v63, %v10884_v56  ;;  %v2817_v3 = vmul.f32 %v2797_v49, %v10885_v9 }
 0x334   :  { %v2858_v14 = vmul.f32 %v2796_v63, %v7138_v19  ;;  %v2859_v26 = vmul.f32 %v2797_v49, %v10886_v47  ;;  %v2856_v30 = vmul.f32 %v2796_v63, %v10887_v10  ;;  %v2857_v61 = vmul.f32 %v2797_v49, %v10888_v12  ;;  %v10889_v49 = vld [vmem:[#allocation6_spill] sm:$0xff] }
 0x335   :  { %v2900_v36 = vsel %vm25_vm0, %v2819_v33, 0.0  ;;  %v2896_v29 = vsel %vm25_vm0, %v2817_v3, 0.0 }
 0x336   :  { %v2753_v32 = vpop.xlane.xlu1 %2752  ;;  %v2901_v7 = vadd.f32 %v2900_v36, %v2818_v38  ;;  %v2897_v52 = vadd.f32 %v2896_v29, %v2816_v58  ;;  %v2980_v45 = vsel %vm25_vm0, %v2859_v26, 0.0  ;;  %v10890_v58 = vld [vmem:[#allocation7_spill] sm:$0xff]  ;;  %v10891_v26 = vld [vmem:[#allocation2_spill] sm:$0xff] }
 0x337   :  { %4889 = vrcp.f32 %v2753_v32  ;;  %v9127_v13 = vadd.f32 %v2980_v45, %v2858_v14  ;;  %v2976_v32 = vsel %vm25_vm0, %v2857_v61, 0.0  ;;  %v10892_v14 = vld [vmem:[#allocation3_spill] sm:$0xff]  ;;  %v10893_v61 = vld [vmem:[#allocation46_spill] sm:$0xff] }
 0x338   :  { %2902 = vadd.xlane.f32.xlu1 %v2901_v7  ;;  %2898 = vadd.xlane.f32.xlu0 %v2897_v52  ;;  %v9130_v15 = vadd.f32 %v2976_v32, %v2856_v30  ;;  %v10894_v52 = vld [vmem:[#allocation47_spill] sm:$0xff]  ;;  %v10895_v32 = vld [vmem:[#allocation48_spill] sm:$0xff] }
 0x33e   :  { %v2757_v2 = vpop.xlane.xlu0 %2756 }
 0x33f   :  { %4891 = vrcp.f32 %v2757_v2  ;;  %v10896_v2 = vld [vmem:[#allocation49_spill] sm:$0xff] }
 0x344   :  { %v4890_v63 = vpop.eup %4889 }
 0x345   :  { %v2798_v33 = vmul.f32 %v4890_v63, %v9037_v60  ;;  %v2799_v3 = vmul.f32 %v4890_v63, %v9039_v53 }
 0x347   :  { %v2822_v38 = vmul.f32 %v2798_v33, %v10889_v49  ;;  %v2823_v36 = vmul.f32 %v2799_v3, %v10890_v58  ;;  %v2820_v45 = vmul.f32 %v2798_v33, %v10891_v26  ;;  %v2821_v29 = vmul.f32 %v2799_v3, %v10892_v14 }
 0x348   :  { %v2862_v7 = vmul.f32 %v2798_v33, %v10893_v61  ;;  %v2863_v30 = vmul.f32 %v2799_v3, %v10894_v52  ;;  %v2860_v37 = vmul.f32 %v2798_v33, %v10895_v32  ;;  %v2861_v11 = vmul.f32 %v2799_v3, %v10896_v2 }
 0x349   :  { %v2908_v60 = vsel %vm25_vm0, %v2823_v36, 0.0  ;;  %v2904_v53 = vsel %vm25_vm0, %v2821_v29, 0.0  ;;  %v10897_v36 = vld [vmem:[#allocation10_spill] sm:$0xff] }
 0x34a   :  { %v2909_v46 = vadd.f32 %v2908_v60, %v2822_v38  ;;  %v2905_v0 = vadd.f32 %v2904_v53, %v2820_v45  ;;  %v2988_v41 = vsel %vm25_vm0, %v2863_v30, 0.0  ;;  %v2984_v1 = vsel %vm25_vm0, %v2861_v11, 0.0  ;;  %v10898_v38 = vld [vmem:[#allocation11_spill] sm:$0xff]  ;;  %v10899_v60 = vld [vmem:[#allocation12_spill] sm:$0xff]  ;;  %v10900_v53 = vld [vmem:[#allocation13_spill] sm:$0xff] }
 0x34b   :  { %v2761_v63 = vpop.xlane.xlu1 %2760  ;;  %v9146_v34 = vadd.f32 %v2988_v41, %v2862_v7  ;;  %v9148_v5 = vadd.f32 %v2984_v1, %v2860_v37  ;;  %v10902_v7 = vld [vmem:[#allocation51_spill] sm:$0xff]  ;;  %v10903_v37 = vld [vmem:[#allocation52_spill] sm:$0xff] }
 0x34c   :  { %4893 = vrcp.f32 %v2761_v63  ;;  %v4892_v52 = vpop.eup %4891  ;;  %2910 = vadd.xlane.f32.xlu1 %v2909_v46  ;;  %2906 = vadd.xlane.f32.xlu0 %v2905_v0  ;;  %v10901_v63 = vld [vmem:[#allocation50_spill] sm:$0xff]  ;;  %v10904_v46 = vld [vmem:[#allocation53_spill] sm:$0xff] }
 0x34d   :  { %v2800_v33 = vmul.f32 %v4892_v52, %v9046_v23  ;;  %v2801_v3 = vmul.f32 %v4892_v52, %v9048_v22 }
 0x34f   :  { %v2826_v29 = vmul.f32 %v2800_v33, %v10897_v36  ;;  %v2827_v45 = vmul.f32 %v2801_v3, %v10898_v38  ;;  %v2824_v30 = vmul.f32 %v2800_v33, %v10899_v60  ;;  %v2825_v11 = vmul.f32 %v2801_v3, %v10900_v53 }
 0x350   :  { %v2866_v41 = vmul.f32 %v2800_v33, %v10901_v63  ;;  %v2867_v1 = vmul.f32 %v2801_v3, %v10902_v7  ;;  %v2864_v2 = vmul.f32 %v2800_v33, %v10903_v37  ;;  %v2865_v0 = vmul.f32 %v2801_v3, %v10904_v46  ;;  %v10912_v37 = vld [vmem:[#allocation57_spill] sm:$0xff] }
 0x351   :  { %v2916_v23 = vsel %vm25_vm0, %v2827_v45, 0.0  ;;  %v2912_v22 = vsel %vm25_vm0, %v2825_v11, 0.0  ;;  %v10905_v11 = vld [vmem:[#allocation14_spill] sm:$0xff] }
 0x352   :  { %v2917_v52 = vadd.f32 %v2916_v23, %v2826_v29  ;;  %v2913_v32 = vadd.f32 %v2912_v22, %v2824_v30  ;;  %v2996_v61 = vsel %vm25_vm0, %v2867_v1, 0.0  ;;  %v2992_v12 = vsel %vm25_vm0, %v2865_v0, 0.0  ;;  %v10906_v30 = vld [vmem:[#allocation15_spill] sm:$0xff]  ;;  %v10907_v1 = vld [vmem:[#allocation16_spill] sm:$0xff]  ;;  %v10908_v0 = vld [vmem:[#allocation17_spill] sm:$0xff] }
 0x353   :  { %v9164_v10 = vadd.f32 %v2996_v61, %v2866_v41  ;;  %v9166_v47 = vadd.f32 %v2992_v12, %v2864_v2  ;;  %v10909_v41 = vld [vmem:[#allocation54_spill] sm:$0xff]  ;;  %v10910_v2 = vld [vmem:[#allocation55_spill] sm:$0xff] }
 0x354   :  { %2918 = vadd.xlane.f32.xlu1 %v2917_v52  ;;  %2914 = vadd.xlane.f32.xlu0 %v2913_v32  ;;  %v10911_v32 = vld [vmem:[#allocation56_spill] sm:$0xff] }
 0x359   :  { %v2765_v7 = vpop.xlane.xlu0 %2764  ;;  %v4894_v33 = vpop.eup %4893 }
 0x35a   :  { %4895 = vrcp.f32 %v2765_v7  ;;  %v2802_v3 = vmul.f32 %v4894_v33, %v9055_v62  ;;  %v2803_v45 = vmul.f32 %v4894_v33, %v9057_v35 }
 0x35c   :  { %v2830_v29 = vmul.f32 %v2802_v3, %v10905_v11  ;;  %v2831_v23 = vmul.f32 %v2803_v45, %v10906_v30  ;;  %v2828_v22 = vmul.f32 %v2802_v3, %v10907_v1  ;;  %v2829_v61 = vmul.f32 %v2803_v45, %v10908_v0 }
 0x35d   :  { %v2870_v12 = vmul.f32 %v2802_v3, %v10909_v41  ;;  %v2871_v52 = vmul.f32 %v2803_v45, %v10910_v2  ;;  %v2868_v46 = vmul.f32 %v2802_v3, %v10911_v32  ;;  %v2869_v7 = vmul.f32 %v2803_v45, %v10912_v37  ;;  %v10918_v32 = vld [vmem:[#allocation23_spill] sm:$0xff] }
 0x35e   :  { %v2924_v62 = vsel %vm25_vm0, %v2831_v23, 0.0  ;;  %v2920_v35 = vsel %vm25_vm0, %v2829_v61, 0.0  ;;  %v10915_v61 = vld [vmem:[#allocation20_spill] sm:$0xff] }
 0x35f   :  { %v2769_v63 = vpop.xlane.xlu1 %2768  ;;  %v2925_v33 = vadd.f32 %v2924_v62, %v2830_v29  ;;  %v2921_v19 = vadd.f32 %v2920_v35, %v2828_v22  ;;  %v3004_v1 = vsel %vm25_vm0, %v2871_v52, 0.0  ;;  %v3000_v41 = vsel %vm25_vm0, %v2869_v7, 0.0  ;;  %v10914_v22 = vld [vmem:[#allocation19_spill] sm:$0xff]  ;;  %v10916_v52 = vld [vmem:[#allocation21_spill] sm:$0xff] }
 0x360   :  { %4897 = vrcp.f32 %v2769_v63  ;;  %v9181_v30 = vadd.f32 %v3004_v1, %v2870_v12  ;;  %v9184_v2 = vadd.f32 %v3000_v41, %v2868_v46  ;;  %v10913_v63 = vld [vmem:[#allocation18_spill] sm:$0xff] }
 0x361   :  { %2926 = vadd.xlane.f32.xlu1 %v2925_v33  ;;  %2922 = vadd.xlane.f32.xlu0 %v2921_v19 }
 0x367   :  { %v4896_v3 = vpop.eup %4895 }
 0x368   :  { %v9187_v45 = vmul.f32 %v4896_v3, %v9064_v24  ;;  %v9190_v23 = vmul.f32 %v4896_v3, %v9066_v44  ;;  %v10917_v3 = vld [vmem:[#allocation22_spill] sm:$0xff] }
 0x36a   :  { %v2834_v29 = vmul.f32 %v9187_v45, %v10913_v63  ;;  %v2835_v1 = vmul.f32 %v9190_v23, %v10914_v22  ;;  %v2832_v12 = vmul.f32 %v9187_v45, %v10915_v61  ;;  %v2833_v19 = vmul.f32 %v9190_v23, %v10916_v52  ;;  %v10920_v52 = vld [vmem:[#allocation25_spill] sm:$0xff] }
 0x36c   :  { %v2932_v24 = vsel %vm25_vm0, %v2835_v1, 0.0  ;;  %v2928_v41 = vsel %vm25_vm0, %v2833_v19, 0.0  ;;  %v10919_v1 = vld [vmem:[#allocation24_spill] sm:$0xff] }
 0x36d   :  { %v2773_v46 = vpop.xlane.xlu0 %2772  ;;  %v4898_v44 = vpop.eup %4897  ;;  %v2933_v7 = vadd.f32 %v2932_v24, %v2834_v29  ;;  %v2929_v62 = vadd.f32 %v2928_v41, %v2832_v12 }
 0x36e   :  { %4899 = vrcp.f32 %v2773_v46  ;;  %v9203_v35 = vmul.f32 %v4898_v44, %v9073_v6  ;;  %v9206_v33 = vmul.f32 %v4898_v44, %v9075_v43 }
 0x36f   :  { %2934 = vadd.xlane.f32.xlu1 %v2933_v7  ;;  %2930 = vadd.xlane.f32.xlu0 %v2929_v62 }
 0x370   :  { %v2838_v37 = vmul.f32 %v9203_v35, %v10917_v3  ;;  %v2839_v46 = vmul.f32 %v9206_v33, %v10918_v32  ;;  %v2836_v19 = vmul.f32 %v9203_v35, %v10919_v1  ;;  %v2837_v29 = vmul.f32 %v9206_v33, %v10920_v52  ;;  %v10921_v52 = vld [vmem:[#allocation26_spill] sm:$0xff]  ;;  %v10922_v32 = vld [vmem:[#allocation27_spill] sm:$0xff]  ;;  %v10936_v3 = vld [vmem:[#allocation41_spill] sm:$0xff] }
 0x372   :  { %v2940_v6 = vsel %vm25_vm0, %v2839_v46, 0.0  ;;  %v2936_v43 = vsel %vm25_vm0, %v2837_v29, 0.0  ;;  %v10923_v29 = vld [vmem:[#allocation28_spill] sm:$0xff] }
 0x373   :  { %v2777_v12 = vpop.xlane.xlu1 %2776  ;;  %v2941_v24 = vadd.f32 %v2940_v6, %v2838_v37  ;;  %v2937_v41 = vadd.f32 %v2936_v43, %v2836_v19  ;;  %v10924_v19 = vld [vmem:[#allocation29_spill] sm:$0xff] }
 0x374   :  { %4901 = vrcp.f32 %v2777_v12 }
 0x375   :  { %2942 = vadd.xlane.f32.xlu1 %v2941_v24  ;;  %2938 = vadd.xlane.f32.xlu0 %v2937_v41 }
 0x37b   :  { %v4900_v44 = vpop.eup %4899 }
 0x37c   :  { %v9219_v62 = vmul.f32 %v4900_v44, %v9084_v55  ;;  %v9222_v1 = vmul.f32 %v4900_v44, %v9086_v21 }
 0x37d   :  { %v2781_v7 = vpop.xlane.xlu0 %2780 }
 0x37e   :  { %4903 = vrcp.f32 %v2781_v7  ;;  %v2842_v12 = vmul.f32 %v9219_v62, %v10921_v52  ;;  %v2843_v46 = vmul.f32 %v9222_v1, %v10922_v32  ;;  %v2840_v37 = vmul.f32 %v9219_v62, %v10923_v29  ;;  %v10925_v29 = vld [vmem:[#allocation30_spill] sm:$0xff]  ;;  %v10926_v32 = vld [vmem:[#allocation31_spill] sm:$0xff] }
 0x37f   :  { %v2841_v6 = vmul.f32 %v9222_v1, %v10924_v19 }
 0x380   :  { %v2948_v43 = vsel %vm25_vm0, %v2843_v46, 0.0 }
 0x381   :  { %v2944_v55 = vsel %vm25_vm0, %v2841_v6, 0.0  ;;  %v4902_v24 = vpop.eup %4901  ;;  %v2949_v21 = vadd.f32 %v2948_v43, %v2842_v12  ;;  %v10927_v6 = vld [vmem:[#allocation32_spill] sm:$0xff] }
 0x382   :  { %v2945_v41 = vadd.f32 %v2944_v55, %v2840_v37  ;;  %v2785_v44 = vpop.xlane.xlu1 %2784  ;;  %v9235_v7 = vmul.f32 %v4902_v24, %v9093_v8  ;;  %v9238_v52 = vmul.f32 %v4902_v24, %v9095_v42  ;;  %v10928_v37 = vld [vmem:[#allocation33_spill] sm:$0xff] }
 0x383   :  { %4905 = vrcp.f32 %v2785_v44  ;;  %2950 = vadd.xlane.f32.xlu1 %v2949_v21 }
 0x384   :  { %2946 = vadd.xlane.f32.xlu0 %v2945_v41  ;;  %v2846_v19 = vmul.f32 %v9235_v7, %v10925_v29  ;;  %v2847_v46 = vmul.f32 %v9238_v52, %v10926_v32  ;;  %v2844_v12 = vmul.f32 %v9235_v7, %v10927_v6  ;;  %v2845_v43 = vmul.f32 %v9238_v52, %v10928_v37  ;;  %v10929_v32 = vld [vmem:[#allocation34_spill] sm:$0xff]  ;;  %v10930_v29 = vld [vmem:[#allocation35_spill] sm:$0xff] }
 0x386   :  { %v2956_v8 = vsel %vm25_vm0, %v2847_v46, 0.0  ;;  %v2952_v42 = vsel %vm25_vm0, %v2845_v43, 0.0  ;;  %v10931_v46 = vld [vmem:[#allocation36_spill] sm:$0xff] }
 0x387   :  { %v2957_v55 = vadd.f32 %v2956_v8, %v2846_v19  ;;  %v2953_v24 = vadd.f32 %v2952_v42, %v2844_v12  ;;  %v10932_v19 = vld [vmem:[#allocation37_spill] sm:$0xff] }
 0x389   :  { %2958 = vadd.xlane.f32.xlu1 %v2957_v55  ;;  %2954 = vadd.xlane.f32.xlu0 %v2953_v24 }
 0x38b   :  { %v4904_v21 = vpop.eup %4903 }
 0x38c   :  { %v9251_v41 = vmul.f32 %v4904_v21, %v9100_v27  ;;  %v9254_v44 = vmul.f32 %v4904_v21, %v9102_v48 }
 0x38e   :  { %v2850_v6 = vmul.f32 %v9251_v41, %v10929_v32  ;;  %v2851_v37 = vmul.f32 %v9254_v44, %v10930_v29  ;;  %v2848_v43 = vmul.f32 %v9251_v41, %v10931_v46  ;;  %v2849_v12 = vmul.f32 %v9254_v44, %v10932_v19  ;;  %v10933_v29 = vld [vmem:[#allocation38_spill] sm:$0xff]  ;;  %v10934_v32 = vld [vmem:[#allocation39_spill] sm:$0xff] }
 0x390   :  { %v2964_v8 = vsel %vm25_vm0, %v2851_v37, 0.0  ;;  %v2960_v27 = vsel %vm25_vm0, %v2849_v12, 0.0  ;;  %v4906_v42 = vpop.eup %4905  ;;  %v10935_v37 = vld [vmem:[#allocation40_spill] sm:$0xff] }
 0x391   :  { %v2965_v55 = vadd.f32 %v2964_v8, %v2850_v6  ;;  %v2961_v48 = vadd.f32 %v2960_v27, %v2848_v43  ;;  %v9267_v24 = vmul.f32 %v4906_v42, %v9107_v20  ;;  %v9270_v21 = vmul.f32 %v4906_v42, %v9109_v18  ;;  %v10937_v27 = vld [vmem:[#allocation59_spill] sm:$0xff] }
 0x392   :  { %v2875_v42 = vmul.f32 %v9190_v23, %v10937_v27 }
 0x393   :  { %2966 = vadd.xlane.f32.xlu1 %v2965_v55  ;;  %2962 = vadd.xlane.f32.xlu0 %v2961_v48  ;;  %v2854_v46 = vmul.f32 %v9267_v24, %v10933_v29  ;;  %v2855_v19 = vmul.f32 %v9270_v21, %v10934_v32  ;;  %v2852_v12 = vmul.f32 %v9267_v24, %v10935_v37  ;;  %v10938_v55 = vld [vmem:[#allocation61_spill] sm:$0xff] }
 0x394   :  { %v2853_v6 = vmul.f32 %v9270_v21, %v10936_v3 }
 0x395   :  { %v2972_v20 = vsel %vm25_vm0, %v2855_v19, 0.0  ;;  %v2873_v19 = vmul.f32 %v9190_v23, %v10938_v55 }
 0x396   :  { %v2968_v43 = vsel %vm25_vm0, %v2853_v6, 0.0  ;;  %v2973_v18 = vadd.f32 %v2972_v20, %v2854_v46  ;;  %v10939_v46 = vld [vmem:[#allocation58_spill] sm:$0xff]  ;;  %v10942_v20 = vld [vmem:[#allocation65_spill] sm:$0xff] }
 0x397   :  { %v2969_v8 = vadd.f32 %v2968_v43, %v2852_v12  ;;  %v2874_v48 = vmul.f32 %v9187_v45, %v10939_v46  ;;  %v10941_v12 = vld [vmem:[#allocation63_spill] sm:$0xff]  ;;  %v2877_v23 = vmul.f32 %v9206_v33, %v10942_v20  ;;  %v10943_v43 = vld [vmem:[#allocation62_spill] sm:$0xff] }
 0x398   :  { %2974 = vadd.xlane.f32.xlu1 %v2973_v18  ;;  %v2879_v6 = vmul.f32 %v9206_v33, %v10941_v12  ;;  %v2878_v18 = vmul.f32 %v9203_v35, %v10943_v43  ;;  %v10945_v12 = vld [vmem:[#allocation67_spill] sm:$0xff] }
 0x399   :  { %2970 = vadd.xlane.f32.xlu0 %v2969_v8  ;;  %v2883_v55 = vmul.f32 %v9222_v1, %v10945_v12 }
 0x39c   :  { %2982 = vadd.xlane.f32.xlu1 %v9127_v13  ;;  %v10940_v13 = vld [vmem:[#allocation60_spill] sm:$0xff] }
 0x39d   :  { %2978 = vadd.xlane.f32.xlu0 %v9130_v15  ;;  %v2872_v15 = vmul.f32 %v9187_v45, %v10940_v13  ;;  %v10944_v45 = vld [vmem:[#allocation64_spill] sm:$0xff] }
 0x39e   :  { %v2876_v8 = vmul.f32 %v9203_v35, %v10944_v45  ;;  %v2880_v35 = vmul.f32 %v9219_v62, %v10833_v25 }
 0x3a0   :  { %2990 = vadd.xlane.f32.xlu1 %v9146_v34  ;;  %v3012_v34 = vsel %vm25_vm0, %v2875_v42, 0.0  ;;  %v3020_v42 = vsel %vm25_vm0, %v2879_v6, 0.0  ;;  %v2887_v6 = vmul.f32 %v9238_v52, %v10838_v28 }
 0x3a1   :  { %2986 = vadd.xlane.f32.xlu0 %v9148_v5  ;;  %v3008_v5 = vsel %vm25_vm0, %v2873_v19, 0.0  ;;  %v3016_v19 = vsel %vm25_vm0, %v2877_v23, 0.0 }
 0x3a2   :  { %v3017_v33 = vadd.f32 %v3016_v19, %v2876_v8 }
 0x3a4   :  { %2998 = vadd.xlane.f32.xlu1 %v9164_v10  ;;  %v3009_v10 = vadd.f32 %v3008_v5, %v2872_v15 }
 0x3a5   :  { %2994 = vadd.xlane.f32.xlu0 %v9166_v47  ;;  %v3013_v47 = vadd.f32 %v3012_v34, %v2874_v48  ;;  %v10946_v48 = vld [vmem:[#allocation66_spill] sm:$0xff]  ;;  %v3028_v34 = vsel %vm25_vm0, %v2883_v55, 0.0  ;;  %v3036_v55 = vsel %vm25_vm0, %v2887_v6, 0.0 }
 0x3a6   :  { %v2882_v15 = vmul.f32 %v9219_v62, %v10946_v48  ;;  %v2884_v62 = vmul.f32 %v9235_v7, %v10845_v4 }
 0x3a8   :  { %3006 = vadd.xlane.f32.xlu1 %v9181_v30  ;;  %v2881_v30 = vmul.f32 %v9222_v1, %v10834_v16  ;;  %v2885_v1 = vmul.f32 %v9238_v52, %v10846_v54  ;;  %v3029_v23 = vadd.f32 %v3028_v34, %v2882_v15  ;;  %v2889_v52 = vmul.f32 %v9254_v44, %v10856_v17 }
 0x3a9   :  { %3002 = vadd.xlane.f32.xlu0 %v9184_v2  ;;  %v3021_v2 = vadd.f32 %v3020_v42, %v2878_v18  ;;  %v10948_v42 = vld [vmem:[#allocation75_spill] sm:$0xff] }
 0x3aa   :  { %v3024_v5 = vsel %vm25_vm0, %v2881_v30, 0.0  ;;  %v3032_v8 = vsel %vm25_vm0, %v2885_v1, 0.0  ;;  %v2891_v19 = vmul.f32 %v9254_v44, %v10948_v42  ;;  %v3040_v34 = vsel %vm25_vm0, %v2889_v52, 0.0 }
 0x3ab   :  { %v2893_v44 = vmul.f32 %v9270_v21, %v10869_v39 }
 0x3ac   :  { %3014 = vadd.xlane.f32.xlu1 %v3013_v47  ;;  %v3025_v47 = vadd.f32 %v3024_v5, %v2880_v35  ;;  %v3044_v35 = vsel %vm25_vm0, %v2891_v19, 0.0  ;;  %v2895_v5 = vmul.f32 %v9270_v21, %v8426_v50 }
 0x3ad   :  { %3010 = vadd.xlane.f32.xlu0 %v3009_v10  ;;  %v10947_v10 = vld [vmem:[#allocation70_spill] sm:$0xff] }
 0x3ae   :  { %v2886_v18 = vmul.f32 %v9235_v7, %v10947_v10  ;;  %v2888_v7 = vmul.f32 %v9251_v41, %v8345_v59 }
 0x3b0   :  { %3022 = vadd.xlane.f32.xlu1 %v3021_v2  ;;  %v3037_v30 = vadd.f32 %v3036_v55, %v2886_v18  ;;  %v3033_v2 = vadd.f32 %v3032_v8, %v2884_v62  ;;  %v3041_v1 = vadd.f32 %v3040_v34, %v2888_v7  ;;  %v3048_v18 = vsel %vm25_vm0, %v2893_v44, 0.0 }
 0x3b1   :  { %3018 = vadd.xlane.f32.xlu0 %v3017_v33  ;;  %v10949_v33 = vld [vmem:[#allocation74_spill] sm:$0xff] }
 0x3b2   :  { %v2890_v15 = vmul.f32 %v9251_v41, %v10949_v33  ;;  %v2892_v41 = vmul.f32 %v9267_v24, %v8452_v31 }
 0x3b4   :  { %3030 = vadd.xlane.f32.xlu1 %v3029_v23  ;;  %v3045_v6 = vadd.f32 %v3044_v35, %v2890_v15  ;;  %v2894_v23 = vmul.f32 %v9267_v24, %v8416_v51  ;;  %v3049_v55 = vadd.f32 %v3048_v18, %v2892_v41 }
 0x3b5   :  { %3026 = vadd.xlane.f32.xlu0 %v3025_v47  ;;  %v3052_v47 = vsel %vm25_vm0, %v2895_v5, 0.0 }
 0x3b6   :  { %v3053_v62 = vadd.f32 %v3052_v47, %v2894_v23 }
 0x3b8   :  { %3038 = vadd.xlane.f32.xlu1 %v3037_v30 }
 0x3b9   :  { %3034 = vadd.xlane.f32.xlu0 %v3033_v2 }
 0x3bc   :  { %3046 = vadd.xlane.f32.xlu1 %v3045_v6 }
 0x3bd   :  { %3042 = vadd.xlane.f32.xlu0 %v3041_v1 }
 0x3c0   :  { %3054 = vadd.xlane.f32.xlu1 %v3053_v62 }
 0x3c1   :  { %3050 = vadd.xlane.f32.xlu0 %v3049_v55  ;;  %v2903_v21 = vpop.xlane.xlu1 %2902  ;;  %v2899_v8 = vpop.xlane.xlu0 %2898 }
 0x3c2   :  { %v3137_v19 = vmul.f32 %v2903_v21, %v2903_v21  ;;  %v3136_v52 = vmul.f32 %v2899_v8, %v2899_v8  ;;  %v3057_v44 = vand.u32 2147483647, %v2903_v21  ;;  %v3056_v6 = vand.u32 2147483647, %v2899_v8 }
 0x3c4   :  { %v3177_v30 = vadd.f32 1.0, %v3137_v19  ;;  %v3176_v2 = vadd.f32 1.0, %v3136_v52  ;;  %v3097_v18 = vmul.f32 %v3057_v44, %v2903_v21  ;;  %v3096_v62 = vmul.f32 %v3056_v6, %v2899_v8 }
 0x3c6   :  { %4907 = vrcp.f32 %v3177_v30 }
 0x3c7   :  { %4909 = vrcp.f32 %v3176_v2 }
 0x3d3   :  { %v4908_v1 = vpop.eup %4907 }
 0x3d4   :  { %v4910_v23 = vpop.eup %4909  ;;  %v3257_v52 = vmul.f32 %v4908_v1, %v3097_v18 }
 0x3d5   :  { %v2911_v15 = vpop.xlane.xlu1 %2910  ;;  %v2907_v24 = vpop.xlane.xlu0 %2906  ;;  %v3256_v30 = vmul.f32 %v4910_v23, %v3096_v62 }
 0x3d6   :  { %v3139_v7 = vmul.f32 %v2911_v15, %v2911_v15  ;;  %v3138_v35 = vmul.f32 %v2907_v24, %v2907_v24  ;;  %v3059_v31 = vand.u32 2147483647, %v2911_v15  ;;  %v3298_v6 = vmul.f32 %v3257_v52, %v10882_v40 }
 0x3d7   :  { %v3296_v1 = vmul.f32 %v3256_v30, %v10884_v56 }
 0x3d8   :  { %v3179_v34 = vadd.f32 1.0, %v3139_v7  ;;  %v3178_v5 = vadd.f32 1.0, %v3138_v35  ;;  %v3058_v7 = vand.u32 2147483647, %v2907_v24  ;;  %v3299_v35 = vmul.f32 %v3257_v52, %v10883_v57 }
 0x3da   :  { %4911 = vrcp.f32 %v3179_v34  ;;  %v3297_v34 = vmul.f32 %v3256_v30, %v10885_v9  ;;  %v3098_v50 = vmul.f32 %v3058_v7, %v2907_v24  ;;  %v3384_v21 = vsel %vm25_vm0, %v3299_v35, 0.0 }
 0x3db   :  { %4913 = vrcp.f32 %v3178_v5  ;;  %v3099_v5 = vmul.f32 %v3059_v31, %v2911_v15  ;;  %v3376_v30 = vadd.f32 %v3298_v6, %v3296_v1 }
 0x3dc   :  { %v3383_v8 = vsel %vm25_vm0, %v3297_v34, 0.0 }
 0x3dd   :  { %v2919_v41 = vpop.xlane.xlu1 %2918  ;;  %v2915_v47 = vpop.xlane.xlu0 %2914  ;;  %v3385_v31 = vadd.f32 %v3384_v21, %v3383_v8 }
 0x3de   :  { %v3141_v55 = vmul.f32 %v2919_v41, %v2919_v41  ;;  %v3140_v19 = vmul.f32 %v2915_v47, %v2915_v47  ;;  %v3060_v24 = vand.u32 2147483647, %v2915_v47 }
 0x3df   :  { %v3386_v21 = vrot.slane %v3385_v31, 4 }
 0x3e0   :  { %v3181_v2 = vadd.f32 1.0, %v3141_v55  ;;  %v3180_v39 = vadd.f32 1.0, %v3140_v19  ;;  %v3061_v55 = vand.u32 2147483647, %v2919_v41  ;;  %v3100_v8 = vmul.f32 %v3060_v24, %v2915_v47 }
 0x3e1   :  { %v3387_v1 = vadd.f32 %v3386_v21, %v3385_v31 }
 0x3e2   :  { %4915 = vrcp.f32 %v3181_v2 }
 0x3e3   :  { %4917 = vrcp.f32 %v3180_v39 }
 0x3e7   :  { %v4912_v51 = vpop.eup %4911 }
 0x3e8   :  { %v4914_v17 = vpop.eup %4913  ;;  %v3259_v44 = vmul.f32 %v4912_v51, %v3099_v5  ;;  %v3101_v5 = vmul.f32 %v3061_v55, %v2919_v41 }
 0x3e9   :  { %v3258_v23 = vmul.f32 %v4914_v17, %v3098_v50 }
 0x3ea   :  { %v2927_v18 = vpop.xlane.xlu1 %2926  ;;  %v2923_v39 = vpop.xlane.xlu0 %2922  ;;  %v3303_v62 = vmul.f32 %v3259_v44, %v10890_v58  ;;  %v3302_v7 = vmul.f32 %v3259_v44, %v10889_v49  ;;  %v3377_v49 = vrot.slane %v3376_v30, 4 }
 0x3eb   :  { %v3143_v19 = vmul.f32 %v2927_v18, %v2927_v18  ;;  %v3301_v15 = vmul.f32 %v3258_v23, %v10892_v14  ;;  %v3142_v2 = vmul.f32 %v2923_v39, %v2923_v39  ;;  %v3300_v52 = vmul.f32 %v3258_v23, %v10891_v26 }
 0x3ec   :  { %v3400_v51 = vsel %vm25_vm0, %v3303_v62, 0.0  ;;  %v3378_v24 = vadd.f32 %v3377_v49, %v3376_v30  ;;  %v3062_v31 = vand.u32 2147483647, %v2923_v39 }
 0x3ed   :  { %v3183_v35 = vadd.f32 1.0, %v3143_v19  ;;  %v3399_v50 = vsel %vm25_vm0, %v3301_v15, 0.0  ;;  %v3182_v17 = vadd.f32 1.0, %v3142_v2  ;;  %v3392_v9 = vadd.f32 %v3302_v7, %v3300_v52 }
 0x3ee   :  { %v3401_v34 = vadd.f32 %v3400_v51, %v3399_v50  ;;  %v3063_v51 = vand.u32 2147483647, %v2927_v18  ;;  %v3379_v21 = vrot.slane %v3378_v24, 2 }
 0x3ef   :  { %4919 = vrcp.f32 %v3183_v35  ;;  %v4916_v58 = vpop.eup %4915  ;;  %v3393_v55 = vrot.slane %v3392_v9, 4 }
 0x3f0   :  { %4921 = vrcp.f32 %v3182_v17  ;;  %v4918_v14 = vpop.eup %4917  ;;  %v3402_v56 = vrot.slane %v3401_v34, 4  ;;  %v3261_v44 = vmul.f32 %v4916_v58, %v3101_v5  ;;  %v3388_v17 = vrot.slane %v3387_v1, 2 }
 0x3f1   :  { %v3260_v62 = vmul.f32 %v4918_v14, %v3100_v8  ;;  %v3394_v5 = vadd.f32 %v3393_v55, %v3392_v9 }
 0x3f2   :  { %v3306_v23 = vmul.f32 %v3261_v44, %v10897_v36  ;;  %v3307_v6 = vmul.f32 %v3261_v44, %v10898_v38  ;;  %v3403_v15 = vadd.f32 %v3402_v56, %v3401_v34 }
 0x3f3   :  { %v3304_v19 = vmul.f32 %v3260_v62, %v10899_v60  ;;  %v3305_v41 = vmul.f32 %v3260_v62, %v10900_v53  ;;  %v3103_v62 = vmul.f32 %v3063_v51, %v2927_v18  ;;  %v10950_v18 = vld [vmem:[#allocation15_spill] sm:$0xff] }
 0x3f4   :  { %v3416_v47 = vsel %vm25_vm0, %v3307_v6, 0.0  ;;  %v3404_v56 = vrot.slane %v3403_v15, 2 }
 0x3f5   :  { %v3408_v2 = vadd.f32 %v3306_v23, %v3304_v19  ;;  %v3415_v7 = vsel %vm25_vm0, %v3305_v41, 0.0  ;;  %v3102_v19 = vmul.f32 %v3062_v31, %v2923_v39  ;;  %v3389_v41 = vadd.f32 %v3388_v17, %v3387_v1  ;;  %v10951_v39 = vld [vmem:[#allocation16_spill] sm:$0xff] }
 0x3f6   :  { %v3417_v58 = vadd.f32 %v3416_v47, %v3415_v7  ;;  %v3395_v7 = vrot.slane %v3394_v5, 2  ;;  %v3405_v60 = vadd.f32 %v3404_v56, %v3403_v15 }
 0x3f7   :  { %v3409_v35 = vrot.slane %v3408_v2, 4  ;;  %v3390_v17 = vrot.slane %v3389_v41, 1 }
 0x3f8   :  { %v9368_v14 = vpop.xlane.xlu1 %2934  ;;  %v9370_v52 = vpop.xlane.xlu0 %2930  ;;  %v3418_v34 = vrot.slane %v3417_v58, 4  ;;  %v3396_v15 = vadd.f32 %v3395_v7, %v3394_v5  ;;  %v3406_v56 = vrot.slane %v3405_v60, 1 }
 0x3f9   :  { %v3145_v50 = vmul.f32 %v9368_v14, %v9368_v14  ;;  %v3144_v49 = vmul.f32 %v9370_v52, %v9370_v52  ;;  %v3410_v8 = vadd.f32 %v3409_v35, %v3408_v2 }
 0x3fa   :  { %v3419_v44 = vadd.f32 %v3418_v34, %v3417_v58 }
 0x3fb   :  { %v3185_v30 = vadd.f32 1.0, %v3145_v50  ;;  %v3184_v23 = vadd.f32 1.0, %v3144_v49  ;;  %v3380_v50 = vadd.f32 %v3379_v21, %v3378_v24  ;;  %v3411_v57 = vrot.slane %v3410_v8, 2 }
 0x3fc   :  { %v4920_v6 = vpop.eup %4919  ;;  %v3420_v38 = vrot.slane %v3419_v44, 2 }
 0x3fd   :  { %4923 = vrcp.f32 %v3185_v30  ;;  %v4922_v47 = vpop.eup %4921  ;;  %v3263_v53 = vmul.f32 %v4920_v6, %v3103_v62  ;;  %v3065_v6 = vand.u32 2147483647, %v9368_v14 }
 0x3fe   :  { %4925 = vrcp.f32 %v3184_v23  ;;  %v2943_v9 = vpop.xlane.xlu1 %2942  ;;  %v2939_v55 = vpop.xlane.xlu0 %2938  ;;  %v3262_v36 = vmul.f32 %v4922_v47, %v3102_v19  ;;  %v3421_v21 = vadd.f32 %v3420_v38, %v3419_v44  ;;  %v3381_v19 = vrot.slane %v3380_v50, 1 }
 0x3ff   :  { %v3147_v26 = vmul.f32 %v2943_v9, %v2943_v9  ;;  %v3310_v2 = vmul.f32 %v3263_v53, %v10905_v11  ;;  %v3311_v58 = vmul.f32 %v3263_v53, %v10950_v18  ;;  %v3146_v51 = vmul.f32 %v2939_v55, %v2939_v55 }
 0x400   :  { %v3308_v35 = vmul.f32 %v3262_v36, %v10951_v39  ;;  %v3309_v1 = vmul.f32 %v3262_v36, %v10908_v0  ;;  %v3412_v53 = vadd.f32 %v3411_v57, %v3410_v8  ;;  %v3391_v36 = vadd.f32 %v3390_v17, %v3389_v41  ;;  %v10955_v0 = vld [vmem:[#allocation24_spill] sm:$0xff]  ;;  %v10956_v39 = vld [vmem:[#allocation25_spill] sm:$0xff] }
 0x401   :  { %v3187_v31 = vadd.f32 1.0, %v3147_v26  ;;  %v3432_v34 = vsel %vm25_vm0, %v3311_v58, 0.0  ;;  %v3186_v49 = vadd.f32 1.0, %v3146_v51  ;;  %v3064_v47 = vand.u32 2147483647, %v9370_v52 }
 0x402   :  { %v3424_v30 = vadd.f32 %v3310_v2, %v3308_v35  ;;  %v3431_v24 = vsel %vm25_vm0, %v3309_v1, 0.0  ;;  %v3397_v58 = vrot.slane %v3396_v15, 1  ;;  %v3407_v51 = vadd.f32 %v3406_v56, %v3405_v60 }
 0x403   :  { %4927 = vrcp.f32 %v3187_v31  ;;  %v3433_v62 = vadd.f32 %v3432_v34, %v3431_v24  ;;  %v3067_v5 = vand.u32 2147483647, %v2943_v9  ;;  %v3422_v7 = vrot.slane %v3421_v21, 1 }
 0x404   :  { %4929 = vrcp.f32 %v3186_v49  ;;  %v3425_v23 = vrot.slane %v3424_v30, 4  ;;  %v3066_v35 = vand.u32 2147483647, %v2939_v55  ;;  %v3413_v1 = vrot.slane %v3412_v53, 1 }
 0x405   :  { %v3434_v26 = vrot.slane %v3433_v62, 4  ;;  %v3105_v38 = vmul.f32 %v3065_v6, %v9368_v14  ;;  %v9385_v44 = vadd.f32 %v3381_v19, %v3380_v50  ;;  %v9388_v57 = vsel %vm25_vm0, %v3391_v36, 0.0 }
 0x406   :  { %v3426_v31 = vadd.f32 %v3425_v23, %v3424_v30  ;;  %v3104_v17 = vmul.f32 %v3064_v47, %v9370_v52  ;;  %v9393_v60 = vadd.f32 %v3397_v58, %v3396_v15  ;;  %v9396_v56 = vsel %vm25_vm0, %v3407_v51, 0.0  ;;  %v10952_v51 = vld [vmem:[#allocation21_spill] sm:$0xff] }
 0x407   :  { %v3435_v2 = vadd.f32 %v3434_v26, %v3433_v62  ;;  %v3107_v14 = vmul.f32 %v3067_v5, %v2943_v9  ;;  %v3423_v62 = vadd.f32 %v3422_v7, %v3421_v21  ;;  %v3106_v6 = vmul.f32 %v3066_v35, %v2939_v55 }
 0x408   :  { %v9400_v36 = vadd.f32 %v3413_v1, %v3412_v53  ;;  %v3427_v52 = vrot.slane %v3426_v31, 2 }
 0x409   :  { %v3436_v41 = vrot.slane %v3435_v2, 2  ;;  %v9408_v7 = vsel %vm25_vm0, %v3423_v62, 0.0 }
 0x40a   :  { %v4924_v8 = vpop.eup %4923 }
 0x40b   :  { %v4926_v30 = vpop.eup %4925  ;;  %v3265_v24 = vmul.f32 %v4924_v8, %v3105_v38  ;;  %v3437_v5 = vadd.f32 %v3436_v41, %v3435_v2  ;;  %v3428_v41 = vadd.f32 %v3427_v52, %v3426_v31 }
 0x40c   :  { %v2951_v34 = vpop.xlane.xlu1 %2950  ;;  %v3264_v23 = vmul.f32 %v4926_v30, %v3104_v17 }
 0x40d   :  { %v9391_v49 = vpop.xlane.xlu0 %2946  ;;  %v3149_v50 = vmul.f32 %v2951_v34, %v2951_v34  ;;  %v3314_v26 = vmul.f32 %v3265_v24, %v10913_v63  ;;  %v3315_v15 = vmul.f32 %v3265_v24, %v10914_v22  ;;  %v3069_v55 = vand.u32 2147483647, %v2951_v34  ;;  %v10953_v63 = vld [vmem:[#allocation22_spill] sm:$0xff] }
 0x40e   :  { %v3148_v19 = vmul.f32 %v9391_v49, %v9391_v49  ;;  %v3312_v58 = vmul.f32 %v3264_v23, %v10915_v61  ;;  %v3313_v38 = vmul.f32 %v3264_v23, %v10952_v51  ;;  %v3068_v8 = vand.u32 2147483647, %v9391_v49 }
 0x40f   :  { %v3189_v47 = vadd.f32 1.0, %v3149_v50  ;;  %v3448_v21 = vsel %vm25_vm0, %v3315_v15, 0.0  ;;  %v3438_v61 = vrot.slane %v3437_v5, 1 }
 0x410   :  { %v3188_v9 = vadd.f32 1.0, %v3148_v19  ;;  %v4928_v53 = vpop.eup %4927  ;;  %v3440_v35 = vadd.f32 %v3314_v26, %v3312_v58  ;;  %v3447_v1 = vsel %vm25_vm0, %v3313_v38, 0.0  ;;  %v10954_v26 = vld [vmem:[#allocation23_spill] sm:$0xff] }
 0x411   :  { %4931 = vrcp.f32 %v3189_v47  ;;  %v4930_v24 = vpop.eup %4929  ;;  %v3449_v50 = vadd.f32 %v3448_v21, %v3447_v1  ;;  %v3267_v23 = vmul.f32 %v4928_v53, %v3107_v14 }
 0x412   :  { %4933 = vrcp.f32 %v3188_v9  ;;  %v2959_v17 = vpop.xlane.xlu1 %2958  ;;  %v2955_v30 = vpop.xlane.xlu0 %2954  ;;  %v3441_v19 = vrot.slane %v3440_v35, 4  ;;  %v3266_v15 = vmul.f32 %v4930_v24, %v3106_v6 }
 0x413   :  { %v3151_v2 = vmul.f32 %v2959_v17, %v2959_v17  ;;  %v3150_v47 = vmul.f32 %v2955_v30, %v2955_v30  ;;  %v3450_v62 = vrot.slane %v3449_v50, 4  ;;  %v3318_v51 = vmul.f32 %v3267_v23, %v10953_v63 }
 0x414   :  { %v3319_v58 = vmul.f32 %v3267_v23, %v10954_v26  ;;  %v3071_v38 = vand.u32 2147483647, %v2959_v17  ;;  %v3442_v22 = vadd.f32 %v3441_v19, %v3440_v35  ;;  %v3316_v9 = vmul.f32 %v3266_v15, %v10955_v0 }
 0x415   :  { %v3317_v18 = vmul.f32 %v3266_v15, %v10956_v39  ;;  %v3191_v11 = vadd.f32 1.0, %v3151_v2  ;;  %v3451_v21 = vadd.f32 %v3450_v62, %v3449_v50  ;;  %v3070_v31 = vand.u32 2147483647, %v2955_v30 }
 0x416   :  { %v3464_v14 = vsel %vm25_vm0, %v3319_v58, 0.0  ;;  %v3190_v52 = vadd.f32 1.0, %v3150_v47  ;;  %v3443_v6 = vrot.slane %v3442_v22, 2  ;;  %v3456_v53 = vadd.f32 %v3318_v51, %v3316_v9 }
 0x417   :  { %v3463_v1 = vsel %vm25_vm0, %v3317_v18, 0.0  ;;  %4935 = vrcp.f32 %v3191_v11  ;;  %v3452_v24 = vrot.slane %v3451_v21, 2  ;;  %v3109_v23 = vmul.f32 %v3069_v55, %v2951_v34 }
 0x418   :  { %v3465_v63 = vadd.f32 %v3464_v14, %v3463_v1  ;;  %4937 = vrcp.f32 %v3190_v52  ;;  %v3457_v35 = vrot.slane %v3456_v53, 4  ;;  %v3429_v19 = vrot.slane %v3428_v41, 1 }
 0x419   :  { %v3439_v0 = vadd.f32 %v3438_v61, %v3437_v5  ;;  %v3444_v26 = vadd.f32 %v3443_v6, %v3442_v22  ;;  %v3108_v50 = vmul.f32 %v3068_v8, %v9391_v49  ;;  %v3111_v2 = vmul.f32 %v3071_v38, %v2959_v17 }
 0x41a   :  { %v3466_v15 = vrot.slane %v3465_v63, 4  ;;  %v3110_v62 = vmul.f32 %v3070_v31, %v2955_v30  ;;  %v3458_v39 = vadd.f32 %v3457_v35, %v3456_v53  ;;  %v3453_v34 = vadd.f32 %v3452_v24, %v3451_v21  ;;  %v10959_v21 = vld [vmem:[#allocation26_spill] sm:$0xff]  ;;  %v10960_v53 = vld [vmem:[#allocation27_spill] sm:$0xff] }
 0x41b   :  { %v3445_v14 = vrot.slane %v3444_v26, 1  ;;  %v9419_v61 = vadd.f32 %v3429_v19, %v3428_v41  ;;  %v9422_v22 = vsel %vm25_vm0, %v3439_v0, 0.0  ;;  %v10961_v19 = vld [vmem:[#allocation28_spill] sm:$0xff] }
 0x41c   :  { %v2967_v58 = vpop.xlane.xlu1 %2966  ;;  %v2963_v47 = vpop.xlane.xlu0 %2962  ;;  %v3467_v11 = vadd.f32 %v3466_v15, %v3465_v63  ;;  %v3459_v52 = vrot.slane %v3458_v39, 2  ;;  %10957 = vst [vmem:[#allocation65_spill] sm:$0xff] %v9422_v22  ;;  %v3454_v35 = vrot.slane %v3453_v34, 1  ;;  %v10975_v22 = vld [vmem:[#allocation37_spill] sm:$0xff] }
 0x41d   :  { %v3073_v51 = vand.u32 2147483647, %v2967_v58  ;;  %v3153_v9 = vmul.f32 %v2967_v58, %v2967_v58  ;;  %v3072_v18 = vand.u32 2147483647, %v2963_v47  ;;  %v3152_v40 = vmul.f32 %v2963_v47, %v2963_v47 }
 0x41e   :  { %v4932_v55 = vpop.eup %4931  ;;  %v3468_v5 = vrot.slane %v3467_v11, 2  ;;  %v9428_v31 = vadd.f32 %v3445_v14, %v3444_v26 }
 0x41f   :  { %v3193_v1 = vadd.f32 1.0, %v3153_v9  ;;  %v4934_v49 = vpop.eup %4933  ;;  %v3269_v8 = vmul.f32 %v4932_v55, %v3109_v23  ;;  %v9424_v17 = vmul.f32 %v3073_v51, %v2967_v58  ;;  %v3192_v30 = vadd.f32 1.0, %v3152_v40  ;;  %v10962_v23 = vld [vmem:[#allocation29_spill] sm:$0xff] }
 0x420   :  { %v3268_v38 = vmul.f32 %v4934_v49, %v3108_v50  ;;  %v9426_v63 = vmul.f32 %v3072_v18, %v2963_v47  ;;  %10958 = vst [vmem:[#allocation62_spill] sm:$0xff] %v9428_v31  ;;  %v9435_v9 = vadd.f32 %v3459_v52, %v3458_v39  ;;  %v9437_v26 = vadd.f32 %v3468_v5, %v3467_v11 }
 0x421   :  { %4939 = vrcp.f32 %v3193_v1  ;;  %v3322_v6 = vmul.f32 %v3269_v8, %v10959_v21  ;;  %v3323_v41 = vmul.f32 %v3269_v8, %v10960_v53  ;;  %v2975_v24 = vpop.xlane.xlu1 %2974  ;;  %v3455_v53 = vadd.f32 %v3454_v35, %v3453_v34  ;;  %v10969_v35 = vld [vmem:[#allocation33_spill] sm:$0xff] }
 0x422   :  { %4941 = vrcp.f32 %v3192_v30  ;;  %v2971_v0 = vpop.xlane.xlu0 %2970  ;;  %v3320_v15 = vmul.f32 %v3268_v38, %v10961_v19  ;;  %v3321_v58 = vmul.f32 %v3268_v38, %v10962_v23  ;;  %v3075_v51 = vand.u32 2147483647, %v2975_v24  ;;  %10963 = vst [vmem:[#allocation64_spill] sm:$0xff] %v9437_v26 }
 0x423   :  { %v3155_v40 = vmul.f32 %v2975_v24, %v2975_v24  ;;  %v3480_v50 = vsel %vm25_vm0, %v3323_v41, 0.0  ;;  %v3154_v47 = vmul.f32 %v2971_v0, %v2971_v0  ;;  %v3074_v1 = vand.u32 2147483647, %v2971_v0 }
 0x424   :  { %v3472_v18 = vadd.f32 %v3322_v6, %v3320_v15  ;;  %v3479_v14 = vsel %vm25_vm0, %v3321_v58, 0.0  ;;  %v4936_v49 = vpop.eup %4935  ;;  %v9440_v30 = vmul.f32 %v3075_v51, %v2975_v24  ;;  %v10965_v15 = vld [vmem:[#allocation30_spill] sm:$0xff] }
 0x425   :  { %v3195_v55 = vadd.f32 1.0, %v3155_v40  ;;  %v3481_v8 = vadd.f32 %v3480_v50, %v3479_v14  ;;  %v3194_v19 = vadd.f32 1.0, %v3154_v47  ;;  %v2983_v38 = vpop.xlane.xlu1 %2982  ;;  %v4938_v21 = vpop.eup %4937  ;;  %v3271_v31 = vmul.f32 %v4936_v49, %v3111_v2  ;;  %v10966_v40 = vld [vmem:[#allocation31_spill] sm:$0xff]  ;;  %v10968_v47 = vld [vmem:[#allocation32_spill] sm:$0xff] }
 0x426   :  { %v2979_v23 = vpop.xlane.xlu0 %2978  ;;  %v3473_v41 = vrot.slane %v3472_v18, 4  ;;  %v3077_v39 = vand.u32 2147483647, %v2983_v38  ;;  %v3270_v52 = vmul.f32 %v4938_v21, %v3110_v62  ;;  %v3157_v5 = vmul.f32 %v2983_v38, %v2983_v38 }
 0x427   :  { %4943 = vrcp.f32 %v3195_v55  ;;  %v3482_v11 = vrot.slane %v3481_v8, 4  ;;  %v3326_v58 = vmul.f32 %v3271_v31, %v10965_v15  ;;  %v3327_v24 = vmul.f32 %v3271_v31, %v10966_v40  ;;  %v10973_v15 = vld [vmem:[#allocation35_spill] sm:$0xff] }
 0x428   :  { %4945 = vrcp.f32 %v3194_v19  ;;  %v9442_v6 = vadd.f32 %v3473_v41, %v3472_v18  ;;  %v3114_v51 = vmul.f32 %v3074_v1, %v2971_v0  ;;  %v3324_v34 = vmul.f32 %v3270_v52, %v10968_v47 }
 0x429   :  { %v9446_v50 = vadd.f32 %v3482_v11, %v3481_v8  ;;  %v3325_v14 = vmul.f32 %v3270_v52, %v10969_v35  ;;  %v3197_v2 = vadd.f32 1.0, %v3157_v5  ;;  %v2991_v55 = vpop.xlane.xlu1 %2990  ;;  %v3496_v49 = vsel %vm25_vm0, %v3327_v24, 0.0 }
 0x42a   :  { %10964 = vst [vmem:[#allocation67_spill] sm:$0xff] %v9442_v6  ;;  %v9451_v62 = vmul.f32 %v3077_v39, %v2983_v38  ;;  %v3156_v21 = vmul.f32 %v2979_v23, %v2979_v23  ;;  %v2987_v19 = vpop.xlane.xlu0 %2986  ;;  %v9454_v18 = vsel %vm25_vm0, %v3455_v53, 0.0  ;;  %v3488_v41 = vadd.f32 %v3326_v58, %v3324_v34 }
 0x42b   :  { %10967 = vst [vmem:[#allocation66_spill] sm:$0xff] %v9446_v50  ;;  %10970 = vst [vmem:[#allocation70_spill] sm:$0xff] %v9454_v18  ;;  %v3495_v31 = vsel %vm25_vm0, %v3325_v14, 0.0  ;;  %4947 = vrcp.f32 %v3197_v2  ;;  %v3076_v0 = vand.u32 2147483647, %v2979_v23  ;;  %v3159_v39 = vmul.f32 %v2991_v55, %v2991_v55  ;;  %v10974_v18 = vld [vmem:[#allocation36_spill] sm:$0xff] }
 0x42c   :  { %v3497_v11 = vadd.f32 %v3496_v49, %v3495_v31  ;;  %v3196_v52 = vadd.f32 1.0, %v3156_v21  ;;  %v3489_v24 = vrot.slane %v3488_v41, 4  ;;  %v3079_v38 = vand.u32 2147483647, %v2991_v55  ;;  %v10972_v21 = vld [vmem:[#allocation34_spill] sm:$0xff] }
 0x42d   :  { %v3158_v35 = vmul.f32 %v2987_v19, %v2987_v19  ;;  %v3078_v58 = vand.u32 2147483647, %v2987_v19  ;;  %v2999_v34 = vpop.xlane.xlu1 %2998  ;;  %v3116_v1 = vmul.f32 %v3076_v0, %v2979_v23  ;;  %v3199_v8 = vadd.f32 1.0, %v3159_v39 }
 0x42e   :  { %v4940_v5 = vpop.eup %4939  ;;  %v3498_v40 = vrot.slane %v3497_v11, 4  ;;  %4949 = vrcp.f32 %v3196_v52  ;;  %v9460_v14 = vadd.f32 %v3489_v24, %v3488_v41  ;;  %v9469_v52 = vmul.f32 %v3079_v38, %v2991_v55  ;;  %v2995_v41 = vpop.xlane.xlu0 %2994 }
 0x42f   :  { %v4942_v47 = vpop.eup %4941  ;;  %v3273_v53 = vmul.f32 %v4940_v5, %v9424_v17  ;;  %v3198_v6 = vadd.f32 1.0, %v3158_v35  ;;  %4951 = vrcp.f32 %v3199_v8  ;;  %v9473_v23 = vmul.f32 %v3078_v58, %v2987_v19 }
 0x430   :  { %v3272_v2 = vmul.f32 %v4942_v47, %v9426_v63  ;;  %v9463_v49 = vadd.f32 %v3498_v40, %v3497_v11  ;;  %v3161_v11 = vmul.f32 %v2999_v34, %v2999_v34  ;;  %v3081_v8 = vand.u32 2147483647, %v2999_v34 }
 0x431   :  { %v3330_v31 = vmul.f32 %v3273_v53, %v10972_v21  ;;  %v3331_v50 = vmul.f32 %v3273_v53, %v10973_v15  ;;  %4953 = vrcp.f32 %v3198_v6  ;;  %v3160_v38 = vmul.f32 %v2995_v41, %v2995_v41  ;;  %v3007_v53 = vpop.xlane.xlu1 %3006 }
 0x432   :  { %10971 = vst [vmem:[#allocation75_spill] sm:$0xff] %v9463_v49  ;;  %v3328_v26 = vmul.f32 %v3272_v2, %v10974_v18  ;;  %v3329_v17 = vmul.f32 %v3272_v2, %v10975_v22  ;;  %v3080_v19 = vand.u32 2147483647, %v2995_v41  ;;  %v10979_v22 = vld [vmem:[#allocation43_spill] sm:$0xff] }
 0x433   :  { %v3512_v63 = vsel %vm25_vm0, %v3331_v50, 0.0  ;;  %v3201_v50 = vadd.f32 1.0, %v3161_v11  ;;  %v3121_v11 = vmul.f32 %v3081_v8, %v2999_v34 }
 0x434   :  { %v4944_v40 = vpop.eup %4943  ;;  %v3504_v0 = vadd.f32 %v3330_v31, %v3328_v26  ;;  %v3511_v35 = vsel %vm25_vm0, %v3329_v17, 0.0  ;;  %v3200_v26 = vadd.f32 1.0, %v3160_v38 }
 0x435   :  { %v4946_v24 = vpop.eup %4945  ;;  %v3513_v39 = vadd.f32 %v3512_v63, %v3511_v35  ;;  %v3275_v55 = vmul.f32 %v4944_v40, %v9440_v30  ;;  %4955 = vrcp.f32 %v3201_v50  ;;  %v3003_v30 = vpop.xlane.xlu0 %3002 }
 0x436   :  { %v3505_v2 = vrot.slane %v3504_v0, 4  ;;  %v3274_v5 = vmul.f32 %v4946_v24, %v3114_v51  ;;  %4957 = vrcp.f32 %v3200_v26  ;;  %v3015_v50 = vpop.xlane.xlu1 %3014  ;;  %v3082_v34 = vand.u32 2147483647, %v3003_v30 }
 0x437   :  { %v3514_v58 = vrot.slane %v3513_v39, 4  ;;  %v3334_v6 = vmul.f32 %v3275_v55, %v10933_v29  ;;  %v3335_v47 = vmul.f32 %v3275_v55, %v10934_v32 }
 0x438   :  { %v9480_v31 = vadd.f32 %v3505_v2, %v3504_v0  ;;  %v3332_v17 = vmul.f32 %v3274_v5, %v10935_v37  ;;  %v3333_v63 = vmul.f32 %v3274_v5, %v10936_v3  ;;  %v4948_v40 = vpop.eup %4947  ;;  %v3083_v0 = vand.u32 2147483647, %v3007_v53 }
 0x439   :  { %v9484_v35 = vadd.f32 %v3514_v58, %v3513_v39  ;;  %v3528_v51 = vsel %vm25_vm0, %v3335_v47, 0.0  ;;  %v3277_v55 = vmul.f32 %v4948_v40, %v9451_v62  ;;  %v3120_v37 = vmul.f32 %v3080_v19, %v2995_v41  ;;  %v10978_v39 = vld [vmem:[#allocation42_spill] sm:$0xff]  ;;  %v3011_v19 = vpop.xlane.xlu0 %3010 }
 0x43a   :  { %10976 = vst [vmem:[#allocation74_spill] sm:$0xff] %v9480_v31  ;;  %v3520_v24 = vadd.f32 %v3334_v6, %v3332_v17  ;;  %v3527_v29 = vsel %vm25_vm0, %v3333_v63, 0.0  ;;  %v3163_v5 = vmul.f32 %v3007_v53, %v3007_v53  ;;  %v3162_v17 = vmul.f32 %v3003_v30, %v3003_v30 }
 0x43b   :  { %10977 = vst [vmem:[#allocation96_spill] sm:$0xff] %v9484_v35  ;;  %v3529_v2 = vadd.f32 %v3528_v51, %v3527_v29  ;;  %v4950_v3 = vpop.eup %4949  ;;  %v3338_v58 = vmul.f32 %v3277_v55, %v10978_v39  ;;  %v3339_v47 = vmul.f32 %v3277_v55, %v10979_v22  ;;  %v9496_v41 = vmul.f32 %v3083_v0, %v3007_v53  ;;  %v10981_v51 = vld [vmem:[#allocation44_spill] sm:$0xff]  ;;  %v10982_v39 = vld [vmem:[#allocation45_spill] sm:$0xff] }
 0x43c   :  { %v3521_v32 = vrot.slane %v3520_v24, 4  ;;  %v3276_v6 = vmul.f32 %v4950_v3, %v3116_v1  ;;  %v3203_v26 = vadd.f32 1.0, %v3163_v5  ;;  %v4952_v40 = vpop.eup %4951  ;;  %v9500_v55 = vmul.f32 %v3082_v34, %v3003_v30  ;;  %v10985_v34 = vld [vmem:[#allocation47_spill] sm:$0xff] }
 0x43d   :  { %v3530_v8 = vrot.slane %v3529_v2, 4  ;;  %v3544_v29 = vsel %vm25_vm0, %v3339_v47, 0.0  ;;  %v3279_v5 = vmul.f32 %v4952_v40, %v9469_v52  ;;  %v3165_v22 = vmul.f32 %v3015_v50, %v3015_v50 }
 0x43e   :  { %v9493_v63 = vadd.f32 %v3521_v32, %v3520_v24  ;;  %v3336_v38 = vmul.f32 %v3276_v6, %v10981_v51  ;;  %v3337_v18 = vmul.f32 %v3276_v6, %v10982_v39  ;;  %4959 = vrcp.f32 %v3203_v26  ;;  %v4954_v3 = vpop.eup %4953  ;;  %v9508_v51 = vpop.xlane.xlu1 %3022  ;;  %v10984_v26 = vld [vmem:[#allocation46_spill] sm:$0xff] }
 0x43f   :  { %v9502_v1 = vadd.f32 %v3530_v8, %v3529_v2  ;;  %v3202_v32 = vadd.f32 1.0, %v3162_v17  ;;  %v3085_v24 = vand.u32 2147483647, %v3015_v50  ;;  %v3278_v62 = vmul.f32 %v4954_v3, %v9473_v23  ;;  %v10986_v8 = vld [vmem:[#allocation48_spill] sm:$0xff]  ;;  %v10987_v17 = vld [vmem:[#allocation49_spill] sm:$0xff] }
 0x440   :  { %10980 = vst [vmem:[#allocation97_spill] sm:$0xff] %v9493_v63  ;;  %v3536_v53 = vadd.f32 %v3338_v58, %v3336_v38  ;;  %v3543_v0 = vsel %vm25_vm0, %v3337_v18, 0.0  ;;  %v3342_v30 = vmul.f32 %v3279_v5, %v10984_v26  ;;  %v3343_v39 = vmul.f32 %v3279_v5, %v10985_v34  ;;  %v3019_v58 = vpop.xlane.xlu0 %3018  ;;  %v10988_v63 = vld [vmem:[#allocation50_spill] sm:$0xff]  ;;  %v10990_v34 = vld [vmem:[#allocation52_spill] sm:$0xff] }
 0x441   :  { %10983 = vst [vmem:[#allocation98_spill] sm:$0xff] %v9502_v1  ;;  %v3545_v6 = vadd.f32 %v3544_v29, %v3543_v0  ;;  %4961 = vrcp.f32 %v3202_v32  ;;  %v3340_v52 = vmul.f32 %v3278_v62, %v10986_v8  ;;  %v3341_v40 = vmul.f32 %v3278_v62, %v10987_v17 }
 0x442   :  { %v3537_v2 = vrot.slane %v3536_v53, 4  ;;  %v3560_v38 = vsel %vm25_vm0, %v3343_v39, 0.0  ;;  %v9515_v18 = vmul.f32 %v3085_v24, %v3015_v50  ;;  %v3084_v23 = vand.u32 2147483647, %v3011_v19  ;;  %v4956_v3 = vpop.eup %4955  ;;  %v3031_v24 = vpop.xlane.xlu1 %3030 }
 0x443   :  { %v3546_v47 = vrot.slane %v3545_v6, 4  ;;  %v3552_v29 = vadd.f32 %v3342_v30, %v3340_v52  ;;  %v3559_v0 = vsel %vm25_vm0, %v3341_v40, 0.0  ;;  %v3205_v26 = vadd.f32 1.0, %v3165_v22  ;;  %v4958_v32 = vpop.eup %4957  ;;  %v10989_v52 = vld [vmem:[#allocation51_spill] sm:$0xff] }
 0x444   :  { %v3164_v5 = vmul.f32 %v3011_v19, %v3011_v19  ;;  %v9519_v8 = vadd.f32 %v3537_v2, %v3536_v53  ;;  %v3561_v62 = vadd.f32 %v3560_v38, %v3559_v0  ;;  %v3281_v17 = vmul.f32 %v4956_v3, %v3121_v11  ;;  %v10991_v2 = vld [vmem:[#allocation53_spill] sm:$0xff]  ;;  %v3027_v3 = vpop.xlane.xlu0 %3026  ;;  %v10992_v0 = vld [vmem:[#allocation55_spill] sm:$0xff] }
 0x445   :  { %v9521_v15 = vadd.f32 %v3546_v47, %v3545_v6  ;;  %v3553_v39 = vrot.slane %v3552_v29, 4  ;;  %v3280_v50 = vmul.f32 %v4958_v32, %v3120_v37  ;;  %4963 = vrcp.f32 %v3205_v26 }
 0x446   :  { %v3562_v21 = vrot.slane %v3561_v62, 4  ;;  %v3346_v30 = vmul.f32 %v3281_v17, %v10988_v63  ;;  %v3347_v40 = vmul.f32 %v3281_v17, %v10989_v52  ;;  %v9525_v22 = vmul.f32 %v3084_v23, %v3011_v19  ;;  %v3039_v47 = vpop.xlane.xlu1 %3038 }
 0x447   :  { %v9527_v35 = vadd.f32 %v3553_v39, %v3552_v29  ;;  %v3344_v53 = vmul.f32 %v3280_v50, %v10990_v34  ;;  %v3345_v38 = vmul.f32 %v3280_v50, %v10991_v2  ;;  %v3204_v11 = vadd.f32 1.0, %v3164_v5 }
 0x448   :  { %v9532_v6 = vadd.f32 %v3562_v21, %v3561_v62  ;;  %v3576_v37 = vsel %vm25_vm0, %v3347_v40, 0.0  ;;  %v3167_v26 = vmul.f32 %v9508_v51, %v9508_v51  ;;  %v3087_v23 = vand.u32 2147483647, %v9508_v51  ;;  %v3035_v52 = vpop.xlane.xlu0 %3034 }
 0x449   :  { %v3568_v17 = vadd.f32 %v3346_v30, %v3344_v53  ;;  %v3575_v19 = vsel %vm25_vm0, %v3345_v38, 0.0  ;;  %4965 = vrcp.f32 %v3204_v11  ;;  %v3086_v50 = vand.u32 2147483647, %v3019_v58 }
 0x44a   :  { %v3577_v32 = vadd.f32 %v3576_v37, %v3575_v19  ;;  %v3207_v21 = vadd.f32 1.0, %v3167_v26  ;;  %v3166_v40 = vmul.f32 %v3019_v58, %v3019_v58  ;;  %v3089_v30 = vand.u32 2147483647, %v3031_v24  ;;  %v10993_v19 = vld [vmem:[#allocation54_spill] sm:$0xff] }
 0x44b   :  { %v4960_v29 = vpop.eup %4959  ;;  %v3569_v62 = vrot.slane %v3568_v17, 4  ;;  %v3169_v53 = vmul.f32 %v3031_v24, %v3031_v24  ;;  %v3127_v37 = vmul.f32 %v3087_v23, %v9508_v51  ;;  %v9552_v1 = vmul.f32 %v3086_v50, %v3019_v58 }
 0x44c   :  { %v3283_v39 = vmul.f32 %v4960_v29, %v9496_v41  ;;  %v3578_v34 = vrot.slane %v3577_v32, 4  ;;  %4967 = vrcp.f32 %v3207_v21  ;;  %v3206_v5 = vadd.f32 1.0, %v3166_v40 }
 0x44d   :  { %v9543_v63 = vadd.f32 %v3569_v62, %v3568_v17  ;;  %v9554_v31 = vmul.f32 %v3089_v30, %v3031_v24  ;;  %v3209_v17 = vadd.f32 1.0, %v3169_v53  ;;  %v10994_v62 = vld [vmem:[#allocation56_spill] sm:$0xff]  ;;  %v3088_v51 = vand.u32 2147483647, %v3027_v3 }
 0x44e   :  { %v4962_v38 = vpop.eup %4961  ;;  %v3351_v2 = vmul.f32 %v3283_v39, %v10992_v0  ;;  %v9547_v26 = vadd.f32 %v3578_v34, %v3577_v32  ;;  %v3350_v41 = vmul.f32 %v3283_v39, %v10993_v19  ;;  %v10995_v0 = vld [vmem:[#allocation57_spill] sm:$0xff]  ;;  %4969 = vrcp.f32 %v3206_v5  ;;  %v3047_v32 = vpop.xlane.xlu1 %3046 }
 0x44f   :  { %v3282_v29 = vmul.f32 %v4962_v38, %v9500_v55  ;;  %4971 = vrcp.f32 %v3209_v17  ;;  %v3168_v23 = vmul.f32 %v3027_v3, %v3027_v3  ;;  %v3091_v55 = vand.u32 2147483647, %v3039_v47 }
 0x450   :  { %v3592_v21 = vsel %vm25_vm0, %v3351_v2, 0.0  ;;  %v3171_v50 = vmul.f32 %v3039_v47, %v3039_v47  ;;  %v3090_v38 = vand.u32 2147483647, %v3035_v52  ;;  %v3170_v17 = vmul.f32 %v3035_v52, %v3035_v52 }
 0x451   :  { %v3348_v11 = vmul.f32 %v3282_v29, %v10994_v62  ;;  %v3349_v49 = vmul.f32 %v3282_v29, %v10995_v0  ;;  %v3208_v53 = vadd.f32 1.0, %v3168_v23  ;;  %v9562_v29 = vmul.f32 %v3088_v51, %v3027_v3  ;;  %v3043_v62 = vpop.xlane.xlu0 %3042 }
 0x452   :  { %v4964_v39 = vpop.eup %4963  ;;  %v3211_v34 = vadd.f32 1.0, %v3171_v50  ;;  %v9565_v2 = vmul.f32 %v3091_v55, %v3039_v47  ;;  %v9571_v51 = vmul.f32 %v3090_v38, %v3035_v52  ;;  %v3173_v23 = vmul.f32 %v3047_v32, %v3047_v32 }
 0x453   :  { %v3584_v58 = vadd.f32 %v3350_v41, %v3348_v11  ;;  %v3591_v24 = vsel %vm25_vm0, %v3349_v49, 0.0  ;;  %v3285_v30 = vmul.f32 %v4964_v39, %v9515_v18  ;;  %4973 = vrcp.f32 %v3208_v53  ;;  %v3055_v39 = vpop.xlane.xlu1 %3054 }
 0x454   :  { %v3593_v40 = vadd.f32 %v3592_v21, %v3591_v24  ;;  %4975 = vrcp.f32 %v3211_v34  ;;  %v3210_v41 = vadd.f32 1.0, %v3170_v17  ;;  %v3093_v18 = vand.u32 2147483647, %v3047_v32  ;;  %v10997_v24 = vld [vmem:[#allocation63_spill] sm:$0xff] }
 0x455   :  { %v3585_v5 = vrot.slane %v3584_v58, 4  ;;  %v3355_v0 = vmul.f32 %v3285_v30, %v10937_v27  ;;  %v3354_v21 = vmul.f32 %v3285_v30, %v10939_v46  ;;  %v3092_v30 = vand.u32 2147483647, %v3043_v62 }
 0x456   :  { %v3594_v19 = vrot.slane %v3593_v40, 4  ;;  %v4966_v11 = vpop.eup %4965  ;;  %4977 = vrcp.f32 %v3210_v41  ;;  %v3172_v52 = vmul.f32 %v3043_v62, %v3043_v62  ;;  %v3095_v38 = vand.u32 2147483647, %v3055_v39 }
 0x457   :  { %v9567_v49 = vadd.f32 %v3585_v5, %v3584_v58  ;;  %v3284_v3 = vmul.f32 %v4966_v11, %v9525_v22  ;;  %v3608_v47 = vsel %vm25_vm0, %v3355_v0, 0.0  ;;  %v10996_v58 = vld [vmem:[#allocation61_spill] sm:$0xff]  ;;  %v3213_v5 = vadd.f32 1.0, %v3173_v23  ;;  %v3051_v11 = vpop.xlane.xlu0 %3050 }
 0x458   :  { %v9574_v50 = vadd.f32 %v3594_v19, %v3593_v40  ;;  %v9579_v22 = vmul.f32 %v3093_v18, %v3047_v32  ;;  %v3175_v40 = vmul.f32 %v3055_v39, %v3055_v39  ;;  %v3212_v27 = vadd.f32 1.0, %v3172_v52 }
 0x459   :  { %v4968_v55 = vpop.eup %4967  ;;  %v3352_v34 = vmul.f32 %v3284_v3, %v10940_v13  ;;  %v3353_v53 = vmul.f32 %v3284_v3, %v10996_v58  ;;  %4979 = vrcp.f32 %v3213_v5  ;;  %v9584_v58 = vmul.f32 %v3092_v30, %v3043_v62 }
 0x45a   :  { %v3287_v17 = vmul.f32 %v4968_v55, %v3127_v37  ;;  %v3215_v37 = vadd.f32 1.0, %v3175_v40  ;;  %v3094_v32 = vand.u32 2147483647, %v3051_v11  ;;  %4981 = vrcp.f32 %v3212_v27 }
 0x45b   :  { %v3600_v46 = vadd.f32 %v3354_v21, %v3352_v34  ;;  %v3607_v19 = vsel %vm25_vm0, %v3353_v53, 0.0  ;;  %v4970_v3 = vpop.eup %4969  ;;  %v3135_v5 = vmul.f32 %v3095_v38, %v3055_v39  ;;  %v10998_v27 = vrot.slane %v9519_v8, 2 }
 0x45c   :  { %v3609_v41 = vadd.f32 %v3608_v47, %v3607_v19  ;;  %v3359_v13 = vmul.f32 %v3287_v17, %v10997_v24  ;;  %v4972_v18 = vpop.eup %4971  ;;  %v3358_v21 = vmul.f32 %v3287_v17, %v10943_v43  ;;  %v3286_v34 = vmul.f32 %v4970_v3, %v9552_v1 }
 0x45d   :  { %v3601_v23 = vrot.slane %v3600_v46, 4  ;;  %v3289_v47 = vmul.f32 %v4972_v18, %v9554_v31  ;;  %4983 = vrcp.f32 %v3215_v37  ;;  %v3174_v19 = vmul.f32 %v3051_v11, %v3051_v11 }
 0x45e   :  { %v3610_v55 = vrot.slane %v3609_v41, 4  ;;  %v3624_v52 = vsel %vm25_vm0, %v3359_v13, 0.0  ;;  %v3356_v62 = vmul.f32 %v3286_v34, %v10944_v45  ;;  %v3357_v30 = vmul.f32 %v3286_v34, %v10942_v20 }
 0x45f   :  { %v9588_v53 = vadd.f32 %v3601_v23, %v3600_v46  ;;  %v3363_v17 = vmul.f32 %v3289_v47, %v10945_v12  ;;  %v9597_v0 = vmul.f32 %v3094_v32, %v3051_v11  ;;  %v3540_v46 = vadd.f32 %v10998_v27, %v9519_v8 }
 0x460   :  { %v9594_v40 = vadd.f32 %v3610_v55, %v3609_v41  ;;  %v4974_v31 = vpop.eup %4973  ;;  %v3616_v39 = vadd.f32 %v3358_v21, %v3356_v62  ;;  %v3623_v13 = vsel %vm25_vm0, %v3357_v30, 0.0  ;;  %v3214_v38 = vadd.f32 1.0, %v3174_v19 }
 0x461   :  { %v4976_v3 = vpop.eup %4975  ;;  %v3625_v23 = vadd.f32 %v3624_v52, %v3623_v13  ;;  %v3362_v41 = vmul.f32 %v3289_v47, %v10946_v48  ;;  %v3288_v37 = vmul.f32 %v4974_v31, %v9562_v29  ;;  %v3541_v18 = vrot.slane %v3540_v46, 1 }
 0x462   :  { %v3617_v11 = vrot.slane %v3616_v39, 4  ;;  %v3291_v32 = vmul.f32 %v4976_v3, %v9565_v2  ;;  %4985 = vrcp.f32 %v3214_v38  ;;  %v10999_v8 = vrot.slane %v9521_v15, 2 }
 0x463   :  { %v4978_v34 = vpop.eup %4977  ;;  %v3626_v21 = vrot.slane %v3625_v23, 4  ;;  %v3640_v62 = vsel %vm25_vm0, %v3363_v17, 0.0  ;;  %v3360_v30 = vmul.f32 %v3288_v37, %v10833_v25  ;;  %v3361_v52 = vmul.f32 %v3288_v37, %v10834_v16 }
 0x464   :  { %v3549_v55 = vadd.f32 %v10999_v8, %v9521_v15  ;;  %v3366_v47 = vmul.f32 %v3291_v32, %v10947_v10  ;;  %v3367_v29 = vmul.f32 %v3291_v32, %v10838_v28  ;;  %v3290_v19 = vmul.f32 %v4978_v34, %v9571_v51 }
 0x465   :  { %v3542_v2 = vadd.f32 %v3541_v18, %v3540_v46  ;;  %v3632_v31 = vadd.f32 %v3362_v41, %v3360_v30  ;;  %v3639_v15 = vsel %vm25_vm0, %v3361_v52, 0.0  ;;  %v9618_v3 = vadd.f32 %v3617_v11, %v3616_v39 }
 0x466   :  { %v3550_v13 = vrot.slane %v3549_v55, 1  ;;  %v4980_v38 = vpop.eup %4979  ;;  %v9620_v17 = vadd.f32 %v3626_v21, %v3625_v23  ;;  %v3641_v8 = vadd.f32 %v3640_v62, %v3639_v15  ;;  %v3364_v37 = vmul.f32 %v3290_v19, %v10845_v4 }
 0x467   :  { %v3633_v1 = vrot.slane %v3632_v31, 4  ;;  %v3656_v32 = vsel %vm25_vm0, %v3367_v29, 0.0  ;;  %v3365_v51 = vmul.f32 %v3290_v19, %v10846_v54  ;;  %v3293_v46 = vmul.f32 %v4980_v38, %v9579_v22  ;;  %v4982_v52 = vpop.eup %4981 }
 0x468   :  { %v3642_v18 = vrot.slane %v3641_v8, 4  ;;  %v3648_v41 = vadd.f32 %v3366_v47, %v3364_v37  ;;  %v3551_v34 = vadd.f32 %v3550_v13, %v3549_v55  ;;  %v3696_v30 = vadd.f32 %v3542_v2, %v9385_v44  ;;  %v11000_v37 = vld [vmem:[#allocation76_spill] sm:$0xff] }
 0x469   :  { %v9627_v39 = vadd.f32 %v3633_v1, %v3632_v31  ;;  %v3655_v23 = vsel %vm25_vm0, %v3365_v51, 0.0  ;;  %v3370_v11 = vmul.f32 %v3293_v46, %v10949_v33  ;;  %v3371_v21 = vmul.f32 %v3293_v46, %v10948_v42  ;;  %v11001_v51 = vld [vmem:[#allocation78_spill] sm:$0xff] }
 0x46a   :  { %v4984_v62 = vpop.eup %4983  ;;  %v9632_v29 = vadd.f32 %v3642_v18, %v3641_v8  ;;  %v3649_v19 = vrot.slane %v3648_v41, 4  ;;  %v3657_v15 = vadd.f32 %v3656_v32, %v3655_v23  ;;  %v3292_v22 = vmul.f32 %v4982_v52, %v9584_v58  ;;  %v11002_v52 = vld [vmem:[#allocation77_spill] sm:$0xff]  ;;  %v11006_v18 = vld [vmem:[#allocation79_spill] sm:$0xff] }
 0x46b   :  { %v3295_v47 = vmul.f32 %v4984_v62, %v3135_v5  ;;  %v3698_v1 = vsel %vm25_vm0, %v3551_v34, 0.0  ;;  %v3672_v8 = vsel %vm25_vm0, %v3371_v21, 0.0  ;;  %v3736_v23 = vmul.f32 0.5, %v3696_v30 }
 0x46c   :  { %v9639_v31 = vadd.f32 %v3649_v19, %v3648_v41  ;;  %v3658_v13 = vrot.slane %v3657_v15, 4  ;;  %v3368_v38 = vmul.f32 %v3292_v22, %v8345_v59  ;;  %v3369_v32 = vmul.f32 %v3292_v22, %v11000_v37 }
 0x46d   :  { %v3375_v58 = vmul.f32 %v3295_v47, %v11001_v51  ;;  %v3699_v46 = vadd.f32 %v3698_v1, %v9388_v57  ;;  %v3374_v34 = vmul.f32 %v3295_v47, %v11002_v52  ;;  %v11003_v21 = vrot.slane %v9527_v35, 2  ;;  %v11004_v47 = vld [vmem:[#allocation82_spill] sm:$0xff] }
 0x46e   :  { %v3664_v5 = vadd.f32 %v3370_v11, %v3368_v38  ;;  %v3671_v19 = vsel %vm25_vm0, %v3369_v32, 0.0  ;;  %v9653_v44 = vadd.f32 %v3658_v13, %v3657_v15  ;;  %v11005_v32 = vrot.slane %v9532_v6, 2  ;;  %v11008_v13 = vld [vmem:[#allocation81_spill] sm:$0xff] }
 0x46f   :  { %v4986_v62 = vpop.eup %4985  ;;  %v3737_v2 = vmul.f32 0.5, %v3699_v46  ;;  %v3556_v22 = vadd.f32 %v11003_v21, %v9527_v35  ;;  %v3673_v57 = vadd.f32 %v3672_v8, %v3671_v19  ;;  %v3688_v11 = vsel %vm25_vm0, %v3375_v58, 0.0  ;;  %v11007_v35 = vld [vmem:[#allocation80_spill] sm:$0xff] }
 0x470   :  { %v3665_v55 = vrot.slane %v3664_v5, 4  ;;  %v3294_v1 = vmul.f32 %v4986_v62, %v9597_v0  ;;  %v3565_v46 = vadd.f32 %v11005_v32, %v9532_v6  ;;  %v9666_v21 = vadd.f32 %v3736_v23, %v11008_v13 }
 0x471   :  { %v9658_v30 = vadd.f32 %v3737_v2, %v11004_v47  ;;  %v3557_v38 = vrot.slane %v3556_v22, 1  ;;  %v3674_v41 = vrot.slane %v3673_v57, 4  ;;  %v11009_v2 = vrot.slane %v9543_v63, 2 }
 0x472   :  { %v3372_v27 = vmul.f32 %v3294_v1, %v11006_v18  ;;  %v3373_v15 = vmul.f32 %v3294_v1, %v11007_v35  ;;  %v3566_v58 = vrot.slane %v3565_v46, 1  ;;  %v9673_v19 = vadd.f32 %v3665_v55, %v3664_v5 }
 0x473   :  { %v3776_v0 = vsel %vm25_vm0, %v9658_v30, -inf  ;;  %v3558_v8 = vadd.f32 %v3557_v38, %v3556_v22  ;;  %v3572_v62 = vadd.f32 %v11009_v2, %v9543_v63  ;;  %v9675_v6 = vadd.f32 %v3674_v41, %v3673_v57 }
 0x474   :  { %v3680_v47 = vadd.f32 %v3374_v34, %v3372_v27  ;;  %v3687_v32 = vsel %vm25_vm0, %v3373_v15, 0.0  ;;  %v3777_v23 = vmax.f32 %v9666_v21, %v3776_v0  ;;  %v3567_v13 = vadd.f32 %v3566_v58, %v3565_v46 }
 0x475   :  { %v3689_v1 = vadd.f32 %v3688_v11, %v3687_v32  ;;  %v3700_v18 = vadd.f32 %v3558_v8, %v9393_v60  ;;  %v3660_v22 = vrot.slane %v9653_v44, 2  ;;  %v3573_v52 = vrot.slane %v3572_v62, 1 }
 0x476   :  { %v3681_v38 = vrot.slane %v3680_v47, 4  ;;  %v11010_v63 = vrot.slane %v9547_v26, 2  ;;  %3778 = vmax.xlane.f32.xlu0 %v3777_v23  ;;  %v3702_v27 = vsel %vm25_vm0, %v3567_v13, 0.0  ;;  %v11011_v41 = vrot.slane %v9567_v49, 2  ;;  %v11013_v13 = vld [vmem:[#allocation83_spill] sm:$0xff] }
 0x477   :  { %v3690_v5 = vrot.slane %v3689_v1, 4  ;;  %v3738_v34 = vmul.f32 0.5, %v3700_v18  ;;  %v3667_v11 = vrot.slane %v9673_v19, 2  ;;  %v3703_v60 = vadd.f32 %v3702_v27, %v9396_v56 }
 0x478   :  { %v3581_v55 = vadd.f32 %v11010_v63, %v9547_v26  ;;  %v3588_v57 = vadd.f32 %v11011_v41, %v9567_v49  ;;  %v3574_v46 = vadd.f32 %v3573_v52, %v3572_v62  ;;  %v3676_v0 = vrot.slane %v9675_v6, 2 }
 0x479   :  { %v9691_v8 = vadd.f32 %v3681_v38, %v3680_v47  ;;  %v11012_v58 = vrot.slane %v9574_v50, 2  ;;  %v9696_v18 = vadd.f32 %v3690_v5, %v3689_v1  ;;  %v3739_v32 = vmul.f32 0.5, %v3703_v60  ;;  %v11015_v38 = vld [vmem:[#allocation68_spill] sm:$0xff] }
 0x47a   :  { %v3582_v15 = vrot.slane %v3581_v55, 1  ;;  %v3589_v26 = vrot.slane %v3588_v57, 1  ;;  %v3704_v49 = vadd.f32 %v3574_v46, %v9400_v36  ;;  %v9700_v63 = vadd.f32 %v3738_v34, %v11013_v13 }
 0x47b   :  { %v3597_v2 = vadd.f32 %v11012_v58, %v9574_v50  ;;  %v11014_v62 = vrot.slane %v9588_v53, 2  ;;  %v9706_v27 = vadd.f32 %v3739_v32, %v11015_v38 }
 0x47c   :  { %v3583_v23 = vadd.f32 %v3582_v15, %v3581_v55  ;;  %v3590_v56 = vadd.f32 %v3589_v26, %v3588_v57  ;;  %v3740_v1 = vmul.f32 0.5, %v3704_v49  ;;  %v11016_v55 = vrot.slane %v9594_v40, 2 }
 0x47d   :  { %v3598_v52 = vrot.slane %v3597_v2, 1  ;;  %v3604_v47 = vadd.f32 %v11014_v62, %v9588_v53  ;;  %v3780_v60 = vsel %vm25_vm0, %v9706_v27, -inf  ;;  %v11017_v53 = vld [vmem:[#allocation69_spill] sm:$0xff]  ;;  %v3461_v26 = vrot.slane %v9435_v9, 1  ;;  %v11020_v62 = vld [vmem:[#allocation72_spill] sm:$0xff] }
 0x47e   :  { %v3706_v50 = vsel %vm25_vm0, %v3583_v23, 0.0  ;;  %v3613_v5 = vadd.f32 %v11016_v55, %v9594_v40  ;;  %v3708_v41 = vadd.f32 %v3590_v56, %v9419_v61  ;;  %v9717_v46 = vadd.f32 %v3740_v1, %v11017_v53  ;;  %v11019_v56 = vld [vmem:[#allocation71_spill] sm:$0xff]  ;;  %v11025_v53 = vld [vmem:[#allocation70_spill] sm:$0xff] }
 0x47f   :  { %v3707_v36 = vadd.f32 %v3706_v50, %v9408_v7  ;;  %v3599_v34 = vadd.f32 %v3598_v52, %v3597_v2  ;;  %v3605_v57 = vrot.slane %v3604_v47, 1  ;;  %v3781_v58 = vmax.f32 %v9700_v63, %v3780_v60  ;;  %v11018_v7 = vld [vmem:[#allocation65_spill] sm:$0xff]  ;;  %v11021_v50 = vld [vmem:[#allocation64_spill] sm:$0xff] }
 0x480   :  { %v3614_v15 = vrot.slane %v3613_v5, 1  ;;  %v3742_v23 = vmul.f32 0.5, %v3708_v41  ;;  %v3462_v13 = vadd.f32 %v3461_v26, %v9435_v9  ;;  %v3470_v1 = vrot.slane %v11021_v50, 1  ;;  %v11023_v41 = vld [vmem:[#allocation62_spill] sm:$0xff] }
 0x481   :  { %v3741_v32 = vmul.f32 0.5, %v3707_v36  ;;  %v3710_v40 = vsel %vm25_vm0, %v3599_v34, 0.0  ;;  %v3606_v49 = vadd.f32 %v3605_v57, %v3604_v47  ;;  %3782 = vmax.xlane.f32.xlu1 %v3781_v58  ;;  %v11022_v55 = vrot.slane %v9618_v3, 2 }
 0x482   :  { %v3711_v2 = vadd.f32 %v3710_v40, %v11018_v7  ;;  %v3615_v61 = vadd.f32 %v3614_v15, %v3613_v5  ;;  %v9728_v38 = vadd.f32 %v3742_v23, %v11020_v62  ;;  %v11024_v9 = vrot.slane %v9620_v17, 2 }
 0x483   :  { %v9725_v52 = vadd.f32 %v3741_v32, %v11019_v56  ;;  %v3620_v36 = vadd.f32 %v11022_v55, %v9618_v3  ;;  %v3712_v60 = vadd.f32 %v3606_v49, %v11023_v41  ;;  %v3471_v26 = vadd.f32 %v3470_v1, %v11021_v50  ;;  %v11026_v3 = vld [vmem:[#allocation73_spill] sm:$0xff]  ;;  %v11029_v1 = vld [vmem:[#allocation84_spill] sm:$0xff] }
 0x484   :  { %v3743_v34 = vmul.f32 0.5, %v3711_v2  ;;  %v3714_v47 = vsel %vm25_vm0, %v3615_v61, 0.0  ;;  %v3629_v5 = vadd.f32 %v11024_v9, %v9620_v17  ;;  %v11027_v17 = vld [vmem:[#allocation67_spill] sm:$0xff]  ;;  %v11032_v9 = vld [vmem:[#allocation85_spill] sm:$0xff] }
 0x485   :  { %v3784_v57 = vsel %vm25_vm0, %v9725_v52, -inf  ;;  %v3715_v15 = vadd.f32 %v3714_v47, %v11025_v53  ;;  %v3621_v58 = vrot.slane %v3620_v36, 1  ;;  %v3744_v23 = vmul.f32 0.5, %v3712_v60 }
 0x486   :  { %v3785_v32 = vmax.f32 %v9717_v46, %v3784_v57  ;;  %v9745_v40 = vadd.f32 %v3743_v34, %v11026_v3  ;;  %v3630_v7 = vrot.slane %v3629_v5, 1  ;;  %v3717_v61 = vsel %vm25_vm0, %v3471_v26, 0.0  ;;  %v11030_v34 = vld [vmem:[#allocation66_spill] sm:$0xff] }
 0x487   :  { %v3745_v2 = vmul.f32 0.5, %v3715_v15  ;;  %v3622_v49 = vadd.f32 %v3621_v58, %v3620_v36  ;;  %v11028_v56 = vrot.slane %v11027_v17, 2  ;;  %v9754_v55 = vadd.f32 %v3744_v23, %v11029_v1 }
 0x488   :  { %3786 = vmax.xlane.f32.xlu0 %v3785_v32  ;;  %v3788_v50 = vsel %vm25_vm0, %v9745_v40, -inf  ;;  %v3631_v41 = vadd.f32 %v3630_v7, %v3629_v5  ;;  %v11031_v60 = vrot.slane %v11030_v34, 2  ;;  %v11033_v32 = vrot.slane %v9627_v39, 2 }
 0x489   :  { %v3476_v62 = vadd.f32 %v11028_v56, %v11027_v17  ;;  %v3789_v36 = vmax.f32 %v9728_v38, %v3788_v50  ;;  %v9761_v57 = vadd.f32 %v3745_v2, %v11032_v9  ;;  %v3716_v53 = vadd.f32 %v3622_v49, %v3462_v13 }
 0x48a   :  { %v3485_v47 = vadd.f32 %v11031_v60, %v11030_v34  ;;  %v3718_v26 = vsel %vm25_vm0, %v3631_v41, 0.0  ;;  %v3636_v3 = vadd.f32 %v11033_v32, %v9627_v39  ;;  %v11034_v5 = vrot.slane %v9632_v29, 2  ;;  %v11035_v34 = vld [vmem:[#allocation86_spill] sm:$0xff] }
 0x48b   :  { %v3477_v15 = vrot.slane %v3476_v62, 1  ;;  %3790 = vmax.xlane.f32.xlu1 %v3789_v36  ;;  %v3792_v7 = vsel %vm25_vm0, %v9761_v57, -inf  ;;  %v3719_v17 = vadd.f32 %v3718_v26, %v3717_v61  ;;  %v3746_v2 = vmul.f32 0.5, %v3716_v53  ;;  %v11037_v36 = vld [vmem:[#allocation75_spill] sm:$0xff] }
 0x48c   :  { %v3486_v58 = vrot.slane %v3485_v47, 1  ;;  %v3645_v23 = vadd.f32 %v11034_v5, %v9632_v29  ;;  %v3793_v13 = vmax.f32 %v9754_v55, %v3792_v7  ;;  %v3637_v50 = vrot.slane %v3636_v3, 1  ;;  %v11040_v26 = vld [vmem:[#allocation87_spill] sm:$0xff] }
 0x48d   :  { %v3478_v56 = vadd.f32 %v3477_v15, %v3476_v62  ;;  %v3747_v41 = vmul.f32 0.5, %v3719_v17  ;;  %v9774_v60 = vadd.f32 %v3746_v2, %v11035_v34  ;;  %v11036_v39 = vrot.slane %v9460_v14, 2 }
 0x48e   :  { %v3487_v49 = vadd.f32 %v3486_v58, %v3485_v47  ;;  %v3646_v1 = vrot.slane %v3645_v23, 1  ;;  %v11038_v9 = vrot.slane %v11037_v36, 2  ;;  %3794 = vmax.xlane.f32.xlu0 %v3793_v13  ;;  %v3638_v61 = vadd.f32 %v3637_v50, %v3636_v3 }
 0x48f   :  { %v3492_v29 = vadd.f32 %v11036_v39, %v9460_v14  ;;  %v11039_v47 = vrot.slane %v9639_v31, 2  ;;  %v9787_v58 = vadd.f32 %v3747_v41, %v11040_v26  ;;  %v3661_v14 = vadd.f32 %v3660_v22, %v9653_v44 }
 0x490   :  { %v3501_v32 = vadd.f32 %v11038_v9, %v11037_v36  ;;  %v3647_v62 = vadd.f32 %v3646_v1, %v3645_v23  ;;  %v3721_v53 = vsel %vm25_vm0, %v3487_v49, 0.0  ;;  %v3720_v17 = vadd.f32 %v3638_v61, %v3478_v56  ;;  %v11041_v23 = vld [vmem:[#allocation74_spill] sm:$0xff]  ;;  %v11043_v61 = vld [vmem:[#allocation96_spill] sm:$0xff] }
 0x491   :  { %v3652_v15 = vadd.f32 %v11039_v47, %v9639_v31  ;;  %v3493_v5 = vrot.slane %v3492_v29, 1  ;;  %v11042_v13 = vrot.slane %v11041_v23, 2  ;;  %v3796_v31 = vsel %vm25_vm0, %v9787_v58, -inf }
 0x492   :  { %v3502_v7 = vrot.slane %v3501_v32, 1  ;;  %v3722_v2 = vsel %vm25_vm0, %v3647_v62, 0.0  ;;  %v3797_v34 = vmax.f32 %v9774_v60, %v3796_v31  ;;  %v3748_v39 = vmul.f32 0.5, %v3720_v17  ;;  %v11047_v31 = vld [vmem:[#allocation97_spill] sm:$0xff] }
 0x493   :  { %v3653_v3 = vrot.slane %v3652_v15, 1  ;;  %v3508_v49 = vadd.f32 %v11042_v13, %v11041_v23  ;;  %v3723_v50 = vadd.f32 %v3722_v2, %v3721_v53  ;;  %v3494_v1 = vadd.f32 %v3493_v5, %v3492_v29  ;;  %v11046_v2 = vld [vmem:[#allocation88_spill] sm:$0xff] }
 0x494   :  { %v3503_v41 = vadd.f32 %v3502_v7, %v3501_v32  ;;  %v3662_v9 = vrot.slane %v3661_v14, 1  ;;  %v3683_v44 = vrot.slane %v9691_v8, 2  ;;  %v3692_v22 = vrot.slane %v9696_v18, 2  ;;  %3798 = vmax.xlane.f32.xlu1 %v3797_v34  ;;  %v11045_v32 = vld [vmem:[#allocation89_spill] sm:$0xff] }
 0x495   :  { %v3654_v36 = vadd.f32 %v3653_v3, %v3652_v15  ;;  %v3749_v56 = vmul.f32 0.5, %v3723_v50  ;;  %v11044_v62 = vrot.slane %v11043_v61, 2  ;;  %v3509_v53 = vrot.slane %v3508_v49, 1 }
 0x496   :  { %v3663_v26 = vadd.f32 %v3662_v9, %v3661_v14  ;;  %v3668_v29 = vadd.f32 %v3667_v11, %v9673_v19  ;;  %v3725_v5 = vsel %vm25_vm0, %v3503_v41, 0.0  ;;  %v3677_v17 = vadd.f32 %v3676_v0, %v9675_v6 }
 0x497   :  { %v3517_v47 = vadd.f32 %v11044_v62, %v11043_v61  ;;  %v3724_v23 = vadd.f32 %v3654_v36, %v3494_v1  ;;  %v9808_v15 = vadd.f32 %v3749_v56, %v11045_v32  ;;  %v9815_v3 = vadd.f32 %v3748_v39, %v11046_v2  ;;  %v11049_v61 = vld [vmem:[#allocation98_spill] sm:$0xff] }
 0x498   :  { %v3726_v14 = vsel %vm25_vm0, %v3663_v26, 0.0  ;;  %v3669_v13 = vrot.slane %v3668_v29, 1  ;;  %v11048_v50 = vrot.slane %v11047_v31, 2  ;;  %v3678_v34 = vrot.slane %v3677_v17, 1 }
 0x499   :  { %v3518_v7 = vrot.slane %v3517_v47, 1  ;;  %v3800_v11 = vsel %vm25_vm0, %v9808_v15, -inf  ;;  %v3727_v1 = vadd.f32 %v3726_v14, %v3725_v5  ;;  %v3750_v9 = vmul.f32 0.5, %v3724_v23 }
 0x49a   :  { %v3524_v19 = vadd.f32 %v11048_v50, %v11047_v31  ;;  %v3801_v36 = vmax.f32 %v9815_v3, %v3800_v11  ;;  %v3510_v6 = vadd.f32 %v3509_v53, %v3508_v49  ;;  %v3670_v0 = vadd.f32 %v3669_v13, %v3668_v29  ;;  %v11052_v29 = vld [vmem:[#allocation90_spill] sm:$0xff] }
 0x49b   :  { %v3519_v41 = vadd.f32 %v3518_v7, %v3517_v47  ;;  %v3751_v39 = vmul.f32 0.5, %v3727_v1  ;;  %v3679_v56 = vadd.f32 %v3678_v34, %v3677_v17  ;;  %v11050_v62 = vrot.slane %v11049_v61, 2  ;;  %v11051_v47 = vld [vmem:[#allocation91_spill] sm:$0xff] }
 0x49c   :  { %3802 = vmax.xlane.f32.xlu0 %v3801_v36  ;;  %v3728_v32 = vadd.f32 %v3670_v0, %v3510_v6  ;;  %v3525_v2 = vrot.slane %v3524_v19, 1  ;;  %v3684_v31 = vadd.f32 %v3683_v44, %v9691_v8  ;;  %v3693_v5 = vadd.f32 %v3692_v22, %v9696_v18  ;;  %v11053_v36 = vld [vmem:[#allocation92_spill] sm:$0xff]  ;;  %v11054_v0 = vld [vmem:[#allocation93_spill] sm:$0xff] }
 0x49d   :  { %v3533_v26 = vadd.f32 %v11050_v62, %v11049_v61  ;;  %v9830_v7 = vadd.f32 %v3751_v39, %v11051_v47  ;;  %v3729_v23 = vsel %vm25_vm0, %v3519_v41, 0.0  ;;  %v3730_v49 = vsel %vm25_vm0, %v3679_v56, 0.0  ;;  %v11056_v47 = vld [vmem:[#allocation95_spill] sm:$0xff] }
 0x49e   :  { %v9835_v17 = vadd.f32 %v3750_v9, %v11052_v29  ;;  %v3731_v14 = vadd.f32 %v3730_v49, %v3729_v23  ;;  %v3685_v13 = vrot.slane %v3684_v31, 1  ;;  %v3694_v50 = vrot.slane %v3693_v5, 1 }
 0x49f   :  { %v3534_v53 = vrot.slane %v3533_v26, 1  ;;  %v3804_v11 = vsel %vm25_vm0, %v9830_v7, -inf  ;;  %v3752_v8 = vmul.f32 0.5, %v3728_v32  ;;  %v3526_v1 = vadd.f32 %v3525_v2, %v3524_v19 }
 0x4a0   :  { %v3805_v18 = vmax.f32 %v9835_v17, %v3804_v11  ;;  %v3753_v22 = vmul.f32 0.5, %v3731_v14  ;;  %v3686_v34 = vadd.f32 %v3685_v13, %v3684_v31  ;;  %v3695_v41 = vadd.f32 %v3694_v50, %v3693_v5  ;;  %v11055_v31 = vld [vmem:[#allocation94_spill] sm:$0xff] }
 0x4a1   :  { %v3535_v44 = vadd.f32 %v3534_v53, %v3533_v26  ;;  %v9844_v39 = vadd.f32 %v3752_v8, %v11054_v0 }
 0x4a2   :  { %3806 = vmax.xlane.f32.xlu1 %v3805_v18  ;;  %v9841_v6 = vadd.f32 %v3753_v22, %v11053_v36  ;;  %v3732_v9 = vadd.f32 %v3686_v34, %v3526_v1  ;;  %v3734_v61 = vsel %vm25_vm0, %v3695_v41, 0.0 }
 0x4a3   :  { %v3733_v56 = vsel %vm25_vm0, %v3535_v44, 0.0 }
 0x4a4   :  { %v3808_v62 = vsel %vm25_vm0, %v9841_v6, -inf  ;;  %v3735_v26 = vadd.f32 %v3734_v61, %v3733_v56  ;;  %v3754_v32 = vmul.f32 0.5, %v3732_v9 }
 0x4a5   :  { %v3809_v19 = vmax.f32 %v9844_v39, %v3808_v62 }
 0x4a6   :  { %v3755_v2 = vmul.f32 0.5, %v3735_v26  ;;  %v9855_v23 = vadd.f32 %v3754_v32, %v11056_v47 }
 0x4a7   :  { %3810 = vmax.xlane.f32.xlu0 %v3809_v19 }
 0x4a8   :  { %v9852_v5 = vadd.f32 %v3755_v2, %v11055_v31 }
 0x4aa   :  { %v3812_v49 = vsel %vm25_vm0, %v9852_v5, -inf }
 0x4ab   :  { %v3813_v53 = vmax.f32 %v9855_v23, %v3812_v49 }
 0x4ad   :  { %3814 = vmax.xlane.f32.xlu1 %v3813_v53 }
 0x4ff   :  { %v3779_v29 = vpop.xlane.xlu0 %3778 }
 0x500   :  { %v3816_v14 = vsub.f32 %v9666_v21, %v3779_v29  ;;  %v3817_v13 = vsub.f32 %v9658_v30, %v3779_v29 }
 0x502   :  { %v3836_v50 = vmul.f32 1.442695, %v3816_v14  ;;  %v3838_v11 = vmul.f32 1.442695, %v3817_v13 }
 0x504   :  { %4987 = vpow2.f32 %v3836_v50 }
 0x505   :  { %4989 = vpow2.f32 %v3838_v11 }
 0x50a   :  { %v3783_v8 = vpop.xlane.xlu1 %3782 }
 0x50b   :  { %v3818_v44 = vsub.f32 %v9700_v63, %v3783_v8  ;;  %v3819_v18 = vsub.f32 %v9706_v27, %v3783_v8 }
 0x50d   :  { %v3840_v22 = vmul.f32 1.442695, %v3818_v44  ;;  %v3842_v1 = vmul.f32 1.442695, %v3819_v18 }
 0x50f   :  { %4991 = vpow2.f32 %v3840_v22 }
 0x510   :  { %4993 = vpow2.f32 %v3842_v1 }
 0x511   :  { %v3787_v34 = vpop.xlane.xlu0 %3786  ;;  %v9866_v36 = vpop.eup %4987 }
 0x512   :  { %v3820_v41 = vsub.f32 %v9717_v46, %v3787_v34  ;;  %v3821_v21 = vsub.f32 %v9725_v52, %v3787_v34  ;;  %v9868_v56 = vpop.eup %4989 }
 0x513   :  { %v3876_v61 = vsel %vm25_vm0, %v9868_v56, 0.0 }
 0x514   :  { %v3844_v30 = vmul.f32 1.442695, %v3820_v41  ;;  %v3846_v9 = vmul.f32 1.442695, %v3821_v21  ;;  %v3791_v0 = vpop.xlane.xlu1 %3790  ;;  %v3877_v52 = vadd.f32 %v9866_v36, %v3876_v61 }
 0x515   :  { %v3822_v63 = vsub.f32 %v9728_v38, %v3791_v0  ;;  %v3823_v27 = vsub.f32 %v9745_v40, %v3791_v0 }
 0x516   :  { %4995 = vpow2.f32 %v3844_v30  ;;  %3878 = vadd.xlane.f32.xlu0 %v3877_v52 }
 0x517   :  { %4997 = vpow2.f32 %v3846_v9  ;;  %v3848_v62 = vmul.f32 1.442695, %v3822_v63  ;;  %v3850_v46 = vmul.f32 1.442695, %v3823_v27  ;;  %v3795_v26 = vpop.xlane.xlu0 %3794 }
 0x518   :  { %v3824_v19 = vsub.f32 %v9754_v55, %v3795_v26  ;;  %v3825_v32 = vsub.f32 %v9761_v57, %v3795_v26 }
 0x519   :  { %4999 = vpow2.f32 %v3848_v62 }
 0x51a   :  { %5001 = vpow2.f32 %v3850_v46  ;;  %v3852_v38 = vmul.f32 1.442695, %v3824_v19  ;;  %v3854_v2 = vmul.f32 1.442695, %v3825_v32 }
 0x51c   :  { %5003 = vpow2.f32 %v3852_v38  ;;  %v9877_v31 = vpop.eup %4991 }
 0x51d   :  { %5005 = vpow2.f32 %v3854_v2  ;;  %v3799_v40 = vpop.xlane.xlu1 %3798  ;;  %v9881_v53 = vpop.eup %4993 }
 0x51e   :  { %v3826_v47 = vsub.f32 %v9774_v60, %v3799_v40  ;;  %v3827_v49 = vsub.f32 %v9787_v58, %v3799_v40  ;;  %v3880_v57 = vsel %vm25_vm0, %v9881_v53, 0.0 }
 0x51f   :  { %v3881_v14 = vadd.f32 %v9877_v31, %v3880_v57 }
 0x520   :  { %v3856_v29 = vmul.f32 1.442695, %v3826_v47  ;;  %v3858_v55 = vmul.f32 1.442695, %v3827_v49 }
 0x521   :  { %3882 = vadd.xlane.f32.xlu1 %v3881_v14 }
 0x522   :  { %5007 = vpow2.f32 %v3856_v29 }
 0x523   :  { %v9886_v13 = vpop.eup %4995  ;;  %5009 = vpow2.f32 %v3858_v55 }
 0x524   :  { %v9888_v11 = vpop.eup %4997 }
 0x525   :  { %v3803_v50 = vpop.xlane.xlu0 %3802  ;;  %v3884_v8 = vsel %vm25_vm0, %v9888_v11, 0.0 }
 0x526   :  { %v3828_v60 = vsub.f32 %v9815_v3, %v3803_v50  ;;  %v3829_v58 = vsub.f32 %v9808_v15, %v3803_v50  ;;  %v9894_v44 = vpop.eup %4999  ;;  %v3885_v1 = vadd.f32 %v9886_v13, %v3884_v8 }
 0x527   :  { %v9897_v34 = vpop.eup %5001 }
 0x528   :  { %v3860_v18 = vmul.f32 1.442695, %v3828_v60  ;;  %v3862_v22 = vmul.f32 1.442695, %v3829_v58  ;;  %3886 = vadd.xlane.f32.xlu0 %v3885_v1  ;;  %v3888_v41 = vsel %vm25_vm0, %v9897_v34, 0.0 }
 0x529   :  { %v9901_v21 = vpop.eup %5003  ;;  %v3889_v3 = vadd.f32 %v9894_v44, %v3888_v41 }
 0x52a   :  { %5011 = vpow2.f32 %v3860_v18  ;;  %v9904_v30 = vpop.eup %5005 }
 0x52b   :  { %5013 = vpow2.f32 %v3862_v22  ;;  %v3807_v15 = vpop.xlane.xlu1 %3806  ;;  %3890 = vadd.xlane.f32.xlu1 %v3889_v3  ;;  %v3892_v63 = vsel %vm25_vm0, %v9904_v30, 0.0 }
 0x52c   :  { %v3830_v9 = vsub.f32 %v9835_v17, %v3807_v15  ;;  %v3831_v0 = vsub.f32 %v9830_v7, %v3807_v15  ;;  %v3893_v62 = vadd.f32 %v9901_v21, %v3892_v63 }
 0x52e   :  { %v3864_v27 = vmul.f32 1.442695, %v3830_v9  ;;  %v3866_v61 = vmul.f32 1.442695, %v3831_v0  ;;  %3894 = vadd.xlane.f32.xlu0 %v3893_v62 }
 0x52f   :  { %v9911_v26 = vpop.eup %5007 }
 0x530   :  { %5015 = vpow2.f32 %v3864_v27  ;;  %v3811_v46 = vpop.xlane.xlu0 %3810  ;;  %v9915_v19 = vpop.eup %5009 }
 0x531   :  { %5017 = vpow2.f32 %v3866_v61  ;;  %v3832_v52 = vsub.f32 %v9844_v39, %v3811_v46  ;;  %v3833_v17 = vsub.f32 %v9841_v6, %v3811_v46  ;;  %v3896_v38 = vsel %vm25_vm0, %v9915_v19, 0.0  ;;  %v11057_v46 = vld [vmem:[#allocation8_spill] sm:$0xff] }
 0x532   :  { %v3897_v2 = vadd.f32 %v9911_v26, %v3896_v38 }
 0x533   :  { %v3868_v7 = vmul.f32 1.442695, %v3832_v52  ;;  %v3870_v32 = vmul.f32 1.442695, %v3833_v17  ;;  %v11058_v17 = vld [vmem:[#allocation9_spill] sm:$0xff] }
 0x534   :  { %3898 = vadd.xlane.f32.xlu1 %v3897_v2  ;;  %v11060_v2 = vld [vmem:[#allocation5_spill] sm:$0xff] }
 0x535   :  { %5019 = vpow2.f32 %v3868_v7 }
 0x536   :  { %5021 = vpow2.f32 %v3870_v32  ;;  %v3815_v40 = vpop.xlane.xlu1 %3814  ;;  %v11059_v32 = vld [vmem:[#allocation4_spill] sm:$0xff] }
 0x537   :  { %v9920_v47 = vpop.eup %5011  ;;  %v3834_v49 = vsub.f32 %v9855_v23, %v3815_v40  ;;  %v3835_v39 = vsub.f32 %v9852_v5, %v3815_v40 }
 0x538   :  { %v9924_v6 = vpop.eup %5013 }
 0x539   :  { %v3872_v29 = vmul.f32 1.442695, %v3834_v49  ;;  %v3874_v55 = vmul.f32 1.442695, %v3835_v39  ;;  %v3900_v57 = vsel %vm25_vm0, %v9924_v6, 0.0 }
 0x53a   :  { %v3901_v14 = vadd.f32 %v9920_v47, %v3900_v57 }
 0x53b   :  { %5023 = vpow2.f32 %v3872_v29 }
 0x53c   :  { %5025 = vpow2.f32 %v3874_v55  ;;  %3902 = vadd.xlane.f32.xlu0 %v3901_v14 }
 0x53d   :  { %v9929_v50 = vpop.eup %5015 }
 0x53e   :  { %v9931_v60 = vpop.eup %5017 }
 0x53f   :  { %v3904_v23 = vsel %vm25_vm0, %v9931_v60, 0.0 }
 0x540   :  { %v3905_v5 = vadd.f32 %v9929_v50, %v3904_v23 }
 0x542   :  { %v9936_v58 = vpop.eup %5019  ;;  %3906 = vadd.xlane.f32.xlu1 %v3905_v5 }
 0x543   :  { %v9938_v8 = vpop.eup %5021 }
 0x544   :  { %v3908_v18 = vsel %vm25_vm0, %v9938_v8, 0.0 }
 0x545   :  { %v3909_v22 = vadd.f32 %v9936_v58, %v3908_v18  ;;  %v11061_v18 = vld [vmem:[#allocation6_spill] sm:$0xff] }
 0x547   :  { %3910 = vadd.xlane.f32.xlu0 %v3909_v22 }
 0x548   :  { %v9943_v1 = vpop.eup %5023 }
 0x549   :  { %v9945_v41 = vpop.eup %5025 }
 0x54a   :  { %v3912_v15 = vsel %vm25_vm0, %v9945_v41, 0.0 }
 0x54b   :  { %v3913_v3 = vadd.f32 %v9943_v1, %v3912_v15  ;;  %v11062_v15 = vld [vmem:[#allocation7_spill] sm:$0xff] }
 0x54d   :  { %3914 = vadd.xlane.f32.xlu1 %v3913_v3 }
 0x59f   :  { %v3879_v9 = vpop.xlane.xlu0 %3878 }
 0x5a0   :  { %5027 = vrcp.f32 %v3879_v9  ;;  %v11063_v9 = vld [vmem:[#allocation2_spill] sm:$0xff] }
 0x5aa   :  { %v3883_v0 = vpop.xlane.xlu1 %3882 }
 0x5ab   :  { %5029 = vrcp.f32 %v3883_v0 }
 0x5ad   :  { %v5028_v63 = vpop.eup %5027 }
 0x5ae   :  { %v9951_v27 = vmul.f32 %v5028_v63, %v9868_v56  ;;  %v9954_v62 = vmul.f32 %v5028_v63, %v9866_v36  ;;  %v11064_v63 = vld [vmem:[#allocation3_spill] sm:$0xff] }
 0x5b0   :  { %v3948_v52 = vmul.f32 %v9954_v62, %v11057_v46  ;;  %v3949_v7 = vmul.f32 %v9951_v27, %v11058_v17  ;;  %v3946_v38 = vmul.f32 %v9954_v62, %v11059_v32  ;;  %v3947_v40 = vmul.f32 %v9951_v27, %v11060_v2  ;;  %v11065_v2 = vld [vmem:[#allocation10_spill] sm:$0xff] }
 0x5b1   :  { %v3887_v61 = vpop.xlane.xlu0 %3886 }
 0x5b2   :  { %5031 = vrcp.f32 %v3887_v61  ;;  %v4030_v56 = vsel %vm25_vm0, %v3949_v7, 0.0  ;;  %v4026_v36 = vsel %vm25_vm0, %v3947_v40, 0.0 }
 0x5b3   :  { %v4031_v39 = vadd.f32 %v4030_v56, %v3948_v52  ;;  %v4027_v29 = vadd.f32 %v4026_v36, %v3946_v38  ;;  %v11067_v36 = vld [vmem:[#allocation12_spill] sm:$0xff] }
 0x5b4   :  { %v3891_v49 = vpop.xlane.xlu1 %3890 }
 0x5b5   :  { %5033 = vrcp.f32 %v3891_v49  ;;  %4032 = vadd.xlane.f32.xlu1 %v4031_v39  ;;  %4028 = vadd.xlane.f32.xlu0 %v4027_v29  ;;  %v11066_v49 = vld [vmem:[#allocation11_spill] sm:$0xff] }
 0x5b7   :  { %v3895_v55 = vpop.xlane.xlu0 %3894 }
 0x5b8   :  { %5035 = vrcp.f32 %v3895_v55  ;;  %v5030_v57 = vpop.eup %5029  ;;  %v11068_v55 = vld [vmem:[#allocation13_spill] sm:$0xff] }
 0x5b9   :  { %v9967_v14 = vmul.f32 %v5030_v57, %v9881_v53  ;;  %v9970_v23 = vmul.f32 %v5030_v57, %v9877_v31 }
 0x5bb   :  { %v3952_v22 = vmul.f32 %v9970_v23, %v11061_v18  ;;  %v3953_v3 = vmul.f32 %v9967_v14, %v11062_v15  ;;  %v3950_v0 = vmul.f32 %v9970_v23, %v11063_v9  ;;  %v3951_v61 = vmul.f32 %v9967_v14, %v11064_v63 }
 0x5bd   :  { %v3899_v5 = vpop.xlane.xlu1 %3898  ;;  %v4038_v53 = vsel %vm25_vm0, %v3953_v3, 0.0  ;;  %v4034_v31 = vsel %vm25_vm0, %v3951_v61, 0.0  ;;  %v11069_v3 = vld [vmem:[#allocation14_spill] sm:$0xff] }
 0x5be   :  { %5037 = vrcp.f32 %v3899_v5  ;;  %v4039_v17 = vadd.f32 %v4038_v53, %v3952_v22  ;;  %v4035_v7 = vadd.f32 %v4034_v31, %v3950_v0  ;;  %v11070_v0 = vld [vmem:[#allocation15_spill] sm:$0xff]  ;;  %v11072_v53 = vld [vmem:[#allocation17_spill] sm:$0xff] }
 0x5bf   :  { %v5032_v46 = vpop.eup %5031 }
 0x5c0   :  { %v9983_v52 = vmul.f32 %v5032_v46, %v9888_v11  ;;  %v9986_v32 = vmul.f32 %v5032_v46, %v9886_v13  ;;  %4040 = vadd.xlane.f32.xlu1 %v4039_v17  ;;  %4036 = vadd.xlane.f32.xlu0 %v4035_v7  ;;  %v11071_v46 = vld [vmem:[#allocation16_spill] sm:$0xff] }
 0x5c2   :  { %v5034_v38 = vpop.eup %5033  ;;  %v3956_v40 = vmul.f32 %v9986_v32, %v11065_v2  ;;  %v3957_v56 = vmul.f32 %v9983_v52, %v11066_v49  ;;  %v3954_v39 = vmul.f32 %v9986_v32, %v11067_v36  ;;  %v3955_v13 = vmul.f32 %v9983_v52, %v11068_v55  ;;  %v11074_v49 = vld [vmem:[#allocation21_spill] sm:$0xff] }
 0x5c3   :  { %v9995_v11 = vmul.f32 %v5034_v38, %v9897_v34  ;;  %v10000_v57 = vmul.f32 %v5034_v38, %v9894_v44 }
 0x5c4   :  { %v4046_v5 = vsel %vm25_vm0, %v3957_v56, 0.0  ;;  %v4042_v15 = vsel %vm25_vm0, %v3955_v13, 0.0  ;;  %v11076_v13 = vld [vmem:[#allocation20_spill] sm:$0xff] }
 0x5c5   :  { %v3903_v29 = vpop.xlane.xlu0 %3902  ;;  %v5036_v18 = vpop.eup %5035  ;;  %v4047_v22 = vadd.f32 %v4046_v5, %v3956_v40  ;;  %v3960_v9 = vmul.f32 %v10000_v57, %v11069_v3  ;;  %v3961_v34 = vmul.f32 %v9995_v11, %v11070_v0  ;;  %v4043_v61 = vadd.f32 %v4042_v15, %v3954_v39  ;;  %v11073_v40 = vld [vmem:[#allocation19_spill] sm:$0xff] }
 0x5c6   :  { %5039 = vrcp.f32 %v3903_v29  ;;  %v10009_v63 = vmul.f32 %v5036_v18, %v9904_v30  ;;  %v3958_v44 = vmul.f32 %v10000_v57, %v11071_v46  ;;  %v3959_v31 = vmul.f32 %v9995_v11, %v11072_v53  ;;  %v11075_v29 = vld [vmem:[#allocation18_spill] sm:$0xff] }
 0x5c7   :  { %4048 = vadd.xlane.f32.xlu1 %v4047_v22  ;;  %v4054_v17 = vsel %vm25_vm0, %v3961_v34, 0.0  ;;  %v10017_v7 = vmul.f32 %v5036_v18, %v9901_v21  ;;  %4044 = vadd.xlane.f32.xlu0 %v4043_v61  ;;  %v11077_v61 = vld [vmem:[#allocation22_spill] sm:$0xff] }
 0x5c8   :  { %v4055_v38 = vadd.f32 %v4054_v17, %v3960_v9  ;;  %v4050_v2 = vsel %vm25_vm0, %v3959_v31, 0.0  ;;  %v3965_v30 = vmul.f32 %v10009_v63, %v11073_v40  ;;  %v3963_v56 = vmul.f32 %v10009_v63, %v11074_v49  ;;  %v11079_v31 = vld [vmem:[#allocation24_spill] sm:$0xff] }
 0x5c9   :  { %v4051_v39 = vadd.f32 %v4050_v2, %v3958_v44  ;;  %v3964_v55 = vmul.f32 %v10017_v7, %v11075_v29  ;;  %v3962_v5 = vmul.f32 %v10017_v7, %v11076_v13  ;;  %v11078_v44 = vld [vmem:[#allocation23_spill] sm:$0xff]  ;;  %v11081_v29 = vld [vmem:[#allocation26_spill] sm:$0xff] }
 0x5ca   :  { %v4062_v21 = vsel %vm25_vm0, %v3965_v30, 0.0  ;;  %v4058_v18 = vsel %vm25_vm0, %v3963_v56, 0.0  ;;  %v11082_v13 = vld [vmem:[#allocation27_spill] sm:$0xff] }
 0x5cb   :  { %v3907_v36 = vpop.xlane.xlu1 %3906  ;;  %v5038_v22 = vpop.eup %5037  ;;  %4056 = vadd.xlane.f32.xlu1 %v4055_v38  ;;  %v4063_v15 = vadd.f32 %v4062_v21, %v3964_v55  ;;  %4052 = vadd.xlane.f32.xlu0 %v4051_v39  ;;  %v4059_v9 = vadd.f32 %v4058_v18, %v3962_v5  ;;  %v11080_v38 = vld [vmem:[#allocation25_spill] sm:$0xff]  ;;  %v11083_v21 = vld [vmem:[#allocation28_spill] sm:$0xff] }
 0x5cc   :  { %5041 = vrcp.f32 %v3907_v36  ;;  %v10031_v3 = vmul.f32 %v5038_v22, %v9915_v19  ;;  %v10034_v0 = vmul.f32 %v5038_v22, %v9911_v26  ;;  %v11084_v22 = vld [vmem:[#allocation29_spill] sm:$0xff] }
 0x5ce   :  { %v3968_v46 = vmul.f32 %v10034_v0, %v11077_v61  ;;  %v3969_v53 = vmul.f32 %v10031_v3, %v11078_v44  ;;  %v3966_v17 = vmul.f32 %v10034_v0, %v11079_v31  ;;  %v3967_v2 = vmul.f32 %v10031_v3, %v11080_v38 }
 0x5cf   :  { %4064 = vadd.xlane.f32.xlu1 %v4063_v15  ;;  %4060 = vadd.xlane.f32.xlu0 %v4059_v9 }
 0x5d0   :  { %v3911_v34 = vpop.xlane.xlu0 %3910  ;;  %v4070_v19 = vsel %vm25_vm0, %v3969_v53, 0.0  ;;  %v4066_v26 = vsel %vm25_vm0, %v3967_v2, 0.0  ;;  %v11085_v53 = vld [vmem:[#allocation30_spill] sm:$0xff]  ;;  %v11087_v2 = vld [vmem:[#allocation32_spill] sm:$0xff] }
 0x5d1   :  { %5043 = vrcp.f32 %v3911_v34  ;;  %v4071_v30 = vadd.f32 %v4070_v19, %v3968_v46  ;;  %v4067_v49 = vadd.f32 %v4066_v26, %v3966_v17  ;;  %v11086_v17 = vld [vmem:[#allocation31_spill] sm:$0xff]  ;;  %v11088_v26 = vld [vmem:[#allocation33_spill] sm:$0xff] }
 0x5d3   :  { %v5040_v40 = vpop.eup %5039  ;;  %4072 = vadd.xlane.f32.xlu1 %v4071_v30  ;;  %4068 = vadd.xlane.f32.xlu0 %v4067_v49 }
 0x5d4   :  { %v10047_v56 = vmul.f32 %v5040_v40, %v9924_v6  ;;  %v10050_v36 = vmul.f32 %v5040_v40, %v9920_v47 }
 0x5d6   :  { %v3915_v39 = vpop.xlane.xlu1 %3914  ;;  %v3972_v55 = vmul.f32 %v10050_v36, %v11081_v29  ;;  %v3973_v5 = vmul.f32 %v10047_v56, %v11082_v13  ;;  %v3970_v18 = vmul.f32 %v10050_v36, %v11083_v21  ;;  %v3971_v15 = vmul.f32 %v10047_v56, %v11084_v22  ;;  %v11089_v13 = vld [vmem:[#allocation34_spill] sm:$0xff]  ;;  %v11090_v21 = vld [vmem:[#allocation35_spill] sm:$0xff]  ;;  %v11091_v22 = vld [vmem:[#allocation36_spill] sm:$0xff] }
 0x5d7   :  { %5045 = vrcp.f32 %v3915_v39 }
 0x5d8   :  { %v4078_v6 = vsel %vm25_vm0, %v3973_v5, 0.0  ;;  %v4074_v47 = vsel %vm25_vm0, %v3971_v15, 0.0 }
 0x5d9   :  { %v5042_v9 = vpop.eup %5041  ;;  %v4079_v34 = vadd.f32 %v4078_v6, %v3972_v55  ;;  %v4075_v61 = vadd.f32 %v4074_v47, %v3970_v18  ;;  %v11092_v6 = vld [vmem:[#allocation37_spill] sm:$0xff] }
 0x5da   :  { %v10063_v46 = vmul.f32 %v5042_v9, %v9931_v60  ;;  %v10066_v44 = vmul.f32 %v5042_v9, %v9929_v50 }
 0x5db   :  { %4080 = vadd.xlane.f32.xlu1 %v4079_v34  ;;  %4076 = vadd.xlane.f32.xlu0 %v4075_v61 }
 0x5dc   :  { %v3976_v31 = vmul.f32 %v10066_v44, %v11085_v53  ;;  %v3977_v38 = vmul.f32 %v10063_v46, %v11086_v17  ;;  %v3974_v19 = vmul.f32 %v10066_v44, %v11087_v2  ;;  %v3975_v40 = vmul.f32 %v10063_v46, %v11088_v26  ;;  %v11093_v17 = vld [vmem:[#allocation43_spill] sm:$0xff]  ;;  %v11094_v2 = vld [vmem:[#allocation45_spill] sm:$0xff]  ;;  %v11095_v26 = vld [vmem:[#allocation38_spill] sm:$0xff] }
 0x5de   :  { %v5044_v30 = vpop.eup %5043  ;;  %v4086_v60 = vsel %vm25_vm0, %v3977_v38, 0.0  ;;  %v4082_v50 = vsel %vm25_vm0, %v3975_v40, 0.0  ;;  %v3989_v38 = vmul.f32 %v9951_v27, %v11093_v17 }
 0x5df   :  { %v10079_v49 = vmul.f32 %v5044_v30, %v9938_v8  ;;  %v4087_v39 = vadd.f32 %v4086_v60, %v3976_v31  ;;  %v4083_v29 = vadd.f32 %v4082_v50, %v3974_v19  ;;  %v10082_v55 = vmul.f32 %v5044_v30, %v9936_v58  ;;  %v11096_v30 = vld [vmem:[#allocation39_spill] sm:$0xff] }
 0x5e0   :  { %v3987_v19 = vmul.f32 %v9951_v27, %v11094_v2  ;;  %v11099_v27 = vld [vmem:[#allocation42_spill] sm:$0xff] }
 0x5e1   :  { %4088 = vadd.xlane.f32.xlu1 %v4087_v39  ;;  %4084 = vadd.xlane.f32.xlu0 %v4083_v29  ;;  %v3980_v5 = vmul.f32 %v10082_v55, %v11089_v13  ;;  %v3981_v18 = vmul.f32 %v10079_v49, %v11090_v21  ;;  %v3978_v15 = vmul.f32 %v10082_v55, %v11091_v22  ;;  %v11098_v39 = vld [vmem:[#allocation41_spill] sm:$0xff]  ;;  %v11100_v22 = vld [vmem:[#allocation44_spill] sm:$0xff]  ;;  %v11103_v2 = vld [vmem:[#allocation46_spill] sm:$0xff] }
 0x5e2   :  { %v3979_v8 = vmul.f32 %v10079_v49, %v11092_v6  ;;  %v4110_v6 = vsel %vm25_vm0, %v3989_v38, 0.0 }
 0x5e3   :  { %v4094_v47 = vsel %vm25_vm0, %v3981_v18, 0.0  ;;  %v3988_v18 = vmul.f32 %v9954_v62, %v11099_v27  ;;  %v11109_v27 = vld [vmem:[#allocation55_spill] sm:$0xff] }
 0x5e4   :  { %v5046_v9 = vpop.eup %5045  ;;  %v4095_v34 = vadd.f32 %v4094_v47, %v3980_v5  ;;  %v4090_v58 = vsel %vm25_vm0, %v3979_v8, 0.0  ;;  %v4106_v8 = vsel %vm25_vm0, %v3987_v19, 0.0  ;;  %v11101_v47 = vld [vmem:[#allocation47_spill] sm:$0xff] }
 0x5e5   :  { %v10095_v61 = vmul.f32 %v5046_v9, %v9945_v41  ;;  %v4091_v53 = vadd.f32 %v4090_v58, %v3978_v15  ;;  %v10098_v31 = vmul.f32 %v5046_v9, %v9943_v1  ;;  %v11097_v41 = vld [vmem:[#allocation40_spill] sm:$0xff]  ;;  %v3986_v15 = vmul.f32 %v9954_v62, %v11100_v22  ;;  %v11110_v22 = vld [vmem:[#allocation57_spill] sm:$0xff] }
 0x5e6   :  { %4096 = vadd.xlane.f32.xlu1 %v4095_v34  ;;  %v3993_v9 = vmul.f32 %v9967_v14, %v11101_v47  ;;  %v11102_v34 = vld [vmem:[#allocation49_spill] sm:$0xff] }
 0x5e7   :  { %4092 = vadd.xlane.f32.xlu0 %v4091_v53  ;;  %v3984_v40 = vmul.f32 %v10098_v31, %v11095_v26  ;;  %v3985_v60 = vmul.f32 %v10095_v61, %v11096_v30  ;;  %v3982_v50 = vmul.f32 %v10098_v31, %v11097_v41  ;;  %v3983_v1 = vmul.f32 %v10095_v61, %v11098_v39  ;;  %v11105_v30 = vld [vmem:[#allocation51_spill] sm:$0xff]  ;;  %v11106_v41 = vld [vmem:[#allocation53_spill] sm:$0xff] }
 0x5e8   :  { %v3991_v58 = vmul.f32 %v9967_v14, %v11102_v34  ;;  %v4111_v53 = vadd.f32 %v4110_v6, %v3988_v18  ;;  %v4107_v17 = vadd.f32 %v4106_v8, %v3986_v15  ;;  %v3992_v26 = vmul.f32 %v9970_v23, %v11103_v2  ;;  %v11111_v8 = vld [vmem:[#allocation54_spill] sm:$0xff]  ;;  %v11114_v2 = vld [vmem:[#allocation61_spill] sm:$0xff] }
 0x5e9   :  { %v4102_v29 = vsel %vm25_vm0, %v3985_v60, 0.0  ;;  %v4098_v13 = vsel %vm25_vm0, %v3983_v1, 0.0  ;;  %v4118_v38 = vsel %vm25_vm0, %v3993_v9, 0.0  ;;  %v3997_v60 = vmul.f32 %v9983_v52, %v11105_v30  ;;  %v11107_v1 = vld [vmem:[#allocation50_spill] sm:$0xff]  ;;  %v11112_v9 = vld [vmem:[#allocation56_spill] sm:$0xff] }
 0x5ea   :  { %v4103_v5 = vadd.f32 %v4102_v29, %v3984_v40  ;;  %v4099_v21 = vadd.f32 %v4098_v13, %v3982_v50  ;;  %v11104_v40 = vld [vmem:[#allocation48_spill] sm:$0xff]  ;;  %v4114_v19 = vsel %vm25_vm0, %v3991_v58, 0.0  ;;  %v3995_v14 = vmul.f32 %v9983_v52, %v11106_v41 }
 0x5eb   :  { %v3990_v62 = vmul.f32 %v9970_v23, %v11104_v40  ;;  %v4119_v50 = vadd.f32 %v4118_v38, %v3992_v26  ;;  %v3996_v29 = vmul.f32 %v9986_v32, %v11107_v1  ;;  %v11108_v13 = vld [vmem:[#allocation52_spill] sm:$0xff]  ;;  %v4001_v18 = vmul.f32 %v9995_v11, %v11109_v27 }
 0x5ec   :  { %4104 = vadd.xlane.f32.xlu1 %v4103_v5  ;;  %4100 = vadd.xlane.f32.xlu0 %v4099_v21  ;;  %v3994_v23 = vmul.f32 %v9986_v32, %v11108_v13  ;;  %v4126_v5 = vsel %vm25_vm0, %v3997_v60, 0.0  ;;  %v4122_v21 = vsel %vm25_vm0, %v3995_v14, 0.0  ;;  %v3999_v52 = vmul.f32 %v9995_v11, %v11110_v22 }
 0x5ed   :  { %v4115_v39 = vadd.f32 %v4114_v19, %v3990_v62  ;;  %v4127_v15 = vadd.f32 %v4126_v5, %v3996_v29  ;;  %v4000_v47 = vmul.f32 %v10000_v57, %v11111_v8  ;;  %v3998_v32 = vmul.f32 %v10000_v57, %v11112_v9  ;;  %v11115_v62 = vld [vmem:[#allocation58_spill] sm:$0xff]  ;;  %v11116_v19 = vld [vmem:[#allocation60_spill] sm:$0xff] }
 0x5ee   :  { %v4123_v6 = vadd.f32 %v4122_v21, %v3994_v23  ;;  %v4134_v34 = vsel %vm25_vm0, %v4001_v18, 0.0  ;;  %v4130_v58 = vsel %vm25_vm0, %v3999_v52, 0.0  ;;  %v4003_v11 = vmul.f32 %v10009_v63, %v11114_v2  ;;  %v11117_v52 = vld [vmem:[#allocation77_spill] sm:$0xff] }
 0x5ef   :  { %v4135_v26 = vadd.f32 %v4134_v34, %v4000_v47  ;;  %v4131_v40 = vadd.f32 %v4130_v58, %v3998_v32  ;;  %v4004_v38 = vmul.f32 %v10017_v7, %v11115_v62  ;;  %v4002_v57 = vmul.f32 %v10017_v7, %v11116_v19 }
 0x5f0   :  { %4112 = vadd.xlane.f32.xlu1 %v4111_v53  ;;  %4108 = vadd.xlane.f32.xlu0 %v4107_v17  ;;  %v11113_v53 = vld [vmem:[#allocation59_spill] sm:$0xff]  ;;  %v4138_v60 = vsel %vm25_vm0, %v4003_v11, 0.0  ;;  %v4009_v41 = vmul.f32 %v10031_v3, %v10997_v24  ;;  %v4006_v7 = vmul.f32 %v10034_v0, %v10944_v45  ;;  %v4013_v24 = vmul.f32 %v10047_v56, %v10945_v12 }
 0x5f1   :  { %v4005_v17 = vmul.f32 %v10009_v63, %v11113_v53  ;;  %v4007_v63 = vmul.f32 %v10031_v3, %v10942_v20  ;;  %v4011_v20 = vmul.f32 %v10047_v56, %v10834_v16  ;;  %v4010_v45 = vmul.f32 %v10050_v36, %v10833_v25 }
 0x5f2   :  { %v4150_v1 = vsel %vm25_vm0, %v4009_v41, 0.0  ;;  %v4017_v12 = vmul.f32 %v10063_v46, %v10838_v28  ;;  %v4015_v16 = vmul.f32 %v10063_v46, %v10846_v54  ;;  %v4014_v25 = vmul.f32 %v10066_v44, %v10845_v4 }
 0x5f3   :  { %v4142_v30 = vsel %vm25_vm0, %v4005_v17, 0.0  ;;  %v4146_v29 = vsel %vm25_vm0, %v4007_v63, 0.0  ;;  %v4154_v23 = vsel %vm25_vm0, %v4011_v20, 0.0  ;;  %v4021_v28 = vmul.f32 %v10079_v49, %v10948_v42 }
 0x5f4   :  { %4120 = vadd.xlane.f32.xlu1 %v4119_v50  ;;  %4116 = vadd.xlane.f32.xlu0 %v4115_v39  ;;  %v4143_v14 = vadd.f32 %v4142_v30, %v4004_v38  ;;  %v4139_v50 = vadd.f32 %v4138_v60, %v4002_v57  ;;  %v4008_v39 = vmul.f32 %v10034_v0, %v10943_v43  ;;  %v4158_v0 = vsel %vm25_vm0, %v4013_v24, 0.0 }
 0x5f5   :  { %v4147_v13 = vadd.f32 %v4146_v29, %v4006_v7  ;;  %v4012_v43 = vmul.f32 %v10050_v36, %v10946_v48  ;;  %v4155_v5 = vadd.f32 %v4154_v23, %v4010_v45  ;;  %v4016_v48 = vmul.f32 %v10066_v44, %v10947_v10 }
 0x5f6   :  { %v4151_v3 = vadd.f32 %v4150_v1, %v4008_v39  ;;  %v4166_v36 = vsel %vm25_vm0, %v4017_v12, 0.0  ;;  %v4162_v21 = vsel %vm25_vm0, %v4015_v16, 0.0  ;;  %v4019_v54 = vmul.f32 %v10079_v49, %v11000_v37 }
 0x5f7   :  { %v4159_v56 = vadd.f32 %v4158_v0, %v4012_v43  ;;  %v4167_v46 = vadd.f32 %v4166_v36, %v4016_v48  ;;  %v4163_v27 = vadd.f32 %v4162_v21, %v4014_v25  ;;  %v4020_v10 = vmul.f32 %v10082_v55, %v10949_v33 }
 0x5f8   :  { %4128 = vadd.xlane.f32.xlu1 %v4127_v15  ;;  %4124 = vadd.xlane.f32.xlu0 %v4123_v6  ;;  %v4018_v4 = vmul.f32 %v10082_v55, %v8345_v59  ;;  %v4174_v44 = vsel %vm25_vm0, %v4021_v28, 0.0  ;;  %v4170_v18 = vsel %vm25_vm0, %v4019_v54, 0.0  ;;  %v4025_v42 = vmul.f32 %v10095_v61, %v11001_v51  ;;  %v11118_v15 = vld [vmem:[#allocation79_spill] sm:$0xff] }
 0x5f9   :  { %v4023_v37 = vmul.f32 %v10095_v61, %v11007_v35  ;;  %v4175_v49 = vadd.f32 %v4174_v44, %v4020_v10  ;;  %v4024_v33 = vmul.f32 %v10098_v31, %v11117_v52  ;;  %v4022_v59 = vmul.f32 %v10098_v31, %v11118_v15 }
 0x5fa   :  { %v4171_v22 = vadd.f32 %v4170_v18, %v4018_v4  ;;  %v4182_v55 = vsel %vm25_vm0, %v4025_v42, 0.0 }
 0x5fb   :  { %v4178_v6 = vsel %vm25_vm0, %v4023_v37, 0.0  ;;  %v4183_v51 = vadd.f32 %v4182_v55, %v4024_v33 }
 0x5fc   :  { %4136 = vadd.xlane.f32.xlu1 %v4135_v26  ;;  %4132 = vadd.xlane.f32.xlu0 %v4131_v40  ;;  %v4179_v8 = vadd.f32 %v4178_v6, %v4022_v59 }
 0x600   :  { %4144 = vadd.xlane.f32.xlu1 %v4143_v14  ;;  %4140 = vadd.xlane.f32.xlu0 %v4139_v50 }
 0x604   :  { %4152 = vadd.xlane.f32.xlu1 %v4151_v3  ;;  %4148 = vadd.xlane.f32.xlu0 %v4147_v13 }
 0x608   :  { %4160 = vadd.xlane.f32.xlu1 %v4159_v56  ;;  %4156 = vadd.xlane.f32.xlu0 %v4155_v5 }
 0x60c   :  { %4168 = vadd.xlane.f32.xlu1 %v4167_v46  ;;  %4164 = vadd.xlane.f32.xlu0 %v4163_v27 }
 0x610   :  { %4176 = vadd.xlane.f32.xlu1 %v4175_v49  ;;  %4172 = vadd.xlane.f32.xlu0 %v4171_v22 }
 0x614   :  { %4184 = vadd.xlane.f32.xlu1 %v4183_v51  ;;  %4180 = vadd.xlane.f32.xlu0 %v4179_v8 }
 0x63e   :  { %v4033_v35 = vpop.xlane.xlu1 %4032  ;;  %v4029_v61 = vpop.xlane.xlu0 %4028 }
 0x63f   :  { %v4267_v47 = vmul.f32 %v4033_v35, %v4033_v35  ;;  %v4266_v9 = vmul.f32 %v4029_v61, %v4029_v61  ;;  %v4187_v2 = vand.u32 2147483647, %v4033_v35  ;;  %v4186_v40 = vand.u32 2147483647, %v4029_v61 }
 0x641   :  { %v4307_v32 = vadd.f32 1.0, %v4267_v47  ;;  %v4306_v34 = vadd.f32 1.0, %v4266_v9  ;;  %v4227_v57 = vmul.f32 %v4187_v2, %v4033_v35  ;;  %v4226_v41 = vmul.f32 %v4186_v40, %v4029_v61 }
 0x643   :  { %5047 = vrcp.f32 %v4307_v32 }
 0x644   :  { %5049 = vrcp.f32 %v4306_v34 }
 0x649   :  { %v4041_v58 = vpop.xlane.xlu1 %4040  ;;  %v4037_v31 = vpop.xlane.xlu0 %4036 }
 0x64a   :  { %v4269_v53 = vmul.f32 %v4041_v58, %v4041_v58  ;;  %v4268_v17 = vmul.f32 %v4037_v31, %v4037_v31  ;;  %v4189_v13 = vand.u32 2147483647, %v4041_v58  ;;  %v4188_v0 = vand.u32 2147483647, %v4037_v31 }
 0x64c   :  { %v4309_v11 = vadd.f32 1.0, %v4269_v53  ;;  %v4308_v26 = vadd.f32 1.0, %v4268_v17  ;;  %v4229_v5 = vmul.f32 %v4189_v13, %v4041_v58  ;;  %v4228_v21 = vmul.f32 %v4188_v0, %v4037_v31 }
 0x64e   :  { %5051 = vrcp.f32 %v4309_v11 }
 0x64f   :  { %5053 = vrcp.f32 %v4308_v26 }
 0x650   :  { %v4049_v62 = vpop.xlane.xlu1 %4048  ;;  %v4045_v19 = vpop.xlane.xlu0 %4044 }
 0x651   :  { %v4271_v38 = vmul.f32 %v4049_v62, %v4049_v62  ;;  %v4270_v30 = vmul.f32 %v4045_v19, %v4045_v19  ;;  %v5048_v60 = vpop.eup %5047  ;;  %v4191_v28 = vand.u32 2147483647, %v4049_v62  ;;  %v4190_v4 = vand.u32 2147483647, %v4045_v19 }
 0x652   :  { %v5050_v14 = vpop.eup %5049  ;;  %v4387_v50 = vmul.f32 %v5048_v60, %v4227_v57 }
 0x653   :  { %v4311_v63 = vadd.f32 1.0, %v4271_v38  ;;  %v4310_v39 = vadd.f32 1.0, %v4270_v30  ;;  %v4386_v1 = vmul.f32 %v5050_v14, %v4226_v41  ;;  %v4231_v49 = vmul.f32 %v4191_v28, %v4049_v62 }
 0x654   :  { %v4057_v7 = vpop.xlane.xlu1 %4056  ;;  %v4053_v24 = vpop.xlane.xlu0 %4052  ;;  %4428 = vst.msk [vmem:[%s10474_s2 + $0x8] sm:$0xff] %vm4426_vm9, %v4387_v50  ;;  %v4230_v33 = vmul.f32 %v4190_v4, %v4045_v19 }
 0x655   :  { %5055 = vrcp.f32 %v4311_v63  ;;  %v4273_v29 = vmul.f32 %v4057_v7, %v4057_v7  ;;  %v4272_v20 = vmul.f32 %v4053_v24, %v4053_v24  ;;  %4427 = vst.msk [vmem:[%s10474_s2] sm:$0xff] %vm4426_vm9, %v4386_v1  ;;  %v4193_v22 = vand.u32 2147483647, %v4057_v7 }
 0x656   :  { %5057 = vrcp.f32 %v4310_v39  ;;  %v4192_v15 = vand.u32 2147483647, %v4053_v24 }
 0x657   :  { %v4313_v3 = vadd.f32 1.0, %v4273_v29  ;;  %v4312_v43 = vadd.f32 1.0, %v4272_v20  ;;  %v4233_v47 = vmul.f32 %v4193_v22, %v4057_v7 }
 0x658   :  { %v4065_v45 = vpop.xlane.xlu1 %4064  ;;  %v4061_v12 = vpop.xlane.xlu0 %4060  ;;  %v4232_v58 = vmul.f32 %v4192_v15, %v4053_v24 }
 0x659   :  { %5059 = vrcp.f32 %v4313_v3  ;;  %v4275_v23 = vmul.f32 %v4065_v45, %v4065_v45  ;;  %v4274_v16 = vmul.f32 %v4061_v12, %v4061_v12  ;;  %v4195_v9 = vand.u32 2147483647, %v4065_v45 }
 0x65a   :  { %5061 = vrcp.f32 %v4312_v43  ;;  %v4194_v31 = vand.u32 2147483647, %v4061_v12 }
 0x65b   :  { %v4315_v56 = vadd.f32 1.0, %v4275_v23  ;;  %v4314_v48 = vadd.f32 1.0, %v4274_v16  ;;  %v5052_v36 = vpop.eup %5051  ;;  %v4235_v62 = vmul.f32 %v4195_v9, %v4065_v45 }
 0x65c   :  { %v4073_v25 = vpop.xlane.xlu1 %4072  ;;  %v4069_v46 = vpop.xlane.xlu0 %4068  ;;  %v4389_v10 = vmul.f32 %v5052_v36, %v4229_v5  ;;  %v4234_v60 = vmul.f32 %v4194_v31, %v4061_v12 }
 0x65d   :  { %5063 = vrcp.f32 %v4315_v56  ;;  %v4277_v54 = vmul.f32 %v4073_v25, %v4073_v25  ;;  %v5054_v27 = vpop.eup %5053  ;;  %v4276_v44 = vmul.f32 %v4069_v46, %v4069_v46  ;;  %v4197_v38 = vand.u32 2147483647, %v4073_v25 }
 0x65e   :  { %5065 = vrcp.f32 %v4314_v48  ;;  %v4388_v18 = vmul.f32 %v5054_v27, %v4228_v21  ;;  %4430 = vst.msk [vmem:[%s10474_s2 + $0x18] sm:$0xff] %vm4426_vm9, %v4389_v10  ;;  %v4196_v41 = vand.u32 2147483647, %v4069_v46 }
 0x65f   :  { %v4317_v42 = vadd.f32 1.0, %v4277_v54  ;;  %v4316_v37 = vadd.f32 1.0, %v4276_v44  ;;  %v4237_v1 = vmul.f32 %v4197_v38, %v4073_v25 }
 0x660   :  { %4429 = vst.msk [vmem:[%s10474_s2 + $0x10] sm:$0xff] %vm4426_vm9, %v4388_v18  ;;  %v4236_v20 = vmul.f32 %v4196_v41, %v4069_v46 }
 0x661   :  { %5067 = vrcp.f32 %v4317_v42 }
 0x662   :  { %v5056_v52 = vpop.eup %5055  ;;  %5069 = vrcp.f32 %v4316_v37 }
 0x663   :  { %v5058_v6 = vpop.eup %5057  ;;  %v4391_v51 = vmul.f32 %v5056_v52, %v4231_v49 }
 0x664   :  { %v4081_v59 = vpop.xlane.xlu1 %4080  ;;  %v4077_v55 = vpop.xlane.xlu0 %4076  ;;  %v4390_v35 = vmul.f32 %v5058_v6, %v4230_v33 }
 0x665   :  { %v4279_v8 = vmul.f32 %v4081_v59, %v4081_v59  ;;  %v4278_v61 = vmul.f32 %v4077_v55, %v4077_v55  ;;  %4432 = vst.msk [vmem:[%s10474_s2 + $0x28] sm:$0xff] %vm4426_vm9, %v4391_v51  ;;  %v4199_v0 = vand.u32 2147483647, %v4081_v59  ;;  %v4198_v16 = vand.u32 2147483647, %v4077_v55 }
 0x666   :  { %v5060_v34 = vpop.eup %5059  ;;  %4431 = vst.msk [vmem:[%s10474_s2 + $0x20] sm:$0xff] %vm4426_vm9, %v4390_v35 }
 0x667   :  { %v4319_v32 = vadd.f32 1.0, %v4279_v8  ;;  %v4318_v53 = vadd.f32 1.0, %v4278_v61  ;;  %v5062_v17 = vpop.eup %5061  ;;  %v4393_v2 = vmul.f32 %v5060_v34, %v4233_v47  ;;  %v4239_v48 = vmul.f32 %v4199_v0, %v4081_v59 }
 0x668   :  { %v4392_v11 = vmul.f32 %v5062_v17, %v4232_v58  ;;  %v4238_v28 = vmul.f32 %v4198_v16, %v4077_v55 }
 0x669   :  { %5071 = vrcp.f32 %v4319_v32  ;;  %4434 = vst.msk [vmem:[%s10474_s2 + $0x38] sm:$0xff] %vm4426_vm9, %v4393_v2 }
 0x66a   :  { %5073 = vrcp.f32 %v4318_v53  ;;  %v4089_v26 = vpop.xlane.xlu1 %4088  ;;  %v4085_v40 = vpop.xlane.xlu0 %4084  ;;  %4433 = vst.msk [vmem:[%s10474_s2 + $0x30] sm:$0xff] %vm4426_vm9, %v4392_v11 }
 0x66b   :  { %v4281_v19 = vmul.f32 %v4089_v26, %v4089_v26  ;;  %v4280_v57 = vmul.f32 %v4085_v40, %v4085_v40  ;;  %v5064_v30 = vpop.eup %5063  ;;  %v4201_v4 = vand.u32 2147483647, %v4089_v26  ;;  %v4200_v18 = vand.u32 2147483647, %v4085_v40 }
 0x66c   :  { %v5066_v63 = vpop.eup %5065  ;;  %v4395_v14 = vmul.f32 %v5064_v30, %v4235_v62 }
 0x66d   :  { %v4321_v50 = vadd.f32 1.0, %v4281_v19  ;;  %v4394_v39 = vmul.f32 %v5066_v63, %v4234_v60  ;;  %v4320_v7 = vadd.f32 1.0, %v4280_v57  ;;  %v4241_v33 = vmul.f32 %v4201_v4, %v4089_v26 }
 0x66e   :  { %4436 = vst.msk [vmem:[%s10474_s2 + $0x48] sm:$0xff] %vm4426_vm9, %v4395_v14  ;;  %v5068_v24 = vpop.eup %5067  ;;  %v4240_v55 = vmul.f32 %v4200_v18, %v4085_v40 }
 0x66f   :  { %5075 = vrcp.f32 %v4321_v50  ;;  %v4097_v29 = vpop.xlane.xlu1 %4096  ;;  %4435 = vst.msk [vmem:[%s10474_s2 + $0x40] sm:$0xff] %vm4426_vm9, %v4394_v39  ;;  %v5070_v43 = vpop.eup %5069  ;;  %v4397_v45 = vmul.f32 %v5068_v24, %v4237_v1 }
 0x670   :  { %5077 = vrcp.f32 %v4320_v7  ;;  %v4283_v3 = vmul.f32 %v4097_v29, %v4097_v29  ;;  %v4093_v13 = vpop.xlane.xlu0 %4092  ;;  %v4396_v12 = vmul.f32 %v5070_v43, %v4236_v20  ;;  %v4203_v6 = vand.u32 2147483647, %v4097_v29 }
 0x671   :  { %v4282_v23 = vmul.f32 %v4093_v13, %v4093_v13  ;;  %4438 = vst.msk [vmem:[%s10474_s2 + $0x58] sm:$0xff] %vm4426_vm9, %v4397_v45  ;;  %v4202_v61 = vand.u32 2147483647, %v4093_v13 }
 0x672   :  { %v4323_v56 = vadd.f32 1.0, %v4283_v3  ;;  %4437 = vst.msk [vmem:[%s10474_s2 + $0x50] sm:$0xff] %vm4426_vm9, %v4396_v12  ;;  %v4243_v53 = vmul.f32 %v4203_v6, %v4097_v29 }
 0x673   :  { %v4322_v5 = vadd.f32 1.0, %v4282_v23  ;;  %v4242_v11 = vmul.f32 %v4202_v61, %v4093_v13 }
 0x674   :  { %5079 = vrcp.f32 %v4323_v56 }
 0x675   :  { %5081 = vrcp.f32 %v4322_v5  ;;  %v4105_v25 = vpop.xlane.xlu1 %4104  ;;  %v10258_v36 = vpop.xlane.xlu0 %4100 }
 0x676   :  { %v5072_v21 = vpop.eup %5071  ;;  %v4285_v54 = vmul.f32 %v4105_v25, %v4105_v25  ;;  %v4284_v46 = vmul.f32 %v10258_v36, %v10258_v36  ;;  %v4205_v57 = vand.u32 2147483647, %v4105_v25  ;;  %v4204_v41 = vand.u32 2147483647, %v10258_v36 }
 0x677   :  { %v5074_v27 = vpop.eup %5073  ;;  %v4399_v10 = vmul.f32 %v5072_v21, %v4239_v48 }
 0x678   :  { %v4398_v44 = vmul.f32 %v5074_v27, %v4238_v28  ;;  %v4325_v42 = vadd.f32 1.0, %v4285_v54  ;;  %v4324_v37 = vadd.f32 1.0, %v4284_v46  ;;  %v4245_v1 = vmul.f32 %v4205_v57, %v4105_v25 }
 0x679   :  { %4440 = vst.msk [vmem:[%s10474_s2 + $0x68] sm:$0xff] %vm4426_vm9, %v4399_v10  ;;  %v10266_v49 = vpop.xlane.xlu1 %4112  ;;  %v10268_v22 = vpop.xlane.xlu0 %4108  ;;  %v4244_v3 = vmul.f32 %v4204_v41, %v10258_v36 }
 0x67a   :  { %4439 = vst.msk [vmem:[%s10474_s2 + $0x60] sm:$0xff] %vm4426_vm9, %v4398_v44  ;;  %5083 = vrcp.f32 %v4325_v42  ;;  %v4287_v52 = vmul.f32 %v10266_v49, %v10266_v49  ;;  %v4286_v15 = vmul.f32 %v10268_v22, %v10268_v22  ;;  %v4207_v29 = vand.u32 2147483647, %v10266_v49 }
 0x67b   :  { %5085 = vrcp.f32 %v4324_v37  ;;  %v4206_v13 = vand.u32 2147483647, %v10268_v22 }
 0x67c   :  { %v5076_v59 = vpop.eup %5075  ;;  %v4327_v51 = vadd.f32 1.0, %v4287_v52  ;;  %v4326_v47 = vadd.f32 1.0, %v4286_v15  ;;  %v4247_v48 = vmul.f32 %v4207_v29, %v10266_v49 }
 0x67d   :  { %v5078_v8 = vpop.eup %5077  ;;  %v4401_v35 = vmul.f32 %v5076_v59, %v4241_v33  ;;  %v10278_v9 = vpop.xlane.xlu1 %4120  ;;  %v4246_v28 = vmul.f32 %v4206_v13, %v10268_v22 }
 0x67e   :  { %v10280_v32 = vpop.xlane.xlu0 %4116  ;;  %v4400_v34 = vmul.f32 %v5078_v8, %v4240_v55  ;;  %5087 = vrcp.f32 %v4327_v51  ;;  %v4289_v58 = vmul.f32 %v10278_v9, %v10278_v9  ;;  %v4209_v25 = vand.u32 2147483647, %v10278_v9 }
 0x67f   :  { %4442 = vst.msk [vmem:[%s10474_s2 + $0x78] sm:$0xff] %vm4426_vm9, %v4401_v35  ;;  %5089 = vrcp.f32 %v4326_v47  ;;  %v4288_v31 = vmul.f32 %v10280_v32, %v10280_v32  ;;  %v4208_v54 = vand.u32 2147483647, %v10280_v32 }
 0x680   :  { %4441 = vst.msk [vmem:[%s10474_s2 + $0x70] sm:$0xff] %vm4426_vm9, %v4400_v34  ;;  %v4329_v17 = vadd.f32 1.0, %v4289_v58  ;;  %v4249_v49 = vmul.f32 %v4209_v25, %v10278_v9 }
 0x681   :  { %v5080_v2 = vpop.eup %5079  ;;  %v4328_v26 = vadd.f32 1.0, %v4288_v31  ;;  %v10294_v40 = vpop.xlane.xlu1 %4128  ;;  %v4248_v15 = vmul.f32 %v4208_v54, %v10280_v32 }
 0x682   :  { %v10296_v62 = vpop.xlane.xlu0 %4124  ;;  %v5082_v38 = vpop.eup %5081  ;;  %v4403_v19 = vmul.f32 %v5080_v2, %v4243_v53  ;;  %5091 = vrcp.f32 %v4329_v17  ;;  %v4291_v30 = vmul.f32 %v10294_v40, %v10294_v40  ;;  %v4211_v22 = vand.u32 2147483647, %v10294_v40 }
 0x683   :  { %v4402_v60 = vmul.f32 %v5082_v38, %v4242_v11  ;;  %5093 = vrcp.f32 %v4328_v26  ;;  %v4290_v63 = vmul.f32 %v10296_v62, %v10296_v62  ;;  %v4210_v59 = vand.u32 2147483647, %v10296_v62 }
 0x684   :  { %4444 = vst.msk [vmem:[%s10474_s2 + $0x88] sm:$0xff] %vm4426_vm9, %v4403_v19  ;;  %v4331_v14 = vadd.f32 1.0, %v4291_v30  ;;  %v4251_v32 = vmul.f32 %v4211_v22, %v10294_v40 }
 0x685   :  { %4443 = vst.msk [vmem:[%s10474_s2 + $0x80] sm:$0xff] %vm4426_vm9, %v4402_v60  ;;  %v4330_v50 = vadd.f32 1.0, %v4290_v63  ;;  %v10311_v39 = vpop.xlane.xlu1 %4136  ;;  %v4250_v53 = vmul.f32 %v4210_v59, %v10296_v62 }
 0x686   :  { %v10313_v7 = vpop.xlane.xlu0 %4132  ;;  %5095 = vrcp.f32 %v4331_v14  ;;  %v4293_v24 = vmul.f32 %v10311_v39, %v10311_v39  ;;  %v4213_v34 = vand.u32 2147483647, %v10311_v39 }
 0x687   :  { %v5084_v20 = vpop.eup %5083  ;;  %5097 = vrcp.f32 %v4330_v50  ;;  %v4292_v43 = vmul.f32 %v10313_v7, %v10313_v7  ;;  %v4212_v17 = vand.u32 2147483647, %v10313_v7 }
 0x688   :  { %v5086_v45 = vpop.eup %5085  ;;  %v4405_v0 = vmul.f32 %v5084_v20, %v4245_v1  ;;  %v4333_v23 = vadd.f32 1.0, %v4293_v24  ;;  %v4253_v62 = vmul.f32 %v4213_v34, %v10311_v39 }
 0x689   :  { %v4404_v12 = vmul.f32 %v5086_v45, %v4244_v3  ;;  %v4332_v16 = vadd.f32 1.0, %v4292_v43  ;;  %v10322_v56 = vpop.xlane.xlu1 %4144  ;;  %v4252_v14 = vmul.f32 %v4212_v17, %v10313_v7 }
 0x68a   :  { %v10324_v5 = vpop.xlane.xlu0 %4140  ;;  %4446 = vst.msk [vmem:[%s10474_s2 + $0x98] sm:$0xff] %vm4426_vm9, %v4405_v0  ;;  %5099 = vrcp.f32 %v4333_v23  ;;  %v4295_v36 = vmul.f32 %v10322_v56, %v10322_v56  ;;  %v4215_v60 = vand.u32 2147483647, %v10322_v56 }
 0x68b   :  { %v5088_v21 = vpop.eup %5087  ;;  %4445 = vst.msk [vmem:[%s10474_s2 + $0x90] sm:$0xff] %vm4426_vm9, %v4404_v12  ;;  %5101 = vrcp.f32 %v4332_v16  ;;  %v4294_v46 = vmul.f32 %v10324_v5, %v10324_v5  ;;  %v4214_v50 = vand.u32 2147483647, %v10324_v5 }
 0x68c   :  { %v5090_v27 = vpop.eup %5089  ;;  %v4407_v10 = vmul.f32 %v5088_v21, %v4247_v48  ;;  %v4335_v4 = vadd.f32 1.0, %v4295_v36  ;;  %v4255_v7 = vmul.f32 %v4215_v60, %v10322_v56 }
 0x68d   :  { %v4406_v44 = vmul.f32 %v5090_v27, %v4246_v28  ;;  %v4334_v18 = vadd.f32 1.0, %v4294_v46  ;;  %v10342_v42 = vpop.xlane.xlu1 %4152  ;;  %v4254_v12 = vmul.f32 %v4214_v50, %v10324_v5 }
 0x68e   :  { %v10344_v37 = vpop.xlane.xlu0 %4148  ;;  %4448 = vst.msk [vmem:[%s10474_s2 + $0xa8] sm:$0xff] %vm4426_vm9, %v4407_v10  ;;  %5103 = vrcp.f32 %v4335_v4  ;;  %v4297_v52 = vmul.f32 %v10342_v42, %v10342_v42  ;;  %v4217_v45 = vand.u32 2147483647, %v10342_v42 }
 0x68f   :  { %v5092_v33 = vpop.eup %5091  ;;  %4447 = vst.msk [vmem:[%s10474_s2 + $0xa0] sm:$0xff] %vm4426_vm9, %v4406_v44  ;;  %5105 = vrcp.f32 %v4334_v18  ;;  %v4296_v55 = vmul.f32 %v10344_v37, %v10344_v37  ;;  %v4216_v16 = vand.u32 2147483647, %v10344_v37 }
 0x690   :  { %v5094_v6 = vpop.eup %5093  ;;  %v4409_v51 = vmul.f32 %v5092_v33, %v4249_v49  ;;  %v4337_v8 = vadd.f32 1.0, %v4297_v52  ;;  %v4257_v27 = vmul.f32 %v4217_v45, %v10342_v42 }
 0x691   :  { %v4408_v35 = vmul.f32 %v5094_v6, %v4248_v15  ;;  %v4336_v61 = vadd.f32 1.0, %v4296_v55  ;;  %v10362_v47 = vpop.xlane.xlu1 %4160  ;;  %v4256_v44 = vmul.f32 %v4216_v16, %v10344_v37 }
 0x692   :  { %v10364_v9 = vpop.xlane.xlu0 %4156  ;;  %4450 = vst.msk [vmem:[%s10474_s2 + $0xb8] sm:$0xff] %vm4426_vm9, %v4409_v51  ;;  %5107 = vrcp.f32 %v4337_v8  ;;  %v4299_v58 = vmul.f32 %v10362_v47, %v10362_v47  ;;  %v4219_v5 = vand.u32 2147483647, %v10362_v47 }
 0x693   :  { %v5096_v31 = vpop.eup %5095  ;;  %4449 = vst.msk [vmem:[%s10474_s2 + $0xb0] sm:$0xff] %vm4426_vm9, %v4408_v35  ;;  %5109 = vrcp.f32 %v4336_v61  ;;  %v4298_v2 = vmul.f32 %v10364_v9, %v10364_v9  ;;  %v4218_v18 = vand.u32 2147483647, %v10364_v9 }
 0x694   :  { %v5098_v11 = vpop.eup %5097  ;;  %v4411_v26 = vmul.f32 %v5096_v31, %v4251_v32  ;;  %v4339_v40 = vadd.f32 1.0, %v4299_v58  ;;  %v4259_v59 = vmul.f32 %v4219_v5, %v10362_v47 }
 0x695   :  { %v4410_v38 = vmul.f32 %v5098_v11, %v4250_v53  ;;  %v4338_v19 = vadd.f32 1.0, %v4298_v2  ;;  %v10382_v57 = vpop.xlane.xlu1 %4168  ;;  %v4258_v6 = vmul.f32 %v4218_v18, %v10364_v9 }
 0x696   :  { %v10384_v30 = vpop.xlane.xlu0 %4164  ;;  %4452 = vst.msk [vmem:[%s10474_s2 + $0xc8] sm:$0xff] %vm4426_vm9, %v4411_v26  ;;  %5111 = vrcp.f32 %v4339_v40  ;;  %v4301_v41 = vmul.f32 %v10382_v57, %v10382_v57  ;;  %v4221_v55 = vand.u32 2147483647, %v10382_v57 }
 0x697   :  { %v5100_v63 = vpop.eup %5099  ;;  %4451 = vst.msk [vmem:[%s10474_s2 + $0xc0] sm:$0xff] %vm4426_vm9, %v4410_v38  ;;  %5113 = vrcp.f32 %v4338_v19  ;;  %v4300_v39 = vmul.f32 %v10384_v30, %v10384_v30  ;;  %v4220_v51 = vand.u32 2147483647, %v10384_v30 }
 0x698   :  { %v5102_v1 = vpop.eup %5101  ;;  %v4413_v29 = vmul.f32 %v5100_v63, %v4253_v62  ;;  %v4341_v24 = vadd.f32 1.0, %v4301_v41  ;;  %v4261_v47 = vmul.f32 %v4221_v55, %v10382_v57 }
 0x699   :  { %v4412_v20 = vmul.f32 %v5102_v1, %v4252_v14  ;;  %v4340_v3 = vadd.f32 1.0, %v4300_v39  ;;  %v4177_v13 = vpop.xlane.xlu1 %4176  ;;  %v4260_v9 = vmul.f32 %v4220_v51, %v10384_v30 }
 0x69a   :  { %v4173_v43 = vpop.xlane.xlu0 %4172  ;;  %4454 = vst.msk [vmem:[%s10474_s2 + $0xd8] sm:$0xff] %vm4426_vm9, %v4413_v29  ;;  %5115 = vrcp.f32 %v4341_v24  ;;  %v4303_v0 = vmul.f32 %v4177_v13, %v4177_v13  ;;  %v4223_v32 = vand.u32 2147483647, %v4177_v13 }
 0x69b   :  { %v5104_v23 = vpop.eup %5103  ;;  %4453 = vst.msk [vmem:[%s10474_s2 + $0xd0] sm:$0xff] %vm4426_vm9, %v4412_v20  ;;  %5117 = vrcp.f32 %v4340_v3  ;;  %v4302_v48 = vmul.f32 %v4173_v43, %v4173_v43  ;;  %v4222_v58 = vand.u32 2147483647, %v4173_v43 }
 0x69c   :  { %v5106_v25 = vpop.eup %5105  ;;  %v4415_v36 = vmul.f32 %v5104_v23, %v4255_v7  ;;  %v4343_v21 = vadd.f32 1.0, %v4303_v0  ;;  %v4263_v2 = vmul.f32 %v4223_v32, %v4177_v13 }
 0x69d   :  { %v4414_v56 = vmul.f32 %v5106_v25, %v4254_v12  ;;  %v4342_v28 = vadd.f32 1.0, %v4302_v48  ;;  %v4185_v54 = vpop.xlane.xlu1 %4184  ;;  %v4262_v40 = vmul.f32 %v4222_v58, %v4173_v43 }
 0x69e   :  { %v4181_v46 = vpop.xlane.xlu0 %4180  ;;  %4456 = vst.msk [vmem:[%s10474_s2 + $0xe8] sm:$0xff] %vm4426_vm9, %v4415_v36  ;;  %5119 = vrcp.f32 %v4343_v21  ;;  %v4305_v10 = vmul.f32 %v4185_v54, %v4185_v54  ;;  %v4225_v11 = vand.u32 2147483647, %v4185_v54 }
 0x69f   :  { %v5108_v4 = vpop.eup %5107  ;;  %4455 = vst.msk [vmem:[%s10474_s2 + $0xe0] sm:$0xff] %vm4426_vm9, %v4414_v56  ;;  %5121 = vrcp.f32 %v4342_v28  ;;  %v4304_v49 = vmul.f32 %v4181_v46, %v4181_v46  ;;  %v4224_v38 = vand.u32 2147483647, %v4181_v46 }
 0x6a0   :  { %v5110_v22 = vpop.eup %5109  ;;  %v4417_v52 = vmul.f32 %v5108_v4, %v4257_v27  ;;  %v4345_v33 = vadd.f32 1.0, %v4305_v10  ;;  %v4265_v62 = vmul.f32 %v4225_v11, %v4185_v54 }
 0x6a1   :  { %v4416_v42 = vmul.f32 %v5110_v22, %v4256_v44  ;;  %v4344_v15 = vadd.f32 1.0, %v4304_v49  ;;  %v4264_v41 = vmul.f32 %v4224_v38, %v4181_v46 }
 0x6a2   :  { %4458 = vst.msk [vmem:[%s10474_s2 + $0xf8] sm:$0xff] %vm4426_vm9, %v4417_v52  ;;  %5123 = vrcp.f32 %v4345_v33 }
 0x6a3   :  { %v5112_v37 = vpop.eup %5111  ;;  %4457 = vst.msk [vmem:[%s10474_s2 + $0xf0] sm:$0xff] %vm4426_vm9, %v4416_v42  ;;  %5125 = vrcp.f32 %v4344_v15 }
 0x6a4   :  { %v5114_v8 = vpop.eup %5113  ;;  %v4419_v35 = vmul.f32 %v5112_v37, %v4259_v59 }
 0x6a5   :  { %v4418_v61 = vmul.f32 %v5114_v8, %v4258_v6 }
 0x6a6   :  { %4460 = vst.msk [vmem:[%s10474_s2 + $0x108] sm:$0xff] %vm4426_vm9, %v4419_v35 }
 0x6a7   :  { %v5116_v34 = vpop.eup %5115  ;;  %4459 = vst.msk [vmem:[%s10474_s2 + $0x100] sm:$0xff] %vm4426_vm9, %v4418_v61 }
 0x6a8   :  { %v5118_v31 = vpop.eup %5117  ;;  %v4421_v53 = vmul.f32 %v5116_v34, %v4261_v47 }
 0x6a9   :  { %v4420_v17 = vmul.f32 %v5118_v31, %v4260_v9 }
 0x6aa   :  { %4462 = vst.msk [vmem:[%s10474_s2 + $0x118] sm:$0xff] %vm4426_vm9, %v4421_v53 }
 0x6ab   :  { %v5120_v26 = vpop.eup %5119  ;;  %4461 = vst.msk [vmem:[%s10474_s2 + $0x110] sm:$0xff] %vm4426_vm9, %v4420_v17 }
 0x6ac   :  { %v5122_v19 = vpop.eup %5121  ;;  %v4423_v57 = vmul.f32 %v5120_v26, %v4263_v2 }
 0x6ad   :  { %v4422_v30 = vmul.f32 %v5122_v19, %v4262_v40 }
 0x6ae   :  { %4464 = vst.msk [vmem:[%s10474_s2 + $0x128] sm:$0xff] %vm4426_vm9, %v4423_v57 }
 0x6af   :  { %v5124_v60 = vpop.eup %5123  ;;  %4463 = vst.msk [vmem:[%s10474_s2 + $0x120] sm:$0xff] %vm4426_vm9, %v4422_v30 }
 0x6b0   :  { %v5126_v63 = vpop.eup %5125  ;;  %v4425_v14 = vmul.f32 %v5124_v60, %v4265_v62 }
 0x6b1   :  { %v4424_v50 = vmul.f32 %v5126_v63, %v4264_v41 }
 0x6b2   :  { %4466 = vst.msk [vmem:[%s10474_s2 + $0x138] sm:$0xff] %vm4426_vm9, %v4425_v14 }
 0x6b3   :  { %4465 = vst.msk [vmem:[%s10474_s2 + $0x130] sm:$0xff] %vm4426_vm9, %v4424_v50 }

</bundles_post_ra>
